<compile_context>
chip_gen: v7x
topology: tpu7x:2x2x1
jax: 0.10.0
libtpu: 0.0.40
codegen_flags: <defaults>
</compile_context>

<pallas_src>
import functools

import jax
import jax.numpy as jnp
from jax import lax
from jax.experimental import pallas as pl
from jax.experimental.pallas import tpu as pltpu


_MAX_TILE_ROWS = 64   # bigger row tiles amortize the per-grid-step overhead


def _round_up(x, m):
    return (x + m - 1) // m * m


# ---------------------------------------------------------------------------
# Fused [3x3 conv (pad=1, s=1, BN folded) -> bias -> ReLU] x 2 kernel
# ---------------------------------------------------------------------------
def _double_conv_kernel(*refs, n_in, has_halo):
    x_refs = refs[:n_in]
    idx = n_in
    if has_halo:
        above = refs[idx:idx + n_in]
        idx += n_in
        below = refs[idx:idx + n_in]
        idx += n_in
    else:
        above = below = ()
    w1_ref, w2_ref, b1_ref, b2_ref, o_ref, xpad_ref, mid_ref = refs[idx:]

    t = pl.program_id(1)
    n_tiles = pl.num_programs(1)

    th = o_ref.shape[1]            # output rows per tile
    w = o_ref.shape[2]             # image width
    cout = o_ref.shape[3]
    cin = xpad_ref.shape[2]        # total input channels (concat fused)
    cmid = mid_ref.shape[2]
    wp = xpad_ref.shape[1] - 2     # width rounded up to a sublane multiple
    r1 = th + 2                    # conv-1 rows incl. 1-row halo each side
    cins = tuple(int(x.shape[3]) for x in x_refs)

    # ---- stage 0: stage the tile (+halo, +channel concat) into a zero-
    # bordered bf16 VMEM buffer.  Only the border strips are zeroed.
    xpad_ref[:, 0:1, :] = jnp.zeros((xpad_ref.shape[0], 1, cin),
                                    xpad_ref.dtype)
    xpad_ref[:, 1 + w:, :] = jnp.zeros((xpad_ref.shape[0], wp + 1 - w, cin),
                                       xpad_ref.dtype)
    zrow = jnp.zeros((2, w, cin), xpad_ref.dtype)

    if has_halo:
        @pl.when(t == 0)
        def _():
            xpad_ref[0:2, 1:1 + w, :] = zrow

        @pl.when(t > 0)
        def _():
            c0 = 0
            for j in range(n_in):
                xpad_ref[0:2, 1:1 + w, c0:c0 + cins[j]] = (
                    above[j][0].astype(xpad_ref.dtype))
                c0 += cins[j]

        @pl.when(t == n_tiles - 1)
        def _():
            xpad_ref[2 + th:, 1:1 + w, :] = zrow

        @pl.when(t < n_tiles - 1)
        def _():
            c0 = 0
            for j in range(n_in):
                xpad_ref[2 + th:, 1:1 + w, c0:c0 + cins[j]] = (
                    below[j][0].astype(xpad_ref.dtype))
                c0 += cins[j]
    else:
        xpad_ref[0:2, 1:1 + w, :] = zrow
        xpad_ref[2 + th:, 1:1 + w, :] = zrow

    c0 = 0
    for j in range(n_in):
        xpad_ref[2:2 + th, 1:1 + w, c0:c0 + cins[j]] = (
            x_refs[j][0].astype(xpad_ref.dtype))
        c0 += cins[j]

    # ---- stage 1: conv1(+folded BN) + bias + ReLU -> bf16 VMEM mid ---------
    # Nine accumulating MXU matmuls on direct ref slices (no im2col concat
    # slab); f32 accumulation, bias/ReLU in f32.
    acc1 = jnp.zeros((r1 * wp, cmid), jnp.float32)
    for kh in range(3):
        for kw in range(3):
            tap = xpad_ref[kh:kh + r1, kw:kw + wp, :].reshape(r1 * wp, cin)
            acc1 = acc1 + jnp.dot(tap, w1_ref[kh * 3 + kw],
                                  preferred_element_type=jnp.float32)
    y1 = jnp.maximum(acc1 + b1_ref[...], 0.0).reshape(r1, wp, cmid)

    mid_ref[:, 0:1, :] = jnp.zeros((r1, 1, cmid), mid_ref.dtype)
    mid_ref[:, 1 + w:, :] = jnp.zeros((r1, wp + 1 - w, cmid), mid_ref.dtype)
    mid_ref[:, 1:1 + w, :] = y1[:, :w, :].astype(mid_ref.dtype)

    # rows of `mid` that fall outside the image are conv zero padding
    @pl.when(t == 0)
    def _():
        mid_ref[0:1] = jnp.zeros((1, wp + 2, cmid), mid_ref.dtype)

    @pl.when(t == n_tiles - 1)
    def _():
        mid_ref[r1 - 1:r1] = jnp.zeros((1, wp + 2, cmid), mid_ref.dtype)

    # ---- stage 2: conv2(+folded BN) + bias + ReLU -> output tile -----------
    acc2 = jnp.zeros((th * wp, cout), jnp.float32)
    for kh in range(3):
        for kw in range(3):
            tap = mid_ref[kh:kh + th, kw:kw + wp, :].reshape(th * wp, cmid)
            acc2 = acc2 + jnp.dot(tap, w2_ref[kh * 3 + kw],
                                  preferred_element_type=jnp.float32)
    y2 = jnp.maximum(acc2 + b2_ref[...], 0.0).reshape(th, wp, cout)
    # TODO(synk): lane-dense (w*cout) output layout for cout < 128 would need
    # an in-register sublane->lane fold.
    o_ref[0] = y2[:, :w, :].astype(o_ref.dtype)


def _pick_tile_rows(h, requested):
    """Row-tile height: even and dividing H so the 2-row halo blocks line up."""
    if (requested is not None and 0 < requested < h and h % requested == 0
            and requested % 2 == 0):
        return requested
    if h <= _MAX_TILE_ROWS:
        return h
    for th in range(_MAX_TILE_ROWS, 2, -2):
        if h % th == 0:
            return th
    return h   # TODO(synk): awkward H (e.g. large prime) -> one big tile


def fold_bn(gamma, beta, mean, var, eps=1e-5):
    """Fold eval-mode BatchNorm into a per-channel scale / bias."""
    scale = gamma / jnp.sqrt(var + eps)
    return scale, beta - mean * scale


def double_conv(xs, w1q, w2q, b1, b2, *, tile_rows=None):
    """Fused (3x3 conv pad=1 s=1 [BN folded] -> bias -> ReLU) x 2.

    xs:    tuple of NHWC inputs concatenated on channels inside the kernel.
    w1q:   (9, cin_total, cmid)  bf16, BN scale already folded in.
    w2q:   (9, cmid, cout)       bf16, BN scale already folded in.
    b1/b2: folded BN biases, f32.
    Output is NHWC bf16.
    """
    xs = tuple(xs)
    n, h, w = xs[0].shape[:3]
    for x in xs:
        assert x.shape[:3] == (n, h, w), (x.shape, (n, h, w))
    cins = tuple(int(x.shape[3]) for x in xs)
    cin = sum(cins)
    cmid = int(w1q.shape[2])
    cout = int(w2q.shape[2])
    assert w1q.shape == (9, cin, cmid), (w1q.shape, cin, cmid)
    assert w2q.shape == (9, cmid, cout), (w2q.shape, cmid, cout)

    th = _pick_tile_rows(h, tile_rows)
    n_tiles = h // th
    has_halo = n_tiles > 1
    wp = _round_up(w, 8)

    b1 = b1.reshape(1, cmid).astype(jnp.float32)
    b2 = b2.reshape(1, cout).astype(jnp.float32)

    in_specs = [pl.BlockSpec((1, th, w, c), lambda b, t: (b, t, 0, 0))
                for c in cins]
    inputs = list(xs)
    if has_halo:
        # halos are 2-row blocks over H -> both must be even
        assert h % 2 == 0 and th % 2 == 0, (h, th)
        hb = th // 2   # number of 2-row halo blocks per tile
        for c in cins:
            in_specs.append(pl.BlockSpec(
                (1, 2, w, c),
                lambda b, t: (b, jnp.maximum(t * hb - 1, 0), 0, 0)))
        for c in cins:
            in_specs.append(pl.BlockSpec(
                (1, 2, w, c),
                lambda b, t: (b, jnp.minimum((t + 1) * hb, h // 2 - 1), 0, 0)))
        inputs += list(xs) + list(xs)

    in_specs += [
        pl.BlockSpec((9, cin, cmid), lambda b, t: (0, 0, 0)),
        pl.BlockSpec((9, cmid, cout), lambda b, t: (0, 0, 0)),
        pl.BlockSpec((1, cmid), lambda b, t: (0, 0)),
        pl.BlockSpec((1, cout), lambda b, t: (0, 0)),
    ]
    inputs += [w1q, w2q, b1, b2]

    kernel = functools.partial(_double_conv_kernel, n_in=len(xs),
                               has_halo=has_halo)

    return pl.pallas_call(
        kernel,
        out_shape=jax.ShapeDtypeStruct((n, h, w, cout), jnp.bfloat16),
        grid_spec=pltpu.PrefetchScalarGridSpec(
            num_scalar_prefetch=0,
            grid=(n, n_tiles),
            in_specs=in_specs,
            out_specs=pl.BlockSpec((1, th, w, cout),
                                   lambda b, t: (b, t, 0, 0)),
            scratch_shapes=[
                pltpu.VMEM((th + 4, wp + 2, cin), jnp.bfloat16),   # padded x
                pltpu.VMEM((th + 2, wp + 2, cmid), jnp.bfloat16),  # block-1
            ],
        ),
        # Both axes independent (halos read from the *input*) -> v7x can shard
        # them across its 2 TensorCores; no-op on v5e/v6e.
        # vmem_limit: tiny for these shapes; v5e/v6e could raise to 64-96 MiB
        # with larger row tiles, v7x should stay within its 64 MiB budget.
        compiler_params=pltpu.CompilerParams(
            dimension_semantics=("parallel", "parallel"),
            vmem_limit_bytes=32 * 1024 * 1024),
    )(*inputs)


# ---------------------------------------------------------------------------
# Module-level parameters / wrappers
# ---------------------------------------------------------------------------
def make_double_conv_params(key, cin, cmid, cout):
    ks = jax.random.split(key, 10)
    return dict(
        w1=0.1 * jax.random.normal(ks[0], (3, 3, cin, cmid), jnp.float32),
        g1=1.0 + 0.1 * jax.random.normal(ks[1], (cmid,), jnp.float32),
        be1=0.1 * jax.random.normal(ks[2], (cmid,), jnp.float32),
        m1=0.1 * jax.random.normal(ks[3], (cmid,), jnp.float32),
        v1=1.0 + 0.2 * jax.random.uniform(ks[4], (cmid,), jnp.float32),
        w2=0.1 * jax.random.normal(ks[5], (3, 3, cmid, cout), jnp.float32),
        g2=1.0 + 0.1 * jax.random.normal(ks[6], (cout,), jnp.float32),
        be2=0.1 * jax.random.normal(ks[7], (cout,), jnp.float32),
        m2=0.1 * jax.random.normal(ks[8], (cout,), jnp.float32),
        v2=1.0 + 0.2 * jax.random.uniform(ks[9], (cout,), jnp.float32),
    )


def _prep_double_conv(p):
    """Fold eval-BN into the weights (exact) and quantise weights to bf16."""
    s1, b1 = fold_bn(p["g1"], p["be1"], p["m1"], p["v1"])
    s2, b2 = fold_bn(p["g2"], p["be2"], p["m2"], p["v2"])
    cin, cmid = p["w1"].shape[2], p["w1"].shape[3]
    cout = p["w2"].shape[3]
    w1q = (p["w1"] * s1[None, None, None, :]).reshape(
        9, cin, cmid).astype(jnp.bfloat16)
    w2q = (p["w2"] * s2[None, None, None, :]).reshape(
        9, cmid, cout).astype(jnp.bfloat16)
    return w1q, w2q, b1.astype(jnp.float32), b2.astype(jnp.float32)


def double_conv_block(x, p, tile_rows=None):
    """Pallas DoubleConv_{ori,down,up} forward (eval-mode BN), NHWC.

    `x` may be a single array or a tuple of arrays (fused channel concat)."""
    w1q, w2q, b1, b2 = _prep_double_conv(p)
    xs = x if isinstance(x, (tuple, list)) else (x,)
    return double_conv(xs, w1q, w2q, b1, b2, tile_rows=tile_rows)


# -------------------------- plain-XLA reference ----------------------------
def _conv_bias_relu_ref(x, w9, bias):
    # match the kernel's quantisation points: bf16 inputs, bf16 folded
    # weights, f32 accumulation, f32 bias + ReLU.
    cin, c = int(w9.shape[1]), int(w9.shape[2])
    xq = x.astype(jnp.bfloat16).astype(jnp.float32)
    wq = w9.astype(jnp.float32).reshape(3, 3, cin, c)
    y = lax.conv_general_dilated(
        xq, wq, window_strides=(1, 1), padding=((1, 1), (1, 1)),
        dimension_numbers=("NHWC", "HWIO", "NHWC"),
        precision=lax.Precision.HIGHEST)
    return jnp.maximum(y + bias.reshape(1, 1, 1, -1), 0.0)


def double_conv_block_ref(x, p, tile_rows=None):
    del tile_rows
    w1q, w2q, b1, b2 = _prep_double_conv(p)
    if isinstance(x, (tuple, list)):
        x = jnp.concatenate([a.astype(jnp.float32) for a in x], axis=-1)
    h1 = _conv_bias_relu_ref(x, w1q, b1).astype(jnp.bfloat16)
    h2 = _conv_bias_relu_ref(h1, w2q, b2)
    return h2.astype(jnp.bfloat16)


# ------------------------------ UNet glue -----------------------------------
# TODO(synk): maxpool / bilinear upsample / pad are memory-bound glue ops left
# to XLA; the double-convs (and the decoder channel concat) run in Pallas.
def _maxpool_2x2(x):
    n, h, w, c = x.shape
    x = x[:, :h // 2 * 2, :w // 2 * 2, :]
    return x.reshape(n, h // 2, 2, w // 2, 2, c).max(axis=(2, 4))


def _upsample_bilinear_2x(x):
    """nn.Upsample(scale_factor=2, mode='bilinear', align_corners=True)."""
    n, h, w, c = x.shape
    ho, wo = 2 * h, 2 * w

    def src(lout, lin):
        if lin == 1:
            z = jnp.zeros((lout,), jnp.float32)
            return z, z.astype(jnp.int32), z.astype(jnp.int32)
        pos = jnp.arange(lout, dtype=jnp.float32) * (lin - 1) / (lout - 1)
        lo = jnp.floor(pos).astype(jnp.int32)
        hi = jnp.minimum(lo + 1, lin - 1)
        return pos - lo.astype(jnp.float32), lo, hi

    fy, y0, y1 = src(ho, h)
    fx, x0, x1 = src(wo, w)
    rows = (x[:, y0, :, :] * (1.0 - fy)[None, :, None, None]
            + x[:, y1, :, :] * fy[None, :, None, None])
    out = (rows[:, :, x0, :] * (1.0 - fx)[None, None, :, None]
           + rows[:, :, x1, :] * fx[None, None, :, None])
    return out.astype(x.dtype)


def _pad_to_match(x, ref):
    dh = ref.shape[1] - x.shape[1]
    dw = ref.shape[2] - x.shape[2]
    return jnp.pad(x, ((0, 0), (dh // 2, dh - dh // 2),
                       (dw // 2, dw - dw // 2), (0, 0)))


_UNET_PLAN = {          # name: (cin, cmid, cout)    (factor = 2 in the spec)
    "inc":   lambda nc: (nc, 32, 32),
    "down1": lambda nc: (32, 64, 64),
    "down2": lambda nc: (64, 64, 64),        # 128 // factor
    "up3":   lambda nc: (128, 64, 32),       # cat(64, 64) -> mid 64 -> 64//2
    "up4":   lambda nc: (64, 32, 32),        # cat(32, 32) -> mid 32 -> 32
}


def make_unet_params(key, n_channels):
    keys = jax.random.split(key, len(_UNET_PLAN))
    return {name: make_double_conv_params(k, *spec(n_channels))
            for k, (name, spec) in zip(keys, _UNET_PLAN.items())}


def unet_forward(x_nchw, params, dc=double_conv_block):
    """UNet.forward (eval mode).  NCHW<->NHWC layout change once per call.
    Inter-layer activations are bf16; the decoder torch.cat is fused into the
    double-conv kernel (two staged inputs), so it never round-trips HBM."""
    x = jnp.transpose(x_nchw, (0, 2, 3, 1)).astype(jnp.float32)
    x1 = dc(x, params["inc"])
    x2 = dc(_maxpool_2x2(x1), params["down1"])
    x3 = dc(_maxpool_2x2(x2), params["down2"])
    u3 = _pad_to_match(_upsample_bilinear_2x(x3), x2)
    y = dc((x2, u3), params["up3"])           # fused torch.cat([x2, up(x3)])
    u4 = _pad_to_match(_upsample_bilinear_2x(y), x1)
    y = dc((x1, u4), params["up4"])           # fused torch.cat([x1, up(y)])
    return jnp.transpose(y, (0, 3, 1, 2)).astype(jnp.float32)


# ---------------------------------------------------------------------------
if __name__ == "__main__":
    root = jax.random.PRNGKey(0)
    k_x, k_p, k_u = jax.random.split(root, 3)

    def check(got, want, what, tol):
        got = jnp.asarray(got, jnp.float32)
        want = jnp.asarray(want, jnp.float32)
        assert got.shape == want.shape, (what, got.shape, want.shape)
        err = float(jnp.max(jnp.abs(got - want)))
        scale = 1.0 + float(jnp.max(jnp.abs(want)))
        assert err <= tol * scale, (what, err, scale)

    # --- DoubleConv building block: every UNet layer shape + halo / concat --
    cases = [
        # (N,  H,  W, cins,     Cmid, Cout, tile_rows)
        (2, 16, 16, (4,),       32,   32,   None),   # inc (single tile)
        (2, 16, 16, (4,),       32,   32,   8),      # 2 row tiles, edge halos
        (1, 32, 16, (8,),       16,   16,   8),      # 4 row tiles, interior
        (2,  8,  8, (32,),      64,   64,   None),   # down1
        (2,  4,  4, (64,),      64,   64,   None),   # down2
        (2,  8,  8, (64, 64),   64,   32,   None),   # up3, fused concat
        (2, 16, 16, (32, 32),   32,   32,   None),   # up4, fused concat
        (2, 16, 16, (4, 4),     16,   16,   8),      # concat + halo tiles
        (1, 13, 15, (8,),       16,   24,   None),   # odd H/W single tile
    ]
    for i, (n, h, w, cins, cmid, cout, tr) in enumerate(cases):
        kk = jax.random.fold_in(k_p, i)
        kxs = jax.random.split(kk, len(cins) + 1)
        xs = tuple(jax.random.normal(kxs[j], (n, h, w, c), jnp.float32)
                   for j, c in enumerate(cins))
        p = make_double_conv_params(kxs[-1], sum(cins), cmid, cout)
        out = jax.block_until_ready(double_conv_block(xs, p, tile_rows=tr))
        ref = jax.block_until_ready(double_conv_block_ref(xs, p))
        check(out, ref, f"double_conv case {i}", tol=3e-2)

    # --- full UNet forward: (2, 4, 16, 16) -> (2, 32, 16, 16) ---------------
    N, C, H, W = 2, 4, 16, 16
    x = jax.random.normal(k_x, (N, C, H, W), jnp.float32)
    params = make_unet_params(k_u, C)
    out = jax.block_until_ready(unet_forward(x, params))
    ref = jax.block_until_ready(
        unet_forward(x, params, dc=double_conv_block_ref))
    assert out.shape == (N, 32, H, W), out.shape
    # bf16-grade error compounds across 10 conv layers -> scale-aware, looser
    # tolerance end-to-end (a real indexing bug would be >> this budget).
    check(out, ref, "unet", tol=5e-2)

    print("KERNEL_OK")
</pallas_src>

<mosaic_0001>
module attributes {stable_mosaic.version = 11 : i64} {
  func.func @_double_conv_kernel(%arg0: i32, %arg1: i32, %arg2: memref<1x16x16x4xf32, #tpu.memory_space<vmem>>, %arg3: memref<9x4x32xbf16, #tpu.memory_space<vmem>>, %arg4: memref<9x32x32xbf16, #tpu.memory_space<vmem>>, %arg5: memref<1x32xf32, #tpu.memory_space<vmem>>, %arg6: memref<1x32xf32, #tpu.memory_space<vmem>>, %arg7: memref<1x16x16x32xbf16, #tpu.memory_space<vmem>>, %arg8: memref<20x18x4xbf16, #tpu.memory_space<vmem>>, %arg9: memref<18x18x32xbf16, #tpu.memory_space<vmem>>) attributes {dimension_semantics = [#tpu.dimension_semantics<parallel>, #tpu.dimension_semantics<parallel>], iteration_bounds = array<i64: 2, 1>, scalar_prefetch = 0 : i64, scratch_operands = 2 : i64, tpu.core_type = #tpu.core_type<tc>, window_params = [{transform_indices = @transform_0, window_bounds = array<i64: 1, 16, 16, 4>}, {pipeline_mode = #tpu.pipeline_mode<synchronous>, transform_indices = @transform_1, window_bounds = array<i64: 9, 4, 32>}, {pipeline_mode = #tpu.pipeline_mode<synchronous>, transform_indices = @transform_2, window_bounds = array<i64: 9, 32, 32>}, {pipeline_mode = #tpu.pipeline_mode<synchronous>, transform_indices = @transform_3, window_bounds = array<i64: 1, 32>}, {pipeline_mode = #tpu.pipeline_mode<synchronous>, transform_indices = @transform_4, window_bounds = array<i64: 1, 32>}, {transform_indices = @transform_5, window_bounds = array<i64: 1, 16, 16, 32>}]} {
    %cst = arith.constant 0.000000e+00 : bf16
    %0 = vector.broadcast %cst : bf16 to vector<20x1x4xbf16>
    %c0 = arith.constant 0 : index
    %c0_0 = arith.constant 0 : index
    %c0_1 = arith.constant 0 : index
    %1 = vector.load %arg8[%c0, %c0_0, %c0_1] : memref<20x18x4xbf16, #tpu.memory_space<vmem>>, vector<20x1x4xbf16>
    tpu.vector_store %arg8[%c0, %c0_0, %c0_1], %0 {strides = array<i32>} : memref<20x18x4xbf16, #tpu.memory_space<vmem>>, vector<20x1x4xbf16>,
    %cst_2 = arith.constant 0.000000e+00 : bf16
    %2 = vector.broadcast %cst_2 : bf16 to vector<20x1x4xbf16>
    %c0_3 = arith.constant 0 : index
    %c17 = arith.constant 17 : index
    %c0_4 = arith.constant 0 : index
    %3 = vector.load %arg8[%c0_3, %c17, %c0_4] : memref<20x18x4xbf16, #tpu.memory_space<vmem>>, vector<20x1x4xbf16>
    tpu.vector_store %arg8[%c0_3, %c17, %c0_4], %2 {strides = array<i32>} : memref<20x18x4xbf16, #tpu.memory_space<vmem>>, vector<20x1x4xbf16>,
    %cst_5 = arith.constant 0.000000e+00 : bf16
    %4 = vector.broadcast %cst_5 : bf16 to vector<2x16x4xbf16>
    %c0_6 = arith.constant 0 : index
    %c1 = arith.constant 1 : index
    %c0_7 = arith.constant 0 : index
    %5 = vector.load %arg8[%c0_6, %c1, %c0_7] : memref<20x18x4xbf16, #tpu.memory_space<vmem>>, vector<2x16x4xbf16>
    tpu.vector_store %arg8[%c0_6, %c1, %c0_7], %4 {strides = array<i32>} : memref<20x18x4xbf16, #tpu.memory_space<vmem>>, vector<2x16x4xbf16>,
    %c18 = arith.constant 18 : index
    %c1_8 = arith.constant 1 : index
    %c0_9 = arith.constant 0 : index
    %6 = vector.load %arg8[%c18, %c1_8, %c0_9] : memref<20x18x4xbf16, #tpu.memory_space<vmem>>, vector<2x16x4xbf16>
    tpu.vector_store %arg8[%c18, %c1_8, %c0_9], %4 {strides = array<i32>} : memref<20x18x4xbf16, #tpu.memory_space<vmem>>, vector<2x16x4xbf16>,
    %c0_10 = arith.constant 0 : index
    %c0_11 = arith.constant 0 : index
    %c0_12 = arith.constant 0 : index
    %c0_13 = arith.constant 0 : index
    %7 = vector.load %arg2[%c0_10, %c0_11, %c0_12, %c0_13] : memref<1x16x16x4xf32, #tpu.memory_space<vmem>>, vector<1x16x16x4xf32>
    %8 = vector.shape_cast %7 : vector<1x16x16x4xf32> to vector<16x16x4xf32>
    %9 = arith.truncf %8 : vector<16x16x4xf32> to vector<16x16x4xbf16>
    %c2 = arith.constant 2 : index
    %c1_14 = arith.constant 1 : index
    %c0_15 = arith.constant 0 : index
    %10 = vector.load %arg8[%c2, %c1_14, %c0_15] : memref<20x18x4xbf16, #tpu.memory_space<vmem>>, vector<16x16x4xbf16>
    tpu.vector_store %arg8[%c2, %c1_14, %c0_15], %9 {strides = array<i32>} : memref<20x18x4xbf16, #tpu.memory_space<vmem>>, vector<16x16x4xbf16>,
    %cst_16 = arith.constant 0.000000e+00 : f32
    %11 = vector.broadcast %cst_16 : f32 to vector<288x32xf32>
    %c0_17 = arith.constant 0 : index
    %c0_18 = arith.constant 0 : index
    %c0_19 = arith.constant 0 : index
    %12 = vector.load %arg8[%c0_17, %c0_18, %c0_19] : memref<20x18x4xbf16, #tpu.memory_space<vmem>>, vector<18x16x4xbf16>
    %13 = vector.shape_cast %12 : vector<18x16x4xbf16> to vector<288x4xbf16>
    %c0_20 = arith.constant 0 : index
    %c0_21 = arith.constant 0 : index
    %c0_22 = arith.constant 0 : index
    %14 = vector.load %arg3[%c0_20, %c0_21, %c0_22] : memref<9x4x32xbf16, #tpu.memory_space<vmem>>, vector<1x4x32xbf16>
    %15 = vector.shape_cast %14 : vector<1x4x32xbf16> to vector<4x32xbf16>
    %cst_23 = arith.constant dense<0.000000e+00> : vector<288x32xf32>
    %16 = tpu.matmul %13, %15, %cst_23 {dimension_numbers = #tpu.dot_dimension_numbers<[1], [0], [0], [1], [0, 0, 1, 1], [], []>} : vector<288x4xbf16>, vector<4x32xbf16>, vector<288x32xf32> -> vector<288x32xf32>
    %17 = arith.addf %11, %16 : vector<288x32xf32>
    %c0_24 = arith.constant 0 : index
    %c1_25 = arith.constant 1 : index
    %c0_26 = arith.constant 0 : index
    %18 = vector.load %arg8[%c0_24, %c1_25, %c0_26] : memref<20x18x4xbf16, #tpu.memory_space<vmem>>, vector<18x16x4xbf16>
    %19 = vector.shape_cast %18 : vector<18x16x4xbf16> to vector<288x4xbf16>
    %c1_27 = arith.constant 1 : index
    %c0_28 = arith.constant 0 : index
    %c0_29 = arith.constant 0 : index
    %20 = vector.load %arg3[%c1_27, %c0_28, %c0_29] : memref<9x4x32xbf16, #tpu.memory_space<vmem>>, vector<1x4x32xbf16>
    %21 = vector.shape_cast %20 : vector<1x4x32xbf16> to vector<4x32xbf16>
    %cst_30 = arith.constant dense<0.000000e+00> : vector<288x32xf32>
    %22 = tpu.matmul %19, %21, %cst_30 {dimension_numbers = #tpu.dot_dimension_numbers<[1], [0], [0], [1], [0, 0, 1, 1], [], []>} : vector<288x4xbf16>, vector<4x32xbf16>, vector<288x32xf32> -> vector<288x32xf32>
    %23 = arith.addf %17, %22 : vector<288x32xf32>
    %c0_31 = arith.constant 0 : index
    %c2_32 = arith.constant 2 : index
    %c0_33 = arith.constant 0 : index
    %24 = vector.load %arg8[%c0_31, %c2_32, %c0_33] : memref<20x18x4xbf16, #tpu.memory_space<vmem>>, vector<18x16x4xbf16>
    %25 = vector.shape_cast %24 : vector<18x16x4xbf16> to vector<288x4xbf16>
    %c2_34 = arith.constant 2 : index
    %c0_35 = arith.constant 0 : index
    %c0_36 = arith.constant 0 : index
    %26 = vector.load %arg3[%c2_34, %c0_35, %c0_36] : memref<9x4x32xbf16, #tpu.memory_space<vmem>>, vector<1x4x32xbf16>
    %27 = vector.shape_cast %26 : vector<1x4x32xbf16> to vector<4x32xbf16>
    %cst_37 = arith.constant dense<0.000000e+00> : vector<288x32xf32>
    %28 = tpu.matmul %25, %27, %cst_37 {dimension_numbers = #tpu.dot_dimension_numbers<[1], [0], [0], [1], [0, 0, 1, 1], [], []>} : vector<288x4xbf16>, vector<4x32xbf16>, vector<288x32xf32> -> vector<288x32xf32>
    %29 = arith.addf %23, %28 : vector<288x32xf32>
    %c1_38 = arith.constant 1 : index
    %c0_39 = arith.constant 0 : index
    %c0_40 = arith.constant 0 : index
    %30 = vector.load %arg8[%c1_38, %c0_39, %c0_40] : memref<20x18x4xbf16, #tpu.memory_space<vmem>>, vector<18x16x4xbf16>
    %31 = vector.shape_cast %30 : vector<18x16x4xbf16> to vector<288x4xbf16>
    %c3 = arith.constant 3 : index
    %c0_41 = arith.constant 0 : index
    %c0_42 = arith.constant 0 : index
    %32 = vector.load %arg3[%c3, %c0_41, %c0_42] : memref<9x4x32xbf16, #tpu.memory_space<vmem>>, vector<1x4x32xbf16>
    %33 = vector.shape_cast %32 : vector<1x4x32xbf16> to vector<4x32xbf16>
    %cst_43 = arith.constant dense<0.000000e+00> : vector<288x32xf32>
    %34 = tpu.matmul %31, %33, %cst_43 {dimension_numbers = #tpu.dot_dimension_numbers<[1], [0], [0], [1], [0, 0, 1, 1], [], []>} : vector<288x4xbf16>, vector<4x32xbf16>, vector<288x32xf32> -> vector<288x32xf32>
    %35 = arith.addf %29, %34 : vector<288x32xf32>
    %c1_44 = arith.constant 1 : index
    %c1_45 = arith.constant 1 : index
    %c0_46 = arith.constant 0 : index
    %36 = vector.load %arg8[%c1_44, %c1_45, %c0_46] : memref<20x18x4xbf16, #tpu.memory_space<vmem>>, vector<18x16x4xbf16>
    %37 = vector.shape_cast %36 : vector<18x16x4xbf16> to vector<288x4xbf16>
    %c4 = arith.constant 4 : index
    %c0_47 = arith.constant 0 : index
    %c0_48 = arith.constant 0 : index
    %38 = vector.load %arg3[%c4, %c0_47, %c0_48] : memref<9x4x32xbf16, #tpu.memory_space<vmem>>, vector<1x4x32xbf16>
    %39 = vector.shape_cast %38 : vector<1x4x32xbf16> to vector<4x32xbf16>
    %cst_49 = arith.constant dense<0.000000e+00> : vector<288x32xf32>
    %40 = tpu.matmul %37, %39, %cst_49 {dimension_numbers = #tpu.dot_dimension_numbers<[1], [0], [0], [1], [0, 0, 1, 1], [], []>} : vector<288x4xbf16>, vector<4x32xbf16>, vector<288x32xf32> -> vector<288x32xf32>
    %41 = arith.addf %35, %40 : vector<288x32xf32>
    %c1_50 = arith.constant 1 : index
    %c2_51 = arith.constant 2 : index
    %c0_52 = arith.constant 0 : index
    %42 = vector.load %arg8[%c1_50, %c2_51, %c0_52] : memref<20x18x4xbf16, #tpu.memory_space<vmem>>, vector<18x16x4xbf16>
    %43 = vector.shape_cast %42 : vector<18x16x4xbf16> to vector<288x4xbf16>
    %c5 = arith.constant 5 : index
    %c0_53 = arith.constant 0 : index
    %c0_54 = arith.constant 0 : index
    %44 = vector.load %arg3[%c5, %c0_53, %c0_54] : memref<9x4x32xbf16, #tpu.memory_space<vmem>>, vector<1x4x32xbf16>
    %45 = vector.shape_cast %44 : vector<1x4x32xbf16> to vector<4x32xbf16>
    %cst_55 = arith.constant dense<0.000000e+00> : vector<288x32xf32>
    %46 = tpu.matmul %43, %45, %cst_55 {dimension_numbers = #tpu.dot_dimension_numbers<[1], [0], [0], [1], [0, 0, 1, 1], [], []>} : vector<288x4xbf16>, vector<4x32xbf16>, vector<288x32xf32> -> vector<288x32xf32>
    %47 = arith.addf %41, %46 : vector<288x32xf32>
    %c2_56 = arith.constant 2 : index
    %c0_57 = arith.constant 0 : index
    %c0_58 = arith.constant 0 : index
    %48 = vector.load %arg8[%c2_56, %c0_57, %c0_58] : memref<20x18x4xbf16, #tpu.memory_space<vmem>>, vector<18x16x4xbf16>
    %49 = vector.shape_cast %48 : vector<18x16x4xbf16> to vector<288x4xbf16>
    %c6 = arith.constant 6 : index
    %c0_59 = arith.constant 0 : index
    %c0_60 = arith.constant 0 : index
    %50 = vector.load %arg3[%c6, %c0_59, %c0_60] : memref<9x4x32xbf16, #tpu.memory_space<vmem>>, vector<1x4x32xbf16>
    %51 = vector.shape_cast %50 : vector<1x4x32xbf16> to vector<4x32xbf16>
    %cst_61 = arith.constant dense<0.000000e+00> : vector<288x32xf32>
    %52 = tpu.matmul %49, %51, %cst_61 {dimension_numbers = #tpu.dot_dimension_numbers<[1], [0], [0], [1], [0, 0, 1, 1], [], []>} : vector<288x4xbf16>, vector<4x32xbf16>, vector<288x32xf32> -> vector<288x32xf32>
    %53 = arith.addf %47, %52 : vector<288x32xf32>
    %c2_62 = arith.constant 2 : index
    %c1_63 = arith.constant 1 : index
    %c0_64 = arith.constant 0 : index
    %54 = vector.load %arg8[%c2_62, %c1_63, %c0_64] : memref<20x18x4xbf16, #tpu.memory_space<vmem>>, vector<18x16x4xbf16>
    %55 = vector.shape_cast %54 : vector<18x16x4xbf16> to vector<288x4xbf16>
    %c7 = arith.constant 7 : index
    %c0_65 = arith.constant 0 : index
    %c0_66 = arith.constant 0 : index
    %56 = vector.load %arg3[%c7, %c0_65, %c0_66] : memref<9x4x32xbf16, #tpu.memory_space<vmem>>, vector<1x4x32xbf16>
    %57 = vector.shape_cast %56 : vector<1x4x32xbf16> to vector<4x32xbf16>
    %cst_67 = arith.constant dense<0.000000e+00> : vector<288x32xf32>
    %58 = tpu.matmul %55, %57, %cst_67 {dimension_numbers = #tpu.dot_dimension_numbers<[1], [0], [0], [1], [0, 0, 1, 1], [], []>} : vector<288x4xbf16>, vector<4x32xbf16>, vector<288x32xf32> -> vector<288x32xf32>
    %59 = arith.addf %53, %58 : vector<288x32xf32>
    %c2_68 = arith.constant 2 : index
    %c2_69 = arith.constant 2 : index
    %c0_70 = arith.constant 0 : index
    %60 = vector.load %arg8[%c2_68, %c2_69, %c0_70] : memref<20x18x4xbf16, #tpu.memory_space<vmem>>, vector<18x16x4xbf16>
    %61 = vector.shape_cast %60 : vector<18x16x4xbf16> to vector<288x4xbf16>
    %c8 = arith.constant 8 : index
    %c0_71 = arith.constant 0 : index
    %c0_72 = arith.constant 0 : index
    %62 = vector.load %arg3[%c8, %c0_71, %c0_72] : memref<9x4x32xbf16, #tpu.memory_space<vmem>>, vector<1x4x32xbf16>
    %63 = vector.shape_cast %62 : vector<1x4x32xbf16> to vector<4x32xbf16>
    %cst_73 = arith.constant dense<0.000000e+00> : vector<288x32xf32>
    %64 = tpu.matmul %61, %63, %cst_73 {dimension_numbers = #tpu.dot_dimension_numbers<[1], [0], [0], [1], [0, 0, 1, 1], [], []>} : vector<288x4xbf16>, vector<4x32xbf16>, vector<288x32xf32> -> vector<288x32xf32>
    %65 = arith.addf %59, %64 : vector<288x32xf32>
    %c0_74 = arith.constant 0 : index
    %c0_75 = arith.constant 0 : index
    %66 = vector.load %arg5[%c0_74, %c0_75] : memref<1x32xf32, #tpu.memory_space<vmem>>, vector<1x32xf32>
    %67 = vector.broadcast %66 : vector<1x32xf32> to vector<288x32xf32>
    %68 = arith.addf %65, %67 : vector<288x32xf32>
    %cst_76 = arith.constant 0.000000e+00 : f32
    %69 = vector.broadcast %cst_76 : f32 to vector<288x32xf32>
    %70 = arith.maximumf %68, %69 : vector<288x32xf32>
    %71 = vector.shape_cast %70 : vector<288x32xf32> to vector<18x16x32xf32>
    %cst_77 = arith.constant 0.000000e+00 : bf16
    %72 = vector.broadcast %cst_77 : bf16 to vector<18x1x32xbf16>
    %c0_78 = arith.constant 0 : index
    %c0_79 = arith.constant 0 : index
    %c0_80 = arith.constant 0 : index
    %73 = vector.load %arg9[%c0_78, %c0_79, %c0_80] : memref<18x18x32xbf16, #tpu.memory_space<vmem>>, vector<18x1x32xbf16>
    tpu.vector_store %arg9[%c0_78, %c0_79, %c0_80], %72 {strides = array<i32>} : memref<18x18x32xbf16, #tpu.memory_space<vmem>>, vector<18x1x32xbf16>,
    %cst_81 = arith.constant 0.000000e+00 : bf16
    %74 = vector.broadcast %cst_81 : bf16 to vector<18x1x32xbf16>
    %c0_82 = arith.constant 0 : index
    %c17_83 = arith.constant 17 : index
    %c0_84 = arith.constant 0 : index
    %75 = vector.load %arg9[%c0_82, %c17_83, %c0_84] : memref<18x18x32xbf16, #tpu.memory_space<vmem>>, vector<18x1x32xbf16>
    tpu.vector_store %arg9[%c0_82, %c17_83, %c0_84], %74 {strides = array<i32>} : memref<18x18x32xbf16, #tpu.memory_space<vmem>>, vector<18x1x32xbf16>,
    %76 = arith.truncf %71 : vector<18x16x32xf32> to vector<18x16x32xbf16>
    %c0_85 = arith.constant 0 : index
    %c1_86 = arith.constant 1 : index
    %c0_87 = arith.constant 0 : index
    %77 = vector.load %arg9[%c0_85, %c1_86, %c0_87] : memref<18x18x32xbf16, #tpu.memory_space<vmem>>, vector<18x16x32xbf16>
    tpu.vector_store %arg9[%c0_85, %c1_86, %c0_87], %76 {strides = array<i32>} : memref<18x18x32xbf16, #tpu.memory_space<vmem>>, vector<18x16x32xbf16>,
    %c0_i32 = arith.constant 0 : i32
    %78 = arith.cmpi eq, %arg1, %c0_i32 : i32
    %79 = arith.extui %78 : i1 to i32
    %c0_i32_88 = arith.constant 0 : i32
    %80 = arith.cmpi ne, %79, %c0_i32_88 : i32
    scf.if %80 {
      %cst_162 = arith.constant 0.000000e+00 : bf16
      %149 = vector.broadcast %cst_162 : bf16 to vector<1x18x32xbf16>
      %c0_163 = arith.constant 0 : index
      %c0_164 = arith.constant 0 : index
      %c0_165 = arith.constant 0 : index
      %150 = vector.load %arg9[%c0_163, %c0_164, %c0_165] : memref<18x18x32xbf16, #tpu.memory_space<vmem>>, vector<1x18x32xbf16>
      tpu.vector_store %arg9[%c0_163, %c0_164, %c0_165], %149 {strides = array<i32>} : memref<18x18x32xbf16, #tpu.memory_space<vmem>>, vector<1x18x32xbf16>,
    } else {
    }
    %c0_i32_89 = arith.constant 0 : i32
    %81 = arith.cmpi eq, %arg1, %c0_i32_89 : i32
    %82 = arith.extui %81 : i1 to i32
    %c0_i32_90 = arith.constant 0 : i32
    %83 = arith.cmpi ne, %82, %c0_i32_90 : i32
    scf.if %83 {
      %cst_162 = arith.constant 0.000000e+00 : bf16
      %149 = vector.broadcast %cst_162 : bf16 to vector<1x18x32xbf16>
      %c17_163 = arith.constant 17 : index
      %c0_164 = arith.constant 0 : index
      %c0_165 = arith.constant 0 : index
      %150 = vector.load %arg9[%c17_163, %c0_164, %c0_165] : memref<18x18x32xbf16, #tpu.memory_space<vmem>>, vector<1x18x32xbf16>
      tpu.vector_store %arg9[%c17_163, %c0_164, %c0_165], %149 {strides = array<i32>} : memref<18x18x32xbf16, #tpu.memory_space<vmem>>, vector<1x18x32xbf16>,
    } else {
    }
    %cst_91 = arith.constant 0.000000e+00 : f32
    %84 = vector.broadcast %cst_91 : f32 to vector<256x32xf32>
    %c0_92 = arith.constant 0 : index
    %c0_93 = arith.constant 0 : index
    %c0_94 = arith.constant 0 : index
    %85 = vector.load %arg9[%c0_92, %c0_93, %c0_94] : memref<18x18x32xbf16, #tpu.memory_space<vmem>>, vector<16x16x32xbf16>
    %86 = vector.shape_cast %85 : vector<16x16x32xbf16> to vector<256x32xbf16>
    %c0_95 = arith.constant 0 : index
    %c0_96 = arith.constant 0 : index
    %c0_97 = arith.constant 0 : index
    %87 = vector.load %arg4[%c0_95, %c0_96, %c0_97] : memref<9x32x32xbf16, #tpu.memory_space<vmem>>, vector<1x32x32xbf16>
    %88 = vector.shape_cast %87 : vector<1x32x32xbf16> to vector<32x32xbf16>
    %cst_98 = arith.constant dense<0.000000e+00> : vector<256x32xf32>
    %89 = tpu.matmul %86, %88, %cst_98 {dimension_numbers = #tpu.dot_dimension_numbers<[1], [0], [0], [1], [0, 0, 1, 1], [], []>} : vector<256x32xbf16>, vector<32x32xbf16>, vector<256x32xf32> -> vector<256x32xf32>
    %90 = arith.addf %84, %89 : vector<256x32xf32>
    %c0_99 = arith.constant 0 : index
    %c1_100 = arith.constant 1 : index
    %c0_101 = arith.constant 0 : index
    %91 = vector.load %arg9[%c0_99, %c1_100, %c0_101] : memref<18x18x32xbf16, #tpu.memory_space<vmem>>, vector<16x16x32xbf16>
    %92 = vector.shape_cast %91 : vector<16x16x32xbf16> to vector<256x32xbf16>
    %c1_102 = arith.constant 1 : index
    %c0_103 = arith.constant 0 : index
    %c0_104 = arith.constant 0 : index
    %93 = vector.load %arg4[%c1_102, %c0_103, %c0_104] : memref<9x32x32xbf16, #tpu.memory_space<vmem>>, vector<1x32x32xbf16>
    %94 = vector.shape_cast %93 : vector<1x32x32xbf16> to vector<32x32xbf16>
    %cst_105 = arith.constant dense<0.000000e+00> : vector<256x32xf32>
    %95 = tpu.matmul %92, %94, %cst_105 {dimension_numbers = #tpu.dot_dimension_numbers<[1], [0], [0], [1], [0, 0, 1, 1], [], []>} : vector<256x32xbf16>, vector<32x32xbf16>, vector<256x32xf32> -> vector<256x32xf32>
    %96 = arith.addf %90, %95 : vector<256x32xf32>
    %c0_106 = arith.constant 0 : index
    %c2_107 = arith.constant 2 : index
    %c0_108 = arith.constant 0 : index
    %97 = vector.load %arg9[%c0_106, %c2_107, %c0_108] : memref<18x18x32xbf16, #tpu.memory_space<vmem>>, vector<16x16x32xbf16>
    %98 = vector.shape_cast %97 : vector<16x16x32xbf16> to vector<256x32xbf16>
    %c2_109 = arith.constant 2 : index
    %c0_110 = arith.constant 0 : index
    %c0_111 = arith.constant 0 : index
    %99 = vector.load %arg4[%c2_109, %c0_110, %c0_111] : memref<9x32x32xbf16, #tpu.memory_space<vmem>>, vector<1x32x32xbf16>
    %100 = vector.shape_cast %99 : vector<1x32x32xbf16> to vector<32x32xbf16>
    %cst_112 = arith.constant dense<0.000000e+00> : vector<256x32xf32>
    %101 = tpu.matmul %98, %100, %cst_112 {dimension_numbers = #tpu.dot_dimension_numbers<[1], [0], [0], [1], [0, 0, 1, 1], [], []>} : vector<256x32xbf16>, vector<32x32xbf16>, vector<256x32xf32> -> vector<256x32xf32>
    %102 = arith.addf %96, %101 : vector<256x32xf32>
    %c1_113 = arith.constant 1 : index
    %c0_114 = arith.constant 0 : index
    %c0_115 = arith.constant 0 : index
    %103 = vector.load %arg9[%c1_113, %c0_114, %c0_115] : memref<18x18x32xbf16, #tpu.memory_space<vmem>>, vector<16x16x32xbf16>
    %104 = vector.shape_cast %103 : vector<16x16x32xbf16> to vector<256x32xbf16>
    %c3_116 = arith.constant 3 : index
    %c0_117 = arith.constant 0 : index
    %c0_118 = arith.constant 0 : index
    %105 = vector.load %arg4[%c3_116, %c0_117, %c0_118] : memref<9x32x32xbf16, #tpu.memory_space<vmem>>, vector<1x32x32xbf16>
    %106 = vector.shape_cast %105 : vector<1x32x32xbf16> to vector<32x32xbf16>
    %cst_119 = arith.constant dense<0.000000e+00> : vector<256x32xf32>
    %107 = tpu.matmul %104, %106, %cst_119 {dimension_numbers = #tpu.dot_dimension_numbers<[1], [0], [0], [1], [0, 0, 1, 1], [], []>} : vector<256x32xbf16>, vector<32x32xbf16>, vector<256x32xf32> -> vector<256x32xf32>
    %108 = arith.addf %102, %107 : vector<256x32xf32>
    %c1_120 = arith.constant 1 : index
    %c1_121 = arith.constant 1 : index
    %c0_122 = arith.constant 0 : index
    %109 = vector.load %arg9[%c1_120, %c1_121, %c0_122] : memref<18x18x32xbf16, #tpu.memory_space<vmem>>, vector<16x16x32xbf16>
    %110 = vector.shape_cast %109 : vector<16x16x32xbf16> to vector<256x32xbf16>
    %c4_123 = arith.constant 4 : index
    %c0_124 = arith.constant 0 : index
    %c0_125 = arith.constant 0 : index
    %111 = vector.load %arg4[%c4_123, %c0_124, %c0_125] : memref<9x32x32xbf16, #tpu.memory_space<vmem>>, vector<1x32x32xbf16>
    %112 = vector.shape_cast %111 : vector<1x32x32xbf16> to vector<32x32xbf16>
    %cst_126 = arith.constant dense<0.000000e+00> : vector<256x32xf32>
    %113 = tpu.matmul %110, %112, %cst_126 {dimension_numbers = #tpu.dot_dimension_numbers<[1], [0], [0], [1], [0, 0, 1, 1], [], []>} : vector<256x32xbf16>, vector<32x32xbf16>, vector<256x32xf32> -> vector<256x32xf32>
    %114 = arith.addf %108, %113 : vector<256x32xf32>
    %c1_127 = arith.constant 1 : index
    %c2_128 = arith.constant 2 : index
    %c0_129 = arith.constant 0 : index
    %115 = vector.load %arg9[%c1_127, %c2_128, %c0_129] : memref<18x18x32xbf16, #tpu.memory_space<vmem>>, vector<16x16x32xbf16>
    %116 = vector.shape_cast %115 : vector<16x16x32xbf16> to vector<256x32xbf16>
    %c5_130 = arith.constant 5 : index
    %c0_131 = arith.constant 0 : index
    %c0_132 = arith.constant 0 : index
    %117 = vector.load %arg4[%c5_130, %c0_131, %c0_132] : memref<9x32x32xbf16, #tpu.memory_space<vmem>>, vector<1x32x32xbf16>
    %118 = vector.shape_cast %117 : vector<1x32x32xbf16> to vector<32x32xbf16>
    %cst_133 = arith.constant dense<0.000000e+00> : vector<256x32xf32>
    %119 = tpu.matmul %116, %118, %cst_133 {dimension_numbers = #tpu.dot_dimension_numbers<[1], [0], [0], [1], [0, 0, 1, 1], [], []>} : vector<256x32xbf16>, vector<32x32xbf16>, vector<256x32xf32> -> vector<256x32xf32>
    %120 = arith.addf %114, %119 : vector<256x32xf32>
    %c2_134 = arith.constant 2 : index
    %c0_135 = arith.constant 0 : index
    %c0_136 = arith.constant 0 : index
    %121 = vector.load %arg9[%c2_134, %c0_135, %c0_136] : memref<18x18x32xbf16, #tpu.memory_space<vmem>>, vector<16x16x32xbf16>
    %122 = vector.shape_cast %121 : vector<16x16x32xbf16> to vector<256x32xbf16>
    %c6_137 = arith.constant 6 : index
    %c0_138 = arith.constant 0 : index
    %c0_139 = arith.constant 0 : index
    %123 = vector.load %arg4[%c6_137, %c0_138, %c0_139] : memref<9x32x32xbf16, #tpu.memory_space<vmem>>, vector<1x32x32xbf16>
    %124 = vector.shape_cast %123 : vector<1x32x32xbf16> to vector<32x32xbf16>
    %cst_140 = arith.constant dense<0.000000e+00> : vector<256x32xf32>
    %125 = tpu.matmul %122, %124, %cst_140 {dimension_numbers = #tpu.dot_dimension_numbers<[1], [0], [0], [1], [0, 0, 1, 1], [], []>} : vector<256x32xbf16>, vector<32x32xbf16>, vector<256x32xf32> -> vector<256x32xf32>
    %126 = arith.addf %120, %125 : vector<256x32xf32>
    %c2_141 = arith.constant 2 : index
    %c1_142 = arith.constant 1 : index
    %c0_143 = arith.constant 0 : index
    %127 = vector.load %arg9[%c2_141, %c1_142, %c0_143] : memref<18x18x32xbf16, #tpu.memory_space<vmem>>, vector<16x16x32xbf16>
    %128 = vector.shape_cast %127 : vector<16x16x32xbf16> to vector<256x32xbf16>
    %c7_144 = arith.constant 7 : index
    %c0_145 = arith.constant 0 : index
    %c0_146 = arith.constant 0 : index
    %129 = vector.load %arg4[%c7_144, %c0_145, %c0_146] : memref<9x32x32xbf16, #tpu.memory_space<vmem>>, vector<1x32x32xbf16>
    %130 = vector.shape_cast %129 : vector<1x32x32xbf16> to vector<32x32xbf16>
    %cst_147 = arith.constant dense<0.000000e+00> : vector<256x32xf32>
    %131 = tpu.matmul %128, %130, %cst_147 {dimension_numbers = #tpu.dot_dimension_numbers<[1], [0], [0], [1], [0, 0, 1, 1], [], []>} : vector<256x32xbf16>, vector<32x32xbf16>, vector<256x32xf32> -> vector<256x32xf32>
    %132 = arith.addf %126, %131 : vector<256x32xf32>
    %c2_148 = arith.constant 2 : index
    %c2_149 = arith.constant 2 : index
    %c0_150 = arith.constant 0 : index
    %133 = vector.load %arg9[%c2_148, %c2_149, %c0_150] : memref<18x18x32xbf16, #tpu.memory_space<vmem>>, vector<16x16x32xbf16>
    %134 = vector.shape_cast %133 : vector<16x16x32xbf16> to vector<256x32xbf16>
    %c8_151 = arith.constant 8 : index
    %c0_152 = arith.constant 0 : index
    %c0_153 = arith.constant 0 : index
    %135 = vector.load %arg4[%c8_151, %c0_152, %c0_153] : memref<9x32x32xbf16, #tpu.memory_space<vmem>>, vector<1x32x32xbf16>
    %136 = vector.shape_cast %135 : vector<1x32x32xbf16> to vector<32x32xbf16>
    %cst_154 = arith.constant dense<0.000000e+00> : vector<256x32xf32>
    %137 = tpu.matmul %134, %136, %cst_154 {dimension_numbers = #tpu.dot_dimension_numbers<[1], [0], [0], [1], [0, 0, 1, 1], [], []>} : vector<256x32xbf16>, vector<32x32xbf16>, vector<256x32xf32> -> vector<256x32xf32>
    %138 = arith.addf %132, %137 : vector<256x32xf32>
    %c0_155 = arith.constant 0 : index
    %c0_156 = arith.constant 0 : index
    %139 = vector.load %arg6[%c0_155, %c0_156] : memref<1x32xf32, #tpu.memory_space<vmem>>, vector<1x32xf32>
    %140 = vector.broadcast %139 : vector<1x32xf32> to vector<256x32xf32>
    %141 = arith.addf %138, %140 : vector<256x32xf32>
    %cst_157 = arith.constant 0.000000e+00 : f32
    %142 = vector.broadcast %cst_157 : f32 to vector<256x32xf32>
    %143 = arith.maximumf %141, %142 : vector<256x32xf32>
    %144 = vector.shape_cast %143 : vector<256x32xf32> to vector<16x16x32xf32>
    %145 = arith.truncf %144 : vector<16x16x32xf32> to vector<16x16x32xbf16>
    %c0_158 = arith.constant 0 : index
    %c0_159 = arith.constant 0 : index
    %c0_160 = arith.constant 0 : index
    %c0_161 = arith.constant 0 : index
    %146 = vector.load %arg7[%c0_158, %c0_159, %c0_160, %c0_161] : memref<1x16x16x32xbf16, #tpu.memory_space<vmem>>, vector<1x16x16x32xbf16>
    %147 = vector.shape_cast %146 : vector<1x16x16x32xbf16> to vector<16x16x32xbf16>
    %148 = vector.shape_cast %145 : vector<16x16x32xbf16> to vector<1x16x16x32xbf16>
    tpu.vector_store %arg7[%c0_158, %c0_159, %c0_160, %c0_161], %148 {strides = array<i32>} : memref<1x16x16x32xbf16, #tpu.memory_space<vmem>>, vector<1x16x16x32xbf16>,
    return
  }
  func.func @transform_0(%arg0: i32, %arg1: i32) -> (i32, i32, i32, i32) {
    %c0_i32 = arith.constant 0 : i32
    %c0_i32_0 = arith.constant 0 : i32
    %c0_i32_1 = arith.constant 0 : i32
    return %arg0, %arg1, %c0_i32, %c0_i32_0 : i32, i32, i32, i32
  }
  func.func @transform_1(%arg0: i32, %arg1: i32) -> (i32, i32, i32) {
    %c0_i32 = arith.constant 0 : i32
    %c0_i32_0 = arith.constant 0 : i32
    %c0_i32_1 = arith.constant 0 : i32
    %c0_i32_2 = arith.constant 0 : i32
    return %c0_i32, %c0_i32_0, %c0_i32_1 : i32, i32, i32
  }
  func.func @transform_2(%arg0: i32, %arg1: i32) -> (i32, i32, i32) {
    %c0_i32 = arith.constant 0 : i32
    %c0_i32_0 = arith.constant 0 : i32
    %c0_i32_1 = arith.constant 0 : i32
    %c0_i32_2 = arith.constant 0 : i32
    return %c0_i32, %c0_i32_0, %c0_i32_1 : i32, i32, i32
  }
  func.func @transform_3(%arg0: i32, %arg1: i32) -> (i32, i32) {
    %c0_i32 = arith.constant 0 : i32
    %c0_i32_0 = arith.constant 0 : i32
    %c0_i32_1 = arith.constant 0 : i32
    return %c0_i32, %c0_i32_0 : i32, i32
  }
  func.func @transform_4(%arg0: i32, %arg1: i32) -> (i32, i32) {
    %c0_i32 = arith.constant 0 : i32
    %c0_i32_0 = arith.constant 0 : i32
    %c0_i32_1 = arith.constant 0 : i32
    return %c0_i32, %c0_i32_0 : i32, i32
  }
  func.func @transform_5(%arg0: i32, %arg1: i32) -> (i32, i32, i32, i32) {
    %c0_i32 = arith.constant 0 : i32
    %c0_i32_0 = arith.constant 0 : i32
    %c0_i32_1 = arith.constant 0 : i32
    return %arg0, %arg1, %c0_i32, %c0_i32_0 : i32, i32, i32, i32
  }
}

</mosaic_0001>

<bundles_post_ra>
// kernel: tpu_custom_call.1
= control target key start
LH: loop header
LB: loop body
LE: loop exit
PB: predicated region body
PF: predicated region fallthrough
CT: control target
= control target key end

     0   :  { %10 = vsyncpa [#allocation5], 0  ;;  %s18707_s0 = inlined_call_operand.vmem [shape: f32[2,16,16,4], index: 0, kind: input, shape index: {}]   ;;  %s18708_s1 = inlined_call_operand.vmem [shape: bf16[9,4,32], index: 1, kind: input, shape index: {}]   ;;  %s18709_s2 = inlined_call_operand.vmem [shape: bf16[9,32,32], index: 2, kind: input, shape index: {}]   ;;  %s18710_s3 = inlined_call_operand.vmem [shape: f32[1,32], index: 3, kind: input, shape index: {}]   ;;  %s18711_s4 = inlined_call_operand.vmem [shape: f32[1,32], index: 4, kind: input, shape index: {}]   ;;  %s18712_s5 = inlined_call_operand.hbm [shape: bf16[2,16,16,32], index: 5, kind: output, shape index: {}]  }
   0x1   :  { %12 = vsyncpa [#allocation5 + $0x1], 0  ;;  %s14741_s18 = smov 0   ;;  %s14743_s19 = smov 0  }
   0x2   :  { %s14745_s20 = smov 0   ;;  %s14747_s21 = smov 0  }
   0x3   :  { %s14749_s22 = smov 0   ;;  %s14751_s23 = smov 0  }
   0x4 LB: > { %s11851_s24 = sadd.s32 4294967295, %s14705_s23   ;;  %s11852_s25 = sadd.s32 4294967294, %s14705_s23   ;;  %s14705_s23 = sphi %s14751_s23, %s18_s23   ;;  %s14701_s22 = sphi %s14749_s22, %s19057_s22   ;;  %s14697_s21 = sphi %s14747_s21, %s19056_s21   ;;  %s14693_s20 = sphi %s14745_s20, %s19055_s20   ;;  %s14689_s19 = sphi %s14743_s19, %s19054_s19   ;;  %s14685_s18 = sphi %s14741_s18, %s19053_s18  }
   0x5   : > { %s30_s26 = sadd.s32 1, %s14701_s22  ;;  %s151_s27 = sadd.s32 1, %s14693_s20 }
   0x6   : > { %p32_p0 = scmp.ge.s32.totalorder %s30_s26, 2  ;;  %p161_p1 = scmp.ne.s32.totalorder %s14693_s20, %s14689_s19 }
   0x7   : > { %p162_p2 = scmp.eq.s32.totalorder %s11851_s24, 1  ;;  %p167_p3 = scmp.ne.s32.totalorder %s14689_s19, %s14685_s18 }
   0x8   : > { %s19059_s26 = smov (%p32_p0, %s30_s26), 0  ;;  %p168_p5 = scmp.eq.s32.totalorder %s11852_s25, 1 }
   0x9   : > { %p14781_p4 = por %p162_p2, %p161_p1  ;;  %s146_s29 = ssub.s32 %s14701_s22, %s19059_s26 }
   0xa   : > { %p11855_p6 = scmp.ge.s32.totalorder %s14705_s23, 1  ;;  %p149_p7 = scmp.eq.s32.totalorder %s146_s29, 0 }
   0xb   : > { %p14788_p8 = por %p168_p5, %p167_p3  ;;  %p212_p9 = scmp.lt.s32.totalorder %s14705_s23, 3 }
   0xc   : > { %s14794_s6 = scalar_select %p149_p7, %s14693_s20, %s151_s27  }
   0xd   : > { %p213_p10 = pnand %p11855_p6, %p212_p9 }
   0xf   : > { %216 = sbr.rel (%p213_p10) target bundleno = 1773 (0x6ed), region = 40 }
  0x16   : > { %v11891_v0 = vld [vmem:[%s18708_s1 + $0x2] sm:$0x3]  ;;  %vm1579_vm0 = vcmask 1041408   ;;  %vm258_vm1 = vcmask 24576   ;;  %vm259_vm2 = vsmask.f32 256 }
  0x17   : > { %14385 = vmatprep.subr.msk.bf16.mxu0 %vm1579_vm0, %v11891_v0  ;;  %v1581_v1 = vsel %vm1579_vm0, %v11891_v0, 0  ;;  %vm14802_vm3 = vmand %vm258_vm1, %vm259_vm2  ;;  %v261_v3 = vld [vmem:[#allocation2] sm:$0x1]  ;;  %vm321_vm4 = vsmask.f32 7938  ;;  %14386 = vmatprep.subr.msk.bf16.mxu1 %vm1579_vm0, %v11891_v0  ;;  %v18815_v5 = vmov 0 }
  0x18   : > { %13174 = vmatpush3.bf16.msra.mxu0 %v1581_v1  ;;  %v262_v4 = vsel %vm14802_vm3, 0, %v261_v3  ;;  %vm14810_vm5 = vmand %vm258_vm1, %vm321_vm4  ;;  %v323_v6 = vld [vmem:[#allocation2 + $0x8] sm:$0x1]  ;;  %vm383_vm6 = vcmask 27648   ;;  %13840 = vmatpush3.bf16.msra.mxu1 %v1581_v1  ;;  %v18713_v8 = vmov 0   ;;  %p246_p11 = scmp.lt.s32.totalorder %s14697_s21, 1 }
  0x19   : > { %v18816_v5 = vsel %vm14810_vm5, 4294967295, %v18815_v5  ;;  %263 = vst [vmem:[#allocation2] sm:$0x1] %v262_v4  ;;  %v324_v7 = vsel %vm14810_vm5, 0, %v323_v6  ;;  %389 = vst.msk [vmem:[#allocation2 + $0x4] sm:$0xf] %vm383_vm6, %v18713_v8 }
  0x1a   : > { %18817 = vst [vmem:[#allocation7_spill] sm:$0xff] %v18816_v5  ;;  %396 = vst.msk [vmem:[#allocation2 + $0x10] sm:$0xf] %vm383_vm6, %v18713_v8  ;;  %v14827_v9 = vld [vmem:[%s18708_s1] sm:$0x3]  ;;  %s247_s11 = scalar_select %p246_p11, %s14697_s21, 1 }
  0x1b   : > { %404 = vst.msk [vmem:[#allocation2 + $0xdc] sm:$0xf] %vm383_vm6, %v18713_v8  ;;  %411 = vst.msk [vmem:[#allocation2 + $0xe8] sm:$0xf] %vm383_vm6, %v18713_v8  ;;  %14387 = vmatprep.subr.msk.bf16.mxu0 %vm1579_vm0, %v14827_v9  ;;  %v264_v10 = vld [vmem:[#allocation2 + $0xc] sm:$0x1] }
  0x1c   : > { %325 = vst [vmem:[#allocation2 + $0x8] sm:$0x1] %v324_v7  ;;  %v326_v11 = vld [vmem:[#allocation2 + $0x14] sm:$0x1]  ;;  %v265_v12 = vsel %vm14802_vm3, 0, %v264_v10  ;;  %vm14843_vm7 = vmand %vm383_vm6, %vm321_vm4  ;;  %s12738_s12 = sshll.u32 %s247_s11, 8 }
  0x1d   : > { %v327_v13 = vsel %vm14810_vm5, 0, %v326_v11  ;;  %v267_v14 = vld [vmem:[#allocation2 + $0x18] sm:$0x1]  ;;  %v329_v15 = vld [vmem:[#allocation2 + $0x20] sm:$0x1]  ;;  %s14854_s15 = scalar_lea.vmem %s18707_s0, %s12738_s12  ;;  %v14882_v58 = vsel %vm1579_vm0, %v14827_v9, 0 }
  0x1e   : > { %266 = vst [vmem:[#allocation2 + $0xc] sm:$0x1] %v265_v12  ;;  %328 = vst [vmem:[#allocation2 + $0x14] sm:$0x1] %v327_v13  ;;  %v268_v16 = vsel %vm14802_vm3, 0, %v267_v14  ;;  %v330_v17 = vsel %vm14810_vm5, 0, %v329_v15 }
  0x1f   : > { %269 = vst [vmem:[#allocation2 + $0x18] sm:$0x1] %v268_v16  ;;  %331 = vst [vmem:[#allocation2 + $0x20] sm:$0x1] %v330_v17  ;;  %v270_v18 = vld [vmem:[#allocation2 + $0x24] sm:$0x1] }
  0x20   : > { %v332_v19 = vld [vmem:[#allocation2 + $0x2c] sm:$0x1]  ;;  %v271_v21 = vsel %vm14802_vm3, 0, %v270_v18  ;;  %v273_v23 = vld [vmem:[#allocation2 + $0x30] sm:$0x1]  ;;  %v415_v35 = vld [vmem:[%s14854_s15] sm:$0xff] }
  0x21   : > { %v333_v22 = vsel %vm14810_vm5, 0, %v332_v19  ;;  %vm543_vm8 = vsmask.f32 4368  ;;  %272 = vst [vmem:[#allocation2 + $0x24] sm:$0x1] %v271_v21  ;;  %v274_v24 = vsel %vm14802_vm3, 0, %v273_v23  ;;  %v12739_v42 = vpack.c.bf16 %v415_v35, %v415_v35 }
  0x22   : > { %334 = vst [vmem:[#allocation2 + $0x2c] sm:$0x1] %v333_v22  ;;  %v385_v25 = vld [vmem:[#allocation2] sm:$0xf]  ;;  %v14858_v26 = vld [vmem:[#allocation2 + $0x4] sm:$0xf]  ;;  %vm14890_vm11 = vmor %vm259_vm2, %vm543_vm8 }
  0x23   : > { %v981_v27 = vld [vmem:[#allocation2 + $0x10] sm:$0xf]  ;;  %275 = vst [vmem:[#allocation2 + $0x30] sm:$0x1] %v274_v24  ;;  %v386_v28 = vsel %vm14843_vm7, 0, %v385_v25  ;;  %v1046_v30 = vshll.u32 %v14858_v26, 16 }
  0x24   : > { %v390_v29 = vld [vmem:[#allocation2 + $0x8] sm:$0x1]  ;;  %vm1033_vm9 = vsmask.f32 3328  ;;  %vm1034_vm10 = vsmask.f32 7440 }
  0x25   : > { %v1050_v31 = vshrl.u32 %v14858_v26, 16  ;;  %v1070_v32 = vshll.u32 %v981_v27, 16  ;;  %387 = vst [vmem:[#allocation2] sm:$0xf] %v386_v28  ;;  %v391_v33 = vsel %vm14802_vm3, 0, %v390_v29  ;;  %v1074_v34 = vshrl.u32 %v981_v27, 16  ;;  %vm14906_vm13 = vmor %vm1033_vm9, %vm1034_vm10 }
  0x26   : > { %v416_v36 = vld [vmem:[%s14854_s15 + $0x8] sm:$0xff]  ;;  %v417_v37 = vld [vmem:[%s14854_s15 + $0x10] sm:$0xff]  ;;  %392 = vst [vmem:[#allocation2 + $0x8] sm:$0x1] %v391_v33  ;;  %v14869_v38 = vrot.slane %v1046_v30, 5  ;;  %v546_v50 = vshrl.u32 %v12739_v42, 16 }
  0x27   : > { %v1052_v39 = vrot.slane %v1050_v31, 4  ;;  %v393_v40 = vld [vmem:[#allocation2 + $0xc] sm:$0xf]  ;;  %v397_v41 = vld [vmem:[#allocation2 + $0x14] sm:$0x1]  ;;  %v12740_v43 = vpack.c.bf16 %v416_v36, %v416_v36  ;;  %v14875_v46 = vrot.slane %v1070_v32, 5  ;;  %v12741_v56 = vpack.c.bf16 %v417_v37, %v417_v37 }
  0x28   : > { %v394_v44 = vsel %vm14843_vm7, 0, %v393_v40  ;;  %v398_v45 = vsel %vm14802_vm3, 0, %v397_v41  ;;  %v1076_v47 = vrot.slane %v1074_v34, 4  ;;  %v335_v48 = vld [vmem:[#allocation2 + $0x38] sm:$0x1]  ;;  %v549_v51 = vshll.u32 %v12739_v42, 16 }
  0x29   : > { %v1053_v49 = vor.u32 %v1052_v39, %v14869_v38  ;;  %395 = vst [vmem:[#allocation2 + $0xc] sm:$0xf] %v394_v44  ;;  %399 = vst [vmem:[#allocation2 + $0x14] sm:$0x1] %v398_v45  ;;  %v554_v52 = vshrl.u32 %v12740_v43, 16  ;;  %v418_v53 = vld [vmem:[%s14854_s15 + $0x18] sm:$0xff] }
  0x2a   : > { %v1077_v54 = vor.u32 %v1076_v47, %v14875_v46  ;;  %v557_v55 = vshll.u32 %v12740_v43, 16  ;;  %v12742_v57 = vpack.c.bf16 %v418_v53, %v418_v53  ;;  %v548_v59 = vrot.slane %v546_v50, 7  ;;  %v866_v0 = vld [vmem:[#allocation2 + $0x18] sm:$0xf]  ;;  %v870_v12 = vld [vmem:[#allocation2 + $0x20] sm:$0x1] }
  0x2b   : > { %v556_v60 = vrot.slane %v554_v52, 7  ;;  %v336_v61 = vsel %vm14810_vm5, 0, %v335_v48  ;;  %v14886_v62 = vrot.slane %v1053_v49, 4  ;;  %v18820_v63 = vmov 0  ;;  %v873_v35 = vld [vmem:[#allocation2 + $0x24] sm:$0xf] }
  0x2c   : > { %v18821_v63 = vsel %vm14890_vm11, 4294967295, %v18820_v63  ;;  %v563_v1 = vshrl.u32 %v12741_v56, 16  ;;  %v566_v3 = vshll.u32 %v12741_v56, 16  ;;  %v571_v4 = vshrl.u32 %v12742_v57, 16  ;;  %337 = vst [vmem:[#allocation2 + $0x38] sm:$0x1] %v336_v61 }
  0x2d   : > { %18822 = vst [vmem:[#allocation8_spill] sm:$0xff] %v18821_v63  ;;  %v14894_v6 = vld [vmem:[#allocation2] sm:$0xf]  ;;  %v551_v7 = vor.u32 %v549_v51, %v548_v59  ;;  %v552_v9 = vrot.slane %v548_v59, 4  ;;  %v559_v10 = vor.u32 %v557_v55, %v556_v60  ;;  %v561_v11 = vrot.slane %v556_v60, 4  ;;  %v420_v41 = vld [vmem:[%s14854_s15 + $0x28] sm:$0xff] }
  0x2e   : > { %v1015_v13 = vld [vmem:[#allocation2 + $0x8] sm:$0x1]  ;;  %v1037_v14 = vshrl.u32 %v14894_v6, 16  ;;  %v1040_v15 = vshll.u32 %v14894_v6, 16  ;;  %vm1524_vm12 = vcmask 31744   ;;  %v14898_v16 = vrot.slane %v1077_v54, 4 }
  0x2f   : > { %v565_v17 = vrot.slane %v563_v1, 7  ;;  %v1056_v18 = vshll.u32 %v1015_v13, 16  ;;  %v560_v19 = vsel %vm14890_vm11, %v552_v9, %v559_v10  ;;  %v867_v21 = vsel %vm14843_vm7, %v551_v7, %v866_v0  ;;  %v419_v40 = vld [vmem:[%s14854_s15 + $0x20] sm:$0xff]  ;;  %v276_v42 = vld [vmem:[#allocation2 + $0x3c] sm:$0x1]  ;;  %v421_v53 = vld [vmem:[%s14854_s15 + $0x30] sm:$0xff] }
  0x30   : > { %v573_v22 = vrot.slane %v571_v4, 7  ;;  %v1039_v24 = vrot.slane %v1037_v14, 4  ;;  %v1042_v25 = vrot.slane %v1040_v15, 5  ;;  %v14910_v27 = vld [vmem:[#allocation2 + $0xc] sm:$0xf]  ;;  %v871_v29 = vsel %vm14802_vm3, %v561_v11, %v870_v12  ;;  %s242_s12 = sand.u32 1, %s14689_s19  }
  0x31   : > { %v1016_v28 = vld [vmem:[#allocation2 + $0x14] sm:$0x1]  ;;  %868 = vst [vmem:[#allocation2 + $0x18] sm:$0xf] %v867_v21  ;;  %869 = vst.msk [vmem:[#allocation2 + $0x1c] sm:$0xf] %vm383_vm6, %v560_v19  ;;  %v568_v30 = vor.u32 %v566_v3, %v565_v17  ;;  %v12743_v56 = vpack.c.bf16 %v419_v40, %v419_v40 }
  0x32   : > { %v1058_v31 = vrot.slane %v1056_v18, 5  ;;  %v1061_v32 = vshrl.u32 %v14910_v27, 16  ;;  %v1064_v33 = vshll.u32 %v14910_v27, 16  ;;  %v1080_v34 = vshll.u32 %v1016_v28, 16  ;;  %872 = vst [vmem:[#allocation2 + $0x20] sm:$0x1] %v871_v29 }
  0x33   : > { %v1043_v36 = vor.u32 %v1042_v25, %v1039_v24  ;;  %v569_v37 = vrot.slane %v565_v17, 4  ;;  %v574_v39 = vshll.u32 %v12742_v57, 16  ;;  %v877_v48 = vld [vmem:[#allocation2 + $0x2c] sm:$0x1]  ;;  %v578_v51 = vrot.slane %v573_v22, 4  ;;  %v422_v28 = vld [vmem:[%s14854_s15 + $0x38] sm:$0xff] }
  0x34   : > { %v1059_v43 = vsel %vm14906_vm13, %v14886_v62, %v1058_v31  ;;  %v1063_v44 = vrot.slane %v1061_v32, 4  ;;  %v1066_v45 = vrot.slane %v1064_v33, 5  ;;  %v1082_v47 = vrot.slane %v1080_v34, 5  ;;  %v338_v18 = vld [vmem:[#allocation2 + $0x44] sm:$0x1]  ;;  %s12839_s17 = sshll.u32 %s14697_s21, 11 }
  0x35   : > { %v1044_v49 = vrot.slane %v1043_v36, 4  ;;  %v576_v50 = vor.u32 %v574_v39, %v573_v22  ;;  %v874_v52 = vsel %vm14843_vm7, %v568_v30, %v873_v35  ;;  %v14928_v57 = vpack.c.bf16 %v420_v41, %v420_v41  ;;  %v880_v25 = vld [vmem:[#allocation2 + $0x30] sm:$0xf]  ;;  %v423_v33 = vld [vmem:[%s14854_s15 + $0x40] sm:$0xff]  ;;  %s18649_s29 = scalar_lea.hbm %s18712_s5, %s12839_s17  ;;  %s18661_s21 = scalar_lea.sflag [#allocation5], %s242_s12 }
  0x36   : > { %v1067_v54 = vor.u32 %v1066_v45, %v1063_v44  ;;  %v1083_v55 = vsel %vm14906_vm13, %v14898_v16, %v1082_v47  ;;  %875 = vst [vmem:[#allocation2 + $0x24] sm:$0xf] %v874_v52  ;;  %v878_v61 = vsel %vm14802_vm3, %v578_v51, %v877_v48  ;;  %v277_v62 = vsel %vm14802_vm3, 0, %v276_v42  ;;  %v14959_v34 = vld [vmem:[%s18708_s1 + $0x4] sm:$0x3]  ;;  %s14708_s8 = smov [#allocation4]  }
  0x37   : > { %v1049_v59 = vsel %vm14906_vm13, %v1044_v49, %v14869_v38  ;;  %v577_v60 = vsel %vm14890_vm11, %v569_v37, %v576_v50  ;;  %879 = vst [vmem:[#allocation2 + $0x2c] sm:$0x1] %v878_v61  ;;  %v580_v7 = vshrl.u32 %v12743_v56, 16  ;;  %278 = vst [vmem:[#allocation2 + $0x3c] sm:$0x1] %v277_v62  ;;  %v14944_v38 = vpack.c.bf16 %v421_v53, %v421_v53  ;;  %s14631_s9 = sshll.u32 %s14708_s8, 4  ;;  %s14632_s9 = int_to_ptr.vmem [resolvable:$false] %s14631_s9 }
  0x38   : > { %v11892_v0 = vcombine.low %v1049_v59, %v1059_v43  ;;  %v1068_v1 = vrot.slane %v1067_v54, 4  ;;  %v14939_v3 = vld [vmem:[#allocation2 + $0x18] sm:$0xf]  ;;  %v14941_v4 = vld [vmem:[#allocation2 + $0x1c] sm:$0xf]  ;;  %v583_v17 = vshll.u32 %v12743_v56, 16  ;;  %v12746_v49 = vpack.c.bf16 %v422_v28, %v422_v28 }
  0x39   : > { %876 = vst.msk [vmem:[#allocation2 + $0x28] sm:$0xf] %vm383_vm6, %v577_v60  ;;  %v1017_v9 = vld [vmem:[#allocation2 + $0x20] sm:$0x1]  ;;  %v1085_v10 = vshrl.u32 %v14939_v3, 16  ;;  %v1088_v11 = vshll.u32 %v14939_v3, 16  ;;  %v14975_v50 = vpack.c.bf16 %v423_v33, %v423_v33 }
  0x3a   : > { %v1094_v12 = vshll.u32 %v14941_v4, 16  ;;  %v1098_v13 = vshrl.u32 %v14941_v4, 16  ;;  %13175 = vmatprep.mubr.msk.bf16.mxu0 %vm1524_vm12, %v11892_v0  ;;  %v1073_v14 = vsel %vm14906_vm13, %v1068_v1, %v14875_v46  ;;  %v1104_v15 = vshll.u32 %v1017_v9, 16  ;;  %v884_v59 = vld [vmem:[#allocation2 + $0x38] sm:$0x1]  ;;  %s14633_s10 = scalar_lea.vmem %s14632_s9, 4096 }
  0x3b   : > { %v582_v16 = vrot.slane %v580_v7, 7  ;;  %v11893_v19 = vcombine.low %v1073_v14, %v1083_v55  ;;  %v1087_v21 = vrot.slane %v1085_v10, 4  ;;  %v1090_v22 = vrot.slane %v1088_v11, 5  ;;  %v279_v1 = vld [vmem:[#allocation2 + $0x48] sm:$0x1] }
  0x3c   : > { %v1096_v24 = vrot.slane %v1094_v12, 5  ;;  %v1100_v29 = vrot.slane %v1098_v13, 4  ;;  %v1106_v30 = vrot.slane %v1104_v15, 5  ;;  %v588_v36 = vshrl.u32 %v14928_v57, 16  ;;  %v341_v12 = vld [vmem:[#allocation2 + $0x50] sm:$0x1] }
  0x3d   : > { %v585_v31 = vor.u32 %v583_v17, %v582_v16  ;;  %v586_v32 = vrot.slane %v582_v16, 4  ;;  %13176 = vmatmul.mubr.msk.bf16.vlgmr.msra.gmra.mrb[0].mxu0 %vm1524_vm12, %v11893_v19  ;;  %v1091_v46 = vor.u32 %v1090_v22, %v1087_v21  ;;  %v14962_v35 = vld [vmem:[#allocation2 + $0x24] sm:$0xf]  ;;  %v591_v37 = vshll.u32 %v14928_v57, 16  ;;  %v424_v13 = vld [vmem:[%s14854_s15 + $0x48] sm:$0xff] }
  0x3e   : > { %v339_v39 = vsel %vm14810_vm5, 0, %v338_v18  ;;  %13212 = vmatpush3.bf16.msra.mxu0 %v14882_v58  ;;  %v1101_v40 = vor.u32 %v1100_v29, %v1096_v24  ;;  %v1109_v41 = vshrl.u32 %v14962_v35, 16  ;;  %v1112_v42 = vshll.u32 %v14962_v35, 16  ;;  %v1018_v47 = vld [vmem:[#allocation2 + $0x2c] sm:$0x1] }
  0x3f   : > { %v881_v43 = vsel %vm14843_vm7, %v585_v31, %v880_v25  ;;  %340 = vst [vmem:[#allocation2 + $0x44] sm:$0x1] %v339_v39  ;;  %v1092_v44 = vrot.slane %v1091_v46, 4  ;;  %v590_v48 = vrot.slane %v588_v36, 7  ;;  %14388 = vmatprep.subr.msk.bf16.mxu0 %vm1579_vm0, %v14959_v34  ;;  %v1128_v56 = vshll.u32 %v1018_v47, 16 }
  0x40   : > { %v14973_v45 = vld [vmem:[#allocation2 + $0x28] sm:$0xf]  ;;  %882 = vst [vmem:[#allocation2 + $0x30] sm:$0xf] %v881_v43  ;;  %v1102_v58 = vrot.slane %v1101_v40, 4  ;;  %v1111_v51 = vrot.slane %v1109_v41, 4 }
  0x41   : > { %v1114_v52 = vrot.slane %v1112_v42, 5  ;;  %v1118_v53 = vshll.u32 %v14973_v45, 16  ;;  %v1097_v54 = vsel %vm14906_vm13, %v1092_v44, %v1096_v24  ;;  %v1122_v55 = vshrl.u32 %v14973_v45, 16  ;;  %v887_v46 = vld [vmem:[#allocation2 + $0x3c] sm:$0xf] }
  0x42   : > { %v593_v57 = vor.u32 %v591_v37, %v590_v48  ;;  %v1107_v60 = vsel %vm14906_vm13, %v1102_v58, %v1106_v30  ;;  %v595_v0 = vrot.slane %v590_v48, 4  ;;  %v1130_v10 = vrot.slane %v1128_v56, 5  ;;  %v282_v48 = vld [vmem:[#allocation2 + $0x54] sm:$0x1]  ;;  %v4729_v2 = vld [vmem:[#allocation2 + $0x24] sm:$0xf] }
  0x43   : > { %v1115_v61 = vor.u32 %v1114_v52, %v1111_v51  ;;  %v1120_v62 = vrot.slane %v1118_v53, 5  ;;  %v11894_v7 = vcombine.low %v1097_v54, %v1107_v60  ;;  %v1124_v9 = vrot.slane %v1122_v55, 4  ;;  %v344_v53 = vld [vmem:[#allocation2 + $0x5c] sm:$0x1] }
  0x44   : > { %v594_v11 = vsel %vm14890_vm11, %v586_v32, %v593_v57  ;;  %v885_v15 = vsel %vm14802_vm3, %v595_v0, %v884_v59  ;;  %v597_v16 = vshrl.u32 %v14944_v38, 16  ;;  %v600_v17 = vshll.u32 %v14944_v38, 16  ;;  %v425_v59 = vld [vmem:[%s14854_s15 + $0x50] sm:$0xff]  ;;  %v426_v60 = vld [vmem:[%s14854_s15 + $0x58] sm:$0xff] }
  0x45   : > { %v1116_v14 = vrot.slane %v1115_v61, 4  ;;  %883 = vst.msk [vmem:[#allocation2 + $0x34] sm:$0xf] %vm383_vm6, %v594_v11  ;;  %13179 = vmatprep.mubr.msk.bf16.mxu0 %vm1524_vm12, %v11894_v7  ;;  %v1125_v18 = vor.u32 %v1124_v9, %v1120_v62  ;;  %886 = vst [vmem:[#allocation2 + $0x38] sm:$0x1] %v885_v15  ;;  %v605_v19 = vshrl.u32 %v12746_v49, 16  ;;  %v12748_v38 = vpack.c.bf16 %v424_v13, %v424_v13 }
  0x46   : > { %v608_v21 = vshll.u32 %v12746_v49, 16  ;;  %v280_v22 = vsel %vm14802_vm3, 0, %v279_v1  ;;  %v599_v28 = vrot.slane %v597_v16, 7  ;;  %v342_v29 = vsel %vm14810_vm5, 0, %v341_v12  ;;  %v891_v47 = vld [vmem:[#allocation2 + $0x44] sm:$0x1] }
  0x47   : > { %v1121_v24 = vsel %vm14906_vm13, %v1116_v14, %v1120_v62  ;;  %v14998_v25 = vld [vmem:[#allocation2 + $0x30] sm:$0xf]  ;;  %281 = vst [vmem:[#allocation2 + $0x48] sm:$0x1] %v280_v22  ;;  %v1126_v30 = vrot.slane %v1125_v18, 4  ;;  %v607_v33 = vrot.slane %v605_v19, 7 }
  0x48   : > { %v1133_v31 = vshrl.u32 %v14998_v25, 16  ;;  %v1136_v32 = vshll.u32 %v14998_v25, 16  ;;  %343 = vst [vmem:[#allocation2 + $0x50] sm:$0x1] %v342_v29  ;;  %v602_v36 = vor.u32 %v600_v17, %v599_v28  ;;  %v603_v37 = vrot.slane %v599_v28, 4 }
  0x49   : > { %v614_v39 = vshrl.u32 %v14975_v50, 16  ;;  %v617_v40 = vshll.u32 %v14975_v50, 16  ;;  %v1131_v41 = vsel %vm14906_vm13, %v1126_v30, %v1130_v10  ;;  %v610_v44 = vor.u32 %v608_v21, %v607_v33  ;;  %v285_v9 = vld [vmem:[#allocation2 + $0x60] sm:$0x1]  ;;  %v347_v10 = vld [vmem:[#allocation2 + $0x68] sm:$0x1] }
  0x4a   : > { %v1135_v42 = vrot.slane %v1133_v31, 4  ;;  %v1138_v43 = vrot.slane %v1136_v32, 5  ;;  %v11895_v49 = vcombine.low %v1121_v24, %v1131_v41  ;;  %v612_v58 = vrot.slane %v607_v33, 4  ;;  %v427_v33 = vld [vmem:[%s14854_s15 + $0x60] sm:$0xff] }
  0x4b   : > { %v888_v51 = vsel %vm14843_vm7, %v602_v36, %v887_v46  ;;  %v616_v52 = vrot.slane %v614_v39, 7  ;;  %v611_v55 = vsel %vm14890_vm11, %v603_v37, %v610_v44  ;;  %v622_v56 = vshrl.u32 %v12748_v38, 16 }
  0x4c   : > { %v15010_v54 = vld [vmem:[#allocation2 + $0x34] sm:$0xf]  ;;  %v1139_v50 = vor.u32 %v1138_v43, %v1135_v42  ;;  %889 = vst [vmem:[#allocation2 + $0x3c] sm:$0xf] %v888_v51  ;;  %v625_v57 = vshll.u32 %v12748_v38, 16  ;;  %13180 = vmatmul.mubr.msk.bf16.gmra.mrb[4].mxu0 %vm1524_vm12, %v11895_v49  ;;  %v892_v1 = vsel %vm14802_vm3, %v612_v58, %v891_v47  ;;  %v283_v21 = vsel %vm14802_vm3, 0, %v282_v48 }
  0x4d   : > { %v1019_v61 = vld [vmem:[#allocation2 + $0x38] sm:$0x1]  ;;  %v1142_v62 = vshll.u32 %v15010_v54, 16  ;;  %v1146_v0 = vshrl.u32 %v15010_v54, 16  ;;  %890 = vst.msk [vmem:[#allocation2 + $0x40] sm:$0xf] %vm383_vm6, %v611_v55  ;;  %v619_v7 = vor.u32 %v617_v40, %v616_v52  ;;  %v12749_v31 = vpack.c.bf16 %v425_v59, %v425_v59 }
  0x4e   : > { %v1140_v11 = vrot.slane %v1139_v50, 4  ;;  %v1152_v12 = vshll.u32 %v1019_v61, 16  ;;  %893 = vst [vmem:[#allocation2 + $0x44] sm:$0x1] %v892_v1  ;;  %v620_v13 = vrot.slane %v616_v52, 4  ;;  %v624_v14 = vrot.slane %v622_v56, 7 }
  0x4f   : > { %v894_v15 = vld [vmem:[#allocation2 + $0x48] sm:$0xf]  ;;  %v1144_v16 = vrot.slane %v1142_v62, 5  ;;  %v1148_v17 = vrot.slane %v1146_v0, 4  ;;  %v898_v19 = vld [vmem:[#allocation2 + $0x50] sm:$0x1]  ;;  %v12750_v32 = vpack.c.bf16 %v426_v60, %v426_v60  ;;  %v15046_v51 = vpack.c.bf16 %v427_v33, %v427_v33 }
  0x50   : > { %v895_v18 = vsel %vm14843_vm7, %v619_v7, %v894_v15  ;;  %v1154_v22 = vrot.slane %v1152_v12, 5  ;;  %v627_v24 = vor.u32 %v625_v57, %v624_v14  ;;  %v629_v28 = vrot.slane %v624_v14, 4  ;;  %284 = vst [vmem:[#allocation2 + $0x54] sm:$0x1] %v283_v21  ;;  %v428_v57 = vld [vmem:[%s14854_s15 + $0x68] sm:$0xff]  ;;  %v429_v0 = vld [vmem:[%s14854_s15 + $0x70] sm:$0xff] }
  0x51   : > { %896 = vst [vmem:[#allocation2 + $0x48] sm:$0xf] %v895_v18  ;;  %v345_v29 = vsel %vm14810_vm5, 0, %v344_v53  ;;  %v1145_v38 = vsel %vm14906_vm13, %v1140_v11, %v1144_v16  ;;  %v1149_v30 = vor.u32 %v1148_v17, %v1144_v16  ;;  %v286_v37 = vsel %vm14802_vm3, 0, %v285_v9  ;;  %v430_v12 = vld [vmem:[%s14854_s15 + $0x78] sm:$0xff] }
  0x52   : > { %346 = vst [vmem:[#allocation2 + $0x5c] sm:$0x1] %v345_v29  ;;  %v628_v46 = vsel %vm14890_vm11, %v620_v13, %v627_v24  ;;  %v899_v36 = vsel %vm14802_vm3, %v629_v28, %v898_v19  ;;  %v348_v39 = vsel %vm14810_vm5, 0, %v347_v10  ;;  %v631_v42 = vshrl.u32 %v12749_v31, 16  ;;  %287 = vst [vmem:[#allocation2 + $0x60] sm:$0x1] %v286_v37 }
  0x53   : > { %v1150_v40 = vrot.slane %v1149_v30, 4  ;;  %v15039_v41 = vld [vmem:[#allocation2 + $0x3c] sm:$0xf]  ;;  %897 = vst.msk [vmem:[#allocation2 + $0x4c] sm:$0xf] %vm383_vm6, %v628_v46  ;;  %v634_v43 = vshll.u32 %v12749_v31, 16  ;;  %v12753_v30 = vpack.c.bf16 %v429_v0, %v429_v0  ;;  %v15064_v31 = vpack.c.bf16 %v430_v12, %v430_v12 }
  0x54   : > { %900 = vst [vmem:[#allocation2 + $0x50] sm:$0x1] %v899_v36  ;;  %v639_v44 = vshrl.u32 %v12750_v32, 16  ;;  %349 = vst [vmem:[#allocation2 + $0x68] sm:$0x1] %v348_v39  ;;  %v1157_v48 = vshrl.u32 %v15039_v41, 16 }
  0x55   : > { %v15042_v47 = vld [vmem:[#allocation2 + $0x40] sm:$0xf]  ;;  %v1160_v49 = vshll.u32 %v15039_v41, 16  ;;  %v642_v58 = vshll.u32 %v12750_v32, 16  ;;  %v1155_v52 = vsel %vm14906_vm13, %v1150_v40, %v1154_v22  ;;  %v1020_v53 = vld [vmem:[#allocation2 + $0x44] sm:$0x1]  ;;  %v12752_v22 = vpack.c.bf16 %v428_v57, %v428_v57 }
  0x56   : > { %v1166_v50 = vshll.u32 %v15042_v47, 16  ;;  %v1170_v55 = vshrl.u32 %v15042_v47, 16  ;;  %v633_v56 = vrot.slane %v631_v42, 7  ;;  %v11896_v59 = vcombine.low %v1145_v38, %v1155_v52 }
  0x57   : > { %v1159_v60 = vrot.slane %v1157_v48, 4  ;;  %v1162_v61 = vrot.slane %v1160_v49, 5  ;;  %v1176_v62 = vshll.u32 %v1020_v53, 16  ;;  %v901_v17 = vld [vmem:[#allocation2 + $0x54] sm:$0xf]  ;;  %v641_v19 = vrot.slane %v639_v44, 7 }
  0x58   : > { %v1168_v1 = vrot.slane %v1166_v50, 5  ;;  %v1172_v7 = vrot.slane %v1170_v55, 4  ;;  %v15054_v9 = vld [vmem:[#allocation2 + $0x48] sm:$0xf]  ;;  %v636_v10 = vor.u32 %v634_v43, %v633_v56  ;;  %v637_v11 = vrot.slane %v633_v56, 4  ;;  %13183 = vmatprep.mubr.msk.bf16.mxu0 %vm1524_vm12, %v11896_v59 }
  0x59   : > { %v1163_v13 = vor.u32 %v1162_v61, %v1159_v60  ;;  %v1178_v14 = vrot.slane %v1176_v62, 5  ;;  %v1181_v15 = vshrl.u32 %v15054_v9, 16  ;;  %v1184_v16 = vshll.u32 %v15054_v9, 16  ;;  %v905_v37 = vld [vmem:[#allocation2 + $0x5c] sm:$0x1] }
  0x5a   : > { %v1173_v18 = vor.u32 %v1172_v7, %v1168_v1  ;;  %v902_v21 = vsel %vm14843_vm7, %v636_v10, %v901_v17  ;;  %v15062_v28 = vld [vmem:[#allocation2 + $0x4c] sm:$0xf]  ;;  %v644_v42 = vor.u32 %v642_v58, %v641_v19  ;;  %v646_v43 = vrot.slane %v641_v19, 4  ;;  %v350_v48 = vld [vmem:[#allocation2 + $0x74] sm:$0x1] }
  0x5b   : > { %v1164_v24 = vrot.slane %v1163_v13, 4  ;;  %v1021_v29 = vld [vmem:[#allocation2 + $0x50] sm:$0x1]  ;;  %v1183_v38 = vrot.slane %v1181_v15, 4  ;;  %903 = vst [vmem:[#allocation2 + $0x54] sm:$0xf] %v902_v21 }
  0x5c   : > { %v1174_v32 = vrot.slane %v1173_v18, 4  ;;  %v1186_v33 = vrot.slane %v1184_v16, 5  ;;  %v1190_v46 = vshll.u32 %v15062_v28, 16  ;;  %v1194_v36 = vshrl.u32 %v15062_v28, 16  ;;  %v288_v44 = vld [vmem:[#allocation2 + $0x6c] sm:$0x1] }
  0x5d   : > { %v1169_v39 = vsel %vm14906_vm13, %v1164_v24, %v1168_v1  ;;  %v1200_v40 = vshll.u32 %v1021_v29, 16  ;;  %v645_v57 = vsel %vm14890_vm11, %v637_v11, %v644_v42  ;;  %v906_v59 = vsel %vm14802_vm3, %v646_v43, %v905_v37  ;;  %v908_v18 = vld [vmem:[#allocation2 + $0x60] sm:$0xf]  ;;  %v912_v29 = vld [vmem:[#allocation2 + $0x68] sm:$0x1] }
  0x5e   : > { %v1179_v49 = vsel %vm14906_vm13, %v1174_v32, %v1178_v14  ;;  %v1187_v52 = vor.u32 %v1186_v33, %v1183_v38  ;;  %v1192_v53 = vrot.slane %v1190_v46, 5  ;;  %v1196_v50 = vrot.slane %v1194_v36, 4  ;;  %904 = vst.msk [vmem:[#allocation2 + $0x58] sm:$0xf] %vm383_vm6, %v645_v57  ;;  %907 = vst [vmem:[#allocation2 + $0x5c] sm:$0x1] %v906_v59 }
  0x5f   : > { %v11897_v55 = vcombine.low %v1169_v39, %v1179_v49  ;;  %v1202_v56 = vrot.slane %v1200_v40, 5  ;;  %v648_v58 = vshrl.u32 %v15046_v51, 16  ;;  %v651_v62 = vshll.u32 %v15046_v51, 16 }
  0x60   : > { %v1188_v60 = vrot.slane %v1187_v52, 4  ;;  %v1197_v61 = vor.u32 %v1196_v50, %v1192_v53  ;;  %v656_v0 = vshrl.u32 %v12752_v22, 16  ;;  %v659_v1 = vshll.u32 %v12752_v22, 16 }
  0x61   : > { %13184 = vmatmul.mubr.msk.bf16.gmra.mrb[8].mxu0 %vm1524_vm12, %v11897_v55  ;;  %v289_v7 = vsel %vm14802_vm3, 0, %v288_v44  ;;  %v351_v10 = vsel %vm14810_vm5, 0, %v350_v48  ;;  %v650_v14 = vrot.slane %v648_v58, 7  ;;  %v665_v51 = vshrl.u32 %v12753_v30, 16 }
  0x62   : > { %v1193_v11 = vsel %vm14906_vm13, %v1188_v60, %v1192_v53  ;;  %v1198_v12 = vrot.slane %v1197_v61, 4  ;;  %v15086_v13 = vld [vmem:[#allocation2 + $0x54] sm:$0xf]  ;;  %290 = vst [vmem:[#allocation2 + $0x6c] sm:$0x1] %v289_v7  ;;  %v658_v17 = vrot.slane %v656_v0, 7 }
  0x63   : > { %352 = vst [vmem:[#allocation2 + $0x74] sm:$0x1] %v351_v10  ;;  %v1205_v15 = vshrl.u32 %v15086_v13, 16  ;;  %v1208_v16 = vshll.u32 %v15086_v13, 16  ;;  %v668_v19 = vshll.u32 %v12753_v30, 16  ;;  %v653_v22 = vor.u32 %v651_v62, %v650_v14 }
  0x64   : > { %v1203_v21 = vsel %vm14906_vm13, %v1198_v12, %v1202_v56  ;;  %v654_v24 = vrot.slane %v650_v14, 4  ;;  %v667_v38 = vrot.slane %v665_v51, 7  ;;  %v661_v36 = vor.u32 %v659_v1, %v658_v17  ;;  %v291_v60 = vld [vmem:[#allocation2 + $0x78] sm:$0x1]  ;;  %v431_v1 = vld [vmem:[%s14854_s15 + $0x80] sm:$0xff]  ;;  %v432_v14 = vld [vmem:[%s14854_s15 + $0x88] sm:$0xff] }
  0x65   : > { %v11898_v32 = vcombine.low %v1193_v11, %v1203_v21  ;;  %v1207_v33 = vrot.slane %v1205_v15, 4  ;;  %v1210_v46 = vrot.slane %v1208_v16, 5  ;;  %v663_v37 = vrot.slane %v658_v17, 4  ;;  %v15095_v42 = vld [vmem:[#allocation2 + $0x58] sm:$0xf] }
  0x66   : > { %v909_v39 = vsel %vm14843_vm7, %v653_v22, %v908_v18  ;;  %v670_v40 = vor.u32 %v668_v19, %v667_v38  ;;  %v1022_v30 = vld [vmem:[#allocation2 + $0x5c] sm:$0x1]  ;;  %v662_v44 = vsel %vm14890_vm11, %v654_v24, %v661_v36  ;;  %v673_v48 = vshrl.u32 %v15064_v31, 16  ;;  %v294_v7 = vld [vmem:[#allocation2 + $0x84] sm:$0x1] }
  0x67   : > { %13187 = vmatprep.mubr.msk.bf16.mxu0 %vm1524_vm12, %v11898_v32  ;;  %v1211_v43 = vor.u32 %v1210_v46, %v1207_v33  ;;  %910 = vst [vmem:[#allocation2 + $0x60] sm:$0xf] %v909_v39  ;;  %v676_v49 = vshll.u32 %v15064_v31, 16  ;;  %v1214_v52 = vshll.u32 %v15095_v42, 16  ;;  %v1218_v53 = vshrl.u32 %v15095_v42, 16 }
  0x68   : > { %v1224_v50 = vshll.u32 %v1022_v30, 16  ;;  %911 = vst.msk [vmem:[#allocation2 + $0x64] sm:$0xf] %vm383_vm6, %v662_v44  ;;  %v913_v55 = vsel %vm14802_vm3, %v663_v37, %v912_v29  ;;  %v671_v56 = vrot.slane %v667_v38, 4  ;;  %v675_v57 = vrot.slane %v673_v48, 7  ;;  %v433_v48 = vld [vmem:[%s14854_s15 + $0x90] sm:$0xff] }
  0x69   : > { %914 = vst [vmem:[#allocation2 + $0x68] sm:$0x1] %v913_v55  ;;  %v915_v59 = vld [vmem:[#allocation2 + $0x6c] sm:$0xf]  ;;  %v1212_v61 = vrot.slane %v1211_v43, 4  ;;  %v1216_v58 = vrot.slane %v1214_v52, 5  ;;  %v12755_v22 = vpack.c.bf16 %v431_v1, %v431_v1  ;;  %v12756_v39 = vpack.c.bf16 %v432_v14, %v432_v14 }
  0x6a   : > { %v1220_v31 = vrot.slane %v1218_v53, 4  ;;  %v916_v62 = vsel %vm14843_vm7, %v670_v40, %v915_v59  ;;  %v919_v0 = vld [vmem:[#allocation2 + $0x74] sm:$0x1]  ;;  %v1226_v10 = vrot.slane %v1224_v50, 5  ;;  %v678_v11 = vor.u32 %v676_v49, %v675_v57 }
  0x6b   : > { %v680_v12 = vrot.slane %v675_v57, 4  ;;  %917 = vst [vmem:[#allocation2 + $0x6c] sm:$0xf] %v916_v62  ;;  %v1217_v17 = vsel %vm14906_vm13, %v1212_v61, %v1216_v58  ;;  %v292_v21 = vsel %vm14802_vm3, 0, %v291_v60  ;;  %v295_v32 = vsel %vm14802_vm3, 0, %v294_v7 }
  0x6c   : > { %v1221_v51 = vor.u32 %v1220_v31, %v1216_v58  ;;  %v679_v15 = vsel %vm14890_vm11, %v671_v56, %v678_v11  ;;  %293 = vst [vmem:[#allocation2 + $0x78] sm:$0x1] %v292_v21  ;;  %296 = vst [vmem:[#allocation2 + $0x84] sm:$0x1] %v295_v32  ;;  %v682_v50 = vshrl.u32 %v12755_v22, 16  ;;  %v685_v55 = vshll.u32 %v12755_v22, 16 }
  0x6d   : > { %v920_v16 = vsel %vm14802_vm3, %v680_v12, %v919_v0  ;;  %918 = vst.msk [vmem:[#allocation2 + $0x70] sm:$0xf] %vm383_vm6, %v679_v15  ;;  %v690_v31 = vshrl.u32 %v12756_v39, 16  ;;  %v693_v62 = vshll.u32 %v12756_v39, 16  ;;  %v434_v0 = vld [vmem:[%s14854_s15 + $0x98] sm:$0xff]  ;;  %v12757_v12 = vpack.c.bf16 %v433_v48, %v433_v48  ;;  %v436_v48 = vld [vmem:[%s14854_s15 + $0xa8] sm:$0xff] }
  0x6e   : > { %v1222_v18 = vrot.slane %v1221_v51, 4  ;;  %v15116_v19 = vld [vmem:[#allocation2 + $0x60] sm:$0xf]  ;;  %921 = vst [vmem:[#allocation2 + $0x74] sm:$0x1] %v920_v16  ;;  %v684_v58 = vrot.slane %v682_v50, 7 }
  0x6f   : > { %v15121_v24 = vld [vmem:[#allocation2 + $0x64] sm:$0xf]  ;;  %v1229_v29 = vshrl.u32 %v15116_v19, 16  ;;  %v1232_v38 = vshll.u32 %v15116_v19, 16  ;;  %vm2138_vm14 = vcmask 1042432   ;;  %vm2139_vm15 = vcmask 1046532  }
  0x70   : > { %v1227_v33 = vsel %vm14906_vm13, %v1222_v18, %v1226_v10  ;;  %v15129_v46 = vld [vmem:[#allocation2 + $0x68] sm:$0x1]  ;;  %v1238_v36 = vshll.u32 %v15121_v24, 16  ;;  %v1242_v37 = vshrl.u32 %v15121_v24, 16  ;;  %v687_v21 = vor.u32 %v685_v55, %v684_v58  ;;  %vm15299_vm1 = vmor %vm2138_vm14, %vm2139_vm15 }
  0x71   : > { %v11899_v40 = vcombine.low %v1217_v17, %v1227_v33  ;;  %v1231_v30 = vrot.slane %v1229_v29, 4  ;;  %v1234_v43 = vrot.slane %v1232_v38, 5  ;;  %v1248_v44 = vshll.u32 %v15129_v46, 16 }
  0x72   : > { %v1240_v49 = vrot.slane %v1238_v36, 5  ;;  %v1244_v52 = vrot.slane %v1242_v37, 4  ;;  %v15135_v53 = vld [vmem:[#allocation2 + $0x6c] sm:$0xf]  ;;  %v12758_v29 = vpack.c.bf16 %v434_v0, %v434_v0  ;;  %v297_v37 = vld [vmem:[#allocation2 + $0x90] sm:$0x1] }
  0x73   : > { %13188 = vmatmul.mubr.msk.bf16.gmra.mrb[12].mxu0 %vm1524_vm12, %v11899_v40  ;;  %v1235_v56 = vor.u32 %v1234_v43, %v1231_v30  ;;  %v1250_v57 = vrot.slane %v1248_v44, 5  ;;  %v1253_v59 = vshrl.u32 %v15135_v53, 16  ;;  %v1256_v60 = vshll.u32 %v15135_v53, 16  ;;  %v922_v22 = vld [vmem:[#allocation2 + $0x78] sm:$0xf]  ;;  %v435_v44 = vld [vmem:[%s14854_s15 + $0xa0] sm:$0xff] }
  0x74   : > { %v1245_v61 = vor.u32 %v1244_v52, %v1240_v49  ;;  %v15141_v7 = vld [vmem:[#allocation2 + $0x70] sm:$0xf]  ;;  %v688_v30 = vrot.slane %v684_v58, 4  ;;  %v15152_v43 = vrot.slane %v690_v31, 7  ;;  %v923_v50 = vsel %vm14843_vm7, %v687_v21, %v922_v22  ;;  %v438_v21 = vld [vmem:[%s14854_s15 + $0xb8] sm:$0xff] }
  0x75   : > { %v1236_v1 = vrot.slane %v1235_v56, 4  ;;  %v15143_v10 = vld [vmem:[#allocation2 + $0x74] sm:$0x1]  ;;  %v1255_v11 = vrot.slane %v1253_v59, 4  ;;  %v1258_v51 = vrot.slane %v1256_v60, 5  ;;  %v1262_v15 = vshll.u32 %v15141_v7, 16 }
  0x76   : > { %v1246_v14 = vrot.slane %v1245_v61, 4  ;;  %v1266_v16 = vshrl.u32 %v15141_v7, 16  ;;  %v1272_v18 = vshll.u32 %v15143_v10, 16  ;;  %v699_v55 = vshrl.u32 %v12757_v12, 16  ;;  %924 = vst [vmem:[#allocation2 + $0x78] sm:$0xf] %v923_v50 }
  0x77   : > { %v1241_v17 = vsel %vm14906_vm13, %v1236_v1, %v1240_v49  ;;  %v1259_v32 = vor.u32 %v1258_v51, %v1255_v11  ;;  %v1264_v33 = vrot.slane %v1262_v15, 5  ;;  %v11928_v56 = vcombine.low %v14894_v6, %v14858_v26  ;;  %v929_v61 = vld [vmem:[#allocation2 + $0x84] sm:$0xf]  ;;  %v300_v11 = vld [vmem:[#allocation2 + $0x9c] sm:$0x1] }
  0x78   : > { %v1251_v38 = vsel %vm14906_vm13, %v1246_v14, %v1250_v57  ;;  %v1268_v36 = vrot.slane %v1266_v16, 4  ;;  %v1274_v40 = vrot.slane %v1272_v18, 5  ;;  %v695_v57 = vor.u32 %v693_v62, %v15152_v43  ;;  %v437_v14 = vld [vmem:[%s14854_s15 + $0xb0] sm:$0xff] }
  0x79   : > { %v11900_v39 = vcombine.low %v1241_v17, %v1251_v38  ;;  %v1260_v49 = vrot.slane %v1259_v32, 4  ;;  %v702_v59 = vshll.u32 %v12757_v12, 16  ;;  %v707_v60 = vshrl.u32 %v12758_v29, 16  ;;  %v303_v12 = vld [vmem:[#allocation2 + $0xa8] sm:$0x1]  ;;  %v439_v32 = vld [vmem:[%s14854_s15 + $0xc0] sm:$0xff] }
  0x7a   : > { %v1269_v52 = vor.u32 %v1268_v36, %v1264_v33  ;;  %v701_v0 = vrot.slane %v699_v55, 7  ;;  %v710_v1 = vshll.u32 %v12758_v29, 16  ;;  %v696_v51 = vsel %vm14890_vm11, %v688_v30, %v695_v57  ;;  %v440_v55 = vld [vmem:[%s14854_s15 + $0xc8] sm:$0xff] }
  0x7b   : > { %13191 = vmatprep.mubr.msk.bf16.mxu0 %vm1524_vm12, %v11900_v39  ;;  %v1265_v58 = vsel %vm14906_vm13, %v1260_v49, %v1264_v33  ;;  %v15167_v26 = vrot.slane %v707_v60, 7  ;;  %v298_v6 = vsel %vm14802_vm3, 0, %v297_v37  ;;  %v12759_v62 = vpack.c.bf16 %v435_v44, %v435_v44  ;;  %925 = vst.msk [vmem:[#allocation2 + $0x7c] sm:$0xf] %vm383_vm6, %v696_v51 }
  0x7c   : > { %v1270_v31 = vrot.slane %v1269_v52, 4  ;;  %v704_v16 = vor.u32 %v702_v59, %v701_v0  ;;  %v705_v17 = vrot.slane %v701_v0, 4  ;;  %299 = vst [vmem:[#allocation2 + $0x90] sm:$0x1] %v298_v6  ;;  %v12760_v18 = vpack.c.bf16 %v436_v48, %v436_v48 }
  0x7d   : > { %v712_v29 = vor.u32 %v710_v1, %v15167_v26  ;;  %v716_v38 = vshrl.u32 %v12759_v62, 16  ;;  %v719_v36 = vshll.u32 %v12759_v62, 16  ;;  %v301_v44 = vsel %vm14802_vm3, 0, %v300_v11 }
  0x7e   : > { %v1275_v15 = vsel %vm14906_vm13, %v1270_v31, %v1274_v40  ;;  %v930_v33 = vsel %vm14843_vm7, %v704_v16, %v929_v61  ;;  %v724_v37 = vshrl.u32 %v12760_v18, 16  ;;  %v727_v39 = vshll.u32 %v12760_v18, 16  ;;  %302 = vst [vmem:[#allocation2 + $0x9c] sm:$0x1] %v301_v44  ;;  %v15191_v31 = vld [vmem:[#allocation2 + $0x10] sm:$0xf] }
  0x7f   : > { %v11901_v22 = vcombine.low %v1265_v58, %v1275_v15  ;;  %v713_v40 = vsel %vm14890_vm11, %v705_v17, %v712_v29  ;;  %931 = vst [vmem:[#allocation2 + $0x84] sm:$0xf] %v930_v33  ;;  %v718_v30 = vrot.slane %v716_v38, 7  ;;  %v12761_v48 = vpack.c.bf16 %v437_v14, %v437_v14  ;;  %v441_v15 = vld [vmem:[%s14854_s15 + $0xd0] sm:$0xff] }
  0x80   : > { %932 = vst.msk [vmem:[#allocation2 + $0x88] sm:$0xf] %vm383_vm6, %v713_v40  ;;  %v15186_v49 = vrot.slane %v724_v37, 7  ;;  %v12762_v52 = vpack.c.bf16 %v438_v21, %v438_v21  ;;  %v304_v50 = vsel %vm14802_vm3, 0, %v303_v12  ;;  %v12763_v57 = vpack.c.bf16 %v439_v32, %v439_v32  ;;  %v442_v21 = vld [vmem:[%s14854_s15 + $0xd8] sm:$0xff] }
  0x81   : > { %13192 = vmatmul.mubr.msk.bf16.gmra.mrb[16].mxu0 %vm1524_vm12, %v11901_v22  ;;  %v721_v59 = vor.u32 %v719_v36, %v718_v30  ;;  %v722_v60 = vrot.slane %v718_v30, 4  ;;  %v733_v61 = vshrl.u32 %v12761_v48, 16  ;;  %v736_v58 = vshll.u32 %v12761_v48, 16  ;;  %305 = vst [vmem:[#allocation2 + $0xa8] sm:$0x1] %v304_v50 }
  0x82   : > { %13213 = vmatprep.mubr.msk.bf16.mxu0 %vm1524_vm12, %v11928_v56  ;;  %v11929_v56 = vcombine.low %v14910_v27, %v15191_v31  ;;  %v729_v0 = vor.u32 %v727_v39, %v15186_v49  ;;  %v741_v1 = vshrl.u32 %v12762_v52, 16  ;;  %v744_v11 = vshll.u32 %v12762_v52, 16  ;;  %v306_v40 = vld [vmem:[#allocation2 + $0xb4] sm:$0x1]  ;;  %v309_v50 = vld [vmem:[#allocation2 + $0xc0] sm:$0x1] }
  0x83   : > { %v2378_v14 = vsel %vm1579_vm0, %v14959_v34, 0  ;;  %v936_v51 = vld [vmem:[#allocation2 + $0x90] sm:$0xf]  ;;  %v735_v6 = vrot.slane %v733_v61, 7  ;;  %v12764_v62 = vpack.c.bf16 %v440_v55, %v440_v55  ;;  %v750_v12 = vshrl.u32 %v12763_v57, 16  ;;  %v444_v61 = vld [vmem:[%s14854_s15 + $0xe8] sm:$0xff] }
  0x84   : > { %v11930_v16 = vcombine.low %v14939_v3, %v14941_v4  ;;  %v730_v17 = vsel %vm14890_vm11, %v722_v60, %v729_v0  ;;  %v937_v27 = vsel %vm14843_vm7, %v721_v59, %v936_v51  ;;  %v15205_v18 = vrot.slane %v741_v1, 7  ;;  %v15213_v4 = vld [vmem:[%s18708_s1 + $0x6] sm:$0x3] }
  0x85   : > { %938 = vst [vmem:[#allocation2 + $0x90] sm:$0xf] %v937_v27  ;;  %939 = vst.msk [vmem:[#allocation2 + $0x94] sm:$0xf] %vm383_vm6, %v730_v17  ;;  %v738_v34 = vor.u32 %v736_v58, %v735_v6  ;;  %v739_v22 = vrot.slane %v735_v6, 4  ;;  %v752_v29 = vrot.slane %v750_v12, 7  ;;  %v12765_v3 = vpack.c.bf16 %v441_v15, %v441_v15 }
  0x86   : > { %v753_v38 = vshll.u32 %v12763_v57, 16  ;;  %v746_v32 = vor.u32 %v744_v11, %v15205_v18  ;;  %v758_v33 = vshrl.u32 %v12764_v62, 16  ;;  %v943_v36 = vld [vmem:[#allocation2 + $0x9c] sm:$0xf]  ;;  %v761_v39 = vshll.u32 %v12764_v62, 16  ;;  %v443_v60 = vld [vmem:[%s14854_s15 + $0xe0] sm:$0xff] }
  0x87   : > { %v12766_v30 = vpack.c.bf16 %v442_v21, %v442_v21  ;;  %v944_v48 = vsel %vm14843_vm7, %v738_v34, %v943_v36  ;;  %v11931_v55 = vcombine.low %v14962_v35, %v14973_v45  ;;  %v11932_v57 = vcombine.low %v14998_v25, %v15010_v54  ;;  %v445_v17 = vld [vmem:[%s14854_s15 + $0xf0] sm:$0xff]  ;;  %v312_v36 = vld [vmem:[#allocation2 + $0xcc] sm:$0x1] }
  0x88   : > { %v755_v37 = vor.u32 %v753_v38, %v752_v29  ;;  %v747_v44 = vsel %vm14890_vm11, %v739_v22, %v746_v32  ;;  %v950_v52 = vld [vmem:[#allocation2 + $0xa8] sm:$0xf]  ;;  %945 = vst [vmem:[#allocation2 + $0x9c] sm:$0xf] %v944_v48  ;;  %v15226_v59 = vrot.slane %v758_v33, 7  ;;  %v756_v58 = vrot.slane %v752_v29, 4 }
  0x89   : > { %13214 = vmatmul.mubr.msk.bf16.vlgmr.msra.gmra.mrb[0].mxu0 %vm1524_vm12, %v11929_v56  ;;  %946 = vst.msk [vmem:[#allocation2 + $0xa0] sm:$0xf] %vm383_vm6, %v747_v44  ;;  %v307_v35 = vsel %vm14802_vm3, 0, %v306_v40  ;;  %v767_v45 = vshrl.u32 %v12765_v3, 16  ;;  %v770_v54 = vshll.u32 %v12765_v3, 16  ;;  %v775_v0 = vshrl.u32 %v12766_v30, 16 }
  0x8a   : > { %13250 = vmatpush3.bf16.msra.mxu0 %v2378_v14  ;;  %13217 = vmatprep.mubr.msk.bf16.mxu0 %vm1524_vm12, %v11930_v16  ;;  %v951_v56 = vsel %vm14843_vm7, %v755_v37, %v950_v52  ;;  %v763_v25 = vor.u32 %v761_v39, %v15226_v59  ;;  %308 = vst [vmem:[#allocation2 + $0xb4] sm:$0x1] %v307_v35  ;;  %v778_v1 = vshll.u32 %v12766_v30, 16  ;;  %v310_v14 = vsel %vm14802_vm3, 0, %v309_v50  ;;  %v446_v29 = vld [vmem:[%s14854_s15 + $0xf8] sm:$0xff]  ;;  %s11856_s15 = sshll.u32 %s242_s12, 7 }
  0x8b   : > { %14389 = vmatprep.subr.msk.bf16.mxu0 %vm1579_vm0, %v15213_v4  ;;  %952 = vst [vmem:[#allocation2 + $0xa8] sm:$0xf] %v951_v56  ;;  %v769_v11 = vrot.slane %v767_v45, 7  ;;  %v12767_v51 = vpack.c.bf16 %v443_v60, %v443_v60  ;;  %v12768_v6 = vpack.c.bf16 %v444_v61, %v444_v61  ;;  %311 = vst [vmem:[#allocation2 + $0xc0] sm:$0x1] %v310_v14  ;;  %v15241_v15 = vrot.slane %v775_v0, 7 }
  0x8c   : > { %v764_v62 = vsel %vm14890_vm11, %v756_v58, %v763_v25  ;;  %v12769_v37 = vpack.c.bf16 %v445_v17, %v445_v17  ;;  %v11933_v39 = vcombine.low %v15039_v41, %v15042_v47  ;;  %v11934_v40 = vcombine.low %v15054_v9, %v15062_v28  ;;  %v2093_v17 = vld [vmem:[#allocation2 + $0x6c] sm:$0xe]  ;;  %s18556_s16 = scalar_lea.vmem [#allocation4], %s11856_s15 }
  0x8d   : > { %v773_v12 = vrot.slane %v769_v11, 4  ;;  %953 = vst.msk [vmem:[#allocation2 + $0xac] sm:$0xf] %vm383_vm6, %v764_v62  ;;  %v784_v16 = vshrl.u32 %v12767_v51, 16  ;;  %v772_v27 = vor.u32 %v770_v54, %v769_v11  ;;  %v780_v21 = vor.u32 %v778_v1, %v15241_v15  ;;  %v2092_v62 = vld [vmem:[#allocation2 + $0x60] sm:$0xe] }
  0x8e   : > { %v787_v34 = vshll.u32 %v12767_v51, 16  ;;  %v792_v22 = vshrl.u32 %v12768_v6, 16  ;;  %v12770_v30 = vpack.c.bf16 %v446_v29, %v446_v29  ;;  %v795_v50 = vshll.u32 %v12768_v6, 16  ;;  %s11769_s24 = sshll.u32 %s18556_s16, 4  ;;  %s18651_s24 = int_to_ptr.vmem [resolvable:$true] %s11769_s24 }
  0x8f   : > { %v781_v38 = vsel %vm14890_vm11, %v773_v12, %v780_v21  ;;  %v786_v33 = vrot.slane %v784_v16, 7  ;;  %v801_v47 = vshrl.u32 %v12769_v37, 16  ;;  %v804_v9 = vshll.u32 %v12769_v37, 16  ;;  %v1000_v12 = vld [vmem:[#allocation2 + $0x84] sm:$0xf]  ;;  %s14627_s7 = scalar_lea.vmem %s18651_s24, 2048  ;;  %p14634_p1 = scmp.lt.s32.totalorder %s18651_s24, %s14632_s9 }
  0x90   : > { %v15251_v3 = vrot.slane %v792_v22, 7  ;;  %960 = vst.msk [vmem:[#allocation2 + $0xb8] sm:$0xf] %vm383_vm6, %v781_v38  ;;  %v809_v28 = vshrl.u32 %v12770_v30, 16  ;;  %v812_v61 = vshll.u32 %v12770_v30, 16  ;;  %v11935_v54 = vcombine.low %v15086_v13, %v15095_v42  ;;  %p14628_p12 = scmp.ne.s32.totalorder %s18651_s24, %s14627_s7  ;;  %p14635_p2 = scmp.lt.s32.totalorder %s14633_s10, %s14627_s7 }
  0x91   : > { %13218 = vmatmul.mubr.msk.bf16.gmra.mrb[4].mxu0 %vm1524_vm12, %v11931_v55  ;;  %v957_v32 = vld [vmem:[#allocation2 + $0xb4] sm:$0xf]  ;;  %v789_v48 = vor.u32 %v787_v34, %v786_v33  ;;  %v790_v52 = vrot.slane %v786_v33, 4  ;;  %v803_v56 = vrot.slane %v801_v47, 7  ;;  %v11936_v1 = vcombine.low %v15116_v19, %v15121_v24  ;;  %v998_v13 = vld [vmem:[#allocation2 + $0x78] sm:$0xf] }
  0x92   : > { %13221 = vmatprep.mubr.msk.bf16.mxu0 %vm1524_vm12, %v11932_v57  ;;  %v958_v44 = vsel %vm14843_vm7, %v772_v27, %v957_v32  ;;  %v964_v55 = vld [vmem:[#allocation2 + $0xc0] sm:$0xf]  ;;  %v313_v57 = vsel %vm14802_vm3, 0, %v312_v36  ;;  %v797_v60 = vor.u32 %v795_v50, %v15251_v3  ;;  %v15270_v35 = vrot.slane %v809_v28, 7  ;;  %v15284_v42 = vld [vmem:[#allocation2 + $0x7c] sm:$0xf]  ;;  %p14629_p13 = pnand %p14628_p12, %p14781_p4  ;;  %p14636_p3 = por %p14635_p2, %p14634_p1 }
  0x93   : > { %959 = vst [vmem:[#allocation2 + $0xb4] sm:$0xf] %v958_v44  ;;  %v965_v41 = vsel %vm14843_vm7, %v789_v48, %v964_v55  ;;  %314 = vst [vmem:[#allocation2 + $0xcc] sm:$0x1] %v313_v57  ;;  %v806_v45 = vor.u32 %v804_v9, %v803_v56  ;;  %v807_v25 = vrot.slane %v803_v56, 4  ;;  %v11937_v19 = vcombine.low %v15135_v53, %v15141_v7 }
  0x94   : > { %966 = vst [vmem:[#allocation2 + $0xc0] sm:$0xf] %v965_v41  ;;  %v798_v58 = vsel %vm14890_vm11, %v790_v52, %v797_v60  ;;  %v814_v0 = vor.u32 %v812_v61, %v15270_v35  ;;  %v11938_v6 = vcombine.low %v998_v13, %v15284_v42  ;;  %v15290_v16 = vld [vmem:[#allocation2 + $0x88] sm:$0xf]  ;;  %v1002_v27 = vld [vmem:[#allocation2 + $0x90] sm:$0xf]  ;;  %p14630_p0 = pneg %p14629_p13 }
  0x95   : > { %967 = vst.msk [vmem:[#allocation2 + $0xc4] sm:$0xf] %vm383_vm6, %v798_v58  ;;  %v15293_v21 = vld [vmem:[#allocation2 + $0x94] sm:$0xf]  ;;  %v353_v34 = vld [vmem:[#allocation2 + $0x80] sm:$0x1]  ;;  %v11939_v22 = vcombine.low %v1000_v12, %v15290_v16 }
  0x96   : > { %v815_v11 = vsel %vm14890_vm11, %v807_v25, %v814_v0  ;;  %v11972_v53 = vrot.slane %v2092_v62, 9  ;;  %v2199_v29 = vrot.slane %v15121_v24, 5  ;;  %v2202_v38 = vrot.slane %v15129_v46, 5  ;;  %v356_v32 = vld [vmem:[#allocation2 + $0x8c] sm:$0x1]  ;;  %p14637_p5 = pnand %p14636_p3, %p14630_p0 }
  0x97   : > { %974 = vst.msk [vmem:[#allocation2 + $0xd0] sm:$0xf] %vm383_vm6, %v815_v11  ;;  %v11940_v33 = vcombine.low %v1002_v27, %v15293_v21  ;;  %v18825_v36 = vmov 0  ;;  %v11973_v37 = vrot.slane %v2093_v17, 9  ;;  %v2206_v44 = vrot.slane %v15141_v7, 5 }
  0x98   : > { %v18826_v36 = vsel %vm15299_vm1, 4294967295, %v18825_v36  ;;  %v2201_v30 = vrot.slane %v2199_v29, 4  ;;  %v1004_v48 = vld [vmem:[#allocation2 + $0x9c] sm:$0xf]  ;;  %v15308_v24 = vld [vmem:[#allocation2 + $0xa0] sm:$0xf] }
  0x99   : > { %13222 = vmatmul.mubr.msk.bf16.gmra.mrb[8].mxu0 %vm1524_vm12, %v11933_v39  ;;  %18827 = vst [vmem:[#allocation9_spill] sm:$0xff] %v18826_v36  ;;  %v359_v39 = vld [vmem:[#allocation2 + $0x98] sm:$0x1]  ;;  %v2209_v46 = vrot.slane %v15143_v10, 5  ;;  %v354_v52 = vsel %vm14810_vm5, 0, %v353_v34  ;;  %v15320_v57 = vsel %vm15299_vm1, %v11973_v37, %v2206_v44  ;;  %v2208_v7 = vrot.slane %v2206_v44, 4 }
  0x9a   : > { %13225 = vmatprep.mubr.msk.bf16.mxu0 %vm1524_vm12, %v11934_v40  ;;  %v971_v14 = vld [vmem:[#allocation2 + $0xcc] sm:$0xf]  ;;  %v15305_v40 = vsel %vm15299_vm1, %v11972_v53, %v2199_v29  ;;  %v362_v50 = vld [vmem:[#allocation2 + $0xa4] sm:$0x1]  ;;  %v15316_v55 = vsel %vm15299_vm1, %v2201_v30, %v2202_v38  ;;  %355 = vst [vmem:[#allocation2 + $0x80] sm:$0x1] %v354_v52  ;;  %v11941_v25 = vcombine.low %v1004_v48, %v15308_v24 }
  0x9b   : > { %v972_v51 = vsel %vm14843_vm7, %v806_v45, %v971_v14  ;;  %v365_v60 = vld [vmem:[#allocation2 + $0xb0] sm:$0x1]  ;;  %v1006_v10 = vld [vmem:[#allocation2 + $0xa8] sm:$0xf]  ;;  %v11991_v41 = vcombine.low %v15305_v40, %v15316_v55  ;;  %v357_v47 = vsel %vm14810_vm5, 0, %v356_v32  ;;  %v15331_v28 = vsel %vm15299_vm1, %v2208_v7, %v2209_v46 }
  0x9c   : > { %973 = vst [vmem:[#allocation2 + $0xcc] sm:$0xf] %v972_v51  ;;  %v15327_v9 = vld [vmem:[#allocation2 + $0xac] sm:$0xf]  ;;  %358 = vst [vmem:[#allocation2 + $0x8c] sm:$0x1] %v357_v47  ;;  %v11992_v58 = vcombine.low %v15320_v57, %v15331_v28 }
  0x9d   : > { %v360_v61 = vsel %vm14810_vm5, 0, %v359_v39  ;;  %v368_v56 = vld [vmem:[#allocation2 + $0xbc] sm:$0x1]  ;;  %v697_v45 = vrot.slane %v15152_v43, 4  ;;  %v371_v0 = vld [vmem:[#allocation2 + $0xc8] sm:$0x1]  ;;  %v11942_v11 = vcombine.low %v1006_v10, %v15327_v9 }
  0x9e   : > { %361 = vst [vmem:[#allocation2 + $0x98] sm:$0x1] %v360_v61  ;;  %v366_v14 = vsel %vm14810_vm5, 0, %v365_v60  ;;  %v714_v51 = vrot.slane %v15167_v26, 4  ;;  %v2084_v13 = vld [vmem:[#allocation2] sm:$0xe] }
  0x9f   : > { %367 = vst [vmem:[#allocation2 + $0xb0] sm:$0x1] %v366_v14  ;;  %v369_v43 = vsel %vm14810_vm5, 0, %v368_v56  ;;  %v731_v12 = vrot.slane %v15186_v49, 4  ;;  %v748_v17 = vrot.slane %v15205_v18, 4  ;;  %v372_v34 = vsel %vm14810_vm5, 0, %v371_v0 }
  0xa0   : > { %370 = vst [vmem:[#allocation2 + $0xbc] sm:$0x1] %v369_v43  ;;  %v765_v26 = vrot.slane %v15226_v59, 4  ;;  %v14558_v53 = vld [vmem:[#allocation2 + $0x4] sm:$0xf]  ;;  %v782_v49 = vrot.slane %v15241_v15, 4 }
  0xa1   : > { %13226 = vmatmul.mubr.msk.bf16.gmra.mrb[12].mxu0 %vm1524_vm12, %v11935_v54  ;;  %v363_v54 = vsel %vm14810_vm5, 0, %v362_v50  ;;  %v926_v27 = vld [vmem:[#allocation2 + $0x80] sm:$0x1]  ;;  %v2143_v29 = vrot.slane %v14558_v53, 5  ;;  %373 = vst [vmem:[#allocation2 + $0xc8] sm:$0x1] %v372_v34 }
  0xa2   : > { %13229 = vmatprep.mubr.msk.bf16.mxu0 %vm1524_vm12, %v11936_v1  ;;  %v2150_v1 = vrot.slane %v15191_v31, 5  ;;  %364 = vst [vmem:[#allocation2 + $0xa4] sm:$0x1] %v363_v54  ;;  %v927_v38 = vsel %vm14802_vm3, %v697_v45, %v926_v27  ;;  %v1008_v18 = vld [vmem:[#allocation2 + $0xb4] sm:$0xf]  ;;  %v799_v44 = vrot.slane %v15251_v3, 4 }
  0xa3   : > { %928 = vst [vmem:[#allocation2 + $0x80] sm:$0x1] %v927_v38  ;;  %v933_v32 = vld [vmem:[#allocation2 + $0x8c] sm:$0x1]  ;;  %v1010_v37 = vld [vmem:[#allocation2 + $0xc0] sm:$0xf] }
  0xa4   : > { %v15362_v59 = vld [vmem:[#allocation2 + $0xc4] sm:$0xf]  ;;  %v934_v39 = vsel %vm14802_vm3, %v714_v51, %v933_v32  ;;  %v11964_v48 = vrot.slane %v2084_v13, 9  ;;  %v816_v52 = vrot.slane %v15270_v35, 4  ;;  %v2145_v50 = vrot.slane %v2143_v29, 4 }
  0xa5   : > { %v940_v30 = vld [vmem:[#allocation2 + $0x98] sm:$0x1]  ;;  %935 = vst [vmem:[#allocation2 + $0x8c] sm:$0x1] %v934_v39  ;;  %v11944_v60 = vcombine.low %v1010_v37, %v15362_v59  ;;  %v15379_v35 = vld [vmem:[#allocation2 + $0xd0] sm:$0xf] }
  0xa6   : > { %v941_v15 = vsel %vm14802_vm3, %v731_v12, %v940_v30  ;;  %v954_v47 = vld [vmem:[#allocation2 + $0xb0] sm:$0x1]  ;;  %v1012_v0 = vld [vmem:[#allocation2 + $0xcc] sm:$0xf]  ;;  %v2144_v14 = vsel %vm15299_vm1, %v11964_v48, %v2143_v29  ;;  %v14559_v13 = vld [vmem:[#allocation2 + $0x1c] sm:$0xf] }
  0xa7   : > { %942 = vst [vmem:[#allocation2 + $0x98] sm:$0x1] %v941_v15  ;;  %v955_v3 = vsel %vm14802_vm3, %v765_v26, %v954_v47  ;;  %v961_v61 = vld [vmem:[#allocation2 + $0xbc] sm:$0x1]  ;;  %v2157_v43 = vrot.slane %v14559_v13, 5  ;;  %v11945_v27 = vcombine.low %v1012_v0, %v15379_v35  ;;  %v2152_v29 = vrot.slane %v2150_v1, 4 }
  0xa8   : > { %956 = vst [vmem:[#allocation2 + $0xb0] sm:$0x1] %v955_v3  ;;  %v962_v56 = vsel %vm14802_vm3, %v782_v49, %v961_v61  ;;  %v968_v45 = vld [vmem:[#allocation2 + $0xc8] sm:$0x1]  ;;  %v14560_v12 = vld [vmem:[#allocation2 + $0x14] sm:$0x1] }
  0xa9   : > { %13230 = vmatmul.mubr.msk.bf16.gmra.mrb[16].mxu0 %vm1524_vm12, %v11937_v19  ;;  %v374_v19 = vld [vmem:[#allocation2 + $0xd4] sm:$0x1]  ;;  %v947_v7 = vld [vmem:[#allocation2 + $0xa4] sm:$0x1]  ;;  %963 = vst [vmem:[#allocation2 + $0xbc] sm:$0x1] %v962_v56  ;;  %v969_v54 = vsel %vm14802_vm3, %v799_v44, %v968_v45 }
  0xaa   : > { %13233 = vmatprep.mubr.msk.bf16.mxu0 %vm1524_vm12, %v11938_v6  ;;  %v14557_v6 = vld [vmem:[#allocation2 + $0x8] sm:$0x1]  ;;  %v948_v10 = vsel %vm14802_vm3, %v748_v17, %v947_v7  ;;  %970 = vst [vmem:[#allocation2 + $0xc8] sm:$0x1] %v969_v54  ;;  %v2153_v17 = vrot.slane %v14560_v12, 5  ;;  %v2159_v49 = vrot.slane %v2157_v43, 4 }
  0xab   : > { %v2146_v62 = vrot.slane %v14557_v6, 5  ;;  %949 = vst [vmem:[#allocation2 + $0xa4] sm:$0x1] %v948_v10  ;;  %v2086_v6 = vld [vmem:[#allocation2 + $0x18] sm:$0xe]  ;;  %v2777_v31 = vsel %vm1579_vm0, %v15213_v4, 0 }
  0xac   : > { %v315_v34 = vld [vmem:[#allocation2 + $0xd8] sm:$0x1]  ;;  %v11966_v38 = vrot.slane %v2086_v6, 9  ;;  %v2154_v37 = vsel %vm15299_vm1, %v2152_v29, %v2153_v17  ;;  %v14562_v39 = vld [vmem:[#allocation2 + $0x28] sm:$0xf]  ;;  %v2241_v28 = vrot.slane %v15327_v9, 5 }
  0xad   : > { %v2147_v51 = vsel %vm15299_vm1, %v2145_v50, %v2146_v62  ;;  %v316_v62 = vsel %vm14802_vm3, 0, %v315_v34  ;;  %v2164_v30 = vrot.slane %v14562_v39, 5  ;;  %v2087_v15 = vld [vmem:[#allocation2 + $0x24] sm:$0xe]  ;;  %v2088_v50 = vld [vmem:[#allocation2 + $0x30] sm:$0xe] }
  0xae   : > { %v11983_v26 = vcombine.low %v2144_v14, %v2147_v51  ;;  %317 = vst [vmem:[#allocation2 + $0xd8] sm:$0x1] %v316_v62  ;;  %v2158_v44 = vsel %vm15299_vm1, %v11966_v38, %v2157_v43  ;;  %v14564_v47 = vld [vmem:[#allocation2 + $0x2c] sm:$0x1]  ;;  %v11968_v56 = vrot.slane %v2088_v50, 9 }
  0xaf   : > { %v2166_v10 = vrot.slane %v2164_v30, 4  ;;  %v2167_v3 = vrot.slane %v14564_v47, 5  ;;  %v14566_v51 = vld [vmem:[#allocation2 + $0x40] sm:$0xf]  ;;  %v2089_v6 = vld [vmem:[#allocation2 + $0x3c] sm:$0xe] }
  0xb0   : > { %v2178_v13 = vrot.slane %v14566_v51, 5  ;;  %v14567_v12 = vld [vmem:[#allocation2 + $0x4c] sm:$0xf]  ;;  %v14568_v62 = vld [vmem:[#allocation2 + $0x44] sm:$0x1] }
  0xb1   : > { %13234 = vmatmul.mubr.msk.bf16.gmra.mrb[20].mxu0 %vm1524_vm12, %v11939_v22  ;;  %v15354_v22 = vld [vmem:[#allocation2 + $0xb8] sm:$0xf]  ;;  %v2168_v14 = vsel %vm15299_vm1, %v2166_v10, %v2167_v3  ;;  %v2185_v17 = vrot.slane %v14567_v12, 5  ;;  %v2181_v38 = vrot.slane %v14568_v62, 5  ;;  %v2213_v3 = vrot.slane %v15284_v42, 5 }
  0xb2   : > { %13237 = vmatprep.mubr.msk.bf16.mxu0 %vm1524_vm12, %v11940_v33  ;;  %v375_v33 = vsel %vm14810_vm5, 0, %v374_v19  ;;  %v11943_v46 = vcombine.low %v1008_v18, %v15354_v22  ;;  %v14561_v18 = vld [vmem:[#allocation2 + $0x20] sm:$0x1]  ;;  %v2180_v29 = vrot.slane %v2178_v13, 4  ;;  %v1026_v51 = vld [vmem:[#allocation2 + $0x8c] sm:$0x1] }
  0xb3   : > { %376 = vst [vmem:[#allocation2 + $0xd4] sm:$0x1] %v375_v33  ;;  %v2160_v32 = vrot.slane %v14561_v18, 5  ;;  %v2187_v18 = vrot.slane %v2185_v17, 4  ;;  %v2223_v40 = vrot.slane %v1026_v51, 5 }
  0xb4   : > { %v2182_v39 = vsel %vm15299_vm1, %v2180_v29, %v2181_v38  ;;  %v1028_v62 = vld [vmem:[#allocation2 + $0xa4] sm:$0x1]  ;;  %v2097_v57 = vld [vmem:[#allocation2 + $0x9c] sm:$0xe]  ;;  %v2098_v38 = vld [vmem:[#allocation2 + $0xa8] sm:$0xe] }
  0xb5   : > { %v2161_v48 = vsel %vm15299_vm1, %v2159_v49, %v2160_v32  ;;  %v401_v61 = vld [vmem:[#allocation2 + $0xd8] sm:$0xf]  ;;  %v14569_v32 = vld [vmem:[#allocation2 + $0x50] sm:$0x1] }
  0xb6   : > { %v402_v0 = vsel %vm14843_vm7, 0, %v401_v61  ;;  %v1025_v61 = vld [vmem:[#allocation2 + $0x80] sm:$0x1]  ;;  %v16078_v36 = vld [vmem:[#allocation2 + $0x50] sm:$0x1] }
  0xb7   : > { %403 = vst [vmem:[#allocation2 + $0xd8] sm:$0xf] %v402_v0  ;;  %v2216_v0 = vrot.slane %v1025_v61, 5 }
  0xb9   : > { %13238 = vmatmul.mubr.msk.bf16.gmra.mrb[24].mxu0 %vm1524_vm12, %v11941_v25  ;;  %v2085_v25 = vld [vmem:[#allocation2 + $0xc] sm:$0xe] }
  0xba   : > { %13241 = vmatprep.mubr.msk.bf16.mxu0 %vm1524_vm12, %v11942_v11  ;;  %v975_v11 = vld [vmem:[#allocation2 + $0xd4] sm:$0x1]  ;;  %v11965_v53 = vrot.slane %v2085_v25, 9  ;;  %v14565_v25 = vld [vmem:[#allocation2 + $0x38] sm:$0x1] }
  0xbb   : > { %v976_v19 = vsel %vm14802_vm3, %v816_v52, %v975_v11  ;;  %v2174_v54 = vrot.slane %v14565_v25, 5  ;;  %v15414_v11 = vld [vmem:[%s18708_s1 + $0x8] sm:$0x3] }
  0xbc   : > { %977 = vst [vmem:[#allocation2 + $0xd4] sm:$0x1] %v976_v19  ;;  %v2151_v33 = vsel %vm15299_vm1, %v11965_v53, %v2150_v1  ;;  %v11985_v1 = vcombine.low %v2158_v44, %v2161_v48  ;;  %v11969_v53 = vrot.slane %v2089_v6, 9  ;;  %v2096_v6 = vld [vmem:[#allocation2 + $0x90] sm:$0xe] }
  0xbd   : > { %v11984_v7 = vcombine.low %v2151_v33, %v2154_v37  ;;  %v2188_v33 = vrot.slane %v14569_v32, 5  ;;  %v11976_v55 = vrot.slane %v2096_v6, 9  ;;  %v11977_v32 = vrot.slane %v2097_v57, 9  ;;  %v14468_v57 = vld [vmem:[#allocation2 + $0x54] sm:$0xff]  }
  0xbe   : > { %v2179_v37 = vsel %vm15299_vm1, %v11969_v53, %v2178_v13  ;;  %v2095_v13 = vld [vmem:[#allocation2 + $0x84] sm:$0xe] }
  0xc1   : > { %13242 = vmatmul.mubr.msk.bf16.gmra.mrb[28].mxu0 %vm1524_vm12, %v11943_v46  ;;  %v14563_v46 = vld [vmem:[#allocation2 + $0x34] sm:$0xf] }
  0xc2   : > { %13245 = vmatprep.mubr.msk.bf16.mxu0 %vm1524_vm12, %v11944_v60  ;;  %v2171_v52 = vrot.slane %v14563_v46, 5  ;;  %v11967_v60 = vrot.slane %v2087_v15, 9  ;;  %v2189_v15 = vsel %vm15299_vm1, %v2187_v18, %v2188_v33  ;;  %v2091_v46 = vld [vmem:[#allocation2 + $0x54] sm:$0xe] }
  0xc4   : > { %v2173_v45 = vrot.slane %v2171_v52, 4  ;;  %v2165_v4 = vsel %vm15299_vm1, %v11967_v60, %v2164_v30  ;;  %v2172_v43 = vsel %vm15299_vm1, %v11968_v56, %v2171_v52  ;;  %v14570_v30 = vld [vmem:[#allocation2 + $0x58] sm:$0xf]  ;;  %v11988_v52 = vcombine.low %v2179_v37, %v2182_v39 }
  0xc5   : > { %v11986_v34 = vcombine.low %v2165_v4, %v2168_v14  ;;  %v2192_v44 = vrot.slane %v14570_v30, 5  ;;  %v2094_v56 = vld [vmem:[#allocation2 + $0x78] sm:$0xe]  ;;  %v2220_v4 = vrot.slane %v15290_v16, 5  ;;  %v2237_v37 = vrot.slane %v1028_v62, 5 }
  0xc6   : > { %v2175_v19 = vsel %vm15299_vm1, %v2173_v45, %v2174_v54  ;;  %v11974_v25 = vrot.slane %v2094_v56, 9  ;;  %v2215_v54 = vrot.slane %v2213_v3, 4  ;;  %v11978_v39 = vrot.slane %v2098_v38, 9  ;;  %v14471_v38 = vld [vmem:[#allocation2 + $0x78] sm:$0xff]  }
  0xc7   : > { %v2243_v30 = vrot.slane %v2241_v28, 4 }
  0xc8   : > { %v2214_v14 = vsel %vm15299_vm1, %v11974_v25, %v2213_v3  ;;  %v2217_v42 = vsel %vm15299_vm1, %v2215_v54, %v2216_v0  ;;  %v2262_v54 = vrot.slane %v15379_v35, 5 }
  0xc9   : > { %13246 = vmatmul.mubr.msk.bf16.gmra.mrb[32].mxu0 %vm1524_vm12, %v11945_v27  ;;  %v2090_v27 = vld [vmem:[#allocation2 + $0x48] sm:$0xe]  ;;  %v11993_v12 = vcombine.low %v2214_v14, %v2217_v42  ;;  %v1032_v14 = vld [vmem:[#allocation2 + $0xd4] sm:$0x1]  ;;  %v2101_v42 = vld [vmem:[#allocation2 + $0xcc] sm:$0xe] }
  0xca   : > { %13251 = vmatprep.mubr.msk.bf16.mxu0 %vm1524_vm12, %v11983_v26  ;;  %v11987_v26 = vcombine.low %v2172_v43, %v2175_v19  ;;  %v11970_v49 = vrot.slane %v2090_v27, 9  ;;  %v2227_v43 = vrot.slane %v15293_v21, 5  ;;  %v1027_v19 = vld [vmem:[#allocation2 + $0x98] sm:$0x1]  ;;  %v2222_v27 = vrot.slane %v2220_v4, 4 }
  0xcb   : > { %v2265_v6 = vrot.slane %v1032_v14, 5  ;;  %v14475_v14 = vld [vmem:[#allocation2 + $0xa8] sm:$0xff]  }
  0xcc   : > { %v2186_v48 = vsel %vm15299_vm1, %v11970_v49, %v2185_v17  ;;  %v11975_v17 = vrot.slane %v2095_v13, 9  ;;  %v2224_v21 = vsel %vm15299_vm1, %v2222_v27, %v2223_v40  ;;  %v2228_v53 = vsel %vm15299_vm1, %v11976_v55, %v2227_v43  ;;  %v14462_v27 = vld [vmem:[#allocation2 + $0xc] sm:$0xff]   ;;  %v14463_v40 = vld [vmem:[#allocation2 + $0x18] sm:$0xff]   ;;  %v14464_v55 = vld [vmem:[#allocation2 + $0x24] sm:$0xff]  }
  0xcd   : > { %v11989_v50 = vcombine.low %v2186_v48, %v2189_v15  ;;  %v2248_v48 = vrot.slane %v15354_v22, 5  ;;  %v2242_v15 = vsel %vm15299_vm1, %v11978_v39, %v2241_v28  ;;  %v14469_v28 = vld [vmem:[#allocation2 + $0x60] sm:$0xff]  }
  0xce   : > { %v2221_v16 = vsel %vm15299_vm1, %v11975_v17, %v2220_v4 }
  0xcf   : > { %v11994_v49 = vcombine.low %v2221_v16, %v2224_v21  ;;  %v2250_v3 = vrot.slane %v2248_v48, 4  ;;  %v377_v16 = vld [vmem:[#allocation2 + $0xe0] sm:$0x1] }
  0xd0   : > { %v378_v21 = vsel %vm14810_vm5, 0, %v377_v16 }
  0xd1   : > { %13252 = vmatmul.mubr.msk.bf16.vlgmr.msra.gmra.mrb[0].mxu0 %vm1524_vm12, %v11984_v7  ;;  %v11971_v7 = vrot.slane %v2091_v46, 9  ;;  %379 = vst [vmem:[#allocation2 + $0xe0] sm:$0x1] %v378_v21 }
  0xd2   : > { %13288 = vmatpush3.bf16.msra.mxu0 %v2777_v31  ;;  %13255 = vmatprep.mubr.msk.bf16.mxu0 %vm1524_vm12, %v11985_v1  ;;  %v2194_v31 = vrot.slane %v2192_v44, 4  ;;  %v14571_v1 = vld [vmem:[#allocation2 + $0x5c] sm:$0x1] }
  0xd3   : > { %14390 = vmatprep.subr.msk.bf16.mxu0 %vm1579_vm0, %v15414_v11  ;;  %v2195_v60 = vrot.slane %v14571_v1, 5  ;;  %v2193_v10 = vsel %vm15299_vm1, %v11971_v7, %v2192_v44  ;;  %v2255_v7 = vrot.slane %v15362_v59, 5  ;;  %v2100_v1 = vld [vmem:[#allocation2 + $0xc0] sm:$0xe] }
  0xd4   : > { %v11980_v56 = vrot.slane %v2100_v1, 9 }
  0xd5   : > { %v2196_v47 = vsel %vm15299_vm1, %v2194_v31, %v2195_v60  ;;  %v1031_v31 = vld [vmem:[#allocation2 + $0xc8] sm:$0x1] }
  0xd6   : > { %v11990_v45 = vcombine.low %v2193_v10, %v2196_v47  ;;  %v2258_v22 = vrot.slane %v1031_v31, 5  ;;  %v2256_v0 = vsel %vm15299_vm1, %v11980_v56, %v2255_v7  ;;  %v15537_v56 = vld [vmem:[#allocation2 + $0x28] sm:$0xf] }
  0xd9   : > { %13256 = vmatmul.mubr.msk.bf16.gmra.mrb[4].mxu0 %vm1524_vm12, %v11986_v34  ;;  %v2230_v34 = vrot.slane %v1027_v19, 5  ;;  %v2264_v19 = vrot.slane %v2262_v54, 4 }
  0xda   : > { %13259 = vmatprep.mubr.msk.bf16.mxu0 %vm1524_vm12, %v11987_v26  ;;  %v2234_v26 = vrot.slane %v15308_v24, 5 }
  0xdc   : > { %v2236_v33 = vrot.slane %v2234_v26, 4  ;;  %v2235_v44 = vsel %vm15299_vm1, %v11977_v32, %v2234_v26  ;;  %v14465_v26 = vld [vmem:[#allocation2 + $0x30] sm:$0xff]  }
  0xdd   : > { %v15524_v32 = vld [vmem:[#allocation2 + $0x10] sm:$0xf] }
  0xde   : > { %v2238_v9 = vsel %vm15299_vm1, %v2236_v33, %v2237_v37  ;;  %v2995_v33 = vld [vmem:[#allocation2 + $0x18] sm:$0xf] }
  0xdf   : > { %v11996_v60 = vcombine.low %v2235_v44, %v2238_v9  ;;  %v15529_v44 = vld [vmem:[#allocation2 + $0x1c] sm:$0xf]  ;;  %v3071_v9 = vshrl.u32 %v2995_v33, 16 }
  0xe0   : > { %v3084_v31 = vshrl.u32 %v15529_v44, 16 }
  0xe1   : > { %13260 = vmatmul.mubr.msk.bf16.gmra.mrb[8].mxu0 %vm1524_vm12, %v11988_v52  ;;  %v1030_v52 = vld [vmem:[#allocation2 + $0xbc] sm:$0x1] }
  0xe2   : > { %13263 = vmatprep.mubr.msk.bf16.mxu0 %vm1524_vm12, %v11989_v50  ;;  %v2099_v50 = vld [vmem:[#allocation2 + $0xb4] sm:$0xe]  ;;  %v2251_v61 = vrot.slane %v1030_v52, 5 }
  0xe3   : > { %v11979_v47 = vrot.slane %v2099_v50, 9 }
  0xe4   : > { %v2252_v59 = vsel %vm15299_vm1, %v2250_v3, %v2251_v61  ;;  %v15534_v3 = vld [vmem:[#allocation2 + $0x14] sm:$0x1]  ;;  %v2998_v61 = vld [vmem:[#allocation2 + $0x24] sm:$0xf] }
  0xe5   : > { %v2249_v25 = vsel %vm15299_vm1, %v11979_v47, %v2248_v48  ;;  %v3074_v48 = vshll.u32 %v2995_v33, 16  ;;  %v14477_v33 = vld [vmem:[#allocation2 + $0xc0] sm:$0xff]  }
  0xe6   : > { %v11998_v51 = vcombine.low %v2249_v25, %v2252_v59 }
  0xe7   : > { %v3076_v47 = vrot.slane %v3074_v48, 5  ;;  %v15567_v48 = vld [vmem:[#allocation2 + $0x38] sm:$0x1] }
  0xe9   : > { %13264 = vmatmul.mubr.msk.bf16.gmra.mrb[12].mxu0 %vm1524_vm12, %v11990_v45  ;;  %v2257_v45 = vrot.slane %v2255_v7, 4  ;;  %v3080_v7 = vshll.u32 %v15529_v44, 16 }
  0xea   : > { %13267 = vmatprep.mubr.msk.bf16.mxu0 %vm1524_vm12, %v11991_v41  ;;  %v2229_v41 = vrot.slane %v2227_v43, 4  ;;  %v11981_v43 = vrot.slane %v2101_v42, 9  ;;  %v3095_v42 = vshrl.u32 %v2998_v61, 16 }
  0xeb   : > { %v2259_v4 = vsel %vm15299_vm1, %v2257_v45, %v2258_v22  ;;  %v15539_v45 = vrot.slane %v3080_v7, 5  ;;  %v3086_v22 = vrot.slane %v3084_v31, 4 }
  0xec   : > { %v2231_v29 = vsel %vm15299_vm1, %v2229_v41, %v2230_v34  ;;  %v11999_v13 = vcombine.low %v2256_v0, %v2259_v4  ;;  %v2263_v35 = vsel %vm15299_vm1, %v11981_v43, %v2262_v54  ;;  %v3589_v41 = vsel %vm1579_vm0, %v15414_v11, 0  ;;  %v15507_v34 = vld [vmem:[%s18708_s1 + $0xa] sm:$0x3]  ;;  %v14466_v11 = vld [vmem:[#allocation2 + $0x3c] sm:$0xff]  }
  0xed   : > { %v11995_v18 = vcombine.low %v2228_v53, %v2231_v29  ;;  %v405_v53 = vld [vmem:[#allocation2 + $0xe0] sm:$0x1]  ;;  %v14467_v29 = vld [vmem:[#allocation2 + $0x48] sm:$0xff]   ;;  %v3066_v54 = vshll.u32 %v15534_v3, 16  ;;  %v3108_v43 = vshrl.u32 %v15537_v56, 16 }
  0xee   : > { %v406_v62 = vsel %vm14802_vm3, 0, %v405_v53  ;;  %v15542_v0 = vld [vmem:[#allocation2 + $0x20] sm:$0x1] }
  0xef   : > { %407 = vst [vmem:[#allocation2 + $0xe0] sm:$0x1] %v406_v62 }
  0xf1   : > { %13268 = vmatmul.mubr.msk.bf16.gmra.mrb[16].mxu0 %vm1524_vm12, %v11992_v58  ;;  %v1029_v58 = vld [vmem:[#allocation2 + $0xb0] sm:$0x1] }
  0xf2   : > { %13271 = vmatprep.mubr.msk.bf16.mxu0 %vm1524_vm12, %v11993_v12  ;;  %v2244_v24 = vrot.slane %v1029_v58, 5  ;;  %v2266_v12 = vsel %vm15299_vm1, %v2264_v19, %v2265_v6  ;;  %v14470_v58 = vld [vmem:[#allocation2 + $0x6c] sm:$0xff]   ;;  %v14476_v19 = vld [vmem:[#allocation2 + $0xb4] sm:$0xff]   ;;  %v3087_v6 = vor.u32 %v3086_v22, %v15539_v45 }
  0xf3   : > { %v12000_v17 = vcombine.low %v2263_v35, %v2266_v12  ;;  %v3090_v35 = vshll.u32 %v15542_v0, 16  ;;  %v3001_v12 = vld [vmem:[#allocation2 + $0x30] sm:$0xf] }
  0xf4   : > { %v2245_v46 = vsel %vm15299_vm1, %v2243_v30, %v2244_v24  ;;  %v3056_v30 = vshll.u32 %v15524_v32, 16  ;;  %v3060_v24 = vshrl.u32 %v15524_v32, 16  ;;  %v3119_v53 = vshrl.u32 %v3001_v12, 16 }
  0xf5   : > { %v11997_v10 = vcombine.low %v2242_v15, %v2245_v46  ;;  %v14473_v15 = vld [vmem:[#allocation2 + $0x90] sm:$0xff]   ;;  %v14474_v46 = vld [vmem:[#allocation2 + $0x9c] sm:$0xff]   ;;  %v3088_v62 = vrot.slane %v3087_v6, 4 }
  0xf6   : > { %v3058_v1 = vrot.slane %v3056_v30, 5 }
  0xf9   : > { %13272 = vmatmul.mubr.msk.bf16.gmra.mrb[20].mxu0 %vm1524_vm12, %v11994_v49  ;;  %v14472_v49 = vld [vmem:[#allocation2 + $0x84] sm:$0xff]  }
  0xfa   : > { %13275 = vmatprep.mubr.msk.bf16.mxu0 %vm1524_vm12, %v11995_v18  ;;  %v2992_v18 = vld [vmem:[#allocation2 + $0xc] sm:$0xf] }
  0xfb   : > { %v3047_v37 = vshrl.u32 %v2992_v18, 16  ;;  %v3050_v39 = vshll.u32 %v2992_v18, 16  ;;  %v15560_v18 = vld [vmem:[#allocation2 + $0x40] sm:$0xf] }
  0xfd   : > { %v3049_v52 = vrot.slane %v3047_v37, 4  ;;  %v3052_v50 = vrot.slane %v3050_v39, 5  ;;  %v14478_v37 = vld [vmem:[#allocation2 + $0xcc] sm:$0xff]  }
  0xff   : > { %v3053_v25 = vor.u32 %v3052_v50, %v3049_v52 }
 0x101   : > { %13276 = vmatmul.mubr.msk.bf16.gmra.mrb[24].mxu0 %vm1524_vm12, %v11996_v60  ;;  %v3062_v60 = vrot.slane %v3060_v24, 4 }
 0x102   : > { %13279 = vmatprep.mubr.msk.bf16.mxu0 %vm1524_vm12, %v11997_v10  ;;  %v3073_v10 = vrot.slane %v3071_v9, 4 }
 0x103   : > { %v3063_v59 = vor.u32 %v3062_v60, %v3058_v1  ;;  %v3152_v60 = vshll.u32 %v15560_v18, 16 }
 0x104   : > { %v3077_v4 = vor.u32 %v3076_v47, %v3073_v10  ;;  %v15576_v47 = vsel %vm1579_vm0, %v15507_v34, 0 }
 0x109   : > { %13280 = vmatmul.mubr.msk.bf16.gmra.mrb[28].mxu0 %vm1524_vm12, %v11998_v51  ;;  %v3098_v51 = vshll.u32 %v2998_v61, 16  ;;  %v3156_v61 = vshrl.u32 %v15560_v18, 16 }
 0x10a   : > { %13283 = vmatprep.mubr.msk.bf16.mxu0 %vm1524_vm12, %v11999_v13  ;;  %v3104_v13 = vshll.u32 %v15537_v56, 16 }
 0x10b   : > { %v3100_v16 = vrot.slane %v3098_v51, 5 }
 0x10c   : > { %v15549_v21 = vrot.slane %v3104_v13, 5  ;;  %v3010_v13 = vld [vmem:[#allocation2 + $0x54] sm:$0xf] }
 0x111   : > { %13284 = vmatmul.mubr.msk.bf16.gmra.mrb[32].mxu0 %vm1524_vm12, %v12000_v17  ;;  %v3054_v17 = vrot.slane %v3053_v25, 4 }
 0x112   : > { %13289 = vmatprep.mubr.msk.bf16.mxu0 %vm1524_vm12, %v14462_v27  ;;  %v3064_v27 = vrot.slane %v3063_v59, 4 }
 0x119   : > { %13290 = vmatmul.mubr.msk.bf16.vlgmr.msra.gmra.mrb[0].mxu0 %vm1524_vm12, %v14463_v40  ;;  %v3068_v40 = vrot.slane %v3066_v54, 5  ;;  %v3138_v54 = vshll.u32 %v15567_v48, 16 }
 0x11a   : > { %13326 = vmatpush3.bf16.msra.mxu0 %v3589_v41  ;;  %13293 = vmatprep.mubr.msk.bf16.mxu0 %vm1524_vm12, %v14464_v55  ;;  %v3078_v55 = vrot.slane %v3077_v4, 4  ;;  %v3097_v41 = vrot.slane %v3095_v42, 4  ;;  %v15581_v4 = vld [vmem:[#allocation2 + $0x4c] sm:$0xf] }
 0x11b   : > { %14391 = vmatprep.subr.msk.bf16.mxu0 %vm1579_vm0, %v15507_v34  ;;  %v3913_v20 = vrot.slane %v15581_v4, 5 }
 0x11c   : > { %v3083_v39 = vsel %vm14906_vm13, %v3078_v55, %v15539_v45  ;;  %v3101_v30 = vor.u32 %v3100_v16, %v3097_v41  ;;  %v3007_v45 = vld [vmem:[#allocation2 + $0x48] sm:$0xf]  ;;  %v3176_v55 = vshll.u32 %v15581_v4, 16  ;;  %v3180_v41 = vshrl.u32 %v15581_v4, 16  ;;  %v14479_v16 = vld [vmem:[#allocation2 + $0xd8] sm:$0xff]  }
 0x11e   : > { %v3102_v22 = vrot.slane %v3101_v30, 4 }
 0x121   : > { %13294 = vmatmul.mubr.msk.bf16.gmra.mrb[4].mxu0 %vm1524_vm12, %v14465_v26  ;;  %v3110_v26 = vrot.slane %v3108_v43, 4  ;;  %v15588_v43 = vld [vmem:[#allocation2 + $0x58] sm:$0xf] }
 0x122   : > { %13297 = vmatprep.mubr.msk.bf16.mxu0 %vm1524_vm12, %v14466_v11  ;;  %v15552_v11 = vld [vmem:[#allocation2 + $0x2c] sm:$0x1] }
 0x123   : > { %v3111_v24 = vor.u32 %v3110_v26, %v15549_v21  ;;  %v3114_v9 = vshll.u32 %v15552_v11, 16  ;;  %v3191_v26 = vshrl.u32 %v3010_v13, 16 }
 0x125   : > { %v3112_v25 = vrot.slane %v3111_v24, 4  ;;  %v3116_v59 = vrot.slane %v3114_v9, 5  ;;  %v3013_v24 = vld [vmem:[#allocation2 + $0x60] sm:$0xf] }
 0x129   : > { %13298 = vmatmul.mubr.msk.bf16.gmra.mrb[8].mxu0 %vm1524_vm12, %v14467_v29  ;;  %v3122_v29 = vshll.u32 %v3001_v12, 16  ;;  %v15592_v12 = vrot.slane %v3152_v60, 5 }
 0x12a   : > { %13301 = vmatprep.mubr.msk.bf16.mxu0 %vm1524_vm12, %v14468_v57  ;;  %v3092_v57 = vrot.slane %v3090_v35, 5 }
 0x12c   : > { %v3093_v7 = vsel %vm14906_vm13, %v3088_v62, %v3092_v57  ;;  %v3204_v62 = vshrl.u32 %v15588_v43, 16  ;;  %v3107_v57 = vsel %vm14906_vm13, %v3102_v22, %v15549_v21  ;;  %v3182_v21 = vrot.slane %v3180_v41, 4  ;;  %v15620_v22 = vld [vmem:[#allocation2 + $0x5c] sm:$0x1] }
 0x12e   : > { %v3206_v60 = vrot.slane %v3204_v62, 4 }
 0x131   : > { %13302 = vmatmul.mubr.msk.bf16.gmra.mrb[12].mxu0 %vm1524_vm12, %v14469_v28  ;;  %v15554_v28 = vld [vmem:[#allocation2 + $0x34] sm:$0xf] }
 0x132   : > { %13305 = vmatprep.mubr.msk.bf16.mxu0 %vm1524_vm12, %v14470_v58  ;;  %v3059_v58 = vsel %vm14906_vm13, %v3054_v17, %v3058_v1  ;;  %v3128_v52 = vshll.u32 %v15554_v28, 16  ;;  %v3132_v50 = vshrl.u32 %v15554_v28, 16  ;;  %v3167_v17 = vshrl.u32 %v3007_v45, 16 }
 0x134   : > { %v15586_v51 = vrot.slane %v3128_v52, 5  ;;  %v3134_v34 = vrot.slane %v3132_v50, 4  ;;  %v3169_v30 = vrot.slane %v3167_v17, 4  ;;  %v15612_v52 = vld [vmem:[#allocation2 + $0x64] sm:$0xf] }
 0x135   : > { %v15615_v50 = vld [vmem:[#allocation2 + $0x50] sm:$0x1] }
 0x139   : > { %13306 = vmatmul.mubr.msk.bf16.gmra.mrb[16].mxu0 %vm1524_vm12, %v14471_v38  ;;  %v3069_v38 = vsel %vm14906_vm13, %v3064_v27, %v3068_v40  ;;  %v3158_v27 = vrot.slane %v3156_v61, 4  ;;  %v3170_v40 = vshll.u32 %v3007_v45, 16 }
 0x13a   : > { %13309 = vmatprep.mubr.msk.bf16.mxu0 %vm1524_vm12, %v14472_v49  ;;  %v3004_v49 = vld [vmem:[#allocation2 + $0x3c] sm:$0xf]  ;;  %v12057_v10 = vcombine.low %v3059_v58, %v3069_v38  ;;  %v3117_v58 = vsel %vm14906_vm13, %v3112_v25, %v3116_v59  ;;  %v3135_v38 = vor.u32 %v3134_v34, %v15586_v51  ;;  %v3215_v25 = vshrl.u32 %v3013_v24, 16 }
 0x13b   : > { %v3143_v31 = vshrl.u32 %v3004_v49, 16  ;;  %v3146_v1 = vshll.u32 %v3004_v49, 16  ;;  %v3159_v9 = vor.u32 %v3158_v27, %v15592_v12  ;;  %v3218_v59 = vshll.u32 %v3013_v24, 16 }
 0x13c   : > { %v3136_v61 = vrot.slane %v3135_v38, 4  ;;  %v3224_v34 = vshll.u32 %v15612_v52, 16 }
 0x13d   : > { %v3145_v6 = vrot.slane %v3143_v31, 4  ;;  %v3148_v35 = vrot.slane %v3146_v1, 5  ;;  %v3160_v17 = vrot.slane %v3159_v9, 4  ;;  %v3220_v38 = vrot.slane %v3218_v59, 5 }
 0x141   : > { %13310 = vmatmul.mubr.msk.bf16.gmra.mrb[20].mxu0 %vm1524_vm12, %v14473_v15  ;;  %v3121_v15 = vrot.slane %v3119_v53, 4  ;;  %v3194_v53 = vshll.u32 %v3010_v13, 16  ;;  %v3228_v13 = vshrl.u32 %v15612_v52, 16 }
 0x142   : > { %13313 = vmatprep.mubr.msk.bf16.mxu0 %vm1524_vm12, %v14474_v46  ;;  %v3124_v46 = vrot.slane %v3122_v29, 5  ;;  %v3200_v29 = vshll.u32 %v15588_v43, 16 }
 0x143   : > { %v3196_v31 = vrot.slane %v3194_v53, 5 }
 0x144   : > { %v3125_v42 = vor.u32 %v3124_v46, %v3121_v15  ;;  %v3172_v15 = vrot.slane %v3170_v40, 5  ;;  %v15610_v46 = vrot.slane %v3176_v55, 5  ;;  %v15617_v1 = vrot.slane %v3200_v29, 5 }
 0x145   : > { %v3186_v40 = vshll.u32 %v15615_v50, 16 }
 0x146   : > { %v3173_v27 = vor.u32 %v3172_v15, %v3169_v30  ;;  %v3183_v55 = vor.u32 %v3182_v21, %v15610_v46  ;;  %v15653_v15 = vld [vmem:[%s18708_s1 + $0xc] sm:$0x3] }
 0x147   : > { %v15648_v9 = vrot.slane %v3186_v40, 5 }
 0x148   : > { %v15646_v24 = vrot.slane %v3173_v27, 4 }
 0x149   : > { %13314 = vmatmul.mubr.msk.bf16.gmra.mrb[24].mxu0 %vm1524_vm12, %v14475_v14  ;;  %v15584_v14 = vcombine.low %v3083_v39, %v3093_v7  ;;  %v3149_v39 = vor.u32 %v3148_v35, %v3145_v6  ;;  %v3193_v7 = vrot.slane %v3191_v26, 4  ;;  %v3016_v6 = vld [vmem:[#allocation2 + $0x6c] sm:$0xf]  ;;  %v15628_v35 = vld [vmem:[#allocation2 + $0x70] sm:$0xf]  ;;  %v3210_v26 = vshll.u32 %v15620_v22, 16 }
 0x14a   : > { %13317 = vmatprep.mubr.msk.bf16.mxu0 %vm1524_vm12, %v14476_v19  ;;  %v15590_v19 = vld [vmem:[#allocation2 + $0x44] sm:$0x1]  ;;  %v3239_v53 = vshrl.u32 %v3016_v6, 16  ;;  %v3242_v29 = vshll.u32 %v3016_v6, 16  ;;  %v3248_v62 = vshll.u32 %v15628_v35, 16  ;;  %v3179_v40 = vsel %vm14906_vm13, %v15646_v24, %v15610_v46 }
 0x14b   : > { %v3162_v49 = vshll.u32 %v15590_v19, 16  ;;  %v3197_v41 = vor.u32 %v3196_v31, %v3193_v7  ;;  %v3212_v7 = vrot.slane %v3210_v26, 5  ;;  %v3022_v26 = vld [vmem:[#allocation2 + $0x84] sm:$0xf] }
 0x14c   : > { %v3287_v24 = vshrl.u32 %v3022_v26, 16 }
 0x14d   : > { %v3164_v45 = vrot.slane %v3162_v49, 5  ;;  %v15638_v49 = vrot.slane %v3224_v34, 5  ;;  %v15664_v34 = vld [vmem:[#allocation2 + $0x7c] sm:$0xf] }
 0x14e   : > { %v3289_v63 = vrot.slane %v3287_v24, 4 }
 0x14f   : > { %v3165_v21 = vsel %vm14906_vm13, %v3160_v17, %v3164_v45 }
 0x151   : > { %13318 = vmatmul.mubr.msk.bf16.gmra.mrb[28].mxu0 %vm1524_vm12, %v14477_v33  ;;  %v15605_v33 = vrot.slane %v3125_v42, 4 }
 0x152   : > { %13321 = vmatprep.mubr.msk.bf16.mxu0 %vm1524_vm12, %v14478_v37  ;;  %v15607_v37 = vrot.slane %v3138_v54, 5  ;;  %v12059_v54 = vcombine.low %v3107_v57, %v3117_v58  ;;  %v3252_v57 = vshrl.u32 %v15628_v35, 16  ;;  %v3217_v58 = vrot.slane %v3215_v25, 4 }
 0x153   : > { %v3131_v42 = vsel %vm14906_vm13, %v15605_v33, %v15586_v51  ;;  %v15634_v51 = vld [vmem:[#allocation2 + $0x68] sm:$0x1]  ;;  %v3230_v33 = vrot.slane %v3228_v13, 4  ;;  %v15662_v25 = vrot.slane %v3248_v62, 5 }
 0x154   : > { %v3234_v31 = vshll.u32 %v15634_v51, 16  ;;  %v3254_v59 = vrot.slane %v3252_v57, 4  ;;  %v3221_v6 = vor.u32 %v3220_v38, %v3217_v58 }
 0x155   : > { %v3231_v45 = vor.u32 %v3230_v33, %v15638_v49 }
 0x156   : > { %v3255_v62 = vor.u32 %v3254_v59, %v15662_v25  ;;  %v3222_v38 = vrot.slane %v3221_v6, 4 }
 0x157   : > { %v3232_v33 = vrot.slane %v3231_v45, 4 }
 0x158   : > { %v3256_v59 = vrot.slane %v3255_v62, 4  ;;  %v3227_v62 = vsel %vm14906_vm13, %v3222_v38, %v15638_v49 }
 0x159   : > { %13322 = vmatmul.mubr.msk.bf16.gmra.mrb[32].mxu0 %vm1524_vm12, %v14479_v16  ;;  %v3207_v16 = vor.u32 %v3206_v60, %v15617_v1  ;;  %v3241_v60 = vrot.slane %v3239_v53, 4  ;;  %v15680_v53 = vld [vmem:[#allocation2 + $0x88] sm:$0xf] }
 0x15a   : > { %13327 = vmatprep.mubr.msk.bf16.mxu0 %vm1524_vm12, %v12057_v10  ;;  %v3150_v10 = vrot.slane %v3149_v39, 4  ;;  %v3141_v39 = vsel %vm14906_vm13, %v3136_v61, %v15607_v37  ;;  %v3184_v37 = vrot.slane %v3183_v55, 4  ;;  %v3244_v61 = vrot.slane %v3242_v29, 5 }
 0x15b   : > { %v3208_v13 = vrot.slane %v3207_v16, 4  ;;  %v3276_v16 = vshrl.u32 %v15664_v34, 16 }
 0x15c   : > { %v3155_v30 = vsel %vm14906_vm13, %v3150_v10, %v15592_v12  ;;  %v3019_v12 = vld [vmem:[#allocation2 + $0x78] sm:$0xf]  ;;  %v15667_v10 = vld [vmem:[#allocation2 + $0x74] sm:$0x1]  ;;  %v3189_v55 = vsel %vm14906_vm13, %v3184_v37, %v15648_v9  ;;  %v3245_v29 = vor.u32 %v3244_v61, %v3241_v60  ;;  %v3290_v9 = vshll.u32 %v3022_v26, 16 }
 0x15d   : > { %v12061_v17 = vcombine.low %v3155_v30, %v3165_v21  ;;  %v3266_v27 = vshll.u32 %v3019_v12, 16  ;;  %v3258_v57 = vshll.u32 %v15667_v10, 16  ;;  %v3213_v58 = vsel %vm14906_vm13, %v3208_v13, %v3212_v7  ;;  %v3025_v30 = vld [vmem:[#allocation2 + $0x90] sm:$0xf] }
 0x15e   : > { %v3296_v21 = vshll.u32 %v15680_v53, 16  ;;  %v3300_v37 = vshrl.u32 %v15680_v53, 16  ;;  %v3278_v7 = vrot.slane %v3276_v16, 4  ;;  %v3246_v61 = vrot.slane %v3245_v29, 4  ;;  %v15705_v29 = vld [vmem:[#allocation2 + $0x8c] sm:$0x1] }
 0x15f   : > { %v3311_v6 = vshrl.u32 %v3025_v30, 16  ;;  %v3314_v45 = vshll.u32 %v3025_v30, 16 }
 0x160   : > { %v3251_v30 = vsel %vm14906_vm13, %v3246_v61, %v15662_v25 }
 0x161   : > { %13328 = vmatmul.mubr.msk.bf16.vlgmr.msra.gmra.mrb[0].mxu0 %vm1524_vm12, %v15584_v14  ;;  %v3198_v14 = vrot.slane %v3197_v41, 4  ;;  %v3272_v41 = vshll.u32 %v15664_v34, 16 }
 0x162   : > { %13364 = vmatpush3.bf16.msra.mxu0 %v15576_v47  ;;  %13331 = vmatprep.mubr.msk.bf16.mxu0 %vm1524_vm12, %v12059_v54  ;;  %v12060_v47 = vcombine.low %v3131_v42, %v3141_v39  ;;  %v3263_v54 = vshrl.u32 %v3019_v12, 16  ;;  %v3236_v42 = vrot.slane %v3234_v31, 5  ;;  %v15689_v39 = vld [vmem:[#allocation2 + $0x80] sm:$0x1]  ;;  %v15693_v31 = vld [vmem:[#allocation2 + $0x94] sm:$0xf] }
 0x163   : > { %14392 = vmatprep.subr.msk.bf16.mxu0 %vm1579_vm0, %v15653_v15  ;;  %v3203_v46 = vsel %vm14906_vm13, %v3198_v14, %v15617_v1  ;;  %v3268_v1 = vrot.slane %v3266_v27, 5  ;;  %v15696_v60 = vrot.slane %v3272_v41, 5  ;;  %v3260_v14 = vrot.slane %v3258_v57, 5 }
 0x164   : > { %v3265_v12 = vrot.slane %v3263_v54, 4  ;;  %v3282_v13 = vshll.u32 %v15689_v39, 16  ;;  %v3320_v26 = vshll.u32 %v15693_v31, 16  ;;  %v3324_v8 = vshrl.u32 %v15693_v31, 16 }
 0x165   : > { %v15702_v54 = vrot.slane %v3296_v21, 5  ;;  %v3302_v27 = vrot.slane %v3300_v37, 4  ;;  %v12062_v41 = vcombine.low %v3179_v40, %v3189_v55  ;;  %v12063_v16 = vcombine.low %v3203_v46, %v3213_v58  ;;  %v3028_v55 = vld [vmem:[#allocation2 + $0x9c] sm:$0xf]  ;;  %v15719_v21 = vld [vmem:[#allocation2 + $0xa0] sm:$0xf] }
 0x166   : > { %v3269_v5 = vor.u32 %v3268_v1, %v3265_v12  ;;  %v3237_v57 = vsel %vm14906_vm13, %v3232_v33, %v3236_v42  ;;  %v3261_v40 = vsel %vm14906_vm13, %v3256_v59, %v3260_v14  ;;  %v3313_v46 = vrot.slane %v3311_v6, 4  ;;  %18828 = vst [vmem:[#allocation10_spill] sm:$0xff] %v15719_v21  ;;  %v15723_v33 = vld [vmem:[#allocation2 + $0x98] sm:$0x1]  ;;  %v3031_v6 = vld [vmem:[#allocation2 + $0xa8] sm:$0xf] }
 0x167   : > { %v3316_v58 = vrot.slane %v3314_v45, 5  ;;  %v15717_v24 = vrot.slane %v3320_v26, 5  ;;  %v3284_v37 = vrot.slane %v3282_v13, 5  ;;  %v3303_v38 = vor.u32 %v3302_v27, %v15702_v54  ;;  %18829 = vst [vmem:[#allocation11_spill] sm:$0xff] %v15723_v33  ;;  %v15731_v27 = vld [vmem:[#allocation2 + $0xa4] sm:$0x1] }
 0x168   : > { %v3306_v42 = vshll.u32 %v15705_v29, 16  ;;  %v3270_v25 = vrot.slane %v3269_v5, 4  ;;  %v3335_v1 = vshrl.u32 %v3028_v55, 16  ;;  %v3348_v61 = vshrl.u32 %v15719_v21, 16  ;;  %18830 = vst [vmem:[#allocation12_spill] sm:$0xff] %v15731_v27 }
 0x169   : > { %13332 = vmatmul.mubr.msk.bf16.gmra.mrb[4].mxu0 %vm1524_vm12, %v12060_v47  ;;  %v3292_v47 = vrot.slane %v3290_v9, 5  ;;  %v3326_v9 = vrot.slane %v3324_v8, 4  ;;  %v3344_v8 = vshll.u32 %v15719_v21, 16  ;;  %v12064_v59 = vcombine.low %v3227_v62, %v3237_v57  ;;  %v15738_v57 = vld [vmem:[#allocation2 + $0xac] sm:$0xf] }
 0x16a   : > { %13335 = vmatprep.mubr.msk.bf16.mxu0 %vm1524_vm12, %v12061_v17  ;;  %v3279_v17 = vor.u32 %v3278_v7, %v15696_v60  ;;  %v3338_v7 = vshll.u32 %v3028_v55, 16  ;;  %v3330_v13 = vshll.u32 %v15723_v33, 16  ;;  %v12065_v45 = vcombine.low %v3251_v30, %v3261_v40  ;;  %18831 = vst [vmem:[#allocation13_spill] sm:$0xff] %v15738_v57  ;;  %v3034_v55 = vld [vmem:[#allocation2 + $0xb4] sm:$0xf] }
 0x16b   : > { %v3293_v49 = vor.u32 %v3292_v47, %v3289_v63  ;;  %v3317_v63 = vor.u32 %v3316_v58, %v3313_v46  ;;  %v3327_v14 = vor.u32 %v3326_v9, %v15717_v24  ;;  %v3304_v47 = vrot.slane %v3303_v38, 4  ;;  %v15742_v9 = vld [vmem:[#allocation2 + $0xb8] sm:$0xf]  ;;  %v15791_v21 = vld [vmem:[#allocation2 + $0xdc] sm:$0xf] }
 0x16c   : > { %v3280_v12 = vrot.slane %v3279_v17, 4  ;;  %v3308_v5 = vrot.slane %v3306_v42, 5  ;;  %v3337_v17 = vrot.slane %v3335_v1, 4  ;;  %v3340_v62 = vrot.slane %v3338_v7, 5  ;;  %18832 = vst [vmem:[#allocation14_spill] sm:$0xff] %v15742_v9 }
 0x16d   : > { %v3294_v26 = vrot.slane %v3293_v49, 4  ;;  %v15740_v46 = vrot.slane %v3344_v8, 5  ;;  %v3350_v30 = vrot.slane %v3348_v61, 4  ;;  %v3359_v40 = vshrl.u32 %v3031_v6, 16 }
 0x16e   : > { %v3362_v58 = vshll.u32 %v3031_v6, 16  ;;  %v3318_v49 = vrot.slane %v3317_v63, 4  ;;  %v3328_v38 = vrot.slane %v3327_v14, 4  ;;  %v3332_v42 = vrot.slane %v3330_v13, 5 }
 0x16f   : > { %v3386_v1 = vshll.u32 %v3034_v55, 16  ;;  %v3299_v7 = vsel %vm14906_vm13, %v3294_v26, %v15702_v54  ;;  %v3309_v8 = vsel %vm14906_vm13, %v3304_v47, %v3308_v5  ;;  %v3392_v61 = vshll.u32 %v15742_v9, 16  ;;  %v15762_v47 = vld [vmem:[#allocation2 + $0xb0] sm:$0x1] }
 0x170   : > { %v3396_v63 = vshrl.u32 %v15742_v9, 16  ;;  %v3341_v14 = vor.u32 %v3340_v62, %v3337_v17  ;;  %v3351_v13 = vor.u32 %v3350_v30, %v15740_v46  ;;  %v3361_v6 = vrot.slane %v3359_v40, 4  ;;  %18833 = vst [vmem:[#allocation15_spill] sm:$0xff] %v15762_v47  ;;  %v15766_v30 = vld [vmem:[#allocation2 + $0xbc] sm:$0x1] }
 0x171   : > { %13336 = vmatmul.mubr.msk.bf16.gmra.mrb[8].mxu0 %vm1524_vm12, %v12062_v41  ;;  %v3275_v41 = vsel %vm14906_vm13, %v3270_v25, %v15696_v60  ;;  %v3354_v60 = vshll.u32 %v15731_v27, 16  ;;  %v3368_v25 = vshll.u32 %v15738_v57, 16  ;;  %v3333_v54 = vsel %vm14906_vm13, %v3328_v38, %v3332_v42  ;;  %18834 = vst [vmem:[#allocation16_spill] sm:$0xff] %v15766_v30  ;;  %v3037_v27 = vld [vmem:[#allocation2 + $0xc0] sm:$0xf] }
 0x172   : > { %13339 = vmatprep.mubr.msk.bf16.mxu0 %vm1524_vm12, %v12063_v16  ;;  %v3285_v16 = vsel %vm14906_vm13, %v3280_v12, %v3284_v37  ;;  %v3372_v37 = vshrl.u32 %v15738_v57, 16  ;;  %v3383_v12 = vshrl.u32 %v3034_v55, 16  ;;  %v3364_v55 = vrot.slane %v3362_v58, 5  ;;  %v15771_v42 = vld [vmem:[#allocation2 + $0xc4] sm:$0xf] }
 0x173   : > { %v3356_v26 = vrot.slane %v3354_v60, 5  ;;  %v15764_v5 = vrot.slane %v3368_v25, 5  ;;  %v12066_v17 = vcombine.low %v3275_v41, %v3285_v16  ;;  %v12067_v62 = vcombine.low %v3299_v7, %v3309_v8  ;;  %18835 = vst [vmem:[#allocation17_spill] sm:$0xff] %v15771_v42 }
 0x174   : > { %v3374_v9 = vrot.slane %v3372_v37, 4  ;;  %v3385_v57 = vrot.slane %v3383_v12, 4  ;;  %v15768_v40 = vrot.slane %v3392_v61, 5  ;;  %v3398_v58 = vrot.slane %v3396_v63, 4  ;;  %v3040_v12 = vld [vmem:[#allocation2 + $0xcc] sm:$0xf] }
 0x175   : > { %v3365_v33 = vor.u32 %v3364_v55, %v3361_v6  ;;  %v3378_v38 = vshll.u32 %v15762_v47, 16  ;;  %v3402_v41 = vshll.u32 %v15766_v30, 16  ;;  %v3407_v16 = vshrl.u32 %v3037_v27, 16 }
 0x176   : > { %v3375_v25 = vor.u32 %v3374_v9, %v15764_v5  ;;  %v3399_v7 = vor.u32 %v3398_v58, %v15768_v40  ;;  %v3410_v8 = vshll.u32 %v3037_v27, 16  ;;  %v3416_v61 = vshll.u32 %v15771_v42, 16 }
 0x177   : > { %v3420_v63 = vshrl.u32 %v15771_v42, 16  ;;  %v3431_v6 = vshrl.u32 %v3040_v12, 16  ;;  %v3434_v55 = vshll.u32 %v3040_v12, 16  ;;  %v3409_v58 = vrot.slane %v3407_v16, 4  ;;  %v15789_v42 = vld [vmem:[#allocation2 + $0xc8] sm:$0x1] }
 0x178   : > { %v3412_v30 = vrot.slane %v3410_v8, 5  ;;  %v15799_v16 = vld [vmem:[#allocation2 + $0xd4] sm:$0x1] }
 0x179   : > { %13340 = vmatmul.mubr.msk.bf16.gmra.mrb[12].mxu0 %vm1524_vm12, %v12064_v59  ;;  %v3323_v59 = vsel %vm14906_vm13, %v3318_v49, %v15717_v24  ;;  %v3342_v24 = vrot.slane %v3341_v14, 4  ;;  %v3352_v49 = vrot.slane %v3351_v13, 4  ;;  %v3366_v14 = vrot.slane %v3365_v33, 4 }
 0x17a   : > { %13343 = vmatprep.mubr.msk.bf16.mxu0 %vm1524_vm12, %v12065_v45  ;;  %v3388_v45 = vrot.slane %v3386_v1, 5  ;;  %v12068_v60 = vcombine.low %v3323_v59, %v3333_v54  ;;  %v15775_v1 = vld [vmem:[#allocation2 + $0xd0] sm:$0xf]  ;;  %v3380_v13 = vrot.slane %v3378_v38, 5  ;;  %v3376_v54 = vrot.slane %v3375_v25, 4 }
 0x17b   : > { %v3357_v9 = vsel %vm14906_vm13, %v3352_v49, %v3356_v26  ;;  %v3440_v59 = vshll.u32 %v15775_v1, 16  ;;  %v3444_v27 = vshrl.u32 %v15775_v1, 16  ;;  %v3043_v26 = vld [vmem:[#allocation2 + $0xd8] sm:$0xf]  ;;  %v3433_v33 = vrot.slane %v3431_v6, 4 }
 0x17c   : > { %v3389_v37 = vor.u32 %v3388_v45, %v3385_v57  ;;  %v3347_v57 = vsel %vm14906_vm13, %v3342_v24, %v15740_v46  ;;  %v3418_v46 = vrot.slane %v3416_v61, 5  ;;  %v3422_v24 = vrot.slane %v3420_v63, 4 }
 0x17d   : > { %v12069_v47 = vcombine.low %v3347_v57, %v3357_v9  ;;  %v3436_v49 = vrot.slane %v3434_v55, 5  ;;  %v3442_v38 = vrot.slane %v3440_v59, 5  ;;  %v3446_v12 = vrot.slane %v3444_v27, 4 }
 0x17e   : > { %v3390_v45 = vrot.slane %v3389_v37, 4  ;;  %v3371_v25 = vsel %vm14906_vm13, %v3366_v14, %v15764_v5  ;;  %v3381_v37 = vsel %vm14906_vm13, %v3376_v54, %v3380_v13  ;;  %v3413_v61 = vor.u32 %v3412_v30, %v3409_v58 }
 0x17f   : > { %v3423_v63 = vor.u32 %v3422_v24, %v3418_v46  ;;  %v3455_v5 = vshrl.u32 %v3043_v26, 16  ;;  %v3458_v57 = vshll.u32 %v3043_v26, 16  ;;  %v3464_v9 = vshll.u32 %v15791_v21, 16  ;;  %v15811_v26 = vld [vmem:[#allocation2 + $0xe0] sm:$0x1] }
 0x180   : > { %v3468_v14 = vshrl.u32 %v15791_v21, 16  ;;  %v3437_v13 = vor.u32 %v3436_v49, %v3433_v33  ;;  %v3447_v6 = vor.u32 %v3446_v12, %v3442_v38  ;;  %v12070_v55 = vcombine.low %v3371_v25, %v3381_v37 }
 0x181   : > { %13344 = vmatmul.mubr.msk.bf16.gmra.mrb[16].mxu0 %vm1524_vm12, %v12066_v17  ;;  %v3404_v17 = vrot.slane %v3402_v41, 5  ;;  %v3426_v41 = vshll.u32 %v15789_v42, 16  ;;  %v3424_v27 = vrot.slane %v3423_v63, 4  ;;  %v3460_v30 = vrot.slane %v3458_v57, 5 }
 0x182   : > { %13347 = vmatprep.mubr.msk.bf16.mxu0 %vm1524_vm12, %v12067_v62  ;;  %v3400_v62 = vrot.slane %v3399_v7, 4  ;;  %v3395_v7 = vsel %vm14906_vm13, %v3390_v45, %v15768_v40  ;;  %v3414_v40 = vrot.slane %v3413_v61, 4  ;;  %v3457_v45 = vrot.slane %v3455_v5, 4  ;;  %v3804_v61 = vld [vmem:[#allocation2 + $0xc] sm:$0xe] }
 0x183   : > { %v3428_v54 = vrot.slane %v3426_v41, 5  ;;  %v3470_v58 = vrot.slane %v3468_v14, 4  ;;  %v3474_v37 = vshll.u32 %v15811_v26, 16  ;;  %v12093_v14 = vrot.slane %v3804_v61, 9 }
 0x184   : > { %v3405_v8 = vsel %vm14906_vm13, %v3400_v62, %v3404_v17  ;;  %v3466_v17 = vrot.slane %v3464_v9, 5  ;;  %v3448_v62 = vrot.slane %v3447_v6, 4  ;;  %v3419_v33 = vsel %vm14906_vm13, %v3414_v40, %v3418_v46 }
 0x185   : > { %v12071_v59 = vcombine.low %v3395_v7, %v3405_v8  ;;  %v3429_v49 = vsel %vm14906_vm13, %v3424_v27, %v3428_v54  ;;  %v3461_v12 = vor.u32 %v3460_v30, %v3457_v45  ;;  %v3878_v8 = vrot.slane %v15524_v32, 5  ;;  %v3806_v27 = vld [vmem:[#allocation2 + $0x24] sm:$0xe]  ;;  %v318_v30 = vld [vmem:[#allocation2 + $0xe4] sm:$0x1] }
 0x186   : > { %v3471_v25 = vor.u32 %v3470_v58, %v3466_v17  ;;  %v12072_v63 = vcombine.low %v3419_v33, %v3429_v49  ;;  %v3476_v9 = vrot.slane %v3474_v37, 5  ;;  %v3881_v6 = vrot.slane %v15534_v3, 5 }
 0x187   : > { %v3462_v5 = vrot.slane %v3461_v12, 4  ;;  %v3892_v3 = vrot.slane %v15537_v56, 5  ;;  %v3895_v33 = vrot.slane %v15552_v11, 5  ;;  %v3807_v11 = vld [vmem:[#allocation2 + $0x30] sm:$0xe]  ;;  %v3906_v37 = vrot.slane %v15560_v18, 5 }
 0x188   : > { %v3472_v57 = vrot.slane %v3471_v25, 4  ;;  %v15863_v18 = vld [vmem:[%s18708_s1 + $0xe] sm:$0x3] }
 0x189   : > { %13348 = vmatmul.mubr.msk.bf16.gmra.mrb[20].mxu0 %vm1524_vm12, %v12068_v60  ;;  %v3450_v60 = vshll.u32 %v15799_v16, 16 }
 0x18a   : > { %13351 = vmatprep.mubr.msk.bf16.mxu0 %vm1524_vm12, %v12069_v47  ;;  %v3438_v47 = vrot.slane %v3437_v13, 4  ;;  %v3880_v13 = vrot.slane %v3878_v8, 4  ;;  %v3477_v32 = vsel %vm14906_vm13, %v3472_v57, %v3476_v9  ;;  %v3908_v9 = vrot.slane %v3906_v37, 4 }
 0x18b   : > { %v3452_v24 = vrot.slane %v3450_v60, 5  ;;  %v3805_v60 = vld [vmem:[#allocation2 + $0x18] sm:$0xe] }
 0x18c   : > { %v3443_v41 = vsel %vm14906_vm13, %v3438_v47, %v3442_v38  ;;  %v3467_v38 = vsel %vm14906_vm13, %v3462_v5, %v3466_v17  ;;  %v3882_v40 = vsel %vm15299_vm1, %v3880_v13, %v3881_v6  ;;  %v12094_v45 = vrot.slane %v3805_v60, 9  ;;  %v3810_v60 = vld [vmem:[#allocation2 + $0x54] sm:$0xe] }
 0x18d   : > { %v3453_v7 = vsel %vm14906_vm13, %v3448_v62, %v3452_v24  ;;  %v12074_v54 = vcombine.low %v3467_v38, %v3477_v32  ;;  %v3888_v47 = vrot.slane %v15542_v0, 5  ;;  %v319_v62 = vsel %vm14802_vm3, 0, %v318_v30  ;;  %v3809_v38 = vld [vmem:[#allocation2 + $0x48] sm:$0xe] }
 0x18e   : > { %v12073_v46 = vcombine.low %v3443_v41, %v3453_v7  ;;  %v3894_v24 = vrot.slane %v3892_v3, 4  ;;  %320 = vst [vmem:[#allocation2 + $0xe4] sm:$0x1] %v319_v62  ;;  %v3899_v0 = vrot.slane %v15554_v28, 5  ;;  %v3808_v41 = vld [vmem:[#allocation2 + $0x3c] sm:$0xe] }
 0x18f   : > { %v3902_v5 = vrot.slane %v15567_v48, 5  ;;  %v12097_v57 = vrot.slane %v3808_v41, 9  ;;  %v3920_v32 = vrot.slane %v15588_v43, 5  ;;  %v12099_v4 = vrot.slane %v3810_v60, 9  ;;  %v3812_v62 = vld [vmem:[#allocation2 + $0x6c] sm:$0xe] }
 0x190   : > { %v3896_v25 = vsel %vm15299_vm1, %v3894_v24, %v3895_v33  ;;  %v3813_v41 = vld [vmem:[#allocation2 + $0x78] sm:$0xe]  ;;  %v18837_v60 = vld [vmem:[#allocation11_spill] sm:$0xff] }
 0x191   : > { %13352 = vmatmul.mubr.msk.bf16.gmra.mrb[24].mxu0 %vm1524_vm12, %v12070_v55  ;;  %v3885_v55 = vrot.slane %v15529_v44, 5  ;;  %v12095_v44 = vrot.slane %v3806_v27, 9  ;;  %v3916_v27 = vrot.slane %v15615_v50, 5 }
 0x192   : > { %13355 = vmatprep.mubr.msk.bf16.mxu0 %vm1524_vm12, %v12071_v59  ;;  %v3879_v59 = vsel %vm15299_vm1, %v12093_v14, %v3878_v8  ;;  %v4511_v8 = vsel %vm1579_vm0, %v15653_v15, 0  ;;  %v3909_v14 = vrot.slane %v15590_v19, 5  ;;  %v3907_v15 = vsel %vm15299_vm1, %v12097_v57, %v3906_v37 }
 0x193   : > { %v12112_v58 = vcombine.low %v3879_v59, %v3882_v40  ;;  %v3887_v17 = vrot.slane %v3885_v55, 4  ;;  %v3886_v56 = vsel %vm15299_vm1, %v12094_v45, %v3885_v55  ;;  %v3893_v12 = vsel %vm15299_vm1, %v12095_v44, %v3892_v3 }
 0x194   : > { %v12114_v61 = vcombine.low %v3893_v12, %v3896_v25  ;;  %v3910_v6 = vsel %vm15299_vm1, %v3908_v9, %v3909_v14  ;;  %v12098_v40 = vrot.slane %v3809_v38, 9  ;;  %v3915_v3 = vrot.slane %v3913_v20, 4 }
 0x195   : > { %v3889_v49 = vsel %vm15299_vm1, %v3887_v17, %v3888_v47  ;;  %v408_v28 = vld [vmem:[#allocation2 + $0xe4] sm:$0xf]  ;;  %v12116_v59 = vcombine.low %v3907_v15, %v3910_v6  ;;  %v3923_v45 = vrot.slane %v15620_v22, 5  ;;  %v3921_v17 = vsel %vm15299_vm1, %v12099_v4, %v3920_v32  ;;  %v3811_v47 = vld [vmem:[#allocation2 + $0x60] sm:$0xe] }
 0x196   : > { %v12113_v7 = vcombine.low %v3886_v56, %v3889_v49  ;;  %v409_v13 = vsel %vm14843_vm7, 0, %v408_v28  ;;  %v3914_v43 = vsel %vm15299_vm1, %v12098_v40, %v3913_v20  ;;  %v3917_v30 = vsel %vm15299_vm1, %v3915_v3, %v3916_v27  ;;  %v3816_v20 = vld [vmem:[#allocation2 + $0x9c] sm:$0xe]  ;;  %v18838_v3 = vld [vmem:[#allocation12_spill] sm:$0xff] }
 0x197   : > { %410 = vst [vmem:[#allocation2 + $0xe4] sm:$0xf] %v409_v13  ;;  %v3934_v22 = vrot.slane %v15628_v35, 5  ;;  %v12117_v44 = vcombine.low %v3914_v43, %v3917_v30  ;;  %v12100_v33 = vrot.slane %v3811_v47, 9  ;;  %v3930_v49 = vrot.slane %v15634_v51, 5 }
 0x198   : > { %v3955_v14 = vrot.slane %v15693_v31, 5  ;;  %v3965_v31 = vrot.slane %v18838_v3, 5  ;;  %v3818_v47 = vld [vmem:[#allocation2 + $0xb4] sm:$0xe] }
 0x199   : > { %13356 = vmatmul.mubr.msk.bf16.gmra.mrb[28].mxu0 %vm1524_vm12, %v12072_v63  ;;  %v12096_v63 = vrot.slane %v3807_v11, 9  ;;  %v3936_v12 = vrot.slane %v3934_v22, 4  ;;  %v3941_v11 = vrot.slane %v15664_v34, 5  ;;  %v3951_v34 = vrot.slane %v15705_v29, 5  ;;  %v18836_v29 = vld [vmem:[#allocation10_spill] sm:$0xff] }
 0x19a   : > { %13359 = vmatprep.mubr.msk.bf16.mxu0 %vm1524_vm12, %v12073_v46  ;;  %v3901_v46 = vrot.slane %v3899_v0, 4 }
 0x19b   : > { %v3900_v48 = vsel %vm15299_vm1, %v12096_v63, %v3899_v0  ;;  %v12101_v0 = vrot.slane %v3812_v62, 9  ;;  %v12102_v63 = vrot.slane %v3813_v41, 9 }
 0x19c   : > { %v3903_v19 = vsel %vm15299_vm1, %v3901_v46, %v3902_v5  ;;  %v3943_v46 = vrot.slane %v3941_v11, 4  ;;  %v3944_v5 = vrot.slane %v15689_v39, 5 }
 0x19d   : > { %v12115_v55 = vcombine.low %v3900_v48, %v3903_v19  ;;  %v3935_v37 = vsel %vm15299_vm1, %v12101_v0, %v3934_v22  ;;  %v3942_v9 = vsel %vm15299_vm1, %v12102_v63, %v3941_v11  ;;  %v3815_v48 = vld [vmem:[#allocation2 + $0x90] sm:$0xe]  ;;  %v3962_v19 = vrot.slane %v18836_v29, 5  ;;  %v18843_v11 = vld [vmem:[#allocation17_spill] sm:$0xff] }
 0x19e   : > { %v12104_v38 = vrot.slane %v3815_v48, 9 }
 0x19f   : > { %v3964_v40 = vrot.slane %v3962_v19, 4 }
 0x1a0   : > { %v3956_v27 = vsel %vm15299_vm1, %v12104_v38, %v3955_v14  ;;  %v14480_v38 = vld [vmem:[#allocation2 + $0x18] sm:$0xff]  }
 0x1a1   : > { %13360 = vmatmul.mubr.msk.bf16.gmra.mrb[32].mxu0 %vm1524_vm12, %v12074_v54  ;;  %v3922_v54 = vrot.slane %v3920_v32, 4  ;;  %v3957_v32 = vrot.slane %v3955_v14, 4  ;;  %v3966_v30 = vsel %vm15299_vm1, %v3964_v40, %v3965_v31  ;;  %v3997_v14 = vrot.slane %v15791_v21, 5  ;;  %v14572_v31 = vld [vmem:[#allocation2 + $0x84] sm:$0xf] }
 0x1a2   : > { %13365 = vmatprep.mubr.msk.bf16.mxu0 %vm1524_vm12, %v12112_v58  ;;  %v3927_v58 = vrot.slane %v15612_v52, 5  ;;  %v3937_v52 = vrot.slane %v15667_v10, 5  ;;  %v3948_v10 = vrot.slane %v15680_v53, 5  ;;  %v3945_v53 = vsel %vm15299_vm1, %v3943_v46, %v3944_v5 }
 0x1a3   : > { %v3924_v50 = vsel %vm15299_vm1, %v3922_v54, %v3923_v45  ;;  %v12121_v15 = vcombine.low %v3942_v9, %v3945_v53  ;;  %v18839_v54 = vld [vmem:[#allocation13_spill] sm:$0xff]  ;;  %v3993_v9 = vrot.slane %v15799_v16, 5 }
 0x1a4   : > { %v12118_v24 = vcombine.low %v3921_v17, %v3924_v50  ;;  %v3929_v56 = vrot.slane %v3927_v58, 4  ;;  %v3928_v25 = vsel %vm15299_vm1, %v12100_v33, %v3927_v58  ;;  %v3938_v51 = vsel %vm15299_vm1, %v3936_v12, %v3937_v52  ;;  %v3817_v58 = vld [vmem:[#allocation2 + $0xa8] sm:$0xe]  ;;  %v18840_v17 = vld [vmem:[#allocation14_spill] sm:$0xff]  ;;  %v18842_v12 = vld [vmem:[#allocation16_spill] sm:$0xff] }
 0x1a5   : > { %v3950_v57 = vrot.slane %v3948_v10, 4  ;;  %v3969_v45 = vrot.slane %v18839_v54, 5  ;;  %v3976_v50 = vrot.slane %v18840_v17, 5  ;;  %v18841_v33 = vld [vmem:[#allocation15_spill] sm:$0xff]  ;;  %v3979_v52 = vrot.slane %v18842_v12, 5 }
 0x1a6   : > { %v3931_v35 = vsel %vm15299_vm1, %v3929_v56, %v3930_v49  ;;  %v3972_v56 = vrot.slane %v18841_v33, 5  ;;  %v12107_v49 = vrot.slane %v3818_v47, 9  ;;  %v14573_v54 = vld [vmem:[#allocation2 + $0x90] sm:$0xf]  ;;  %v14575_v47 = vld [vmem:[#allocation2 + $0xa8] sm:$0xf] }
 0x1a7   : > { %v3952_v39 = vsel %vm15299_vm1, %v3950_v57, %v3951_v34  ;;  %v3978_v0 = vrot.slane %v3976_v50, 4  ;;  %v1376_v33 = vshll.u32 %v14575_v47, 16 }
 0x1a9   : > { %13366 = vmatmul.mubr.msk.bf16.vlgmr.msra.gmra.mrb[0].mxu0 %vm1524_vm12, %v12113_v7  ;;  %v3814_v7 = vld [vmem:[#allocation2 + $0x84] sm:$0xe]  ;;  %v3980_v41 = vsel %vm15299_vm1, %v3978_v0, %v3979_v52  ;;  %v15994_v0 = vld [vmem:[#allocation2 + $0x94] sm:$0xf] }
 0x1aa   : > { %13402 = vmatpush3.bf16.msra.mxu0 %v4511_v8  ;;  %13369 = vmatprep.mubr.msk.bf16.mxu0 %vm1524_vm12, %v12114_v61  ;;  %v12119_v8 = vcombine.low %v3928_v25, %v3931_v35  ;;  %v12120_v61 = vcombine.low %v3935_v37, %v3938_v51  ;;  %v12103_v28 = vrot.slane %v3814_v7, 9  ;;  %v3983_v37 = vrot.slane %v18843_v11, 5  ;;  %v14578_v52 = vld [vmem:[#allocation2 + $0xb4] sm:$0xf] }
 0x1ab   : > { %14393 = vmatprep.subr.msk.bf16.mxu0 %vm1579_vm0, %v15863_v18  ;;  %v3977_v51 = vsel %vm15299_vm1, %v12107_v49, %v3976_v50  ;;  %v3990_v7 = vrot.slane %v15775_v1, 5  ;;  %v1400_v11 = vshll.u32 %v14578_v52, 16 }
 0x1ac   : > { %v3949_v13 = vsel %vm15299_vm1, %v12103_v28, %v3948_v10  ;;  %v3819_v10 = vld [vmem:[#allocation2 + $0xc0] sm:$0xe]  ;;  %v12126_v63 = vcombine.low %v3977_v51, %v3980_v41  ;;  %v3985_v5 = vrot.slane %v3983_v37, 4  ;;  %v3986_v28 = vrot.slane %v15789_v42, 5 }
 0x1ad   : > { %v12122_v6 = vcombine.low %v3949_v13, %v3952_v39  ;;  %v12108_v46 = vrot.slane %v3819_v10, 9  ;;  %v3992_v34 = vrot.slane %v3990_v7, 4  ;;  %v3821_v39 = vld [vmem:[#allocation2 + $0xd8] sm:$0xe] }
 0x1ae   : > { %v3987_v1 = vsel %vm15299_vm1, %v3985_v5, %v3986_v28  ;;  %v12110_v29 = vrot.slane %v3821_v39, 9  ;;  %v4726_v10 = vld [vmem:[#allocation2 + $0x18] sm:$0xf]  ;;  %v16009_v28 = vrot.slane %v1376_v33, 5  ;;  %v16021_v39 = vld [vmem:[#allocation2 + $0x1c] sm:$0xf] }
 0x1af   : > { %v3984_v53 = vsel %vm15299_vm1, %v12108_v46, %v3983_v37  ;;  %v3994_v42 = vsel %vm15299_vm1, %v3992_v34, %v3993_v9  ;;  %v14579_v37 = vld [vmem:[#allocation2 + $0xc0] sm:$0xf]  ;;  %v16014_v9 = vld [vmem:[#allocation2 + $0xb8] sm:$0xf]  ;;  %v4790_v40 = vshll.u32 %v16021_v39, 16 }
 0x1b0   : > { %v12127_v16 = vcombine.low %v3984_v53, %v3987_v1  ;;  %v3998_v21 = vsel %vm15299_vm1, %v12110_v29, %v3997_v14  ;;  %v1421_v51 = vshrl.u32 %v14579_v37, 16  ;;  %v1424_v41 = vshll.u32 %v14579_v37, 16  ;;  %v14485_v1 = vld [vmem:[#allocation2 + $0x54] sm:$0xff]   ;;  %v16052_v53 = vld [vmem:[#allocation2 + $0x4c] sm:$0xf] }
 0x1b1   : > { %13370 = vmatmul.mubr.msk.bf16.gmra.mrb[4].mxu0 %vm1524_vm12, %v12115_v55  ;;  %v3958_v55 = vrot.slane %v18837_v60, 5  ;;  %v14482_v60 = vld [vmem:[#allocation2 + $0x30] sm:$0xff]   ;;  %v16023_v29 = vrot.slane %v1400_v11, 5  ;;  %v16042_v11 = vld [vmem:[#allocation2 + $0x20] sm:$0x1]  ;;  %v16044_v37 = vrot.slane %v4790_v40, 5 }
 0x1b2   : > { %13373 = vmatprep.mubr.msk.bf16.mxu0 %vm1524_vm12, %v12116_v59  ;;  %v12105_v59 = vrot.slane %v3816_v20, 9  ;;  %v4000_v20 = vrot.slane %v15811_v26, 5  ;;  %v5323_v26 = vsel %vm1579_vm0, %v15863_v18, 0  ;;  %v14483_v18 = vld [vmem:[#allocation2 + $0x3c] sm:$0xff]   ;;  %18846 = vst [vmem:[#allocation11_spill] sm:$0xff] %v16052_v53 }
 0x1b3   : > { %v3959_v4 = vsel %vm15299_vm1, %v3957_v32, %v3958_v55  ;;  %v14481_v32 = vld [vmem:[#allocation2 + $0x24] sm:$0xff]   ;;  %v15976_v55 = vld [vmem:[%s18708_s1 + $0x10] sm:$0x3] }
 0x1b4   : > { %v3963_v43 = vsel %vm15299_vm1, %v12105_v59, %v3962_v19  ;;  %v12123_v22 = vcombine.low %v3956_v27, %v3959_v4  ;;  %v3999_v19 = vrot.slane %v3997_v14, 4  ;;  %v380_v59 = vld [vmem:[#allocation2 + $0xec] sm:$0x1]  ;;  %v1301_v27 = vshrl.u32 %v14572_v31, 16 }
 0x1b5   : > { %v12124_v62 = vcombine.low %v3963_v43, %v3966_v30  ;;  %v381_v3 = vsel %vm14810_vm5, 0, %v380_v59  ;;  %v1304_v4 = vshll.u32 %v14572_v31, 16  ;;  %v14484_v43 = vld [vmem:[#allocation2 + $0x48] sm:$0xff]   ;;  %v1328_v30 = vshll.u32 %v14573_v54, 16  ;;  %v4732_v59 = vld [vmem:[#allocation2 + $0x30] sm:$0xf] }
 0x1b6   : > { %382 = vst [vmem:[#allocation2 + $0xec] sm:$0x1] %v381_v3  ;;  %v4794_v3 = vshrl.u32 %v16021_v39, 16  ;;  %v4733_v31 = vld [vmem:[#allocation2 + $0x34] sm:$0xf] }
 0x1b9   : > { %13374 = vmatmul.mubr.msk.bf16.gmra.mrb[8].mxu0 %vm1524_vm12, %v12117_v44  ;;  %v12106_v44 = vrot.slane %v3817_v58, 9  ;;  %v14574_v58 = vld [vmem:[#allocation2 + $0x9c] sm:$0xf] }
 0x1ba   : > { %13377 = vmatprep.mubr.msk.bf16.mxu0 %vm1524_vm12, %v12118_v24  ;;  %v3971_v24 = vrot.slane %v3969_v45, 4  ;;  %v1349_v17 = vshrl.u32 %v14574_v58, 16  ;;  %v1352_v50 = vshll.u32 %v14574_v58, 16 }
 0x1bb   : > { %v3970_v25 = vsel %vm15299_vm1, %v12106_v44, %v3969_v45  ;;  %v1325_v45 = vshrl.u32 %v14573_v54, 16  ;;  %v15986_v44 = vld [vmem:[#allocation2 + $0x88] sm:$0xf]  ;;  %v4805_v54 = vshrl.u32 %v4729_v2, 16 }
 0x1bc   : > { %v3973_v35 = vsel %vm15299_vm1, %v3971_v24, %v3972_v56  ;;  %v15990_v56 = vrot.slane %v1304_v4, 5 }
 0x1bd   : > { %v15992_v49 = vrot.slane %v1325_v45, 4  ;;  %v412_v5 = vld [vmem:[#allocation2 + $0xec] sm:$0x1]  ;;  %v4808_v45 = vshll.u32 %v4729_v2, 16 }
 0x1be   : > { %v413_v14 = vsel %vm14802_vm3, 0, %v412_v5 }
 0x1bf   : > { %414 = vst [vmem:[#allocation2 + $0xec] sm:$0x1] %v413_v14  ;;  %v4807_v14 = vrot.slane %v4805_v54, 4 }
 0x1c1   : > { %13378 = vmatmul.mubr.msk.bf16.gmra.mrb[12].mxu0 %vm1524_vm12, %v12119_v8  ;;  %v3820_v8 = vld [vmem:[#allocation2 + $0xcc] sm:$0xe] }
 0x1c2   : > { %13381 = vmatprep.mubr.msk.bf16.mxu0 %vm1524_vm12, %v12120_v61  ;;  %v12125_v61 = vcombine.low %v3970_v25, %v3973_v35  ;;  %v12109_v57 = vrot.slane %v3820_v8, 9  ;;  %v1397_v25 = vshrl.u32 %v14578_v52, 16  ;;  %v15998_v35 = vrot.slane %v1328_v30, 5 }
 0x1c3   : > { %v16002_v8 = vrot.slane %v1352_v50, 5  ;;  %v4832_v50 = vshll.u32 %v4732_v59, 16 }
 0x1c4   : > { %v3991_v13 = vsel %vm15299_vm1, %v12109_v57, %v3990_v7  ;;  %v16000_v7 = vrot.slane %v1349_v17, 4  ;;  %v16011_v57 = vld [vmem:[#allocation2 + $0xac] sm:$0xf]  ;;  %v4829_v17 = vshrl.u32 %v4732_v59, 16 }
 0x1c5   : > { %v12128_v48 = vcombine.low %v3991_v13, %v3994_v42  ;;  %v16019_v13 = vrot.slane %v1397_v25, 4  ;;  %v14486_v42 = vld [vmem:[#allocation2 + $0x60] sm:$0xff]   ;;  %v14487_v25 = vld [vmem:[#allocation2 + $0x6c] sm:$0xff]  }
 0x1c6   : > { %v4831_v59 = vrot.slane %v4829_v17, 4 }
 0x1c9   : > { %13382 = vmatmul.mubr.msk.bf16.gmra.mrb[16].mxu0 %vm1524_vm12, %v12121_v15  ;;  %v4001_v15 = vsel %vm15299_vm1, %v3999_v19, %v4000_v20  ;;  %v16025_v19 = vrot.slane %v1421_v51, 4  ;;  %v16027_v20 = vrot.slane %v1424_v41, 5 }
 0x1ca   : > { %13385 = vmatprep.mubr.msk.bf16.mxu0 %vm1524_vm12, %v12122_v6  ;;  %v12129_v6 = vcombine.low %v3998_v21, %v4001_v15  ;;  %v16029_v21 = vld [vmem:[#allocation2 + $0xc4] sm:$0xf] }
 0x1d1   : > { %13386 = vmatmul.mubr.msk.bf16.gmra.mrb[20].mxu0 %vm1524_vm12, %v12123_v22  ;;  %v1373_v22 = vshrl.u32 %v14575_v47, 16  ;;  %v4838_v47 = vshll.u32 %v4733_v31, 16 }
 0x1d2   : > { %13389 = vmatprep.mubr.msk.bf16.mxu0 %vm1524_vm12, %v12124_v62  ;;  %v15984_v62 = vrot.slane %v1301_v27, 4  ;;  %v4735_v27 = vld [vmem:[#allocation2 + $0x3c] sm:$0xf] }
 0x1d3   : > { %v16007_v46 = vrot.slane %v1373_v22, 4  ;;  %v4842_v22 = vshrl.u32 %v4733_v31, 16  ;;  %v4853_v33 = vshrl.u32 %v4735_v27, 16  ;;  %v4856_v52 = vshll.u32 %v4735_v27, 16 }
 0x1d4   : > { %v4834_v31 = vrot.slane %v4832_v50, 5  ;;  %v16050_v27 = vrot.slane %v4838_v47, 5  ;;  %v16063_v50 = vld [vmem:[#allocation2 + $0x44] sm:$0x1] }
 0x1d5   : > { %v4855_v40 = vrot.slane %v4853_v33, 4  ;;  %v4858_v15 = vrot.slane %v4856_v52, 5  ;;  %v4886_v33 = vshll.u32 %v16052_v53, 16  ;;  %v4890_v52 = vshrl.u32 %v16052_v53, 16 }
 0x1d9   : > { %13390 = vmatmul.mubr.msk.bf16.gmra.mrb[24].mxu0 %vm1524_vm12, %v12125_v61  ;;  %v16004_v61 = vld [vmem:[#allocation2 + $0xa0] sm:$0xf] }
 0x1da   : > { %13393 = vmatprep.mubr.msk.bf16.mxu0 %vm1524_vm12, %v12126_v63  ;;  %v14490_v63 = vld [vmem:[#allocation2 + $0x90] sm:$0xff]  }
 0x1e1   : > { %13394 = vmatmul.mubr.msk.bf16.gmra.mrb[28].mxu0 %vm1524_vm12, %v12127_v16  ;;  %v4781_v16 = vshrl.u32 %v4726_v10, 16 }
 0x1e2   : > { %13397 = vmatprep.mubr.msk.bf16.mxu0 %vm1524_vm12, %v12128_v48  ;;  %v4784_v48 = vshll.u32 %v4726_v10, 16  ;;  %v14488_v10 = vld [vmem:[#allocation2 + $0x78] sm:$0xff]  }
 0x1e4   : > { %v4786_v4 = vrot.slane %v4784_v48, 5  ;;  %v16046_v48 = vld [vmem:[#allocation2 + $0x2c] sm:$0x1] }
 0x1e5   : > { %18845 = vst [vmem:[#allocation10_spill] sm:$0xff] %v16046_v48  ;;  %v4824_v17 = vshll.u32 %v16046_v48, 16 }
 0x1e7   : > { %v4826_v48 = vrot.slane %v4824_v17, 5 }
 0x1e9   : > { %13398 = vmatmul.mubr.msk.bf16.gmra.mrb[32].mxu0 %vm1524_vm12, %v12129_v6  ;;  %v16032_v6 = vld [vmem:[#allocation2 + $0xcc] sm:$0xf] }
 0x1ea   : > { %13403 = vmatprep.mubr.msk.bf16.mxu0 %vm1524_vm12, %v14480_v38 }
 0x1f1   : > { %13404 = vmatmul.mubr.msk.bf16.vlgmr.msra.gmra.mrb[0].mxu0 %vm1524_vm12, %v14481_v32  ;;  %v16035_v32 = vld [vmem:[#allocation2 + $0xd0] sm:$0xf] }
 0x1f2   : > { %13440 = vmatpush3.bf16.msra.mxu0 %v5323_v26  ;;  %13407 = vmatprep.mubr.msk.bf16.mxu0 %vm1524_vm12, %v14482_v60  ;;  %v4730_v26 = vld [vmem:[#allocation2 + $0x28] sm:$0xf]  ;;  %v4844_v60 = vrot.slane %v4842_v22, 4 }
 0x1f3   : > { %14394 = vmatprep.subr.msk.bf16.mxu0 %vm1579_vm0, %v15976_v55  ;;  %v4814_v30 = vshll.u32 %v4730_v26, 16  ;;  %v4818_v58 = vshrl.u32 %v4730_v26, 16 }
 0x1f5   : > { %v16048_v2 = vrot.slane %v4814_v30, 5  ;;  %v4820_v26 = vrot.slane %v4818_v58, 4  ;;  %v4800_v30 = vshll.u32 %v16042_v11, 16 }
 0x1f7   : > { %v4821_v22 = vor.u32 %v4820_v26, %v16048_v2  ;;  %v4802_v12 = vrot.slane %v4800_v30, 5 }
 0x1f9   : > { %13408 = vmatmul.mubr.msk.bf16.gmra.mrb[4].mxu0 %vm1524_vm12, %v14483_v18  ;;  %v4783_v18 = vrot.slane %v4781_v16, 4  ;;  %v4738_v16 = vld [vmem:[#allocation2 + $0x48] sm:$0xf] }
 0x1fa   : > { %13411 = vmatprep.mubr.msk.bf16.mxu0 %vm1524_vm12, %v14484_v43  ;;  %v4736_v43 = vld [vmem:[#allocation2 + $0x40] sm:$0xf]  ;;  %v4877_v54 = vshrl.u32 %v4738_v16, 16 }
 0x1fb   : > { %v4862_v51 = vshll.u32 %v4736_v43, 16  ;;  %v4866_v41 = vshrl.u32 %v4736_v43, 16  ;;  %v4787_v5 = vor.u32 %v4786_v4, %v4783_v18 }
 0x1fd   : > { %v16057_v18 = vrot.slane %v4862_v51, 5  ;;  %v4868_v4 = vrot.slane %v4866_v41, 4  ;;  %v16065_v47 = vrot.slane %v4787_v5, 4  ;;  %v4835_v51 = vor.u32 %v4834_v31, %v4831_v59  ;;  %v16076_v31 = vld [vmem:[#allocation2 + $0x58] sm:$0xf] }
 0x1fe   : > { %v4845_v41 = vor.u32 %v4844_v60, %v16050_v27  ;;  %v4879_v5 = vrot.slane %v4877_v54, 4  ;;  %v16074_v59 = vrot.slane %v4886_v33, 5  ;;  %v4892_v60 = vrot.slane %v4890_v52, 4 }
 0x1ff   : > { %v4910_v33 = vshll.u32 %v16076_v31, 16  ;;  %v4914_v52 = vshrl.u32 %v16076_v31, 16 }
 0x201   : > { %13412 = vmatmul.mubr.msk.bf16.gmra.mrb[8].mxu0 %vm1524_vm12, %v14485_v1  ;;  %v4796_v1 = vrot.slane %v4794_v3, 4  ;;  %v16055_v3 = vld [vmem:[#allocation2 + $0x38] sm:$0x1] }
 0x202   : > { %13415 = vmatprep.mubr.msk.bf16.mxu0 %vm1524_vm12, %v14486_v42  ;;  %v4810_v42 = vrot.slane %v4808_v45, 5  ;;  %18847 = vst [vmem:[#allocation12_spill] sm:$0xff] %v16055_v3  ;;  %v4880_v45 = vshll.u32 %v4738_v16, 16  ;;  %v4872_v16 = vshll.u32 %v16063_v50, 16 }
 0x203   : > { %v4797_v43 = vor.u32 %v4796_v1, %v16044_v37  ;;  %v4859_v1 = vor.u32 %v4858_v15, %v4855_v40  ;;  %v4822_v15 = vrot.slane %v4821_v22, 4  ;;  %v4836_v40 = vrot.slane %v4835_v51, 4 }
 0x204   : > { %v4811_v58 = vor.u32 %v4810_v42, %v4807_v14  ;;  %v14489_v14 = vld [vmem:[#allocation2 + $0x84] sm:$0xff]   ;;  %v4869_v42 = vor.u32 %v4868_v4, %v16057_v18  ;;  %v4882_v34 = vrot.slane %v4880_v45, 5  ;;  %v18848_v22 = vshrl.u32 %v16032_v6, 16 }
 0x205   : > { %v4798_v26 = vrot.slane %v4797_v43, 4  ;;  %v4860_v54 = vrot.slane %v4859_v1, 4  ;;  %v4874_v43 = vrot.slane %v4872_v16, 5  ;;  %v1448_v51 = vshll.u32 %v16032_v6, 16  ;;  %v16102_v6 = vld [vmem:[#allocation2 + $0x5c] sm:$0x1] }
 0x206   : > { %v4812_v53 = vrot.slane %v4811_v58, 4  ;;  %v4870_v45 = vrot.slane %v4869_v42, 4  ;;  %v4883_v30 = vor.u32 %v4882_v34, %v4879_v5  ;;  %18849 = vst [vmem:[#allocation13_spill] sm:$0xff] %v16102_v6  ;;  %v14491_v1 = vld [vmem:[#allocation2 + $0x9c] sm:$0xff]   ;;  %v16114_v16 = vrot.slane %v4910_v33, 5 }
 0x207   : > { %v4916_v5 = vrot.slane %v4914_v52, 4  ;;  %v14586_v52 = vld [vmem:[#allocation2 + $0x78] sm:$0xf] }
 0x208   : > { %v4817_v34 = vsel %vm14906_vm13, %v4812_v53, %v16048_v2  ;;  %v4875_v53 = vsel %vm14906_vm13, %v4870_v45, %v4874_v43  ;;  %v4744_v2 = vld [vmem:[#allocation2 + $0x60] sm:$0xf] }
 0x209   : > { %13416 = vmatmul.mubr.msk.bf16.gmra.mrb[12].mxu0 %vm1524_vm12, %v14487_v25  ;;  %v4741_v25 = vld [vmem:[#allocation2 + $0x54] sm:$0xf]  ;;  %v4917_v33 = vor.u32 %v4916_v5, %v16114_v16 }
 0x20a   : > { %13419 = vmatprep.mubr.msk.bf16.mxu0 %vm1524_vm12, %v14488_v10  ;;  %v4848_v10 = vshll.u32 %v16055_v3, 16  ;;  %v4901_v24 = vshrl.u32 %v4741_v25, 16  ;;  %v4904_v38 = vshll.u32 %v4741_v25, 16  ;;  %v4846_v3 = vrot.slane %v4845_v41, 4 }
 0x20b   : > { %v16086_v25 = vrot.slane %v18848_v22, 4  ;;  %v4893_v41 = vor.u32 %v4892_v60, %v16074_v59  ;;  %v1277_v22 = vshrl.u32 %v14586_v52, 16  ;;  %v4918_v5 = vrot.slane %v4917_v33, 4 }
 0x20c   : > { %v4850_v4 = vrot.slane %v4848_v10, 5  ;;  %v4903_v58 = vrot.slane %v4901_v24, 4  ;;  %v4906_v17 = vrot.slane %v4904_v38, 5  ;;  %v4896_v10 = vshll.u32 %v16078_v36, 16 }
 0x20d   : > { %v4793_v24 = vsel %vm14906_vm13, %v16065_v47, %v16044_v37  ;;  %v4827_v38 = vsel %vm14906_vm13, %v4822_v15, %v4826_v48  ;;  %v14492_v47 = vld [vmem:[#allocation2 + $0xa8] sm:$0xff]   ;;  %v4884_v48 = vrot.slane %v4883_v30, 4  ;;  %v4894_v60 = vrot.slane %v4893_v41, 4 }
 0x20e   : > { %v4851_v37 = vsel %vm14906_vm13, %v4846_v3, %v4850_v4  ;;  %v4907_v42 = vor.u32 %v4906_v17, %v4903_v58  ;;  %v4898_v3 = vrot.slane %v4896_v10, 5  ;;  %v4920_v15 = vshll.u32 %v16102_v6, 16 }
 0x20f   : > { %v4925_v4 = vshrl.u32 %v4744_v2, 16  ;;  %v16128_v45 = vcombine.low %v4817_v34, %v4827_v38  ;;  %v4889_v17 = vsel %vm14906_vm13, %v4884_v48, %v16074_v59  ;;  %v1280_v10 = vshll.u32 %v14586_v52, 16  ;;  %v16142_v34 = vld [vmem:[#allocation2 + $0x68] sm:$0x1]  ;;  %v14494_v48 = vld [vmem:[#allocation2 + $0xc0] sm:$0xff]  }
 0x210   : > { %v4922_v41 = vrot.slane %v4920_v15, 5  ;;  %v4944_v52 = vshll.u32 %v16142_v34, 16 }
 0x211   : > { %13420 = vmatmul.mubr.msk.bf16.gmra.mrb[16].mxu0 %vm1524_vm12, %v14489_v14  ;;  %v4841_v14 = vsel %vm14906_vm13, %v4836_v40, %v16050_v27  ;;  %v16118_v27 = vrot.slane %v1448_v51, 5  ;;  %v4899_v51 = vsel %vm14906_vm13, %v4894_v60, %v4898_v3  ;;  %v4927_v38 = vrot.slane %v4925_v4, 4  ;;  %v14588_v3 = vld [vmem:[#allocation2 + $0x80] sm:$0x1]  ;;  %v4747_v4 = vld [vmem:[#allocation2 + $0x6c] sm:$0xf] }
 0x212   : > { %13423 = vmatprep.mubr.msk.bf16.mxu0 %vm1524_vm12, %v14490_v63  ;;  %v4803_v63 = vsel %vm14906_vm13, %v4798_v26, %v4802_v12  ;;  %v4865_v12 = vsel %vm14906_vm13, %v4860_v54, %v16057_v18  ;;  %v16116_v26 = vld [vmem:[#allocation2 + $0x64] sm:$0xf]  ;;  %v16125_v18 = vsel %vm1579_vm0, %v15976_v55, 0  ;;  %v4928_v54 = vshll.u32 %v4744_v2, 16 }
 0x213   : > { %v16121_v40 = vcombine.low %v4793_v24, %v4803_v63  ;;  %v16130_v43 = vcombine.low %v4841_v14, %v4851_v37  ;;  %v16132_v30 = vcombine.low %v4865_v12, %v4875_v53  ;;  %v4934_v58 = vshll.u32 %v16116_v26, 16  ;;  %v14587_v24 = vld [vmem:[#allocation2 + $0x7c] sm:$0xf]  ;;  %v14493_v12 = vld [vmem:[#allocation2 + $0xb4] sm:$0xff]  }
 0x214   : > { %v4908_v55 = vrot.slane %v4907_v42, 4  ;;  %v1286_v63 = vshll.u32 %v14587_v24, 16  ;;  %v1279_v14 = vrot.slane %v1277_v22, 4  ;;  %v1290_v37 = vshrl.u32 %v14587_v24, 16 }
 0x215   : > { %v16144_v59 = vrot.slane %v4934_v58, 5  ;;  %v4938_v53 = vshrl.u32 %v16116_v26, 16  ;;  %v1282_v2 = vrot.slane %v1280_v10, 5  ;;  %v16147_v42 = vcombine.low %v4889_v17, %v4899_v51  ;;  %v14589_v17 = vld [vmem:[#allocation2 + $0x8c] sm:$0x1] }
 0x216   : > { %v1292_v60 = vrot.slane %v1290_v37, 4  ;;  %v1296_v15 = vshll.u32 %v14588_v3, 16  ;;  %v1307_v22 = vor.u32 %v15990_v56, %v15984_v62  ;;  %v1310_v58 = vshll.u32 %v15986_v44, 16  ;;  %v16159_v37 = vld [vmem:[#allocation2 + $0x70] sm:$0xf] }
 0x217   : > { %v18850_v10 = vshrl.u32 %v15986_v44, 16  ;;  %v1320_v51 = vshll.u32 %v14589_v17, 16  ;;  %v4913_v33 = vsel %vm14906_vm13, %v4908_v55, %v16114_v16  ;;  %v4949_v3 = vshrl.u32 %v4747_v4, 16 }
 0x218   : > { %v1298_v6 = vrot.slane %v1296_v15, 5  ;;  %v1312_v62 = vrot.slane %v1310_v58, 5  ;;  %v4923_v15 = vsel %vm14906_vm13, %v4918_v5, %v4922_v41  ;;  %v16166_v16 = vrot.slane %v4944_v52, 5 }
 0x219   : > { %13424 = vmatmul.mubr.msk.bf16.gmra.mrb[20].mxu0 %vm1524_vm12, %v14491_v1  ;;  %v4930_v1 = vrot.slane %v4928_v54, 5  ;;  %v1283_v54 = vor.u32 %v1282_v2, %v1279_v14  ;;  %v1308_v2 = vrot.slane %v1307_v22, 4  ;;  %v1322_v17 = vrot.slane %v1320_v51, 5  ;;  %v14496_v22 = vld [vmem:[#allocation2 + $0xd8] sm:$0xff]  }
 0x21a   : > { %13427 = vmatprep.mubr.msk.bf16.mxu0 %vm1524_vm12, %v14492_v47  ;;  %v1288_v47 = vrot.slane %v1286_v63, 5  ;;  %v1316_v63 = vrot.slane %v18850_v10, 4  ;;  %v4952_v55 = vshll.u32 %v4747_v4, 16  ;;  %v1331_v4 = vor.u32 %v15998_v35, %v15992_v49 }
 0x21b   : > { %v1284_v14 = vrot.slane %v1283_v54, 4  ;;  %v4931_v56 = vor.u32 %v4930_v1, %v4927_v38  ;;  %v4958_v54 = vshll.u32 %v16159_v37, 16  ;;  %v14495_v38 = vld [vmem:[#allocation2 + $0xcc] sm:$0xff]   ;;  %v4962_v1 = vshrl.u32 %v16159_v37, 16 }
 0x21c   : > { %v1293_v24 = vor.u32 %v1292_v60, %v1288_v47  ;;  %v4940_v60 = vrot.slane %v4938_v53, 4  ;;  %v1317_v10 = vor.u32 %v1316_v63, %v1312_v62  ;;  %v1313_v41 = vsel %vm14906_vm13, %v1308_v2, %v1312_v62  ;;  %v16187_v2 = vld [vmem:[#allocation2 + $0x74] sm:$0x1] }
 0x21d   : > { %v16176_v58 = vrot.slane %v4931_v56, 4  ;;  %v18851_v63 = vshrl.u32 %v15994_v0, 16  ;;  %v4951_v62 = vrot.slane %v4949_v3, 4  ;;  %v4954_v56 = vrot.slane %v4952_v55, 5 }
 0x21e   : > { %v1294_v44 = vrot.slane %v1293_v24, 4  ;;  %v1318_v5 = vrot.slane %v1317_v10, 4  ;;  %v4941_v52 = vor.u32 %v4940_v60, %v16144_v59  ;;  %v1334_v24 = vshll.u32 %v15994_v0, 16 }
 0x21f   : > { %v1340_v51 = vrot.slane %v18851_v63, 4  ;;  %v1355_v49 = vor.u32 %v16002_v8, %v16000_v7  ;;  %v16192_v35 = vrot.slane %v4958_v54, 5  ;;  %v1358_v0 = vshll.u32 %v16004_v61, 16  ;;  %v16200_v54 = vld [vmem:[#allocation2 + $0x7c] sm:$0xf] }
 0x220   : > { %v4964_v10 = vrot.slane %v4962_v1, 4  ;;  %v4968_v8 = vshll.u32 %v16187_v2, 16  ;;  %v4937_v1 = vsel %vm14906_vm13, %v16176_v58, %v16144_v59  ;;  %vm6141_vm0 = vcmask 253952  }
 0x221   : > { %13428 = vmatmul.mubr.msk.bf16.gmra.mrb[24].mxu0 %vm1524_vm12, %v14493_v12  ;;  %v1289_v12 = vsel %vm14906_vm13, %v1284_v14, %v1288_v47  ;;  %v16174_v47 = vcombine.low %v4913_v33, %v4923_v15  ;;  %v14590_v14 = vld [vmem:[#allocation2 + $0x98] sm:$0x1]  ;;  %v1332_v15 = vrot.slane %v1331_v4, 4  ;;  %v1356_v3 = vrot.slane %v1355_v49, 4  ;;  %vm16576_vm3 = vmand %vm6141_vm0, %vm259_vm2 }
 0x222   : > { %13431 = vmatprep.mubr.msk.bf16.mxu0 %vm1524_vm12, %v14494_v48  ;;  %v1299_v48 = vsel %vm14906_vm13, %v1294_v44, %v1298_v6  ;;  %v1323_v6 = vsel %vm14906_vm13, %v1318_v5, %v1322_v17  ;;  %v1344_v33 = vshll.u32 %v14590_v14, 16  ;;  %v4750_v44 = vld [vmem:[#allocation2 + $0x78] sm:$0xf]  ;;  %v18852_v17 = vshrl.u32 %v16004_v61, 16  ;;  %vm16586_vm5 = vmand %vm6141_vm0, %vm321_vm4 }
 0x223   : > { %v11902_v53 = vcombine.low %v1289_v12, %v1299_v48  ;;  %v11903_v60 = vcombine.low %v1313_v41, %v1323_v6  ;;  %v1336_v12 = vrot.slane %v1334_v24, 5  ;;  %v14591_v48 = vld [vmem:[#allocation2 + $0xa4] sm:$0x1]  ;;  %v1360_v41 = vrot.slane %v1358_v0, 5 }
 0x224   : > { %v1364_v55 = vrot.slane %v18852_v17, 4  ;;  %v1368_v7 = vshll.u32 %v14591_v48, 16  ;;  %v4942_v5 = vrot.slane %v4941_v52, 4  ;;  %v4976_v4 = vshll.u32 %v4750_v44, 16  ;;  %v14497_v6 = vld [vmem:[#allocation2 + $0xe4] sm:$0xff]  }
 0x225   : > { %13195 = vmatprep.mubr.msk.bf16.mxu1 %vm1524_vm12, %v11902_v53  ;;  %v1346_v53 = vrot.slane %v1344_v33, 5  ;;  %v1337_v61 = vsel %vm14906_vm13, %v1332_v15, %v1336_v12  ;;  %v4982_v33 = vshll.u32 %v16200_v54, 16  ;;  %v1361_v49 = vsel %vm14906_vm13, %v1356_v3, %v1360_v41 }
 0x226   : > { %13196 = vmatmul.mubr.msk.bf16.vlgmr.msra.gmra.mrb[0].mxu1 %vm1524_vm12, %v11903_v60  ;;  %v1365_v63 = vor.u32 %v1364_v55, %v1360_v41  ;;  %v1370_v14 = vrot.slane %v1368_v7, 5  ;;  %v4955_v60 = vor.u32 %v4954_v56, %v4951_v62  ;;  %v1379_v52 = vor.u32 %v16009_v28, %v16007_v46  ;;  %v14592_v55 = vld [vmem:[#allocation2 + $0xb0] sm:$0x1] }
 0x227   : > { %v4947_v62 = vsel %vm14906_vm13, %v4942_v5, %v16166_v16  ;;  %v4986_v3 = vshrl.u32 %v16200_v54, 16  ;;  %v1392_v48 = vshll.u32 %v14592_v55, 16  ;;  %v16231_v7 = vrot.slane %v4968_v8, 5  ;;  %v14593_v5 = vld [vmem:[#allocation2 + $0xbc] sm:$0x1] }
 0x228   : > { %v1366_v58 = vrot.slane %v1365_v63, 4  ;;  %v1380_v46 = vrot.slane %v1379_v52, 4  ;;  %v16245_v8 = vrot.slane %v4982_v33, 5  ;;  %v16247_v63 = vld [vmem:[#allocation2 + $0x88] sm:$0xf]  ;;  %vm6720_vm2 = vcmask 257024  }
 0x229   : > { %13432 = vmatmul.mubr.msk.bf16.gmra.mrb[28].mxu0 %vm1524_vm12, %v14495_v38  ;;  %v1341_v38 = vor.u32 %v1340_v51, %v1336_v12  ;;  %v4965_v51 = vor.u32 %v4964_v10, %v16192_v35  ;;  %v18853_v12 = vshrl.u32 %v16011_v57, 16  ;;  %v4978_v10 = vrot.slane %v4976_v4, 5  ;;  %vm16714_vm6 = vmand %vm6720_vm2, %vm321_vm4 }
 0x22a   : > { %13435 = vmatprep.mubr.msk.bf16.mxu0 %vm1524_vm12, %v14496_v22  ;;  %v4973_v22 = vshrl.u32 %v4750_v44, 16  ;;  %v1382_v44 = vshll.u32 %v16011_v57, 16  ;;  %v1371_v17 = vsel %vm14906_vm13, %v1366_v58, %v1370_v14  ;;  %v1403_v57 = vor.u32 %v16023_v29, %v16019_v13 }
 0x22b   : > { %v1342_v24 = vrot.slane %v1341_v38, 4  ;;  %v1388_v0 = vrot.slane %v18853_v12, 4  ;;  %v11905_v28 = vcombine.low %v1361_v49, %v1371_v17  ;;  %v1406_v38 = vshll.u32 %v16014_v9, 16 }
 0x22c   : > { %v4975_v56 = vrot.slane %v4973_v22, 4  ;;  %v1384_v16 = vrot.slane %v1382_v44, 5  ;;  %v1416_v22 = vshll.u32 %v14593_v5, 16  ;;  %v16236_v4 = vcombine.low %v4937_v1, %v4947_v62 }
 0x22d   : > { %v1347_v59 = vsel %vm14906_vm13, %v1342_v24, %v1346_v53  ;;  %v18854_v53 = vshrl.u32 %v16014_v9, 16  ;;  %v1394_v13 = vrot.slane %v1392_v48, 5  ;;  %v16243_v29 = vrot.slane %v4965_v51, 4  ;;  %v4756_v48 = vld [vmem:[#allocation2 + $0x90] sm:$0xf] }
 0x22e   : > { %v11904_v15 = vcombine.low %v1337_v61, %v1347_v59  ;;  %v4753_v61 = vld [vmem:[#allocation2 + $0x84] sm:$0xf]  ;;  %v1389_v24 = vor.u32 %v1388_v0, %v1384_v16  ;;  %v1404_v9 = vrot.slane %v1403_v57, 4  ;;  %v1408_v14 = vrot.slane %v1406_v38, 5 }
 0x22f   : > { %v1412_v41 = vrot.slane %v18854_v53, 4  ;;  %v4979_v49 = vor.u32 %v4978_v10, %v4975_v56  ;;  %v4988_v1 = vrot.slane %v4986_v3, 4  ;;  %v4997_v52 = vshrl.u32 %v4753_v61, 16  ;;  %v16279_v53 = vld [vmem:[#allocation2 + $0x94] sm:$0xf] }
 0x230   : > { %13199 = vmatprep.mubr.msk.bf16.mxu1 %vm1524_vm12, %v11904_v15  ;;  %v1390_v59 = vrot.slane %v1389_v24, 4  ;;  %v1418_v62 = vrot.slane %v1416_v22, 5  ;;  %v5000_v15 = vshll.u32 %v4753_v61, 16  ;;  %v5006_v51 = vshll.u32 %v16247_v63, 16 }
 0x231   : > { %13436 = vmatmul.mubr.msk.bf16.gmra.mrb[32].mxu0 %vm1524_vm12, %v14497_v6  ;;  %v16240_v6 = vld [vmem:[#allocation2 + $0x80] sm:$0x1]  ;;  %13200 = vmatmul.mubr.msk.bf16.gmra.mrb[4].mxu1 %vm1524_vm12, %v11905_v28  ;;  %v1413_v44 = vor.u32 %v1412_v41, %v1408_v14  ;;  %v1430_v12 = vshll.u32 %v16029_v21, 16  ;;  %v1409_v0 = vsel %vm14906_vm13, %v1404_v9, %v1408_v14  ;;  %v1427_v3 = vor.u32 %v16027_v20, %v16025_v19 }
 0x232   : > { %13441 = vmatprep.mubr.msk.bf16.mxu0 %vm1524_vm12, %v16121_v40  ;;  %v16238_v40 = vrot.slane %v4955_v60, 4  ;;  %v1385_v60 = vsel %vm14906_vm13, %v1380_v46, %v1384_v16  ;;  %v4992_v58 = vshll.u32 %v16240_v6, 16  ;;  %v1395_v33 = vsel %vm14906_vm13, %v1390_v59, %v1394_v13  ;;  %v16286_v13 = vld [vmem:[#allocation2 + $0x8c] sm:$0x1] }
 0x233   : > { %v11906_v56 = vcombine.low %v1385_v60, %v1395_v33  ;;  %v1414_v10 = vrot.slane %v1413_v44, 4  ;;  %v16265_v17 = vrot.slane %v4979_v49, 4  ;;  %v4989_v46 = vor.u32 %v4988_v1, %v16245_v8 }
 0x234   : > { %v1432_v28 = vrot.slane %v1430_v12, 5  ;;  %v16270_v55 = vrot.slane %v4992_v58, 5  ;;  %v1428_v20 = vrot.slane %v1427_v3, 4  ;;  %v16277_v38 = vrot.slane %v5000_v15, 5  ;;  %v4759_v58 = vld [vmem:[#allocation2 + $0x9c] sm:$0xf] }
 0x235   : > { %13203 = vmatprep.mubr.msk.bf16.mxu1 %vm1524_vm12, %v11906_v56  ;;  %v1419_v19 = vsel %vm14906_vm13, %v1414_v10, %v1418_v62  ;;  %v16281_v5 = vrot.slane %v5006_v51, 5  ;;  %v5010_v22 = vshrl.u32 %v16247_v63, 16  ;;  %v1451_v24 = vor.u32 %v16118_v27, %v16086_v25  ;;  %v14595_v62 = vld [vmem:[#allocation2 + $0xd4] sm:$0x1]  ;;  %v16296_v15 = vld [vmem:[#allocation2 + $0xa0] sm:$0xf] }
 0x236   : > { %v11907_v41 = vcombine.low %v1409_v0, %v1419_v19  ;;  %v5021_v9 = vshrl.u32 %v4756_v48, 16  ;;  %v1433_v14 = vsel %vm14906_vm13, %v1428_v20, %v1432_v28  ;;  %v1454_v1 = vshll.u32 %v16035_v32, 16 }
 0x237   : > { %v5024_v60 = vshll.u32 %v4756_v48, 16  ;;  %v5030_v59 = vshll.u32 %v16279_v53, 16  ;;  %v1464_v25 = vshll.u32 %v14595_v62, 16  ;;  %v5034_v27 = vshrl.u32 %v16279_v53, 16 }
 0x238   : > { %v1452_v33 = vrot.slane %v1451_v24, 4  ;;  %v1456_v12 = vrot.slane %v1454_v1, 5  ;;  %v4990_v56 = vrot.slane %v4989_v46, 4  ;;  %v5012_v0 = vrot.slane %v5010_v22, 4  ;;  %v16323_v24 = vld [vmem:[#allocation2 + $0x98] sm:$0x1] }
 0x239   : > { %13442 = vmatmul.mubr.msk.bf16.vlgmr.msra.gmra.mrb[0].mxu0 %vm1524_vm12, %v16128_v45  ;;  %v18855_v45 = vshrl.u32 %v16029_v21, 16  ;;  %13204 = vmatmul.mubr.msk.bf16.gmra.mrb[8].mxu1 %vm1524_vm12, %v11907_v41  ;;  %v5016_v10 = vshll.u32 %v16286_v13, 16  ;;  %v5023_v3 = vrot.slane %v5021_v9, 4  ;;  %v5026_v48 = vrot.slane %v5024_v60, 5 }
 0x23a   : > { %13478 = vmatpush3.bf16.msra.mxu0 %v16125_v18  ;;  %13445 = vmatprep.mubr.msk.bf16.mxu0 %vm1524_vm12, %v16130_v43  ;;  %v14594_v18 = vld [vmem:[#allocation2 + $0xc8] sm:$0x1]  ;;  %v16275_v43 = vrot.slane %v4997_v52, 4  ;;  %v18856_v52 = vshrl.u32 %v16035_v32, 16  ;;  %v5048_v19 = vshll.u32 %v4759_v58, 16  ;;  %v5054_v20 = vshll.u32 %v16296_v15, 16 }
 0x23b   : > { %v1436_v16 = vrot.slane %v18855_v45, 4  ;;  %v1440_v57 = vshll.u32 %v14594_v18, 16  ;;  %v5058_v18 = vshrl.u32 %v16296_v15, 16  ;;  %v5036_v46 = vrot.slane %v5034_v27, 4 }
 0x23c   : > { %v1460_v44 = vrot.slane %v18856_v52, 4  ;;  %v5003_v22 = vor.u32 %v16277_v38, %v16275_v43  ;;  %v4985_v9 = vsel %vm14906_vm13, %v16265_v17, %v16245_v8  ;;  %v16334_v43 = vrot.slane %v5054_v20, 5  ;;  %v4768_v20 = vld [vmem:[#allocation2 + $0xc0] sm:$0xf] }
 0x23d   : > { %v1437_v21 = vor.u32 %v1436_v16, %v1432_v28  ;;  %v1442_v61 = vrot.slane %v1440_v57, 5  ;;  %v5045_v28 = vshrl.u32 %v4759_v58, 16  ;;  %v1466_v16 = vrot.slane %v1464_v25, 5  ;;  %v16340_v58 = vld [vmem:[#allocation2 + $0xa4] sm:$0x1] }
 0x23e   : > { %v1461_v45 = vor.u32 %v1460_v44, %v1456_v12  ;;  %v1457_v57 = vsel %vm14906_vm13, %v1452_v33, %v1456_v12  ;;  %v5060_v38 = vrot.slane %v5058_v18, 4  ;;  %v5018_v60 = vrot.slane %v5016_v10, 5 }
 0x23f   : > { %v1438_v49 = vrot.slane %v1437_v21, 4  ;;  %v4971_v21 = vsel %vm14906_vm13, %v16243_v29, %v16231_v7  ;;  %v5050_v29 = vrot.slane %v5048_v19, 5  ;;  %v5040_v17 = vshll.u32 %v16323_v24, 16  ;;  %v16358_v19 = vld [vmem:[#allocation2 + $0xb8] sm:$0xf] }
 0x240   : > { %v1462_v41 = vrot.slane %v1461_v45, 4  ;;  %v5061_v12 = vor.u32 %v5060_v38, %v16334_v43  ;;  %vm7362_vm4 = vcmask 261120  }
 0x241   : > { %v1443_v51 = vsel %vm14906_vm13, %v1438_v49, %v1442_v61  ;;  %13446 = vmatmul.mubr.msk.bf16.gmra.mrb[4].mxu0 %vm1524_vm12, %v16132_v30  ;;  %v16308_v30 = vrot.slane %v5030_v59, 5  ;;  %v5013_v61 = vor.u32 %v5012_v0, %v16281_v5  ;;  %v16336_v49 = vld [vmem:[#allocation2 + $0xac] sm:$0xf]  ;;  %v5027_v59 = vor.u32 %v5026_v48, %v5023_v3 }
 0x242   : > { %v11908_v32 = vcombine.low %v1433_v14, %v1443_v51  ;;  %13449 = vmatprep.mubr.msk.bf16.mxu0 %vm1524_vm12, %v16147_v42  ;;  %v4961_v42 = vsel %vm14906_vm13, %v16238_v40, %v16192_v35  ;;  %v4995_v35 = vsel %vm14906_vm13, %v4990_v56, %v16270_v55  ;;  %v5047_v40 = vrot.slane %v5045_v28, 4  ;;  %v4762_v14 = vld [vmem:[#allocation2 + $0xa8] sm:$0xf]  ;;  %v16351_v28 = vld [vmem:[#allocation2 + $0xb0] sm:$0x1] }
 0x243   : > { %v1467_v7 = vsel %vm14906_vm13, %v1462_v41, %v1466_v16  ;;  %v5037_v8 = vor.u32 %v5036_v46, %v16308_v30  ;;  %v5004_v55 = vrot.slane %v5003_v22, 4  ;;  %v5014_v52 = vrot.slane %v5013_v61, 4 }
 0x244   : > { %13207 = vmatprep.mubr.msk.bf16.mxu1 %vm1524_vm12, %v11908_v32  ;;  %v11909_v1 = vcombine.low %v1457_v57, %v1467_v7  ;;  %v5069_v44 = vshrl.u32 %v4762_v14, 16  ;;  %v5072_v62 = vshll.u32 %v4762_v14, 16  ;;  %v5078_v25 = vshll.u32 %v16336_v49, 16 }
 0x245   : > { %v5082_v27 = vshrl.u32 %v16336_v49, 16  ;;  %v12193_v51 = vcombine.low %v4961_v42, %v4971_v21  ;;  %v5051_v33 = vor.u32 %v5050_v29, %v5047_v40  ;;  %v5064_v56 = vshll.u32 %v16340_v58, 16  ;;  %v16362_v42 = vld [vmem:[#allocation2 + $0xc4] sm:$0xf] }
 0x246   : > { %13208 = vmatmul.mubr.msk.bf16.gmra.mrb[12].mxu1 %vm1524_vm12, %v11909_v1  ;;  %v12194_v0 = vcombine.low %v4985_v9, %v4995_v35  ;;  %v5028_v10 = vrot.slane %v5027_v59, 4  ;;  %v5038_v32 = vrot.slane %v5037_v8, 4  ;;  %v5042_v3 = vrot.slane %v5040_v17, 5 }
 0x247   : > { %v5019_v45 = vsel %vm14906_vm13, %v5014_v52, %v5018_v60  ;;  %v5071_v16 = vrot.slane %v5069_v44, 4  ;;  %v5074_v48 = vrot.slane %v5072_v62, 5  ;;  %v16360_v18 = vrot.slane %v5078_v25, 5  ;;  %v16382_v44 = vld [vmem:[#allocation2 + $0xbc] sm:$0x1] }
 0x248   : > { %v5084_v46 = vrot.slane %v5082_v27, 4  ;;  %v5052_v21 = vrot.slane %v5051_v33, 4  ;;  %v5062_v22 = vrot.slane %v5061_v12, 4  ;;  %v5066_v61 = vrot.slane %v5064_v56, 5  ;;  %v16386_v56 = vld [vmem:[#allocation2 + $0xc8] sm:$0x1] }
 0x249   : > { %13450 = vmatmul.mubr.msk.bf16.gmra.mrb[8].mxu0 %vm1524_vm12, %v16174_v47  ;;  %v4765_v47 = vld [vmem:[#allocation2 + $0xb4] sm:$0xf]  ;;  %v5102_v9 = vshll.u32 %v16358_v19, 16  ;;  %v5106_v35 = vshrl.u32 %v16358_v19, 16  ;;  %v5117_v40 = vshrl.u32 %v4768_v20, 16  ;;  %v5120_v14 = vshll.u32 %v4768_v20, 16 }
 0x24a   : > { %13453 = vmatprep.mubr.msk.bf16.mxu0 %vm1524_vm12, %v16236_v4  ;;  %v5009_v4 = vsel %vm14906_vm13, %v5004_v55, %v16281_v5  ;;  %v5093_v57 = vshrl.u32 %v4765_v47, 16  ;;  %v5096_v41 = vshll.u32 %v4765_v47, 16  ;;  %v5088_v5 = vshll.u32 %v16351_v28, 16 }
 0x24b   : > { %v5033_v7 = vsel %vm14906_vm13, %v5028_v10, %v16308_v30  ;;  %v5043_v29 = vsel %vm14906_vm13, %v5038_v32, %v5042_v3  ;;  %v5126_v38 = vshll.u32 %v16362_v42, 16  ;;  %v5130_v1 = vshrl.u32 %v16362_v42, 16  ;;  %v4771_v10 = vld [vmem:[#allocation2 + $0xcc] sm:$0xf] }
 0x24c   : > { %v5075_v60 = vor.u32 %v5074_v48, %v5071_v16  ;;  %v5085_v59 = vor.u32 %v5084_v46, %v16360_v18  ;;  %v5095_v8 = vrot.slane %v5093_v57, 4  ;;  %v5098_v17 = vrot.slane %v5096_v41, 5  ;;  %v16391_v48 = vld [vmem:[#allocation2 + $0xd0] sm:$0xf]  ;;  %v4774_v41 = vld [vmem:[#allocation2 + $0xd8] sm:$0xf] }
 0x24d   : > { %v5057_v55 = vsel %vm14906_vm13, %v5052_v21, %v16334_v43  ;;  %v5067_v30 = vsel %vm14906_vm13, %v5062_v22, %v5066_v61  ;;  %v5090_v52 = vrot.slane %v5088_v5, 5  ;;  %v16384_v62 = vrot.slane %v5102_v9, 5  ;;  %v16395_v21 = vld [vmem:[#allocation2 + $0xdc] sm:$0xf] }
 0x24e   : > { %v5108_v25 = vrot.slane %v5106_v35, 4  ;;  %v5119_v27 = vrot.slane %v5117_v40, 4  ;;  %v12195_v33 = vcombine.low %v5009_v4, %v5019_v45  ;;  %v12196_v12 = vcombine.low %v5033_v7, %v5043_v29 }
 0x24f   : > { %v16388_v47 = vrot.slane %v5126_v38, 5  ;;  %v5076_v43 = vrot.slane %v5075_v60, 4  ;;  %v5086_v32 = vrot.slane %v5085_v59, 4  ;;  %v5099_v3 = vor.u32 %v5098_v17, %v5095_v8 }
 0x250   : > { %v5112_v16 = vshll.u32 %v16382_v44, 16  ;;  %v12197_v20 = vcombine.low %v5057_v55, %v5067_v30  ;;  %v5109_v46 = vor.u32 %v5108_v25, %v16384_v62  ;;  %v5136_v4 = vshll.u32 %v16386_v56, 16  ;;  %v16409_v25 = vld [vmem:[#allocation2 + $0xd4] sm:$0x1] }
 0x251   : > { %13454 = vmatmul.mubr.msk.bf16.gmra.mrb[12].mxu0 %vm1524_vm12, %v12193_v51  ;;  %v5122_v51 = vrot.slane %v5120_v14, 5  ;;  %v5141_v45 = vshrl.u32 %v4771_v10, 16  ;;  %v5144_v61 = vshll.u32 %v4771_v10, 16  ;;  %v5150_v5 = vshll.u32 %v16391_v48, 16 }
 0x252   : > { %13457 = vmatprep.mubr.msk.bf16.mxu0 %vm1524_vm12, %v12194_v0  ;;  %v5132_v0 = vrot.slane %v5130_v1, 4  ;;  %v5154_v9 = vshrl.u32 %v16391_v48, 16  ;;  %v5081_v35 = vsel %vm14906_vm13, %v5076_v43, %v16360_v18  ;;  %v5091_v40 = vsel %vm14906_vm13, %v5086_v32, %v5090_v52  ;;  %v4777_v52 = vld [vmem:[#allocation2 + $0xe4] sm:$0xf]  ;;  %v16411_v32 = vld [vmem:[#allocation2 + $0xe8] sm:$0xf] }
 0x253   : > { %v5123_v57 = vor.u32 %v5122_v51, %v5119_v27  ;;  %v5100_v14 = vrot.slane %v5099_v3, 4  ;;  %v5114_v7 = vrot.slane %v5112_v16, 5  ;;  %v5165_v29 = vshrl.u32 %v4774_v41, 16 }
 0x254   : > { %v5133_v22 = vor.u32 %v5132_v0, %v16388_v47  ;;  %v5168_v38 = vshll.u32 %v4774_v41, 16  ;;  %v5174_v1 = vshll.u32 %v16395_v21, 16  ;;  %v5178_v60 = vshrl.u32 %v16395_v21, 16 }
 0x255   : > { %v5110_v59 = vrot.slane %v5109_v46, 4  ;;  %v5124_v8 = vrot.slane %v5123_v57, 4  ;;  %v5138_v17 = vrot.slane %v5136_v4, 5  ;;  %v5143_v55 = vrot.slane %v5141_v45, 4  ;;  %v16419_v57 = vld [vmem:[#allocation2 + $0xe0] sm:$0x1] }
 0x256   : > { %v5134_v30 = vrot.slane %v5133_v22, 4  ;;  %v5146_v27 = vrot.slane %v5144_v61, 5  ;;  %v5152_v18 = vrot.slane %v5150_v5, 5  ;;  %v5156_v51 = vrot.slane %v5154_v9, 4 }
 0x257   : > { %v5170_v0 = vrot.slane %v5168_v38, 5  ;;  %v5176_v10 = vrot.slane %v5174_v1, 5  ;;  %v5180_v43 = vrot.slane %v5178_v60, 4  ;;  %v5105_v3 = vsel %vm14906_vm13, %v5100_v14, %v16384_v62 }
 0x258   : > { %v5115_v16 = vsel %vm14906_vm13, %v5110_v59, %v5114_v7  ;;  %v5160_v46 = vshll.u32 %v16409_v25, 16  ;;  %v5129_v4 = vsel %vm14906_vm13, %v5124_v8, %v16388_v47  ;;  %v5139_v45 = vsel %vm14906_vm13, %v5134_v30, %v5138_v17 }
 0x259   : > { %13458 = vmatmul.mubr.msk.bf16.gmra.mrb[16].mxu0 %vm1524_vm12, %v12195_v33  ;;  %v12198_v33 = vcombine.low %v5081_v35, %v5091_v40  ;;  %v5147_v41 = vor.u32 %v5146_v27, %v5143_v55  ;;  %v5157_v22 = vor.u32 %v5156_v51, %v5152_v18  ;;  %v5189_v62 = vshrl.u32 %v4777_v52, 16  ;;  %v16431_v27 = vld [vmem:[#allocation2 + $0xec] sm:$0x1] }
 0x25a   : > { %13461 = vmatprep.mubr.msk.bf16.mxu0 %vm1524_vm12, %v12196_v12  ;;  %v5167_v12 = vrot.slane %v5165_v29, 4  ;;  %v5192_v61 = vshll.u32 %v4777_v52, 16  ;;  %v5198_v5 = vshll.u32 %v16411_v32, 16  ;;  %v5202_v9 = vshrl.u32 %v16411_v32, 16 }
 0x25b   : > { %v5181_v40 = vor.u32 %v5180_v43, %v5176_v10  ;;  %v12199_v14 = vcombine.low %v5105_v3, %v5115_v16  ;;  %v12200_v7 = vcombine.low %v5129_v4, %v5139_v45  ;;  %v5148_v47 = vrot.slane %v5147_v41, 4 }
 0x25c   : > { %v5171_v35 = vor.u32 %v5170_v0, %v5167_v12  ;;  %v5158_v29 = vrot.slane %v5157_v22, 4  ;;  %v5162_v38 = vrot.slane %v5160_v46, 5  ;;  %v5191_v1 = vrot.slane %v5189_v62, 4  ;;  %v5538_v46 = vld [vmem:[#allocation2 + $0x18] sm:$0xe] }
 0x25d   : > { %v5194_v60 = vrot.slane %v5192_v61, 5  ;;  %v5200_v59 = vrot.slane %v5198_v5, 5  ;;  %v5204_v8 = vrot.slane %v5202_v9, 4  ;;  %v5182_v55 = vrot.slane %v5181_v40, 4  ;;  %v14596_v9 = vld [vmem:[#allocation2 + $0x28] sm:$0xf] }
 0x25e   : > { %v5172_v17 = vrot.slane %v5171_v35, 4  ;;  %v5153_v51 = vsel %vm14906_vm13, %v5148_v47, %v5152_v18  ;;  %v5208_v0 = vshll.u32 %v16431_v27, 16  ;;  %v5612_v16 = vrot.slane %v16021_v39, 5 }
 0x25f   : > { %v5195_v52 = vor.u32 %v5194_v60, %v5191_v1  ;;  %v5205_v12 = vor.u32 %v5204_v8, %v5200_v59  ;;  %v12222_v62 = vrot.slane %v5538_v46, 9  ;;  %v5615_v5 = vrot.slane %v16042_v11, 5  ;;  %v14597_v11 = vld [vmem:[#allocation2 + $0x34] sm:$0xf]  ;;  %v5541_v46 = vld [vmem:[#allocation2 + $0x3c] sm:$0xe] }
 0x260   : > { %v5177_v43 = vsel %vm14906_vm13, %v5172_v17, %v5176_v10  ;;  %v5210_v22 = vrot.slane %v5208_v0, 5  ;;  %v5614_v61 = vrot.slane %v5612_v16, 4  ;;  %v5619_v35 = vrot.slane %v14596_v9, 5  ;;  %v14598_v0 = vld [vmem:[#allocation2 + $0x40] sm:$0xf] }
 0x261   : > { %13462 = vmatmul.mubr.msk.bf16.gmra.mrb[20].mxu0 %vm1524_vm12, %v12197_v20  ;;  %v5184_v20 = vshll.u32 %v16419_v57, 16  ;;  %v5196_v45 = vrot.slane %v5195_v52, 4  ;;  %v5206_v41 = vrot.slane %v5205_v12, 4  ;;  %v5626_v47 = vrot.slane %v14597_v11, 5  ;;  %v5543_v11 = vld [vmem:[#allocation2 + $0x54] sm:$0xe] }
 0x262   : > { %13465 = vmatprep.mubr.msk.bf16.mxu0 %vm1524_vm12, %v12198_v33  ;;  %v5163_v33 = vsel %vm14906_vm13, %v5158_v29, %v5162_v38  ;;  %v5540_v29 = vld [vmem:[#allocation2 + $0x30] sm:$0xe]  ;;  %v5621_v8 = vrot.slane %v5619_v35, 4  ;;  %v5643_v9 = vrot.slane %v16078_v36, 5  ;;  %v5654_v36 = vrot.slane %v16116_v26, 5 }
 0x263   : > { %v5186_v30 = vrot.slane %v5184_v20, 5  ;;  %v12201_v4 = vcombine.low %v5153_v51, %v5163_v33  ;;  %v5201_v10 = vsel %vm14906_vm13, %v5196_v45, %v5200_v59  ;;  %v5211_v39 = vsel %vm14906_vm13, %v5206_v41, %v5210_v22  ;;  %v18858_v59 = vld [vmem:[#allocation10_spill] sm:$0xff]  ;;  %v18859_v51 = vld [vmem:[#allocation12_spill] sm:$0xff]  ;;  %v5542_v45 = vld [vmem:[#allocation2 + $0x48] sm:$0xe] }
 0x264   : > { %v5613_v20 = vsel %vm15299_vm1, %v12222_v62, %v5612_v16  ;;  %v12203_v38 = vcombine.low %v5201_v10, %v5211_v39  ;;  %v5622_v17 = vrot.slane %v18858_v59, 5  ;;  %v5629_v33 = vrot.slane %v18859_v51, 5 }
 0x265   : > { %v5187_v3 = vsel %vm14906_vm13, %v5182_v55, %v5186_v30  ;;  %v12224_v55 = vrot.slane %v5540_v29, 9  ;;  %v5628_v30 = vrot.slane %v5626_v47, 4  ;;  %v12225_v62 = vrot.slane %v5541_v46, 9 }
 0x266   : > { %v12202_v18 = vcombine.low %v5177_v43, %v5187_v3  ;;  %v5623_v12 = vsel %vm15299_vm1, %v5621_v8, %v5622_v17  ;;  %v5633_v43 = vrot.slane %v14598_v0, 5  ;;  %v12226_v10 = vrot.slane %v5542_v45, 9  ;;  %v18861_v8 = vld [vmem:[#allocation13_spill] sm:$0xff] }
 0x267   : > { %v5627_v3 = vsel %vm15299_vm1, %v12224_v55, %v5626_v47  ;;  %v5630_v16 = vsel %vm15299_vm1, %v5628_v30, %v5629_v33  ;;  %v5544_v47 = vld [vmem:[#allocation2 + $0x60] sm:$0xe]  ;;  %v5650_v59 = vrot.slane %v18861_v8, 5  ;;  %v5656_v55 = vrot.slane %v5654_v36, 4  ;;  %v5546_v0 = vld [vmem:[#allocation2 + $0x78] sm:$0xe] }
 0x268   : > { %v12243_v22 = vcombine.low %v5627_v3, %v5630_v16  ;;  %v12228_v17 = vrot.slane %v5544_v47, 9  ;;  %v5661_v51 = vrot.slane %v16159_v37, 5  ;;  %v5671_v37 = vrot.slane %v16240_v6, 5  ;;  %v5549_v47 = vld [vmem:[#allocation2 + $0x9c] sm:$0xe] }
 0x269   : > { %13466 = vmatmul.mubr.msk.bf16.gmra.mrb[24].mxu0 %vm1524_vm12, %v12199_v14  ;;  %v5616_v14 = vsel %vm15299_vm1, %v5614_v61, %v5615_v5  ;;  %v5635_v61 = vrot.slane %v5633_v43, 4  ;;  %v5636_v5 = vrot.slane %v16063_v50, 5  ;;  %v5682_v6 = vrot.slane %v16279_v53, 5 }
 0x26a   : > { %13469 = vmatprep.mubr.msk.bf16.mxu0 %vm1524_vm12, %v12200_v7  ;;  %v5539_v7 = vld [vmem:[#allocation2 + $0x24] sm:$0xe]  ;;  %v12241_v1 = vcombine.low %v5613_v20, %v5616_v14  ;;  %v5647_v14 = vrot.slane %v16076_v31, 5  ;;  %v5657_v31 = vrot.slane %v16142_v34, 5  ;;  %v5655_v33 = vsel %vm15299_vm1, %v12228_v17, %v5654_v36 }
 0x26b   : > { %v12223_v60 = vrot.slane %v5539_v7, 9  ;;  %v5637_v20 = vsel %vm15299_vm1, %v5635_v61, %v5636_v5  ;;  %v5668_v34 = vrot.slane %v16200_v54, 5  ;;  %v5663_v46 = vrot.slane %v5661_v51, 4  ;;  %v5547_v61 = vld [vmem:[#allocation2 + $0x84] sm:$0xe] }
 0x26c   : > { %v5548_v5 = vld [vmem:[#allocation2 + $0x90] sm:$0xe] }
 0x26d   : > { %v5620_v52 = vsel %vm15299_vm1, %v12223_v60, %v5619_v35  ;;  %v5634_v35 = vsel %vm15299_vm1, %v12225_v62, %v5633_v43  ;;  %v5649_v60 = vrot.slane %v5647_v14, 4  ;;  %v5670_v45 = vrot.slane %v5668_v34, 4 }
 0x26e   : > { %v12242_v41 = vcombine.low %v5620_v52, %v5623_v12  ;;  %v12244_v29 = vcombine.low %v5634_v35, %v5637_v20  ;;  %v5658_v52 = vsel %vm15299_vm1, %v5656_v55, %v5657_v31  ;;  %v5545_v12 = vld [vmem:[#allocation2 + $0x6c] sm:$0xe]  ;;  %v5678_v20 = vrot.slane %v16286_v13, 5 }
 0x26f   : > { %v5651_v26 = vsel %vm15299_vm1, %v5649_v60, %v5650_v59  ;;  %v12247_v3 = vcombine.low %v5655_v33, %v5658_v52  ;;  %v12229_v16 = vrot.slane %v5545_v12, 9  ;;  %v12233_v60 = vrot.slane %v5549_v47, 9  ;;  %v5552_v33 = vld [vmem:[#allocation2 + $0xc0] sm:$0xe] }
 0x270   : > { %v5692_v59 = vrot.slane %v16340_v58, 5 }
 0x271   : > { %13470 = vmatmul.mubr.msk.bf16.gmra.mrb[28].mxu0 %vm1524_vm12, %v12201_v4  ;;  %v18860_v4 = vld [vmem:[#allocation11_spill] sm:$0xff] }
 0x272   : > { %13473 = vmatprep.mubr.msk.bf16.mxu0 %vm1524_vm12, %v12202_v18  ;;  %v5640_v18 = vrot.slane %v18860_v4, 5  ;;  %v5664_v4 = vrot.slane %v16187_v2, 5  ;;  %v5672_v2 = vsel %vm15299_vm1, %v5670_v45, %v5671_v37  ;;  %v5553_v45 = vld [vmem:[#allocation2 + $0xcc] sm:$0xe]  ;;  %v5554_v37 = vld [vmem:[#allocation2 + $0xd8] sm:$0xe] }
 0x274   : > { %v5642_v39 = vrot.slane %v5640_v18, 4  ;;  %v5641_v7 = vsel %vm15299_vm1, %v12226_v10, %v5640_v18  ;;  %v12230_v18 = vrot.slane %v5546_v0, 9  ;;  %v5665_v54 = vsel %vm15299_vm1, %v5663_v46, %v5664_v4 }
 0x275   : > { %v5717_v4 = vrot.slane %v16391_v48, 5  ;;  %v5727_v48 = vrot.slane %v16419_v57, 5 }
 0x276   : > { %v5644_v50 = vsel %vm15299_vm1, %v5642_v39, %v5643_v9  ;;  %v5669_v62 = vsel %vm15299_vm1, %v12230_v18, %v5668_v34  ;;  %v12231_v9 = vrot.slane %v5547_v61, 9  ;;  %v12238_v61 = vrot.slane %v5554_v37, 9 }
 0x277   : > { %v12249_v39 = vcombine.low %v5669_v62, %v5672_v2  ;;  %v5719_v62 = vrot.slane %v5717_v4, 4  ;;  %v5720_v2 = vrot.slane %v16409_v25, 5 }
 0x279   : > { %13474 = vmatmul.mubr.msk.bf16.gmra.mrb[32].mxu0 %vm1524_vm12, %v12203_v38  ;;  %v12245_v38 = vcombine.low %v5641_v7, %v5644_v50  ;;  %v5684_v7 = vrot.slane %v5682_v6, 4 }
 0x27a   : > { %13479 = vmatprep.mubr.msk.bf16.mxu0 %vm1524_vm12, %v12241_v1  ;;  %v12227_v1 = vrot.slane %v5543_v11, 9  ;;  %v5689_v11 = vrot.slane %v16296_v15, 5  ;;  %v5699_v15 = vrot.slane %v16351_v28, 5  ;;  %v5710_v28 = vrot.slane %v16362_v42, 5 }
 0x27c   : > { %v5648_v30 = vsel %vm15299_vm1, %v12227_v1, %v5647_v14  ;;  %v12232_v14 = vrot.slane %v5548_v5, 9  ;;  %v5691_v8 = vrot.slane %v5689_v11, 4  ;;  %v5690_v31 = vsel %vm15299_vm1, %v12233_v60, %v5689_v11  ;;  %v6152_v60 = vld [vmem:[#allocation3 + $0x24] sm:$0x1] }
 0x27d   : > { %v12246_v43 = vcombine.low %v5648_v30, %v5651_v26  ;;  %v5703_v30 = vrot.slane %v16358_v19, 5  ;;  %v5713_v19 = vrot.slane %v16386_v56, 5  ;;  %v5724_v56 = vrot.slane %v16395_v21, 5 }
 0x27e   : > { %v5683_v36 = vsel %vm15299_vm1, %v12232_v14, %v5682_v6  ;;  %v5721_v21 = vsel %vm15299_vm1, %v5719_v62, %v5720_v2  ;;  %v6222_v62 = vld [vmem:[#allocation3 + $0x68] sm:$0x1] }
 0x27f   : > { %v5705_v0 = vrot.slane %v5703_v30, 4  ;;  %v5726_v6 = vrot.slane %v5724_v56, 4  ;;  %v6223_v2 = vsel %vm16586_vm5, 0, %v6222_v62 }
 0x280   : > { %6224 = vst [vmem:[#allocation3 + $0x68] sm:$0x1] %v6223_v2 }
 0x281   : > { %13480 = vmatmul.mubr.msk.bf16.vlgmr.msra.gmra.mrb[0].mxu0 %vm1524_vm12, %v12242_v41  ;;  %v5662_v41 = vsel %vm15299_vm1, %v12229_v16, %v5661_v51  ;;  %v5551_v51 = vld [vmem:[#allocation2 + $0xb4] sm:$0xe]  ;;  %v5712_v16 = vrot.slane %v5710_v28, 4  ;;  %v5728_v25 = vsel %vm15299_vm1, %v5726_v6, %v5727_v48  ;;  %v16639_v6 = vld [vmem:[%s18709_s2] sm:$0xff]  }
 0x282   : > { %13483 = vmatprep.mubr.msk.bf16.mxu0 %vm1524_vm12, %v12243_v22  ;;  %v5675_v22 = vrot.slane %v16247_v63, 5  ;;  %v12248_v10 = vcombine.low %v5662_v41, %v5665_v54  ;;  %v5685_v63 = vrot.slane %v16323_v24, 5  ;;  %v5696_v24 = vrot.slane %v16336_v49, 5 }
 0x283   : > { %v5693_v49 = vsel %vm15299_vm1, %v5691_v8, %v5692_v59  ;;  %v12235_v34 = vrot.slane %v5551_v51, 9  ;;  %v6153_v8 = vsel %vm16576_vm3, 0, %v6152_v60  ;;  %v6149_v59 = vld [vmem:[#allocation3 + $0x18] sm:$0x1]  ;;  %v6155_v51 = vld [vmem:[#allocation3 + $0x30] sm:$0x1] }
 0x284   : > { %v5677_v35 = vrot.slane %v5675_v22, 4  ;;  %v5676_v50 = vsel %vm15299_vm1, %v12231_v9, %v5675_v22  ;;  %v5686_v13 = vsel %vm15299_vm1, %v5684_v7, %v5685_v63  ;;  %v5698_v55 = vrot.slane %v5696_v24, 4  ;;  %v5555_v9 = vld [vmem:[#allocation2 + $0xe4] sm:$0xe]  ;;  %6154 = vst [vmem:[#allocation3 + $0x24] sm:$0x1] %v6153_v8 }
 0x285   : > { %v12251_v1 = vcombine.low %v5683_v36, %v5686_v13  ;;  %v12252_v52 = vcombine.low %v5690_v31, %v5693_v49  ;;  %v5704_v46 = vsel %vm15299_vm1, %v12235_v34, %v5703_v30  ;;  %v12237_v22 = vrot.slane %v5553_v45, 9  ;;  %v6143_v36 = vld [vmem:[#allocation3] sm:$0x1] }
 0x286   : > { %v5679_v53 = vsel %vm15299_vm1, %v5677_v35, %v5678_v20  ;;  %v5700_v58 = vsel %vm15299_vm1, %v5698_v55, %v5699_v15  ;;  %v12239_v20 = vrot.slane %v5555_v9, 9  ;;  %v5734_v7 = vrot.slane %v16431_v27, 5  ;;  %v6146_v27 = vld [vmem:[#allocation3 + $0xc] sm:$0x1]  ;;  %v14498_v55 = vld [vmem:[%s18709_s2 + $0x10] sm:$0xff]  }
 0x287   : > { %v5718_v5 = vsel %vm15299_vm1, %v12237_v22, %v5717_v4  ;;  %v6147_v11 = vsel %vm16576_vm3, 0, %v6146_v27  ;;  %v6144_v13 = vsel %vm16576_vm3, 0, %v6143_v36  ;;  %v6207_v15 = vld [vmem:[#allocation3 + $0x2c] sm:$0x1]  ;;  %13515 = vmatprep.subr.bf16.mxu1 %v14498_v55  ;;  %v6204_v49 = vld [vmem:[#allocation3 + $0x20] sm:$0x1] }
 0x288   : > { %v12256_v57 = vcombine.low %v5718_v5, %v5721_v21  ;;  %6148 = vst [vmem:[#allocation3 + $0xc] sm:$0x1] %v6147_v11  ;;  %6145 = vst [vmem:[#allocation3] sm:$0x1] %v6144_v13  ;;  %v6208_v31 = vsel %vm16586_vm5, 0, %v6207_v15  ;;  %13516 = vmatpush3.bf16.msra.mxu1 %v14498_v55  ;;  %v6205_v30 = vsel %vm16586_vm5, 0, %v6204_v49 }
 0x289   : > { %13484 = vmatmul.mubr.msk.bf16.gmra.mrb[4].mxu0 %vm1524_vm12, %v12244_v29  ;;  %v5550_v29 = vld [vmem:[#allocation2 + $0xa8] sm:$0xe]  ;;  %6209 = vst [vmem:[#allocation3 + $0x2c] sm:$0x1] %v6208_v31  ;;  %6206 = vst [vmem:[#allocation3 + $0x20] sm:$0x1] %v6205_v30 }
 0x28a   : > { %13487 = vmatprep.mubr.msk.bf16.mxu0 %vm1524_vm12, %v12245_v38  ;;  %v12250_v38 = vcombine.low %v5676_v50, %v5679_v53  ;;  %v12234_v17 = vrot.slane %v5550_v29, 9  ;;  %v6176_v21 = vld [vmem:[#allocation3 + $0x84] sm:$0x1]  ;;  %v6179_v11 = vld [vmem:[#allocation3 + $0x90] sm:$0x1] }
 0x28b   : > { %v6180_v36 = vsel %vm16576_vm3, 0, %v6179_v11  ;;  %v6237_v13 = vld [vmem:[#allocation3 + $0xa4] sm:$0x1]  ;;  %v6185_v15 = vld [vmem:[#allocation3 + $0xa8] sm:$0x1] }
 0x28c   : > { %v5697_v26 = vsel %vm15299_vm1, %v12234_v17, %v5696_v24  ;;  %v6201_v24 = vld [vmem:[#allocation3 + $0x14] sm:$0x1]  ;;  %v6150_v17 = vsel %vm16576_vm3, 0, %v6149_v59  ;;  %6181 = vst [vmem:[#allocation3 + $0x90] sm:$0x1] %v6180_v36  ;;  %v6186_v31 = vsel %vm16576_vm3, 0, %v6185_v15 }
 0x28d   : > { %v12253_v12 = vcombine.low %v5697_v26, %v5700_v58  ;;  %v6202_v29 = vsel %vm16586_vm5, 0, %v6201_v24  ;;  %6151 = vst [vmem:[#allocation3 + $0x18] sm:$0x1] %v6150_v17  ;;  %v6158_v26 = vld [vmem:[#allocation3 + $0x3c] sm:$0x1] }
 0x28e   : > { %6203 = vst [vmem:[#allocation3 + $0x14] sm:$0x1] %v6202_v29  ;;  %v6159_v58 = vsel %vm16576_vm3, 0, %v6158_v26  ;;  %v6234_v24 = vld [vmem:[#allocation3 + $0x98] sm:$0x1]  ;;  %v6238_v29 = vsel %vm16586_vm5, 0, %v6237_v13 }
 0x28f   : > { %6160 = vst [vmem:[#allocation3 + $0x3c] sm:$0x1] %v6159_v58  ;;  %6239 = vst [vmem:[#allocation3 + $0xa4] sm:$0x1] %v6238_v29  ;;  %v6188_v59 = vld [vmem:[#allocation3 + $0xb4] sm:$0x1] }
 0x290   : > { %v6189_v55 = vsel %vm16576_vm3, 0, %v6188_v59  ;;  %6187 = vst [vmem:[#allocation3 + $0xa8] sm:$0x1] %v6186_v31  ;;  %v6243_v49 = vld [vmem:[#allocation3 + $0xbc] sm:$0x1] }
 0x291   : > { %13488 = vmatmul.mubr.msk.bf16.gmra.mrb[8].mxu0 %vm1524_vm12, %v12246_v43  ;;  %v5706_v43 = vrot.slane %v16382_v44, 5  ;;  %v5714_v44 = vsel %vm15299_vm1, %v5712_v16, %v5713_v19  ;;  %v6219_v19 = vld [vmem:[#allocation3 + $0x5c] sm:$0x1]  ;;  %6190 = vst [vmem:[#allocation3 + $0xb4] sm:$0x1] %v6189_v55  ;;  %v6244_v30 = vsel %vm16586_vm5, 0, %v6243_v49 }
 0x292   : > { %13491 = vmatprep.mubr.msk.bf16.mxu0 %vm1524_vm12, %v12247_v3  ;;  %v12236_v3 = vrot.slane %v5552_v33, 9  ;;  %v6213_v33 = vld [vmem:[#allocation3 + $0x44] sm:$0x1]  ;;  %v6240_v26 = vld [vmem:[#allocation3 + $0xb0] sm:$0x1] }
 0x293   : > { %v5707_v42 = vsel %vm15299_vm1, %v5705_v0, %v5706_v43  ;;  %v6164_v0 = vld [vmem:[#allocation3 + $0x54] sm:$0x1]  ;;  %6245 = vst [vmem:[#allocation3 + $0xbc] sm:$0x1] %v6244_v30  ;;  %v6241_v58 = vsel %vm16586_vm5, 0, %v6240_v26 }
 0x294   : > { %v5711_v18 = vsel %vm15299_vm1, %v12236_v3, %v5710_v28  ;;  %v12254_v41 = vcombine.low %v5704_v46, %v5707_v42  ;;  %v6156_v28 = vsel %vm16576_vm3, 0, %v6155_v51  ;;  %v6165_v43 = vsel %vm16576_vm3, 0, %v6164_v0  ;;  %v6161_v3 = vld [vmem:[#allocation3 + $0x48] sm:$0x1]  ;;  %v6216_v42 = vld [vmem:[#allocation3 + $0x50] sm:$0x1] }
 0x295   : > { %v12255_v54 = vcombine.low %v5711_v18, %v5714_v44  ;;  %6157 = vst [vmem:[#allocation3 + $0x30] sm:$0x1] %v6156_v28  ;;  %6166 = vst [vmem:[#allocation3 + $0x54] sm:$0x1] %v6165_v43  ;;  %v6162_v16 = vsel %vm16576_vm3, 0, %v6161_v3  ;;  %v6220_v46 = vsel %vm16586_vm5, 0, %v6219_v19 }
 0x296   : > { %6163 = vst [vmem:[#allocation3 + $0x48] sm:$0x1] %v6162_v16  ;;  %6221 = vst [vmem:[#allocation3 + $0x5c] sm:$0x1] %v6220_v46  ;;  %v6217_v4 = vsel %vm16586_vm5, 0, %v6216_v42  ;;  %v14499_v18 = vld [vmem:[%s18709_s2 + $0x18] sm:$0xff]  }
 0x297   : > { %6218 = vst [vmem:[#allocation3 + $0x50] sm:$0x1] %v6217_v4  ;;  %13517 = vmatprep.subr.bf16.mxu1 %v14499_v18  ;;  %v6170_v44 = vld [vmem:[#allocation3 + $0x6c] sm:$0x1]  ;;  %6242 = vst [vmem:[#allocation3 + $0xb0] sm:$0x1] %v6241_v58 }
 0x298   : > { %13518 = vmatpush3.bf16.msra.mxu1 %v14499_v18  ;;  %v6171_v45 = vsel %vm16576_vm3, 0, %v6170_v44  ;;  %v6194_v28 = vld [vmem:[#allocation3 + $0xcc] sm:$0x1]  ;;  %v6191_v19 = vld [vmem:[#allocation3 + $0xc0] sm:$0x1] }
 0x299   : > { %13492 = vmatmul.mubr.msk.bf16.gmra.mrb[12].mxu0 %vm1524_vm12, %v12248_v10  ;;  %v5731_v10 = vrot.slane %v16411_v32, 5  ;;  %6172 = vst [vmem:[#allocation3 + $0x6c] sm:$0x1] %v6171_v45  ;;  %13551 = vmatprep.subr.bf16.mxu1 %v16639_v6  ;;  %v6249_v46 = vld [vmem:[#allocation3 + $0xd4] sm:$0x1]  ;;  %v6192_v44 = vsel %vm16576_vm3, 0, %v6191_v19 }
 0x29a   : > { %13495 = vmatprep.mubr.msk.bf16.mxu0 %vm1524_vm12, %v12249_v39  ;;  %v5725_v39 = vsel %vm15299_vm1, %v12238_v61, %v5724_v56  ;;  %v6167_v56 = vld [vmem:[#allocation3 + $0x60] sm:$0x1]  ;;  %6193 = vst [vmem:[#allocation3 + $0xc0] sm:$0x1] %v6192_v44  ;;  %v6730_v59 = vld [vmem:[#allocation3 + $0xc] sm:$0xf] }
 0x29b   : > { %v12257_v35 = vcombine.low %v5725_v39, %v5728_v25  ;;  %v5733_v14 = vrot.slane %v5731_v10, 4  ;;  %v5732_v32 = vsel %vm15299_vm1, %v12239_v20, %v5731_v10  ;;  %v6168_v37 = vsel %vm16576_vm3, 0, %v6167_v56  ;;  %v6173_v39 = vld [vmem:[#allocation3 + $0x78] sm:$0x1]  ;;  %v6231_v25 = vld [vmem:[#allocation3 + $0x8c] sm:$0x1] }
 0x29c   : > { %6169 = vst [vmem:[#allocation3 + $0x60] sm:$0x1] %v6168_v37  ;;  %v6177_v10 = vsel %vm16576_vm3, 0, %v6176_v21  ;;  %v6174_v9 = vsel %vm16576_vm3, 0, %v6173_v39  ;;  %v6250_v56 = vsel %vm16586_vm5, 0, %v6249_v46 }
 0x29d   : > { %v5735_v63 = vsel %vm15299_vm1, %v5733_v14, %v5734_v7  ;;  %6178 = vst [vmem:[#allocation3 + $0x84] sm:$0x1] %v6177_v10  ;;  %6175 = vst [vmem:[#allocation3 + $0x78] sm:$0x1] %v6174_v9  ;;  %v6246_v21 = vld [vmem:[#allocation3 + $0xc8] sm:$0x1] }
 0x29e   : > { %v12258_v50 = vcombine.low %v5732_v32, %v5735_v63  ;;  %v6182_v63 = vld [vmem:[#allocation3 + $0x9c] sm:$0x1]  ;;  %6251 = vst [vmem:[#allocation3 + $0xd4] sm:$0x1] %v6250_v56 }
 0x29f   : > { %v6183_v27 = vsel %vm16576_vm3, 0, %v6182_v63 }
 0x2a0   : > { %6184 = vst [vmem:[#allocation3 + $0x9c] sm:$0x1] %v6183_v27 }
 0x2a1   : > { %13496 = vmatmul.mubr.msk.bf16.gmra.mrb[16].mxu0 %vm1524_vm12, %v12250_v38  ;;  %v6198_v38 = vld [vmem:[#allocation3 + $0x8] sm:$0x1] }
 0x2a2   : > { %13499 = vmatprep.mubr.msk.bf16.mxu0 %vm1524_vm12, %v12251_v1  ;;  %v6199_v1 = vsel %vm16586_vm5, 0, %v6198_v38  ;;  %v6235_v38 = vsel %vm16586_vm5, 0, %v6234_v24 }
 0x2a3   : > { %6200 = vst [vmem:[#allocation3 + $0x8] sm:$0x1] %v6199_v1  ;;  %6236 = vst [vmem:[#allocation3 + $0x98] sm:$0x1] %v6235_v38 }
 0x2a9   : > { %13500 = vmatmul.mubr.msk.bf16.gmra.mrb[20].mxu0 %vm1524_vm12, %v12252_v52  ;;  %v6214_v52 = vsel %vm16586_vm5, 0, %v6213_v33  ;;  %v16691_v33 = vld [vmem:[%s18710_s3] ss:$0 sm:$0xff] }
 0x2aa   : > { %13503 = vmatprep.mubr.msk.bf16.mxu0 %vm1524_vm12, %v12253_v12  ;;  %6215 = vst [vmem:[#allocation3 + $0x44] sm:$0x1] %v6214_v52  ;;  %v6210_v12 = vld [vmem:[#allocation3 + $0x38] sm:$0x1]  ;;  %v6195_v52 = vsel %vm16576_vm3, 0, %v6194_v28 }
 0x2ab   : > { %v6211_v34 = vsel %vm16586_vm5, 0, %v6210_v12  ;;  %6196 = vst [vmem:[#allocation3 + $0xcc] sm:$0x1] %v6195_v52  ;;  %v6722_v28 = vld [vmem:[#allocation3] sm:$0xf] }
 0x2ac   : > { %6212 = vst [vmem:[#allocation3 + $0x38] sm:$0x1] %v6211_v34  ;;  %v6727_v44 = vld [vmem:[#allocation3 + $0x8] sm:$0x1] }
 0x2b1   : > { %13504 = vmatmul.mubr.msk.bf16.gmra.mrb[24].mxu0 %vm1524_vm12, %v12254_v41  ;;  %v6225_v41 = vld [vmem:[#allocation3 + $0x74] sm:$0x1] }
 0x2b2   : > { %13507 = vmatprep.mubr.msk.bf16.mxu0 %vm1524_vm12, %v12255_v54  ;;  %v6226_v54 = vsel %vm16586_vm5, 0, %v6225_v41 }
 0x2b3   : > { %6227 = vst [vmem:[#allocation3 + $0x74] sm:$0x1] %v6226_v54 }
 0x2b9   : > { %13508 = vmatmul.mubr.msk.bf16.gmra.mrb[28].mxu0 %vm1524_vm12, %v12256_v57  ;;  %v6232_v57 = vsel %vm16586_vm5, 0, %v6231_v25  ;;  %v6247_v25 = vsel %vm16586_vm5, 0, %v6246_v21 }
 0x2ba   : > { %13511 = vmatprep.mubr.msk.bf16.mxu0 %vm1524_vm12, %v12257_v35  ;;  %v6228_v35 = vld [vmem:[#allocation3 + $0x80] sm:$0x1]  ;;  %6233 = vst [vmem:[#allocation3 + $0x8c] sm:$0x1] %v6232_v57  ;;  %6248 = vst [vmem:[#allocation3 + $0xc8] sm:$0x1] %v6247_v25 }
 0x2bb   : > { %v6229_v20 = vsel %vm16586_vm5, 0, %v6228_v35 }
 0x2bc   : > { %6230 = vst [vmem:[#allocation3 + $0x80] sm:$0x1] %v6229_v20 }
 0x2c1   : > { %13512 = vmatmul.mubr.msk.bf16.gmra.mrb[32].mxu0 %vm1524_vm12, %v12258_v50 }
 0x2f9   : > { %v16630_v22 = vpop.f32.mrb[0].mxu1 }
 0x2fa   : > { %v16634_v61 = vpop.f32.mrb[1].mxu1 }
 0x2fb   : > { %v16641_v48 = vpop.f32.mrb[2].mxu1 }
 0x2fc   : > { %v16643_v5 = vpop.f32.mrb[3].mxu1 }
 0x304   : > { %v16654_v14 = vpop.f32.mrb[4].mxu1 }
 0x305   : > { %v16656_v7 = vpop.f32.mrb[5].mxu1 }
 0x306   : > { %v16658_v32 = vpop.f32.mrb[6].mxu1 }
 0x307   : > { %v16660_v50 = vpop.f32.mrb[7].mxu1 }
 0x30c   : > { %v16670_v1 = vpop.f32.mrb[8].mxu1 }
 0x30d   : > { %v16672_v60 = vpop.f32.mrb[9].mxu1 }
 0x30e   : > { %v16674_v8 = vpop.f32.mrb[10].mxu1 }
 0x30f   : > { %v16676_v17 = vpop.f32.mrb[11].mxu1 }
 0x319   : > { %v16686_v51 = vpop.f32.mrb[12].mxu1 }
 0x31a   : > { %v16697_v16 = vpop.f32.mrb[13].mxu1 }
 0x31b   : > { %v16702_v45 = vpop.f32.mrb[14].mxu1 }
 0x31c   : > { %v16707_v2 = vpop.f32.mrb[15].mxu1 }
 0x354   : > { %v13481_v12 = vpop.f32.mrb[0].mxu0 }
 0x355   : > { %v6071_v34 = vadd.f32 %v13481_v12, %v16691_v33  ;;  %v5883_v0 = vpop.f32.mrb[1].mxu0 }
 0x356   : > { %v6069_v43 = vadd.f32 %v16691_v33, %v5883_v0  ;;  %v13482_v3 = vpop.f32.mrb[2].mxu0 }
 0x357   : > { %v6107_v42 = vmax.f32 %v6071_v34, 0.0  ;;  %v6072_v4 = vadd.f32 %v13482_v3, %v16691_v33  ;;  %v5886_v18 = vpop.f32.mrb[3].mxu0  ;;  %v6734_v3 = vld [vmem:[#allocation3 + $0x14] sm:$0x1] }
 0x358   : > { %v6105_v37 = vmax.f32 %v6069_v43, 0.0  ;;  %v6070_v41 = vadd.f32 %v16691_v33, %v5886_v18 }
 0x359   : > { %v12773_v54 = vpack.c.bf16 %v6107_v42, %v6107_v42  ;;  %v6108_v62 = vmax.f32 %v6072_v4, 0.0 }
 0x35a   : > { %v12771_v10 = vpack.c.bf16 %v6105_v37, %v6105_v37  ;;  %v6106_v39 = vmax.f32 %v6070_v41, 0.0 }
 0x35b   : > { %v6378_v9 = vshrl.u32 %v12773_v54, 16  ;;  %v12774_v57 = vpack.c.bf16 %v6108_v62, %v6108_v62  ;;  %v6381_v35 = vshll.u32 %v12773_v54, 16 }
 0x35c   : > { %v6361_v20 = vshrl.u32 %v12771_v10, 16  ;;  %v6364_v63 = vshll.u32 %v12771_v10, 16  ;;  %v12772_v27 = vpack.c.bf16 %v6106_v39, %v6106_v39  ;;  %v13485_v11 = vpop.f32.mrb[4].mxu0 }
 0x35d   : > { %v6380_v36 = vrot.slane %v6378_v9, 7  ;;  %v6386_v13 = vshrl.u32 %v12774_v57, 16  ;;  %v6389_v24 = vshll.u32 %v12774_v57, 16  ;;  %v6075_v29 = vadd.f32 %v13485_v11, %v16691_v33  ;;  %v5899_v38 = vpop.f32.mrb[5].mxu0 }
 0x35e   : > { %v6363_v55 = vrot.slane %v6361_v20, 7  ;;  %v6369_v15 = vshrl.u32 %v12772_v27, 16  ;;  %v6372_v31 = vshll.u32 %v12772_v27, 16  ;;  %v6073_v49 = vadd.f32 %v16691_v33, %v5899_v38  ;;  %v13486_v30 = vpop.f32.mrb[6].mxu0  ;;  %v6744_v38 = vld [vmem:[#allocation3 + $0x24] sm:$0xf] }
 0x35f   : > { %v6383_v26 = vor.u32 %v6381_v35, %v6380_v36  ;;  %v6384_v58 = vrot.slane %v6380_v36, 4  ;;  %v6388_v52 = vrot.slane %v6386_v13, 7  ;;  %v6111_v12 = vmax.f32 %v6075_v29, 0.0  ;;  %v5902_v34 = vpop.f32.mrb[7].mxu0 }
 0x360   : > { %v6366_v0 = vor.u32 %v6364_v63, %v6363_v55  ;;  %v6367_v43 = vrot.slane %v6363_v55, 4  ;;  %v6371_v19 = vrot.slane %v6369_v15, 7  ;;  %v6109_v46 = vmax.f32 %v6073_v49, 0.0 }
 0x361   : > { %v6731_v42 = vsel %vm16714_vm6, %v6383_v26, %v6730_v59  ;;  %v6391_v4 = vor.u32 %v6389_v24, %v6388_v52  ;;  %v6393_v18 = vrot.slane %v6388_v52, 4  ;;  %v12777_v56 = vpack.c.bf16 %v6111_v12, %v6111_v12  ;;  %v6737_v26 = vld [vmem:[#allocation3 + $0x18] sm:$0xf] }
 0x362   : > { %6732 = vst [vmem:[#allocation3 + $0xc] sm:$0xf] %v6731_v42  ;;  %v6723_v37 = vsel %vm16714_vm6, %v6366_v0, %v6722_v28  ;;  %v6374_v41 = vor.u32 %v6372_v31, %v6371_v19  ;;  %v6376_v54 = vrot.slane %v6371_v19, 4  ;;  %v12775_v62 = vpack.c.bf16 %v6109_v46, %v6109_v46 }
 0x363   : > { %6724 = vst [vmem:[#allocation3] sm:$0xf] %v6723_v37  ;;  %v6392_v10 = vsel %vm14890_vm11, %v6384_v58, %v6391_v4  ;;  %v6735_v39 = vsel %vm16576_vm3, %v6393_v18, %v6734_v3  ;;  %v6412_v25 = vshrl.u32 %v12777_v56, 16  ;;  %v18869_v9 = vmov 0  }
 0x364   : > { %6853 = vst.msk [vmem:[#allocation3] sm:$0xf] %vm6720_vm2, %v18869_v9  ;;  %6733 = vst.msk [vmem:[#allocation3 + $0x10] sm:$0xf] %vm6720_vm2, %v6392_v10  ;;  %v6375_v57 = vsel %vm14890_vm11, %v6367_v43, %v6374_v41  ;;  %v6728_v35 = vsel %vm16576_vm3, %v6376_v54, %v6727_v44  ;;  %v6415_v20 = vshll.u32 %v12777_v56, 16  ;;  %v6395_v63 = vshrl.u32 %v12775_v62, 16 }
 0x365   : > { %6736 = vst [vmem:[#allocation3 + $0x14] sm:$0x1] %v6735_v39  ;;  %v13489_v27 = vpop.f32.mrb[8].mxu0  ;;  %6726 = vst.msk [vmem:[#allocation3 + $0x4] sm:$0xf] %vm6720_vm2, %v6375_v57  ;;  %v16735_v11 = vrot.slane %v6412_v25, 7  ;;  %v6076_v36 = vadd.f32 %v13486_v30, %v16691_v33  ;;  %v6074_v13 = vadd.f32 %v16691_v33, %v5902_v34 }
 0x366   : > { %6729 = vst [vmem:[#allocation3 + $0x8] sm:$0x1] %v6728_v35  ;;  %v6079_v24 = vadd.f32 %v13489_v27, %v16691_v33  ;;  %v5915_v29 = vpop.f32.mrb[9].mxu0  ;;  %6854 = vst.msk [vmem:[#allocation3 + $0x4] sm:$0xf] %vm6720_vm2, %v18869_v9  ;;  %v6397_v59 = vrot.slane %v6395_v63, 7 }
 0x367   : > { %6856 = vst.msk [vmem:[#allocation3 + $0x8] sm:$0x1] %vm6141_vm0, %v18869_v9  ;;  %v6398_v55 = vshll.u32 %v12775_v62, 16  ;;  %v6077_v15 = vadd.f32 %v16691_v33, %v5915_v29  ;;  %v13490_v31 = vpop.f32.mrb[10].mxu0  ;;  %v6417_v49 = vor.u32 %v6415_v20, %v16735_v11  ;;  %v6418_v30 = vrot.slane %v16735_v11, 4 }
 0x368   : > { %v6112_v58 = vmax.f32 %v6076_v36, 0.0  ;;  %v6110_v28 = vmax.f32 %v6074_v13, 0.0  ;;  %v5918_v52 = vpop.f32.mrb[11].mxu0  ;;  %v6401_v34 = vrot.slane %v6397_v59, 4  ;;  %v6115_v0 = vmax.f32 %v6079_v24, 0.0 }
 0x369   : > { %v6400_v12 = vor.u32 %v6398_v55, %v6397_v59  ;;  %v6113_v43 = vmax.f32 %v6077_v15, 0.0  ;;  %v6745_v3 = vsel %vm16714_vm6, %v6417_v49, %v6744_v38  ;;  %v6080_v42 = vadd.f32 %v13490_v31, %v16691_v33  ;;  %v6748_v10 = vld [vmem:[#allocation3 + $0x2c] sm:$0x1]  ;;  %v6741_v39 = vld [vmem:[#allocation3 + $0x20] sm:$0x1] }
 0x36a   : > { %v12778_v19 = vpack.c.bf16 %v6112_v58, %v6112_v58  ;;  %v12776_v46 = vpack.c.bf16 %v6110_v28, %v6110_v28  ;;  %6746 = vst [vmem:[#allocation3 + $0x24] sm:$0xf] %v6745_v3  ;;  %v12781_v18 = vpack.c.bf16 %v6115_v0, %v6115_v0  ;;  %v6078_v56 = vadd.f32 %v16691_v33, %v5918_v52  ;;  %v6758_v38 = vld [vmem:[#allocation3 + $0x3c] sm:$0xf]  ;;  %v6751_v52 = vld [vmem:[#allocation3 + $0x30] sm:$0xf] }
 0x36b   : > { %v6738_v4 = vsel %vm16714_vm6, %v6400_v12, %v6737_v26  ;;  %v12779_v44 = vpack.c.bf16 %v6113_v43, %v6113_v43  ;;  %v6116_v36 = vmax.f32 %v6080_v42, 0.0 }
 0x36c   : > { %6739 = vst [vmem:[#allocation3 + $0x18] sm:$0xf] %v6738_v4  ;;  %v6420_v37 = vshrl.u32 %v12778_v19, 16  ;;  %v6423_v41 = vshll.u32 %v12778_v19, 16  ;;  %v6403_v54 = vshrl.u32 %v12776_v46, 16  ;;  %v6406_v62 = vshll.u32 %v12776_v46, 16 }
 0x36d   : > { %v6446_v25 = vshrl.u32 %v12781_v18, 16  ;;  %v6449_v57 = vshll.u32 %v12781_v18, 16  ;;  %v6429_v35 = vshrl.u32 %v12779_v44, 16  ;;  %v6432_v20 = vshll.u32 %v12779_v44, 16  ;;  %v13493_v63 = vpop.f32.mrb[12].mxu0 }
 0x36e   : > { %v6422_v27 = vrot.slane %v6420_v37, 7  ;;  %v6405_v11 = vrot.slane %v6403_v54, 7  ;;  %v6114_v13 = vmax.f32 %v6078_v56, 0.0  ;;  %v5931_v24 = vpop.f32.mrb[13].mxu0  ;;  %v6083_v55 = vadd.f32 %v13493_v63, %v16691_v33 }
 0x36f   : > { %v16753_v29 = vrot.slane %v6446_v25, 7  ;;  %v16755_v59 = vrot.slane %v6429_v35, 7  ;;  %v6081_v15 = vadd.f32 %v16691_v33, %v5931_v24  ;;  %v13494_v31 = vpop.f32.mrb[14].mxu0  ;;  %v12782_v56 = vpack.c.bf16 %v6116_v36, %v6116_v36 }
 0x370   : > { %v6425_v49 = vor.u32 %v6423_v41, %v6422_v27  ;;  %v6427_v26 = vrot.slane %v6422_v27, 4  ;;  %v6408_v58 = vor.u32 %v6406_v62, %v6405_v11  ;;  %v6410_v28 = vrot.slane %v6405_v11, 4  ;;  %v5934_v12 = vpop.f32.mrb[15].mxu0 }
 0x371   : > { %v6451_v0 = vor.u32 %v6449_v57, %v16753_v29  ;;  %v6452_v43 = vrot.slane %v16753_v29, 4  ;;  %v6434_v3 = vor.u32 %v6432_v20, %v16755_v59  ;;  %v6435_v19 = vrot.slane %v16755_v59, 4  ;;  %v6762_v20 = vld [vmem:[#allocation3 + $0x44] sm:$0x1] }
 0x372   : > { %v6426_v46 = vsel %vm14890_vm11, %v6418_v30, %v6425_v49  ;;  %v6749_v42 = vsel %vm16576_vm3, %v6427_v26, %v6748_v10  ;;  %v6409_v4 = vsel %vm14890_vm11, %v6401_v34, %v6408_v58  ;;  %v6742_v18 = vsel %vm16576_vm3, %v6410_v28, %v6741_v39 }
 0x373   : > { %6747 = vst.msk [vmem:[#allocation3 + $0x28] sm:$0xf] %vm6720_vm2, %v6426_v46  ;;  %6750 = vst [vmem:[#allocation3 + $0x2c] sm:$0x1] %v6749_v42  ;;  %v6759_v44 = vsel %vm16714_vm6, %v6451_v0, %v6758_v38  ;;  %v6752_v30 = vsel %vm16714_vm6, %v6434_v3, %v6751_v52  ;;  %v12780_v37 = vpack.c.bf16 %v6114_v13, %v6114_v13  ;;  %v6119_v34 = vmax.f32 %v6083_v55, 0.0 }
 0x374   : > { %6740 = vst.msk [vmem:[#allocation3 + $0x1c] sm:$0xf] %vm6720_vm2, %v6409_v4  ;;  %6743 = vst [vmem:[#allocation3 + $0x20] sm:$0x1] %v6742_v18  ;;  %v6117_v41 = vmax.f32 %v6081_v15, 0.0  ;;  %v6084_v54 = vadd.f32 %v13494_v31, %v16691_v33  ;;  %v6082_v62 = vadd.f32 %v16691_v33, %v5934_v12  ;;  %v6454_v10 = vshrl.u32 %v12782_v56, 16 }
 0x375   : > { %6760 = vst [vmem:[#allocation3 + $0x3c] sm:$0xf] %v6759_v44  ;;  %6753 = vst [vmem:[#allocation3 + $0x30] sm:$0xf] %v6752_v30  ;;  %v6457_v39 = vshll.u32 %v12782_v56, 16  ;;  %v6437_v25 = vshrl.u32 %v12780_v37, 16  ;;  %v12785_v63 = vpack.c.bf16 %v6119_v34, %v6119_v34 }
 0x376   : > { %v6440_v57 = vshll.u32 %v12780_v37, 16  ;;  %v13497_v35 = vpop.f32.mrb[16].mxu0  ;;  %v12783_v27 = vpack.c.bf16 %v6117_v41, %v6117_v41  ;;  %v6120_v11 = vmax.f32 %v6084_v54, 0.0  ;;  %v6118_v24 = vmax.f32 %v6082_v62, 0.0  ;;  %v6755_v38 = vld [vmem:[#allocation3 + $0x38] sm:$0x1] }
 0x377   : > { %v5947_v36 = vpop.f32.mrb[17].mxu0  ;;  %v6456_v13 = vrot.slane %v6454_v10, 7  ;;  %v6439_v29 = vrot.slane %v6437_v25, 7  ;;  %v6087_v59 = vadd.f32 %v13497_v35, %v16691_v33  ;;  %v6480_v31 = vshrl.u32 %v12785_v63, 16  ;;  %v6772_v34 = vld [vmem:[#allocation3 + $0x54] sm:$0xf] }
 0x378   : > { %v6085_v55 = vadd.f32 %v16691_v33, %v5947_v36  ;;  %v13498_v15 = vpop.f32.mrb[18].mxu0  ;;  %v6483_v49 = vshll.u32 %v12785_v63, 16  ;;  %v6463_v26 = vshrl.u32 %v12783_v27, 16  ;;  %v6466_v58 = vshll.u32 %v12783_v27, 16  ;;  %v6765_v41 = vld [vmem:[#allocation3 + $0x48] sm:$0xf] }
 0x379   : > { %v5950_v28 = vpop.f32.mrb[19].mxu0  ;;  %v6459_v52 = vor.u32 %v6457_v39, %v6456_v13  ;;  %v6461_v12 = vrot.slane %v6456_v13, 4  ;;  %v6442_v0 = vor.u32 %v6440_v57, %v6439_v29  ;;  %v6444_v3 = vrot.slane %v6439_v29, 4  ;;  %v6861_v39 = vld [vmem:[#allocation3] sm:$0xf] }
 0x37a   : > { %v6482_v46 = vrot.slane %v6480_v31, 7  ;;  %v6465_v42 = vrot.slane %v6463_v26, 7  ;;  %v12786_v4 = vpack.c.bf16 %v6120_v11, %v6120_v11  ;;  %v12784_v18 = vpack.c.bf16 %v6118_v24, %v6118_v24  ;;  %v6776_v11 = vld [vmem:[#allocation3 + $0x5c] sm:$0x1]  ;;  %v6769_v24 = vld [vmem:[#allocation3 + $0x50] sm:$0x1] }
 0x37b   : > { %v6460_v44 = vsel %vm14890_vm11, %v6452_v43, %v6459_v52  ;;  %v6763_v30 = vsel %vm16576_vm3, %v6461_v12, %v6762_v20  ;;  %v6443_v56 = vsel %vm14890_vm11, %v6435_v19, %v6442_v0  ;;  %v6756_v37 = vsel %vm16576_vm3, %v6444_v3, %v6755_v38 }
 0x37c   : > { %6761 = vst.msk [vmem:[#allocation3 + $0x40] sm:$0xf] %vm6720_vm2, %v6460_v44  ;;  %6764 = vst [vmem:[#allocation3 + $0x44] sm:$0x1] %v6763_v30  ;;  %v6485_v54 = vor.u32 %v6483_v49, %v6482_v46  ;;  %v6486_v62 = vrot.slane %v6482_v46, 4  ;;  %v6468_v43 = vor.u32 %v6466_v58, %v6465_v42  ;;  %v6469_v10 = vrot.slane %v6465_v42, 4 }
 0x37d   : > { %6754 = vst.msk [vmem:[#allocation3 + $0x34] sm:$0xf] %vm6720_vm2, %v6443_v56  ;;  %6757 = vst [vmem:[#allocation3 + $0x38] sm:$0x1] %v6756_v37  ;;  %v6488_v25 = vshrl.u32 %v12786_v4, 16  ;;  %v6491_v57 = vshll.u32 %v12786_v4, 16  ;;  %v6088_v49 = vadd.f32 %v13498_v15, %v16691_v33  ;;  %v6086_v26 = vadd.f32 %v16691_v33, %v5950_v28 }
 0x37e   : > { %v6471_v35 = vshrl.u32 %v12784_v18, 16  ;;  %v6474_v19 = vshll.u32 %v12784_v18, 16  ;;  %v16791_v20 = vpop.f32.mrb[20].mxu0  ;;  %v6773_v63 = vsel %vm16714_vm6, %v6485_v54, %v6772_v34  ;;  %v6766_v27 = vsel %vm16714_vm6, %v6468_v43, %v6765_v41  ;;  %v6862_v37 = vld [vmem:[#allocation3 + $0x4] sm:$0xf] }
 0x37f   : > { %v6123_v36 = vmax.f32 %v6087_v59, 0.0  ;;  %v6121_v13 = vmax.f32 %v6085_v55, 0.0  ;;  %v16797_v29 = vpop.f32.mrb[21].mxu0  ;;  %6774 = vst [vmem:[#allocation3 + $0x54] sm:$0xf] %v6773_v63  ;;  %v6490_v38 = vrot.slane %v6488_v25, 7 }
 0x380   : > { %6767 = vst [vmem:[#allocation3 + $0x48] sm:$0xf] %v6766_v27  ;;  %v6473_v31 = vrot.slane %v6471_v35, 7  ;;  %v16801_v58 = vpop.f32.mrb[22].mxu0  ;;  %v6914_v0 = vshrl.u32 %v6861_v39, 16  ;;  %v6917_v3 = vshll.u32 %v6861_v39, 16 }
 0x381   : > { %v12789_v52 = vpack.c.bf16 %v6123_v36, %v6123_v36  ;;  %v12787_v12 = vpack.c.bf16 %v6121_v13, %v6121_v13  ;;  %v16803_v46 = vpop.f32.mrb[23].mxu0  ;;  %v6493_v59 = vor.u32 %v6491_v57, %v6490_v38  ;;  %v6495_v55 = vrot.slane %v6490_v38, 4  ;;  %v6786_v54 = vld [vmem:[#allocation3 + $0x6c] sm:$0xf]  ;;  %v6779_v43 = vld [vmem:[#allocation3 + $0x60] sm:$0xf] }
 0x382   : > { %v6476_v42 = vor.u32 %v6474_v19, %v6473_v31  ;;  %v6478_v4 = vrot.slane %v6473_v31, 4  ;;  %v6122_v57 = vmax.f32 %v6086_v26, 0.0  ;;  %v6897_v35 = vld [vmem:[#allocation3 + $0x8] sm:$0x1]  ;;  %v6916_v19 = vrot.slane %v6914_v0, 4 }
 0x383   : > { %v6514_v18 = vshrl.u32 %v12789_v52, 16  ;;  %v6517_v44 = vshll.u32 %v12789_v52, 16  ;;  %v6497_v30 = vshrl.u32 %v12787_v12, 16  ;;  %v6500_v56 = vshll.u32 %v12787_v12, 16 }
 0x384   : > { %v6494_v15 = vsel %vm14890_vm11, %v6486_v62, %v6493_v59  ;;  %v6777_v28 = vsel %vm16576_vm3, %v6495_v55, %v6776_v11  ;;  %v6477_v34 = vsel %vm14890_vm11, %v6469_v10, %v6476_v42  ;;  %v6770_v41 = vsel %vm16576_vm3, %v6478_v4, %v6769_v24  ;;  %v16815_v11 = vpop.f32.mrb[24].mxu0 }
 0x385   : > { %6775 = vst.msk [vmem:[#allocation3 + $0x58] sm:$0xf] %vm6720_vm2, %v6494_v15  ;;  %6778 = vst [vmem:[#allocation3 + $0x5c] sm:$0x1] %v6777_v28  ;;  %v6516_v39 = vrot.slane %v6514_v18, 7  ;;  %v6499_v25 = vrot.slane %v6497_v30, 7  ;;  %v12788_v12 = vpack.c.bf16 %v6122_v57, %v6122_v57 }
 0x386   : > { %6768 = vst.msk [vmem:[#allocation3 + $0x4c] sm:$0xf] %vm6720_vm2, %v6477_v34  ;;  %6771 = vst [vmem:[#allocation3 + $0x50] sm:$0x1] %v6770_v41  ;;  %v6124_v62 = vmax.f32 %v6088_v49, 0.0  ;;  %v6919_v63 = vrot.slane %v6917_v3, 5 }
 0x387   : > { %v6923_v27 = vshll.u32 %v6862_v37, 16  ;;  %v6927_v10 = vshrl.u32 %v6862_v37, 16  ;;  %v6519_v24 = vor.u32 %v6517_v44, %v6516_v39  ;;  %v6520_v36 = vrot.slane %v6516_v39, 4  ;;  %v16817_v31 = vpop.f32.mrb[25].mxu0  ;;  %v6863_v49 = vld [vmem:[#allocation3 + $0xc] sm:$0xf] }
 0x388   : > { %v6502_v13 = vor.u32 %v6500_v56, %v6499_v25  ;;  %v6503_v38 = vrot.slane %v6499_v25, 4  ;;  %v12790_v52 = vpack.c.bf16 %v6124_v62, %v6124_v62  ;;  %v6920_v59 = vor.u32 %v6919_v63, %v6916_v19  ;;  %v16819_v26 = vpop.f32.mrb[26].mxu0  ;;  %v6864_v18 = vld [vmem:[#allocation3 + $0x10] sm:$0xf]  ;;  %v6783_v19 = vld [vmem:[#allocation3 + $0x68] sm:$0x1] }
 0x389   : > { %v6925_v55 = vrot.slane %v6923_v27, 5  ;;  %v6787_v0 = vsel %vm16714_vm6, %v6519_v24, %v6786_v54  ;;  %v6929_v42 = vrot.slane %v6927_v10, 4  ;;  %v6933_v4 = vshll.u32 %v6897_v35, 16  ;;  %v16825_v44 = vpop.f32.mrb[27].mxu0  ;;  %v6790_v54 = vld [vmem:[#allocation3 + $0x74] sm:$0x1] }
 0x38a   : > { %v6780_v3 = vsel %vm16714_vm6, %v6502_v13, %v6779_v43  ;;  %6788 = vst [vmem:[#allocation3 + $0x6c] sm:$0xf] %v6787_v0  ;;  %v6522_v30 = vshrl.u32 %v12790_v52, 16  ;;  %v6525_v56 = vshll.u32 %v12790_v52, 16  ;;  %v6505_v37 = vshrl.u32 %v12788_v12, 16 }
 0x38b   : > { %6781 = vst [vmem:[#allocation3 + $0x60] sm:$0xf] %v6780_v3  ;;  %v6508_v15 = vshll.u32 %v12788_v12, 16  ;;  %v6921_v28 = vrot.slane %v6920_v59, 4  ;;  %v6930_v34 = vor.u32 %v6929_v42, %v6925_v55  ;;  %v6935_v41 = vrot.slane %v6933_v4, 5 }
 0x38c   : > { %v6938_v39 = vshrl.u32 %v6863_v49, 16  ;;  %v6524_v25 = vrot.slane %v6522_v30, 7  ;;  %v6507_v62 = vrot.slane %v6505_v37, 7  ;;  %v6941_v57 = vshll.u32 %v6863_v49, 16  ;;  %v6898_v59 = vld [vmem:[#allocation3 + $0x14] sm:$0x1] }
 0x38d   : > { %v6947_v43 = vshll.u32 %v6864_v18, 16  ;;  %v6926_v35 = vsel %vm14906_vm13, %v6921_v28, %v6925_v55  ;;  %v6931_v63 = vrot.slane %v6930_v34, 4  ;;  %v6951_v10 = vshrl.u32 %v6864_v18, 16  ;;  %v16829_v0 = vpop.f32.mrb[28].mxu0 }
 0x38e   : > { %v6940_v27 = vrot.slane %v6938_v39, 4  ;;  %v6527_v24 = vor.u32 %v6525_v56, %v6524_v25  ;;  %v6529_v13 = vrot.slane %v6524_v25, 4  ;;  %v6510_v52 = vor.u32 %v6508_v15, %v6507_v62  ;;  %v16833_v30 = vpop.f32.mrb[29].mxu0  ;;  %v6865_v15 = vld [vmem:[#allocation3 + $0x18] sm:$0xf] }
 0x38f   : > { %v6512_v12 = vrot.slane %v6507_v62, 4  ;;  %v6936_v3 = vsel %vm14906_vm13, %v6931_v63, %v6935_v41  ;;  %v6943_v42 = vrot.slane %v6941_v57, 5  ;;  %v6949_v49 = vrot.slane %v6947_v43, 5  ;;  %v16843_v28 = vpop.f32.mrb[30].mxu0 }
 0x390   : > { %v6953_v4 = vrot.slane %v6951_v10, 4  ;;  %v6528_v55 = vsel %vm14890_vm11, %v6520_v36, %v6527_v24  ;;  %v6791_v18 = vsel %vm16576_vm3, %v6529_v13, %v6790_v54  ;;  %v6511_v56 = vsel %vm14890_vm11, %v6503_v38, %v6510_v52  ;;  %v16847_v25 = vpop.f32.mrb[31].mxu0 }
 0x391   : > { %v6784_v37 = vsel %vm16576_vm3, %v6512_v12, %v6783_v19  ;;  %6789 = vst.msk [vmem:[#allocation3 + $0x70] sm:$0xf] %vm6720_vm2, %v6528_v55  ;;  %6792 = vst [vmem:[#allocation3 + $0x74] sm:$0x1] %v6791_v18  ;;  %v12318_v34 = vcombine.low %v6926_v35, %v6936_v3  ;;  %v6944_v36 = vor.u32 %v6943_v42, %v6940_v27  ;;  %v6957_v39 = vshll.u32 %v6898_v59, 16  ;;  %v14501_v3 = vld [vmem:[%s18709_s2 + $0x8] sm:$0xff]  }
 0x392   : > { %6782 = vst.msk [vmem:[#allocation3 + $0x64] sm:$0xf] %vm6720_vm2, %v6511_v56  ;;  %6785 = vst [vmem:[#allocation3 + $0x68] sm:$0x1] %v6784_v37  ;;  %v6954_v41 = vor.u32 %v6953_v4, %v6949_v49  ;;  %v13841_v38 = vadd.f32 %v16791_v20, %v16630_v22  ;;  %v13842_v54 = vadd.f32 %v16797_v29, %v16634_v61  ;;  %v6962_v63 = vshrl.u32 %v6865_v15, 16 }
 0x393   : > { %v13843_v62 = vadd.f32 %v16801_v58, %v16641_v48  ;;  %v13844_v57 = vadd.f32 %v16803_v46, %v16643_v5  ;;  %13519 = vmatprep.mubr.msk.bf16.mxu1 %vm7362_vm4, %v12318_v34  ;;  %v6945_v43 = vrot.slane %v6944_v36, 4  ;;  %v6959_v35 = vrot.slane %v6957_v39, 5  ;;  %v6866_v20 = vld [vmem:[#allocation3 + $0x1c] sm:$0xf]  ;;  %v6899_v29 = vld [vmem:[#allocation3 + $0x20] sm:$0x1] }
 0x394   : > { %v6955_v19 = vrot.slane %v6954_v41, 4  ;;  %v6091_v27 = vadd.f32 %v13841_v38, %v16691_v33  ;;  %v6089_v10 = vadd.f32 %v13842_v54, %v16691_v33  ;;  %v6964_v58 = vrot.slane %v6962_v63, 4  ;;  %v16866_v59 = vpop.f32.mrb[32].mxu0 }
 0x395   : > { %v6092_v22 = vadd.f32 %v13843_v62, %v16691_v33  ;;  %v6090_v61 = vadd.f32 %v13844_v57, %v16691_v33  ;;  %v6950_v48 = vsel %vm14906_vm13, %v6945_v43, %v6949_v49  ;;  %v6965_v46 = vshll.u32 %v6865_v15, 16  ;;  %v16871_v18 = vpop.f32.mrb[33].mxu0  ;;  %v6867_v62 = vld [vmem:[#allocation3 + $0x24] sm:$0xf] }
 0x396   : > { %v6960_v5 = vsel %vm14906_vm13, %v6955_v19, %v6959_v35  ;;  %v6127_v13 = vmax.f32 %v6091_v27, 0.0  ;;  %v6125_v52 = vmax.f32 %v6089_v10, 0.0  ;;  %v6971_v55 = vshll.u32 %v6866_v20, 16  ;;  %v16874_v36 = vpop.f32.mrb[34].mxu0  ;;  %v14502_v27 = vld [vmem:[%s18709_s2 + $0x20] sm:$0xff]  }
 0x397   : > { %v12319_v24 = vcombine.low %v6950_v48, %v6960_v5  ;;  %v6128_v12 = vmax.f32 %v6092_v22, 0.0  ;;  %v6126_v42 = vmax.f32 %v6090_v61, 0.0  ;;  %v6967_v4 = vrot.slane %v6965_v46, 5  ;;  %v16877_v57 = vpop.f32.mrb[35].mxu0  ;;  %v6800_v10 = vld [vmem:[#allocation3 + $0x84] sm:$0xf] }
 0x398   : > { %v6975_v49 = vshrl.u32 %v6866_v20, 16  ;;  %v12793_v56 = vpack.c.bf16 %v6127_v13, %v6127_v13  ;;  %v12791_v37 = vpack.c.bf16 %v6125_v52, %v6125_v52  ;;  %v6981_v34 = vshll.u32 %v6899_v29, 16  ;;  %v6793_v29 = vld [vmem:[#allocation3 + $0x78] sm:$0xf]  ;;  %v6804_v13 = vld [vmem:[#allocation3 + $0x8c] sm:$0x1] }
 0x399   : > { %13520 = vmatmul.mubr.msk.bf16.vlgmr.msra.gmra.mrb[16].mxu1 %vm7362_vm4, %v12319_v24  ;;  %v12794_v15 = vpack.c.bf16 %v6128_v12, %v6128_v12  ;;  %v12792_v41 = vpack.c.bf16 %v6126_v42, %v6126_v42  ;;  %v6968_v39 = vor.u32 %v6967_v4, %v6964_v58  ;;  %v6973_v38 = vrot.slane %v6971_v55, 5 }
 0x39a   : > { %13552 = vmatpush3.bf16.msra.mxu1 %v16639_v6  ;;  %v6977_v54 = vrot.slane %v6975_v49, 4  ;;  %v6548_v43 = vshrl.u32 %v12793_v56, 16  ;;  %v6551_v19 = vshll.u32 %v12793_v56, 16  ;;  %v6531_v35 = vshrl.u32 %v12791_v37, 16 }
 0x39b   : > { %v6534_v63 = vshll.u32 %v12791_v37, 16  ;;  %13553 = vmatprep.subr.bf16.mxu1 %v14501_v3  ;;  %v6556_v22 = vshrl.u32 %v12794_v15, 16  ;;  %v6559_v61 = vshll.u32 %v12794_v15, 16  ;;  %v6539_v6 = vshrl.u32 %v12792_v41, 16  ;;  %v6797_v37 = vld [vmem:[#allocation3 + $0x80] sm:$0x1] }
 0x39c   : > { %v6542_v20 = vshll.u32 %v12792_v41, 16  ;;  %v6550_v48 = vrot.slane %v6548_v43, 7  ;;  %v6533_v5 = vrot.slane %v6531_v35, 7  ;;  %v6969_v58 = vrot.slane %v6968_v39, 4  ;;  %v6868_v35 = vld [vmem:[#allocation3 + $0x28] sm:$0xf] }
 0x39d   : > { %v6978_v46 = vor.u32 %v6977_v54, %v6973_v38  ;;  %v6558_v24 = vrot.slane %v6556_v22, 7  ;;  %v6541_v52 = vrot.slane %v6539_v6, 7  ;;  %v6983_v12 = vrot.slane %v6981_v34, 5 }
 0x39e   : > { %v6986_v42 = vshrl.u32 %v6867_v62, 16  ;;  %13554 = vmatpush3.bf16.msra.mxu1 %v14501_v3  ;;  %v6553_v4 = vor.u32 %v6551_v19, %v6550_v48  ;;  %v6554_v55 = vrot.slane %v6550_v48, 4  ;;  %v6536_v49 = vor.u32 %v6534_v63, %v6533_v5  ;;  %v6900_v19 = vld [vmem:[#allocation3 + $0x2c] sm:$0x1] }
 0x39f   : > { %v6537_v56 = vrot.slane %v6533_v5, 4  ;;  %13587 = vmatprep.subr.bf16.mxu1 %v14502_v27  ;;  %v6561_v15 = vor.u32 %v6559_v61, %v6558_v24  ;;  %v6563_v40 = vrot.slane %v6558_v24, 4  ;;  %v6544_v41 = vor.u32 %v6542_v20, %v6541_v52 }
 0x3a0   : > { %v6546_v43 = vrot.slane %v6541_v52, 4  ;;  %v6801_v39 = vsel %vm16714_vm6, %v6553_v4, %v6800_v10  ;;  %v6794_v54 = vsel %vm16714_vm6, %v6536_v49, %v6793_v29  ;;  %v6974_v3 = vsel %vm14906_vm13, %v6969_v58, %v6973_v38  ;;  %v16902_v58 = vld [vmem:[#allocation3 + $0x30] sm:$0xf] }
 0x3a1   : > { %v6979_v34 = vrot.slane %v6978_v46, 4  ;;  %6802 = vst [vmem:[#allocation3 + $0x84] sm:$0xf] %v6801_v39  ;;  %6795 = vst [vmem:[#allocation3 + $0x78] sm:$0xf] %v6794_v54  ;;  %v6562_v63 = vsel %vm14890_vm11, %v6554_v55, %v6561_v15  ;;  %v6805_v27 = vsel %vm16576_vm3, %v6563_v40, %v6804_v13  ;;  %v6545_v22 = vsel %vm14890_vm11, %v6537_v56, %v6544_v41 }
 0x3a2   : > { %v6798_v10 = vsel %vm16576_vm3, %v6546_v43, %v6797_v37  ;;  %6803 = vst.msk [vmem:[#allocation3 + $0x88] sm:$0xf] %vm6720_vm2, %v6562_v63  ;;  %6806 = vst [vmem:[#allocation3 + $0x8c] sm:$0x1] %v6805_v27  ;;  %v6988_v61 = vrot.slane %v6986_v42, 4  ;;  %v6989_v6 = vshll.u32 %v6867_v62, 16  ;;  %v13845_v29 = vadd.f32 %v16815_v11, %v16654_v14 }
 0x3a3   : > { %6796 = vst.msk [vmem:[#allocation3 + $0x7c] sm:$0xf] %vm6720_vm2, %v6545_v22  ;;  %6799 = vst [vmem:[#allocation3 + $0x80] sm:$0x1] %v6798_v10  ;;  %v6984_v38 = vsel %vm14906_vm13, %v6979_v34, %v6983_v12  ;;  %v6995_v20 = vshll.u32 %v6868_v35, 16  ;;  %v6999_v40 = vshrl.u32 %v6868_v35, 16  ;;  %v13846_v13 = vadd.f32 %v16817_v31, %v16656_v7 }
 0x3a4   : > { %v12320_v48 = vcombine.low %v6974_v3, %v6984_v38  ;;  %v7005_v5 = vshll.u32 %v6900_v19, 16  ;;  %v6991_v46 = vrot.slane %v6989_v6, 5  ;;  %v13847_v52 = vadd.f32 %v16819_v26, %v16658_v32  ;;  %v16916_v26 = vld [vmem:[#allocation3 + $0x34] sm:$0xf]  ;;  %v6814_v38 = vld [vmem:[#allocation3 + $0x9c] sm:$0xf] }
 0x3a5   : > { %v6997_v24 = vrot.slane %v6995_v20, 5  ;;  %v7001_v62 = vrot.slane %v6999_v40, 4  ;;  %v6095_v42 = vadd.f32 %v13845_v29, %v16691_v33  ;;  %v13848_v4 = vadd.f32 %v16825_v44, %v16660_v50  ;;  %v6807_v40 = vld [vmem:[#allocation3 + $0x90] sm:$0xf]  ;;  %v6818_v29 = vld [vmem:[#allocation3 + $0xa4] sm:$0x1] }
 0x3a6   : > { %13523 = vmatprep.mubr.msk.bf16.mxu1 %vm7362_vm4, %v12320_v48  ;;  %v7007_v12 = vrot.slane %v7005_v5, 5  ;;  %v6992_v14 = vor.u32 %v6991_v46, %v6988_v61  ;;  %v6093_v11 = vadd.f32 %v13846_v13, %v16691_v33  ;;  %v6096_v55 = vadd.f32 %v13847_v52, %v16691_v33 }
 0x3a7   : > { %v7010_v49 = vshrl.u32 %v16902_v58, 16  ;;  %v7002_v7 = vor.u32 %v7001_v62, %v6997_v24  ;;  %v6131_v31 = vmax.f32 %v6095_v42, 0.0  ;;  %v6094_v32 = vadd.f32 %v13848_v4, %v16691_v33  ;;  %v6811_v62 = vld [vmem:[#allocation3 + $0x98] sm:$0x1] }
 0x3a8   : > { %v7013_v56 = vshll.u32 %v16902_v58, 16  ;;  %v6993_v37 = vrot.slane %v6992_v14, 4  ;;  %v6129_v15 = vmax.f32 %v6093_v11, 0.0  ;;  %v6132_v41 = vmax.f32 %v6096_v55, 0.0 }
 0x3a9   : > { %v7012_v43 = vrot.slane %v7010_v49, 4  ;;  %v7003_v50 = vrot.slane %v7002_v7, 4  ;;  %v12797_v44 = vpack.c.bf16 %v6131_v31, %v6131_v31  ;;  %v6130_v35 = vmax.f32 %v6094_v32, 0.0 }
 0x3aa   : > { %v7015_v39 = vrot.slane %v7013_v56, 5  ;;  %v6998_v54 = vsel %vm14906_vm13, %v6993_v37, %v6997_v24  ;;  %v12795_v3 = vpack.c.bf16 %v6129_v15, %v6129_v15  ;;  %v12798_v34 = vpack.c.bf16 %v6132_v41, %v6132_v41 }
 0x3ab   : > { %v7019_v19 = vshll.u32 %v16916_v26, 16  ;;  %v7008_v33 = vsel %vm14906_vm13, %v7003_v50, %v7007_v12  ;;  %v6582_v63 = vshrl.u32 %v12797_v44, 16  ;;  %v6585_v27 = vshll.u32 %v12797_v44, 16  ;;  %v6901_v12 = vld [vmem:[#allocation3 + $0x38] sm:$0x1] }
 0x3ac   : > { %v12796_v22 = vpack.c.bf16 %v6130_v35, %v6130_v35  ;;  %v12321_v10 = vcombine.low %v6998_v54, %v7008_v33  ;;  %v6565_v61 = vshrl.u32 %v12795_v3, 16  ;;  %v6568_v6 = vshll.u32 %v12795_v3, 16  ;;  %v16928_v44 = vld [vmem:[#allocation3 + $0x3c] sm:$0xf]  ;;  %v16930_v35 = vld [vmem:[#allocation3 + $0x40] sm:$0xf] }
 0x3ad   : > { %v6590_v20 = vshrl.u32 %v12798_v34, 16  ;;  %v6584_v48 = vrot.slane %v6582_v63, 7  ;;  %v6593_v5 = vshll.u32 %v12798_v34, 16  ;;  %v7016_v42 = vor.u32 %v7015_v39, %v7012_v43  ;;  %v6902_v34 = vld [vmem:[#allocation3 + $0x44] sm:$0x1] }
 0x3ae   : > { %v6573_v46 = vshrl.u32 %v12796_v22, 16  ;;  %v6576_v24 = vshll.u32 %v12796_v22, 16  ;;  %13524 = vmatmul.mubr.msk.bf16.gmra.mrb[20].mxu1 %vm7362_vm4, %v12321_v10  ;;  %v6567_v13 = vrot.slane %v6565_v61, 7  ;;  %v7021_v4 = vrot.slane %v7019_v19, 5 }
 0x3af   : > { %v6592_v52 = vrot.slane %v6590_v20, 7  ;;  %v6587_v14 = vor.u32 %v6585_v27, %v6584_v48  ;;  %v6588_v11 = vrot.slane %v6584_v48, 4  ;;  %v7023_v49 = vshrl.u32 %v16916_v26, 16 }
 0x3b0   : > { %v6575_v55 = vrot.slane %v6573_v46, 7  ;;  %v6570_v7 = vor.u32 %v6568_v6, %v6567_v13  ;;  %v6571_v31 = vrot.slane %v6567_v13, 4  ;;  %v7017_v50 = vrot.slane %v7016_v42, 4 }
 0x3b1   : > { %v6595_v32 = vor.u32 %v6593_v5, %v6592_v52  ;;  %v6597_v56 = vrot.slane %v6592_v52, 4  ;;  %v6815_v37 = vsel %vm16714_vm6, %v6587_v14, %v6814_v38  ;;  %v7025_v3 = vrot.slane %v7023_v49, 4 }
 0x3b2   : > { %v6578_v15 = vor.u32 %v6576_v24, %v6575_v55  ;;  %v6580_v41 = vrot.slane %v6575_v55, 4  ;;  %6816 = vst [vmem:[#allocation3 + $0x9c] sm:$0xf] %v6815_v37  ;;  %v6808_v43 = vsel %vm16714_vm6, %v6570_v7, %v6807_v40  ;;  %v7022_v63 = vsel %vm14906_vm13, %v7017_v50, %v7021_v4  ;;  %v16976_v50 = vld [vmem:[#allocation3 + $0x4c] sm:$0xf] }
 0x3b3   : > { %v6596_v39 = vsel %vm14890_vm11, %v6588_v11, %v6595_v32  ;;  %v6819_v54 = vsel %vm16576_vm3, %v6597_v56, %v6818_v29  ;;  %6809 = vst [vmem:[#allocation3 + $0x90] sm:$0xf] %v6808_v43  ;;  %v7029_v27 = vshll.u32 %v6901_v12, 16  ;;  %v7026_v22 = vor.u32 %v7025_v3, %v7021_v4  ;;  %v16960_v4 = vld [vmem:[#allocation3 + $0x48] sm:$0xf] }
 0x3b4   : > { %6817 = vst.msk [vmem:[#allocation3 + $0xa0] sm:$0xf] %vm6720_vm2, %v6596_v39  ;;  %6820 = vst [vmem:[#allocation3 + $0xa4] sm:$0x1] %v6819_v54  ;;  %v6579_v19 = vsel %vm14890_vm11, %v6571_v31, %v6578_v15  ;;  %v6812_v33 = vsel %vm16576_vm3, %v6580_v41, %v6811_v62  ;;  %v7034_v10 = vshrl.u32 %v16928_v44, 16  ;;  %v7037_v38 = vshll.u32 %v16928_v44, 16 }
 0x3b5   : > { %6810 = vst.msk [vmem:[#allocation3 + $0x94] sm:$0xf] %vm6720_vm2, %v6579_v19  ;;  %6813 = vst [vmem:[#allocation3 + $0x98] sm:$0x1] %v6812_v33  ;;  %v7043_v61 = vshll.u32 %v16930_v35, 16  ;;  %v7031_v6 = vrot.slane %v7029_v27, 5  ;;  %v13849_v40 = vadd.f32 %v16829_v0, %v16670_v1  ;;  %v13850_v42 = vadd.f32 %v16833_v30, %v16672_v60 }
 0x3b6   : > { %v7047_v20 = vshrl.u32 %v16930_v35, 16  ;;  %v7053_v48 = vshll.u32 %v6902_v34, 16  ;;  %v7027_v5 = vrot.slane %v7026_v22, 4  ;;  %v7036_v29 = vrot.slane %v7034_v10, 4  ;;  %v16955_v62 = vld [vmem:[%s18710_s3] ss:$0 sm:$0xff] }
 0x3b7   : > { %v7039_v46 = vrot.slane %v7037_v38, 5  ;;  %v7045_v24 = vrot.slane %v7043_v61, 5  ;;  %v6099_v12 = vadd.f32 %v16955_v62, %v13849_v40  ;;  %v13851_v14 = vadd.f32 %v16843_v28, %v16674_v8 }
 0x3b8   : > { %v7049_v13 = vrot.slane %v7047_v20, 4  ;;  %v7055_v52 = vrot.slane %v7053_v48, 5  ;;  %v7032_v1 = vsel %vm14906_vm13, %v7027_v5, %v7031_v6  ;;  %v13852_v11 = vadd.f32 %v16847_v25, %v16676_v17  ;;  %v6828_v6 = vld [vmem:[#allocation3 + $0xb4] sm:$0xf] }
 0x3b9   : > { %v7040_v0 = vor.u32 %v7039_v46, %v7036_v29  ;;  %v12322_v55 = vcombine.low %v7022_v63, %v7032_v1  ;;  %v6135_v7 = vmax.f32 %v6099_v12, 0.0  ;;  %v6097_v31 = vadd.f32 %v16955_v62, %v13850_v42  ;;  %v16982_v1 = vld [vmem:[#allocation3 + $0x50] sm:$0x1] }
 0x3ba   : > { %v7050_v49 = vor.u32 %v7049_v13, %v7045_v24  ;;  %v6100_v60 = vadd.f32 %v16955_v62, %v13851_v14  ;;  %v6098_v30 = vadd.f32 %v16955_v62, %v13852_v11  ;;  %v7058_v56 = vshrl.u32 %v16960_v4, 16  ;;  %v6821_v13 = vld [vmem:[#allocation3 + $0xa8] sm:$0xf] }
 0x3bb   : > { %v7041_v32 = vrot.slane %v7040_v0, 4  ;;  %13527 = vmatprep.mubr.msk.bf16.mxu1 %vm7362_vm4, %v12322_v55  ;;  %v12801_v15 = vpack.c.bf16 %v6135_v7, %v6135_v7  ;;  %v6133_v8 = vmax.f32 %v6097_v31, 0.0  ;;  %v7061_v28 = vshll.u32 %v16960_v4, 16  ;;  %v6832_v7 = vld [vmem:[#allocation3 + $0xbc] sm:$0x1] }
 0x3bc   : > { %v7051_v37 = vrot.slane %v7050_v49, 4  ;;  %v6136_v25 = vmax.f32 %v6100_v60, 0.0  ;;  %v6134_v41 = vmax.f32 %v6098_v30, 0.0  ;;  %v7060_v43 = vrot.slane %v7058_v56, 4  ;;  %v6825_v31 = vld [vmem:[#allocation3 + $0xb0] sm:$0x1] }
 0x3bd   : > { %v7046_v17 = vsel %vm14906_vm13, %v7041_v32, %v7045_v24  ;;  %v6616_v54 = vshrl.u32 %v12801_v15, 16  ;;  %v6619_v3 = vshll.u32 %v12801_v15, 16  ;;  %v12799_v34 = vpack.c.bf16 %v6133_v8, %v6133_v8  ;;  %v16987_v15 = vld [vmem:[#allocation3 + $0x54] sm:$0xf] }
 0x3be   : > { %v7056_v39 = vsel %vm14906_vm13, %v7051_v37, %v7055_v52  ;;  %v12802_v33 = vpack.c.bf16 %v6136_v25, %v6136_v25  ;;  %v12800_v63 = vpack.c.bf16 %v6134_v41, %v6134_v41  ;;  %v7063_v27 = vrot.slane %v7061_v28, 5  ;;  %v16994_v41 = vld [vmem:[#allocation3 + $0x58] sm:$0xf] }
 0x3bf   : > { %v12323_v19 = vcombine.low %v7046_v17, %v7056_v39  ;;  %v6618_v22 = vrot.slane %v6616_v54, 7  ;;  %v6599_v10 = vshrl.u32 %v12799_v34, 16  ;;  %v6602_v38 = vshll.u32 %v12799_v34, 16 }
 0x3c0   : > { %v7067_v61 = vshll.u32 %v16976_v50, 16  ;;  %v6624_v20 = vshrl.u32 %v12802_v33, 16  ;;  %v6627_v48 = vshll.u32 %v12802_v33, 16  ;;  %v6607_v40 = vshrl.u32 %v12800_v63, 16 }
 0x3c1   : > { %13528 = vmatmul.mubr.msk.bf16.gmra.mrb[24].mxu1 %vm7362_vm4, %v12323_v19  ;;  %v6610_v5 = vshll.u32 %v12800_v63, 16  ;;  %v6621_v29 = vor.u32 %v6619_v3, %v6618_v22  ;;  %v6622_v46 = vrot.slane %v6618_v22, 4  ;;  %v6601_v24 = vrot.slane %v6599_v10, 7 }
 0x3c2   : > { %v7064_v52 = vor.u32 %v7063_v27, %v7060_v43  ;;  %v6626_v12 = vrot.slane %v6624_v20, 7  ;;  %v6609_v42 = vrot.slane %v6607_v40, 7  ;;  %v7069_v0 = vrot.slane %v7067_v61, 5  ;;  %v16996_v43 = vld [vmem:[#allocation3 + $0x5c] sm:$0x1] }
 0x3c3   : > { %v7071_v14 = vshrl.u32 %v16976_v50, 16  ;;  %v6829_v11 = vsel %vm16714_vm6, %v6621_v29, %v6828_v6  ;;  %v6604_v55 = vor.u32 %v6602_v38, %v6601_v24  ;;  %v6605_v49 = vrot.slane %v6601_v24, 4  ;;  %v17015_v6 = vld [vmem:[#allocation3 + $0x60] sm:$0xf] }
 0x3c4   : > { %v7065_v32 = vrot.slane %v7064_v52, 4  ;;  %6830 = vst [vmem:[#allocation3 + $0xb4] sm:$0xf] %v6829_v11  ;;  %v6629_v60 = vor.u32 %v6627_v48, %v6626_v12  ;;  %v6631_v30 = vrot.slane %v6626_v12, 4  ;;  %v6612_v56 = vor.u32 %v6610_v5, %v6609_v42 }
 0x3c5   : > { %v6614_v37 = vrot.slane %v6609_v42, 4  ;;  %v6822_v8 = vsel %vm16714_vm6, %v6604_v55, %v6821_v13  ;;  %v7073_v17 = vrot.slane %v7071_v14, 4  ;;  %v7077_v25 = vshll.u32 %v16982_v1, 16 }
 0x3c6   : > { %v7070_v28 = vsel %vm14906_vm13, %v7065_v32, %v7069_v0  ;;  %6823 = vst [vmem:[#allocation3 + $0xa8] sm:$0xf] %v6822_v8  ;;  %v6630_v39 = vsel %vm14890_vm11, %v6622_v46, %v6629_v60  ;;  %v6833_v54 = vsel %vm16576_vm3, %v6631_v30, %v6832_v7  ;;  %v6613_v3 = vsel %vm14890_vm11, %v6605_v49, %v6612_v56 }
 0x3c7   : > { %v6826_v34 = vsel %vm16576_vm3, %v6614_v37, %v6825_v31  ;;  %6831 = vst.msk [vmem:[#allocation3 + $0xb8] sm:$0xf] %vm6720_vm2, %v6630_v39  ;;  %6834 = vst [vmem:[#allocation3 + $0xbc] sm:$0x1] %v6833_v54  ;;  %v7074_v19 = vor.u32 %v7073_v17, %v7069_v0  ;;  %v7079_v33 = vrot.slane %v7077_v25, 5  ;;  %v7082_v63 = vshrl.u32 %v16987_v15, 16 }
 0x3c8   : > { %6824 = vst.msk [vmem:[#allocation3 + $0xac] sm:$0xf] %vm6720_vm2, %v6613_v3  ;;  %6827 = vst [vmem:[#allocation3 + $0xb0] sm:$0x1] %v6826_v34  ;;  %v7085_v27 = vshll.u32 %v16987_v15, 16  ;;  %v7091_v22 = vshll.u32 %v16994_v41, 16  ;;  %v13853_v61 = vadd.f32 %v16866_v59, %v16686_v51  ;;  %v13854_v5 = vadd.f32 %v16871_v18, %v16697_v16 }
 0x3c9   : > { %v7095_v10 = vshrl.u32 %v16994_v41, 16  ;;  %v7101_v38 = vshll.u32 %v16996_v43, 16  ;;  %v7075_v20 = vrot.slane %v7074_v19, 4  ;;  %v7084_v48 = vrot.slane %v7082_v63, 4 }
 0x3ca   : > { %v7087_v40 = vrot.slane %v7085_v27, 5  ;;  %v7093_v29 = vrot.slane %v7091_v22, 5  ;;  %v6103_v13 = vadd.f32 %v16955_v62, %v13853_v61  ;;  %v6101_v42 = vadd.f32 %v16955_v62, %v13854_v5 }
 0x3cb   : > { %v7097_v46 = vrot.slane %v7095_v10, 4  ;;  %v7103_v24 = vrot.slane %v7101_v38, 5  ;;  %v7080_v52 = vsel %vm14906_vm13, %v7075_v20, %v7079_v33  ;;  %v13855_v51 = vadd.f32 %v16874_v36, %v16702_v45  ;;  %v6842_v33 = vld [vmem:[#allocation3 + $0xcc] sm:$0xf]  ;;  %v6835_v20 = vld [vmem:[#allocation3 + $0xc0] sm:$0xf] }
 0x3cc   : > { %v7088_v12 = vor.u32 %v7087_v40, %v7084_v48  ;;  %v12324_v59 = vcombine.low %v7070_v28, %v7080_v52  ;;  %v6139_v14 = vmax.f32 %v6103_v13, 0.0  ;;  %v13856_v16 = vadd.f32 %v16877_v57, %v16707_v2  ;;  %v17034_v2 = vld [vmem:[#allocation3 + $0x64] sm:$0xf]  ;;  %v17041_v13 = vld [vmem:[#allocation3 + $0x68] sm:$0x1] }
 0x3cd   : > { %v7098_v0 = vor.u32 %v7097_v46, %v7093_v29  ;;  %v6137_v11 = vmax.f32 %v6101_v42, 0.0  ;;  %v6104_v55 = vadd.f32 %v16955_v62, %v13855_v51  ;;  %v7106_v49 = vshrl.u32 %v17015_v6, 16 }
 0x3ce   : > { %v7089_v18 = vrot.slane %v7088_v12, 4  ;;  %13531 = vmatprep.mubr.msk.bf16.mxu1 %vm7362_vm4, %v12324_v59  ;;  %v12805_v31 = vpack.c.bf16 %v6139_v14, %v6139_v14  ;;  %v6102_v32 = vadd.f32 %v16955_v62, %v13856_v16  ;;  %v7109_v45 = vshll.u32 %v17015_v6, 16 }
 0x3cf   : > { %v7099_v7 = vrot.slane %v7098_v0, 4  ;;  %v12803_v60 = vpack.c.bf16 %v6137_v11, %v6137_v11  ;;  %v6140_v30 = vmax.f32 %v6104_v55, 0.0  ;;  %v7108_v57 = vrot.slane %v7106_v49, 4  ;;  %v17045_v0 = vld [vmem:[#allocation3 + $0x6c] sm:$0xf] }
 0x3d0   : > { %v7094_v36 = vsel %vm14906_vm13, %v7089_v18, %v7093_v29  ;;  %v6650_v37 = vshrl.u32 %v12805_v31, 16  ;;  %v6653_v8 = vshll.u32 %v12805_v31, 16  ;;  %v6138_v28 = vmax.f32 %v6102_v32, 0.0  ;;  %v6839_v11 = vld [vmem:[#allocation3 + $0xc8] sm:$0x1] }
 0x3d1   : > { %v7104_v56 = vsel %vm14906_vm13, %v7099_v7, %v7103_v24  ;;  %v6633_v25 = vshrl.u32 %v12803_v60, 16  ;;  %v6636_v39 = vshll.u32 %v12803_v60, 16  ;;  %v12806_v62 = vpack.c.bf16 %v6140_v30, %v6140_v30  ;;  %v6846_v24 = vld [vmem:[#allocation3 + $0xd4] sm:$0x1]  ;;  %v17049_v49 = vld [vmem:[#allocation3 + $0x70] sm:$0xf] }
 0x3d2   : > { %v12325_v17 = vcombine.low %v7094_v36, %v7104_v56  ;;  %v6652_v54 = vrot.slane %v6650_v37, 7  ;;  %v12804_v3 = vpack.c.bf16 %v6138_v28, %v6138_v28  ;;  %v7111_v34 = vrot.slane %v7109_v45, 5  ;;  %v17054_v36 = vld [vmem:[#allocation3 + $0x74] sm:$0x1]  ;;  %v17056_v60 = vld [vmem:[#allocation3 + $0x78] sm:$0xf] }
 0x3d3   : > { %v7115_v19 = vshll.u32 %v17034_v2, 16  ;;  %v6635_v63 = vrot.slane %v6633_v25, 7  ;;  %v6658_v27 = vshrl.u32 %v12806_v62, 16  ;;  %v6661_v22 = vshll.u32 %v12806_v62, 16  ;;  %v17065_v37 = vld [vmem:[#allocation3 + $0x7c] sm:$0xf] }
 0x3d4   : > { %13532 = vmatmul.mubr.msk.bf16.gmra.mrb[28].mxu1 %vm7362_vm4, %v12325_v17  ;;  %v7119_v10 = vshrl.u32 %v17034_v2, 16  ;;  %v6655_v38 = vor.u32 %v6653_v8, %v6652_v54  ;;  %v6656_v61 = vrot.slane %v6652_v54, 4  ;;  %v6641_v48 = vshrl.u32 %v12804_v3, 16 }
 0x3d5   : > { %v6644_v40 = vshll.u32 %v12804_v3, 16  ;;  %v6638_v5 = vor.u32 %v6636_v39, %v6635_v63  ;;  %v6639_v29 = vrot.slane %v6635_v63, 4  ;;  %v6660_v46 = vrot.slane %v6658_v27, 7  ;;  %v17072_v39 = vld [vmem:[#allocation3 + $0x80] sm:$0x1] }
 0x3d6   : > { %v7112_v52 = vor.u32 %v7111_v34, %v7108_v57  ;;  %v6843_v12 = vsel %vm16714_vm6, %v6655_v38, %v6842_v33  ;;  %v6643_v42 = vrot.slane %v6641_v48, 7  ;;  %v7117_v51 = vrot.slane %v7115_v19, 5  ;;  %v17082_v3 = vld [vmem:[#allocation3 + $0x84] sm:$0xf] }
 0x3d7   : > { %v7121_v59 = vrot.slane %v7119_v10, 4  ;;  %6844 = vst [vmem:[#allocation3 + $0xcc] sm:$0xf] %v6843_v12  ;;  %v6836_v14 = vsel %vm16714_vm6, %v6638_v5, %v6835_v20  ;;  %v6663_v16 = vor.u32 %v6661_v22, %v6660_v46  ;;  %v6665_v18 = vrot.slane %v6660_v46, 4 }
 0x3d8   : > { %v7113_v55 = vrot.slane %v7112_v52, 4  ;;  %6858 = vst.msk [vmem:[#allocation3 + $0xcc] sm:$0xf] %vm6720_vm2, %v18869_v9  ;;  %6837 = vst [vmem:[#allocation3 + $0xc0] sm:$0xf] %v6836_v14  ;;  %v6646_v7 = vor.u32 %v6644_v40, %v6643_v42  ;;  %v6648_v31 = vrot.slane %v6643_v42, 4 }
 0x3d9   : > { %v7122_v32 = vor.u32 %v7121_v59, %v7117_v51  ;;  %v7125_v45 = vshll.u32 %v17041_v13, 16  ;;  %v6664_v47 = vsel %vm14890_vm11, %v6656_v61, %v6663_v16  ;;  %v6847_v30 = vsel %vm16576_vm3, %v6665_v18, %v6846_v24  ;;  %v17093_v24 = vld [vmem:[#allocation3 + $0x88] sm:$0xf]  ;;  %v17095_v42 = vld [vmem:[#allocation3 + $0x8c] sm:$0x1] }
 0x3da   : > { %v7118_v57 = vsel %vm14906_vm13, %v7113_v55, %v7117_v51  ;;  %v7130_v56 = vshrl.u32 %v17045_v0, 16  ;;  %6845 = vst.msk [vmem:[#allocation3 + $0xd0] sm:$0xf] %vm6720_vm2, %v6664_v47  ;;  %6848 = vst [vmem:[#allocation3 + $0xd4] sm:$0x1] %v6847_v30  ;;  %v6647_v8 = vsel %vm14890_vm11, %v6639_v29, %v6646_v7  ;;  %v6840_v28 = vsel %vm16576_vm3, %v6648_v31, %v6839_v11 }
 0x3db   : > { %v7123_v17 = vrot.slane %v7122_v32, 4  ;;  %v7127_v25 = vrot.slane %v7125_v45, 5  ;;  %6859 = vst.msk [vmem:[#allocation3 + $0xd0] sm:$0xf] %vm6720_vm2, %v18869_v9  ;;  %6838 = vst.msk [vmem:[#allocation3 + $0xc4] sm:$0xf] %vm6720_vm2, %v6647_v8 }
 0x3dc   : > { %6860 = vst.msk [vmem:[#allocation3 + $0xd4] sm:$0x1] %vm6141_vm0, %v18869_v9  ;;  %6841 = vst [vmem:[#allocation3 + $0xc8] sm:$0x1] %v6840_v28  ;;  %v7132_v62 = vrot.slane %v7130_v56, 4  ;;  %v7133_v21 = vshll.u32 %v17045_v0, 16 }
 0x3dd   : > { %v7139_v54 = vshll.u32 %v17049_v49, 16  ;;  %v7143_v53 = vshrl.u32 %v17049_v49, 16  ;;  %v7128_v34 = vsel %vm14906_vm13, %v7123_v17, %v7127_v25  ;;  %v7149_v19 = vshll.u32 %v17054_v36, 16  ;;  %v17099_v55 = vld [vmem:[#allocation3 + $0x90] sm:$0xf] }
 0x3de   : > { %v7154_v33 = vshrl.u32 %v17056_v60, 16  ;;  %v7157_v9 = vshll.u32 %v17056_v60, 16  ;;  %v12326_v63 = vcombine.low %v7118_v57, %v7128_v34  ;;  %v7135_v27 = vrot.slane %v7133_v21, 5  ;;  %v17107_v8 = vld [vmem:[#allocation3 + $0x94] sm:$0xf] }
 0x3df   : > { %v7141_v22 = vrot.slane %v7139_v54, 5  ;;  %v7145_v10 = vrot.slane %v7143_v53, 4  ;;  %v7151_v38 = vrot.slane %v7149_v19, 5  ;;  %v7163_v48 = vshll.u32 %v17065_v37, 16  ;;  %v17111_v21 = vld [vmem:[#allocation3 + $0x9c] sm:$0xf] }
 0x3e0   : > { %v7156_v61 = vrot.slane %v7154_v33, 4  ;;  %v7159_v20 = vrot.slane %v7157_v9, 5  ;;  %13535 = vmatprep.mubr.msk.bf16.mxu1 %vm7362_vm4, %v12326_v63  ;;  %v7136_v40 = vor.u32 %v7135_v27, %v7132_v62  ;;  %v7167_v29 = vshrl.u32 %v17065_v37, 16  ;;  %v17114_v19 = vld [vmem:[#allocation3 + $0x98] sm:$0x1] }
 0x3e1   : > { %v7146_v5 = vor.u32 %v7145_v10, %v7141_v22  ;;  %v7173_v46 = vshll.u32 %v17072_v39, 16  ;;  %v7165_v12 = vrot.slane %v7163_v48, 5  ;;  %v7178_v51 = vshrl.u32 %v17082_v3, 16  ;;  %v17117_v9 = vld [vmem:[#allocation3 + $0xa0] sm:$0xf] }
 0x3e2   : > { %v7160_v52 = vor.u32 %v7159_v20, %v7156_v61  ;;  %v7181_v59 = vshll.u32 %v17082_v3, 16  ;;  %v7137_v14 = vrot.slane %v7136_v40, 4  ;;  %v7169_v18 = vrot.slane %v7167_v29, 4 }
 0x3e3   : > { %v7147_v16 = vrot.slane %v7146_v5, 4  ;;  %v7175_v11 = vrot.slane %v7173_v46, 5  ;;  %v7180_v31 = vrot.slane %v7178_v51, 4  ;;  %v7187_v45 = vshll.u32 %v17093_v24, 16 }
 0x3e4   : > { %v7161_v7 = vrot.slane %v7160_v52, 4  ;;  %v7183_v32 = vrot.slane %v7181_v59, 5  ;;  %v7142_v47 = vsel %vm14906_vm13, %v7137_v14, %v7141_v22  ;;  %v7170_v57 = vor.u32 %v7169_v18, %v7165_v12  ;;  %v17128_v59 = vld [vmem:[#allocation3 + $0xa4] sm:$0x1] }
 0x3e5   : > { %v7152_v30 = vsel %vm14906_vm13, %v7147_v16, %v7151_v38  ;;  %v7191_v56 = vshrl.u32 %v17093_v24, 16  ;;  %v7189_v62 = vrot.slane %v7187_v45, 5  ;;  %v7197_v34 = vshll.u32 %v17095_v42, 16 }
 0x3e6   : > { %v12327_v28 = vcombine.low %v7142_v47, %v7152_v30  ;;  %v7166_v17 = vsel %vm14906_vm13, %v7161_v7, %v7165_v12  ;;  %v7184_v25 = vor.u32 %v7183_v32, %v7180_v31  ;;  %v7171_v54 = vrot.slane %v7170_v57, 4  ;;  %v17135_v31 = vld [vmem:[#allocation3 + $0xa8] sm:$0xf]  ;;  %v17139_v57 = vld [vmem:[#allocation3 + $0xac] sm:$0xf] }
 0x3e7   : > { %v7193_v53 = vrot.slane %v7191_v56, 4  ;;  %v7202_v33 = vshrl.u32 %v17099_v55, 16  ;;  %v7205_v27 = vshll.u32 %v17099_v55, 16  ;;  %v7211_v22 = vshll.u32 %v17107_v8, 16 }
 0x3e8   : > { %13536 = vmatmul.mubr.msk.bf16.gmra.mrb[32].mxu1 %vm7362_vm4, %v12327_v28  ;;  %v7185_v63 = vrot.slane %v7184_v25, 4  ;;  %v7215_v10 = vshrl.u32 %v17107_v8, 16  ;;  %v7176_v38 = vsel %vm14906_vm13, %v7171_v54, %v7175_v11  ;;  %v7199_v20 = vrot.slane %v7197_v34, 5 }
 0x3e9   : > { %v7194_v61 = vor.u32 %v7193_v53, %v7189_v62  ;;  %v7204_v48 = vrot.slane %v7202_v33, 4  ;;  %v12328_v40 = vcombine.low %v7166_v17, %v7176_v38  ;;  %v7207_v29 = vrot.slane %v7205_v27, 5 }
 0x3ea   : > { %v7190_v5 = vsel %vm14906_vm13, %v7185_v63, %v7189_v62  ;;  %v7213_v46 = vrot.slane %v7211_v22, 5  ;;  %v7217_v12 = vrot.slane %v7215_v10, 4  ;;  %v7221_v51 = vshll.u32 %v17114_v19, 16  ;;  %v17146_v22 = vld [vmem:[#allocation3 + $0xb4] sm:$0xf] }
 0x3eb   : > { %v7195_v52 = vrot.slane %v7194_v61, 4  ;;  %v7226_v14 = vshrl.u32 %v17111_v21, 16  ;;  %13539 = vmatprep.mubr.msk.bf16.mxu1 %vm7362_vm4, %v12328_v40  ;;  %v7208_v16 = vor.u32 %v7207_v29, %v7204_v48  ;;  %v7229_v18 = vshll.u32 %v17111_v21, 16  ;;  %v17154_v40 = vld [vmem:[#allocation3 + $0xb8] sm:$0xf] }
 0x3ec   : > { %v7235_v11 = vshll.u32 %v17117_v9, 16  ;;  %v7239_v7 = vshrl.u32 %v17117_v9, 16  ;;  %v7218_v45 = vor.u32 %v7217_v12, %v7213_v46  ;;  %v7223_v47 = vrot.slane %v7221_v51, 5 }
 0x3ed   : > { %v7200_v32 = vsel %vm14906_vm13, %v7195_v52, %v7199_v20  ;;  %v7228_v30 = vrot.slane %v7226_v14, 4  ;;  %v7209_v28 = vrot.slane %v7208_v16, 4  ;;  %v7231_v17 = vrot.slane %v7229_v18, 5  ;;  %v17152_v20 = vld [vmem:[#allocation3 + $0xb0] sm:$0x1] }
 0x3ee   : > { %v12329_v56 = vcombine.low %v7190_v5, %v7200_v32  ;;  %v7237_v25 = vrot.slane %v7235_v11, 5  ;;  %v7219_v62 = vrot.slane %v7218_v45, 4  ;;  %v7241_v54 = vrot.slane %v7239_v7, 4 }
 0x3ef   : > { %v7245_v53 = vshll.u32 %v17128_v59, 16  ;;  %v7250_v34 = vshrl.u32 %v17135_v31, 16  ;;  %v7232_v33 = vor.u32 %v7231_v17, %v7228_v30  ;;  %v7253_v63 = vshll.u32 %v17135_v31, 16 }
 0x3f0   : > { %13540 = vmatmul.mubr.msk.bf16.gmra.mrb[36].mxu1 %vm7362_vm4, %v12329_v56  ;;  %v7259_v27 = vshll.u32 %v17139_v57, 16  ;;  %v7214_v10 = vsel %vm14906_vm13, %v7209_v28, %v7213_v46  ;;  %v7224_v38 = vsel %vm14906_vm13, %v7219_v62, %v7223_v47  ;;  %v7242_v61 = vor.u32 %v7241_v54, %v7237_v25  ;;  %v17166_v56 = vld [vmem:[#allocation3 + $0xbc] sm:$0x1] }
 0x3f1   : > { %v7252_v48 = vrot.slane %v7250_v34, 4  ;;  %v12330_v5 = vcombine.low %v7214_v10, %v7224_v38  ;;  %v7233_v29 = vrot.slane %v7232_v33, 4  ;;  %v7247_v52 = vrot.slane %v7245_v53, 5 }
 0x3f2   : > { %v7255_v12 = vrot.slane %v7253_v63, 5  ;;  %v7243_v51 = vrot.slane %v7242_v61, 4  ;;  %v7261_v14 = vrot.slane %v7259_v27, 5  ;;  %v7263_v16 = vshrl.u32 %v17139_v57, 16 }
 0x3f3   : > { %v7274_v18 = vshrl.u32 %v17146_v22, 16  ;;  %13543 = vmatprep.mubr.msk.bf16.mxu1 %vm7362_vm4, %v12330_v5  ;;  %v7269_v11 = vshll.u32 %v17152_v20, 16  ;;  %v7277_v7 = vshll.u32 %v17146_v22, 16  ;;  %v7283_v32 = vshll.u32 %v17154_v40, 16 }
 0x3f4   : > { %v7256_v46 = vor.u32 %v7255_v12, %v7252_v48  ;;  %v7238_v45 = vsel %vm14906_vm13, %v7233_v29, %v7237_v25  ;;  %v7248_v47 = vsel %vm14906_vm13, %v7243_v51, %v7247_v52  ;;  %v7265_v30 = vrot.slane %v7263_v16, 4 }
 0x3f5   : > { %v7276_v28 = vrot.slane %v7274_v18, 4  ;;  %v12331_v17 = vcombine.low %v7238_v45, %v7248_v47  ;;  %v7279_v54 = vrot.slane %v7277_v7, 5  ;;  %v7285_v34 = vrot.slane %v7283_v32, 5  ;;  %v7884_v47 = vld [vmem:[#allocation3 + $0x84] sm:$0xe] }
 0x3f6   : > { %v7257_v62 = vrot.slane %v7256_v46, 4  ;;  %v7266_v53 = vor.u32 %v7265_v30, %v7261_v14  ;;  %v7287_v33 = vshrl.u32 %v17154_v40, 16  ;;  %v7293_v27 = vshll.u32 %v17166_v56, 16  ;;  %v7886_v45 = vld [vmem:[#allocation3 + $0x9c] sm:$0xe] }
 0x3f7   : > { %v7280_v63 = vor.u32 %v7279_v54, %v7276_v28  ;;  %v7271_v10 = vrot.slane %v7269_v11, 5  ;;  %v12359_v52 = vcombine.low %v16987_v15, %v16994_v41  ;;  %v12360_v12 = vcombine.low %v17015_v6, %v17034_v2 }
 0x3f8   : > { %13544 = vmatmul.mubr.msk.bf16.gmra.mrb[40].mxu1 %vm7362_vm4, %v12331_v17  ;;  %v7267_v25 = vrot.slane %v7266_v53, 4  ;;  %v7289_v38 = vrot.slane %v7287_v33, 4  ;;  %v7262_v61 = vsel %vm14906_vm13, %v7257_v62, %v7261_v14  ;;  %v7295_v16 = vrot.slane %v7293_v27, 5  ;;  %v14600_v17 = vld [vmem:[#allocation3] sm:$0xf] }
 0x3f9   : > { %v7281_v48 = vrot.slane %v7280_v63, 4  ;;  %v12361_v18 = vcombine.low %v17045_v0, %v17049_v49  ;;  %v12362_v46 = vcombine.low %v17056_v60, %v17065_v37  ;;  %v12363_v11 = vcombine.low %v17082_v3, %v17093_v24  ;;  %v17198_v62 = vld [vmem:[#allocation3 + $0x4] sm:$0xf]  ;;  %v14602_v33 = vld [vmem:[#allocation3 + $0xc] sm:$0xf] }
 0x3fa   : > { %v7272_v5 = vsel %vm14906_vm13, %v7267_v25, %v7271_v10  ;;  %v7290_v29 = vor.u32 %v7289_v38, %v7285_v34  ;;  %v12352_v54 = vcombine.low %v14600_v17, %v17198_v62  ;;  %v17203_v63 = vld [vmem:[#allocation3 + $0x10] sm:$0xf]  ;;  %v14604_v25 = vld [vmem:[#allocation3 + $0x18] sm:$0xf]  ;;  %v17209_v10 = vld [vmem:[#allocation3 + $0x1c] sm:$0xf]  ;;  %v12356_v17 = vcombine.low %v16902_v58, %v16916_v26 }
 0x3fb   : > { %v12332_v51 = vcombine.low %v7262_v61, %v7272_v5  ;;  %v7286_v30 = vsel %vm14906_vm13, %v7281_v48, %v7285_v34  ;;  %v12353_v27 = vcombine.low %v14602_v33, %v17203_v63  ;;  %v14504_v34 = vld [vmem:[%s18709_s2 + $0x28] sm:$0xff]   ;;  %v12354_v38 = vcombine.low %v14604_v25, %v17209_v10  ;;  %v7881_v61 = vld [vmem:[#allocation3 + $0x60] sm:$0xe]  ;;  %v7882_v48 = vld [vmem:[#allocation3 + $0x6c] sm:$0xe] }
 0x3fc   : > { %v7291_v14 = vrot.slane %v7290_v29, 4  ;;  %v14606_v5 = vld [vmem:[%s18709_s2 + $0x20] sm:$0xff]   ;;  %v17220_v29 = vld [vmem:[%s18709_s2 + $0x30] sm:$0xff]   ;;  %v7883_v33 = vld [vmem:[#allocation3 + $0x78] sm:$0xe]  ;;  %v7989_v26 = vrot.slane %v17054_v36, 5  ;;  %v18871_v15 = vcombine.low %v17099_v55, %v17107_v8  ;;  %v18872_v60 = vcombine.low %v17111_v21, %v17117_v9 }
 0x3fd   : > { %13547 = vmatprep.mubr.msk.bf16.mxu1 %vm7362_vm4, %v12332_v51  ;;  %v12394_v51 = vrot.slane %v7881_v61, 9  ;;  %v8024_v32 = vrot.slane %v17152_v20, 5  ;;  %v7923_v6 = vrot.slane %v17198_v62, 5  ;;  %v7930_v55 = vrot.slane %v17203_v63, 5 }
 0x3fe   : > { %v7296_v28 = vsel %vm14906_vm13, %v7291_v14, %v7295_v16  ;;  %v7979_v16 = vrot.slane %v17034_v2, 5  ;;  %v14607_v14 = vld [vmem:[#allocation3 + $0x24] sm:$0xf]  ;;  %v7873_v2 = vld [vmem:[#allocation3] sm:$0xe]  ;;  %v18874_v21 = vcombine.low %v17146_v22, %v17154_v40 }
 0x3ff   : > { %v12333_v53 = vcombine.low %v7286_v30, %v7296_v28  ;;  %v17223_v30 = vld [vmem:[#allocation3 + $0x28] sm:$0xf]  ;;  %v12386_v0 = vrot.slane %v7873_v2, 9 }
 0x400   : > { %v12355_v28 = vcombine.low %v14607_v14, %v17223_v30  ;;  %v7981_v61 = vrot.slane %v7979_v16, 4 }
 0x401   : > { %13548 = vmatmul.mubr.msk.bf16.gmra.mrb[44].mxu1 %vm7362_vm4, %v12333_v53  ;;  %v7986_v53 = vrot.slane %v17049_v49, 5  ;;  %v7925_v49 = vrot.slane %v7923_v6, 4  ;;  %v7924_v3 = vsel %vm15299_vm1, %v12386_v0, %v7923_v6  ;;  %v14613_v6 = vld [vmem:[#allocation3 + $0x2c] sm:$0x1]  ;;  %v7877_v0 = vld [vmem:[#allocation3 + $0x30] sm:$0xe] }
 0x402   : > { %13555 = vmatprep.mubr.msk.bf16.mxu1 %vm7362_vm4, %v12352_v54  ;;  %v12395_v54 = vrot.slane %v7882_v48, 9  ;;  %v7993_v48 = vrot.slane %v17065_v37, 5  ;;  %v18873_v37 = vcombine.low %v17135_v31, %v17139_v57  ;;  %v7947_v2 = vrot.slane %v14613_v6, 5  ;;  %v9450_v6 = vld [vmem:[#allocation3 + $0x24] sm:$0xe] }
 0x403   : > { %v7988_v58 = vrot.slane %v7986_v53, 4 }
 0x404   : > { %v17238_v14 = vsel %vm15299_vm1, %v12395_v54, %v7986_v53  ;;  %v7995_v36 = vrot.slane %v7993_v48, 4  ;;  %v12397_v54 = vrot.slane %v7884_v47, 9  ;;  %v7885_v53 = vld [vmem:[#allocation3 + $0x90] sm:$0xe] }
 0x409   : > { %13556 = vmatmul.mubr.msk.bf16.vlgmr.msra.gmra.mrb[16].mxu1 %vm7362_vm4, %v12353_v27  ;;  %v12357_v27 = vcombine.low %v16928_v44, %v16930_v35  ;;  %v12396_v35 = vrot.slane %v7883_v33, 9 }
 0x40a   : > { %13588 = vmatpush3.bf16.msra.mxu1 %v14606_v5  ;;  %13559 = vmatprep.mubr.msk.bf16.mxu1 %vm7362_vm4, %v12354_v38  ;;  %v17233_v38 = vsel %vm15299_vm1, %v12394_v51, %v7979_v16  ;;  %v7982_v5 = vrot.slane %v17041_v13, 5  ;;  %v7996_v13 = vrot.slane %v17072_v39, 5  ;;  %v17253_v16 = vsel %vm15299_vm1, %v7988_v58, %v7989_v26 }
 0x40b   : > { %13589 = vmatprep.subr.bf16.mxu1 %v14504_v34  ;;  %v17264_v58 = vsel %vm15299_vm1, %v12396_v35, %v7993_v48  ;;  %v12398_v26 = vrot.slane %v7885_v53, 9  ;;  %v8014_v48 = vrot.slane %v17117_v9, 5  ;;  %v7887_v35 = vld [vmem:[#allocation3 + $0xa8] sm:$0xe]  ;;  %v8017_v51 = vrot.slane %v17128_v59, 5 }
 0x40c   : > { %v17245_v44 = vsel %vm15299_vm1, %v7981_v61, %v7982_v5  ;;  %v12358_v61 = vcombine.low %v16960_v4, %v16976_v50  ;;  %v8003_v5 = vrot.slane %v17095_v42, 5  ;;  %v17268_v47 = vsel %vm15299_vm1, %v7995_v36, %v7996_v13  ;;  %v7888_v53 = vld [vmem:[#allocation3 + $0xb4] sm:$0xe]  ;;  %v7874_v9 = vld [vmem:[#allocation3 + $0xc] sm:$0xe] }
 0x40d   : > { %v8016_v42 = vrot.slane %v8014_v48, 4 }
 0x40e   : > { %13590 = vmatpush3.bf16.msra.mxu1 %v14504_v34  ;;  %v8000_v34 = vrot.slane %v17093_v24, 5 }
 0x40f   : > { %13623 = vmatprep.subr.bf16.mxu1 %v17220_v29  ;;  %v17304_v59 = vsel %vm15299_vm1, %v8016_v42, %v8017_v51 }
 0x410   : > { %v8002_v33 = vrot.slane %v8000_v34, 4  ;;  %v17272_v4 = vsel %vm15299_vm1, %v12397_v54, %v8000_v34  ;;  %v8010_v34 = vrot.slane %v17114_v19, 5  ;;  %v12399_v54 = vrot.slane %v7886_v45, 9 }
 0x411   : > { %13560 = vmatmul.mubr.msk.bf16.gmra.mrb[20].mxu1 %vm7362_vm4, %v12355_v28  ;;  %v8007_v28 = vrot.slane %v17107_v8, 5  ;;  %v12400_v19 = vrot.slane %v7887_v35, 9  ;;  %v8028_v45 = vrot.slane %v17154_v40, 5  ;;  %v7937_v8 = vrot.slane %v17209_v10, 5  ;;  %v14612_v40 = vld [vmem:[#allocation3 + $0x34] sm:$0xf] }
 0x412   : > { %13563 = vmatprep.mubr.msk.bf16.mxu1 %vm7362_vm4, %v12356_v17  ;;  %v17279_v17 = vsel %vm15299_vm1, %v8002_v33, %v8003_v5  ;;  %v8021_v33 = vrot.slane %v17139_v57, 5  ;;  %v17297_v13 = vsel %vm15299_vm1, %v12399_v54, %v8014_v48  ;;  %v8031_v48 = vrot.slane %v17166_v56, 5  ;;  %v14610_v57 = vld [vmem:[#allocation3 + $0x14] sm:$0x1] }
 0x413   : > { %v8009_v36 = vrot.slane %v8007_v28, 4  ;;  %v17287_v39 = vsel %vm15299_vm1, %v12398_v26, %v8007_v28  ;;  %v8030_v7 = vrot.slane %v8028_v45, 4  ;;  %v7939_v31 = vrot.slane %v7937_v8, 4 }
 0x414   : > { %v8023_v26 = vrot.slane %v8021_v33, 4  ;;  %v17313_v35 = vsel %vm15299_vm1, %v12400_v19, %v8021_v33  ;;  %v7944_v10 = vrot.slane %v17223_v30, 5  ;;  %v7951_v33 = vrot.slane %v14612_v40, 5  ;;  %v7876_v30 = vld [vmem:[#allocation3 + $0x24] sm:$0xe] }
 0x415   : > { %v17293_v5 = vsel %vm15299_vm1, %v8009_v36, %v8010_v34  ;;  %v12401_v34 = vrot.slane %v7888_v53, 9  ;;  %v17328_v56 = vsel %vm15299_vm1, %v8030_v7, %v8031_v48  ;;  %v7875_v7 = vld [vmem:[#allocation3 + $0x18] sm:$0xe]  ;;  %v17573_v36 = vld [vmem:[#allocation3 + $0xac] sm:$0xf] }
 0x416   : > { %v17317_v51 = vsel %vm15299_vm1, %v8023_v26, %v8024_v32  ;;  %v14611_v32 = vld [vmem:[#allocation3 + $0x20] sm:$0x1]  ;;  %v12388_v54 = vrot.slane %v7875_v7, 9  ;;  %v14513_v26 = vld [vmem:[%s18709_s2 + $0x38] sm:$0xff]   ;;  %v7946_v48 = vrot.slane %v7944_v10, 4 }
 0x417   : > { %v17324_v42 = vsel %vm15299_vm1, %v12401_v34, %v8028_v45  ;;  %v7940_v62 = vrot.slane %v14611_v32, 5  ;;  %v14616_v7 = vld [vmem:[#allocation3 + $0x44] sm:$0x1]  ;;  %v7879_v32 = vld [vmem:[#allocation3 + $0x48] sm:$0xe] }
 0x418   : > { %v7938_v45 = vsel %vm15299_vm1, %v12388_v54, %v7937_v8  ;;  %v7965_v8 = vrot.slane %v16976_v50, 5  ;;  %v7961_v50 = vrot.slane %v14616_v7, 5  ;;  %v12392_v54 = vrot.slane %v7879_v32, 9 }
 0x419   : > { %13564 = vmatmul.mubr.msk.bf16.gmra.mrb[24].mxu1 %vm7362_vm4, %v12357_v27  ;;  %v7941_v22 = vsel %vm15299_vm1, %v7939_v31, %v7940_v62  ;;  %v7968_v62 = vrot.slane %v16982_v1, 5  ;;  %v7880_v1 = vld [vmem:[#allocation3 + $0x54] sm:$0xe] }
 0x41a   : > { %13567 = vmatprep.mubr.msk.bf16.mxu1 %vm7362_vm4, %v12358_v61  ;;  %v12387_v61 = vrot.slane %v7874_v9, 9  ;;  %v12408_v34 = vcombine.low %v7938_v45, %v7941_v22 }
 0x41c   : > { %v7931_v53 = vsel %vm15299_vm1, %v12387_v61, %v7930_v55 }
 0x421   : > { %13568 = vmatmul.mubr.msk.bf16.gmra.mrb[28].mxu1 %vm7362_vm4, %v12359_v52  ;;  %v14609_v52 = vld [vmem:[#allocation3 + $0x8] sm:$0x1] }
 0x422   : > { %13571 = vmatprep.mubr.msk.bf16.mxu1 %vm7362_vm4, %v12360_v12  ;;  %v7926_v12 = vrot.slane %v14609_v52, 5 }
 0x424   : > { %v7927_v24 = vsel %vm15299_vm1, %v7925_v49, %v7926_v12  ;;  %v14614_v49 = vld [vmem:[#allocation3 + $0x38] sm:$0x1]  ;;  %v17394_v12 = vld [vmem:[%s18709_s2 + $0x40] sm:$0xff]  }
 0x425   : > { %v7954_v52 = vrot.slane %v14614_v49, 5  ;;  %v9451_v49 = vld [vmem:[#allocation3 + $0x30] sm:$0xe] }
 0x429   : > { %13572 = vmatmul.mubr.msk.bf16.gmra.mrb[32].mxu1 %vm7362_vm4, %v12361_v18  ;;  %v12406_v18 = vcombine.low %v7924_v3, %v7927_v24  ;;  %v14615_v3 = vld [vmem:[#allocation3 + $0x40] sm:$0xf] }
 0x42a   : > { %13575 = vmatprep.mubr.msk.bf16.mxu1 %vm7362_vm4, %v12362_v46  ;;  %v7932_v46 = vrot.slane %v7930_v55, 4  ;;  %v7958_v24 = vrot.slane %v14615_v3, 5  ;;  %v12518_v3 = vrot.slane %v9450_v6, 9 }
 0x42c   : > { %v7960_v31 = vrot.slane %v7958_v24, 4 }
 0x431   : > { %13576 = vmatmul.mubr.msk.bf16.gmra.mrb[36].mxu1 %vm7362_vm4, %v12363_v11  ;;  %v7933_v11 = vrot.slane %v14610_v57, 5  ;;  %v7878_v57 = vld [vmem:[#allocation3 + $0x3c] sm:$0xe] }
 0x432   : > { %13579 = vmatprep.mubr.msk.bf16.mxu1 %vm7362_vm4, %v18871_v15  ;;  %v7953_v15 = vrot.slane %v7951_v33, 4  ;;  %v12391_v61 = vrot.slane %v7878_v57, 9 }
 0x433   : > { %v7934_v63 = vsel %vm15299_vm1, %v7932_v46, %v7933_v11  ;;  %v7967_v11 = vrot.slane %v7965_v8, 4 }
 0x434   : > { %v12407_v19 = vcombine.low %v7931_v53, %v7934_v63  ;;  %v7955_v55 = vsel %vm15299_vm1, %v7953_v15, %v7954_v52  ;;  %v7962_v63 = vsel %vm15299_vm1, %v7960_v31, %v7961_v50  ;;  %v7959_v40 = vsel %vm15299_vm1, %v12391_v61, %v7958_v24  ;;  %v17427_v15 = vld [vmem:[#allocation3 + $0x34] sm:$0xf]  ;;  %v17431_v52 = vld [vmem:[#allocation3 + $0x38] sm:$0x1]  ;;  %v17447_v31 = vld [vmem:[#allocation3 + $0x50] sm:$0x1] }
 0x435   : > { %v7969_v22 = vsel %vm15299_vm1, %v7967_v11, %v7968_v62  ;;  %v7966_v53 = vsel %vm15299_vm1, %v12392_v54, %v7965_v8  ;;  %v9535_v24 = vrot.slane %v17427_v15, 5  ;;  %v9538_v7 = vrot.slane %v17431_v52, 5  ;;  %v17454_v50 = vld [vmem:[#allocation3 + $0x58] sm:$0xf] }
 0x437   : > { %v9537_v11 = vrot.slane %v9535_v24, 4 }
 0x439   : > { %13580 = vmatmul.mubr.msk.bf16.gmra.mrb[40].mxu1 %vm7362_vm4, %v18872_v60  ;;  %v12389_v60 = vrot.slane %v7876_v30, 9  ;;  %v17473_v54 = vsel %vm15299_vm1, %v9537_v11, %v9538_v7 }
 0x43a   : > { %13583 = vmatprep.mubr.msk.bf16.mxu1 %vm7362_vm4, %v18873_v37  ;;  %v7948_v37 = vsel %vm15299_vm1, %v7946_v48, %v7947_v2  ;;  %v17423_v48 = vld [vmem:[#allocation3 + $0x28] sm:$0xf]  ;;  %18879 = vst [vmem:[#allocation17_spill] sm:$0xff] %v17473_v54 }
 0x441   : > { %13584 = vmatmul.mubr.msk.bf16.gmra.mrb[44].mxu1 %vm7362_vm4, %v18874_v21 }
 0x442   : > { %13591 = vmatprep.mubr.msk.bf16.mxu1 %vm7362_vm4, %v12406_v18  ;;  %v7945_v18 = vsel %vm15299_vm1, %v12389_v60, %v7944_v10  ;;  %v7972_v10 = vrot.slane %v16994_v41, 5  ;;  %v7975_v41 = vrot.slane %v16996_v43, 5  ;;  %v17433_v60 = vld [vmem:[#allocation3 + $0x40] sm:$0xf]  ;;  %v9528_v43 = vrot.slane %v17423_v48, 5 }
 0x443   : > { %v12409_v46 = vcombine.low %v7945_v18, %v7948_v37  ;;  %v17437_v37 = vld [vmem:[#allocation3 + $0x4c] sm:$0xf]  ;;  %v9542_v61 = vrot.slane %v17433_v60, 5 }
 0x444   : > { %v7974_v45 = vrot.slane %v7972_v10, 4  ;;  %v9530_v8 = vrot.slane %v9528_v43, 4  ;;  %v17451_v57 = vsel %vm15299_vm1, %v12518_v3, %v9528_v43 }
 0x445   : > { %18876 = vst [vmem:[#allocation14_spill] sm:$0xff] %v17451_v57  ;;  %v14531_v57 = vld [vmem:[#allocation3 + $0xc0] sm:$0xff]  }
 0x449   : > { %13592 = vmatmul.mubr.msk.bf16.vlgmr.msra.gmra.mrb[16].mxu1 %vm7362_vm4, %v12407_v19  ;;  %v12412_v19 = vcombine.low %v7966_v53, %v7969_v22  ;;  %v17476_v53 = vld [vmem:[#allocation3 + $0x68] sm:$0x1] }
 0x44a   : > { %13624 = vmatpush3.bf16.msra.mxu1 %v17220_v29  ;;  %13595 = vmatprep.mubr.msk.bf16.mxu1 %vm7362_vm4, %v12408_v34  ;;  %v12390_v29 = vrot.slane %v7877_v0, 9  ;;  %v7976_v34 = vsel %vm15299_vm1, %v7974_v45, %v7975_v41  ;;  %v17429_v0 = vld [vmem:[#allocation3 + $0x2c] sm:$0x1] }
 0x44b   : > { %13625 = vmatprep.subr.bf16.mxu1 %v14513_v26  ;;  %v9531_v18 = vrot.slane %v17429_v0, 5 }
 0x44c   : > { %v7952_v21 = vsel %vm15299_vm1, %v12390_v29, %v7951_v33  ;;  %v12411_v33 = vcombine.low %v7959_v40, %v7962_v63  ;;  %v9452_v29 = vld [vmem:[#allocation3 + $0x3c] sm:$0xe]  ;;  %v17467_v63 = vld [vmem:[#allocation3 + $0x64] sm:$0xf]  ;;  %v9549_v40 = vrot.slane %v17437_v37, 5 }
 0x44d   : > { %v12410_v9 = vcombine.low %v7952_v21, %v7955_v55  ;;  %v18875_v55 = vcombine.low %v17233_v38, %v17245_v44  ;;  %v9453_v21 = vld [vmem:[#allocation3 + $0x48] sm:$0xe]  ;;  %v17456_v38 = vld [vmem:[#allocation3 + $0x5c] sm:$0x1]  ;;  %v17460_v44 = vsel %vm15299_vm1, %v9530_v8, %v9531_v18  ;;  %v12520_v62 = vrot.slane %v9452_v29, 9 }
 0x44e   : > { %13626 = vmatpush3.bf16.msra.mxu1 %v14513_v26  ;;  %v12393_v26 = vrot.slane %v7880_v1, 9  ;;  %18877 = vst [vmem:[#allocation15_spill] sm:$0xff] %v17460_v44  ;;  %v12521_v22 = vrot.slane %v9453_v21, 9  ;;  %v9544_v1 = vrot.slane %v9542_v61, 4  ;;  %v9551_v6 = vrot.slane %v9549_v40, 4 }
 0x44f   : > { %13659 = vmatprep.subr.bf16.mxu1 %v17394_v12  ;;  %v17482_v45 = vsel %vm15299_vm1, %v12520_v62, %v9542_v61  ;;  %v9563_v29 = vrot.slane %v17467_v63, 5  ;;  %v18883_v8 = vcombine.low %v17238_v14, %v17253_v16  ;;  %v17503_v18 = vld [vmem:[#allocation3 + $0x7c] sm:$0xf]  ;;  %v9457_v62 = vld [vmem:[#allocation3 + $0x78] sm:$0xe]  ;;  %v18885_v61 = vcombine.low %v17264_v58, %v17268_v47 }
 0x450   : > { %v7973_v30 = vsel %vm15299_vm1, %v12393_v26, %v7972_v10  ;;  %18880 = vst [vmem:[#allocation7_spill] sm:$0xff] %v17482_v45  ;;  %v9455_v26 = vld [vmem:[#allocation3 + $0x60] sm:$0xe]  ;;  %v17515_v14 = vld [vmem:[#allocation3 + $0x74] sm:$0x1] }
 0x451   : > { %13596 = vmatmul.mubr.msk.bf16.gmra.mrb[20].mxu1 %vm7362_vm4, %v12409_v46  ;;  %v12413_v2 = vcombine.low %v7973_v30, %v7976_v34  ;;  %v12519_v46 = vrot.slane %v9451_v49, 9  ;;  %v17485_v34 = vld [vmem:[#allocation3 + $0x70] sm:$0xf]  ;;  %v17489_v30 = vsel %vm15299_vm1, %v12521_v22, %v9549_v40  ;;  %v9556_v49 = vrot.slane %v17454_v50, 5  ;;  %v17517_v16 = vld [vmem:[#allocation3 + $0x80] sm:$0x1] }
 0x452   : > { %13599 = vmatprep.mubr.msk.bf16.mxu1 %vm7362_vm4, %v12410_v9  ;;  %v17445_v9 = vld [vmem:[#allocation3 + $0x44] sm:$0x1]  ;;  %18881 = vst [vmem:[#allocation10_spill] sm:$0xff] %v17489_v30  ;;  %v12523_v7 = vrot.slane %v9455_v26, 9  ;;  %v17528_v26 = vld [vmem:[#allocation3 + $0x8c] sm:$0x1] }
 0x453   : > { %v17464_v32 = vsel %vm15299_vm1, %v12519_v46, %v9535_v24  ;;  %v9545_v41 = vrot.slane %v17445_v9, 5  ;;  %v9559_v24 = vrot.slane %v17456_v38, 5  ;;  %v9558_v11 = vrot.slane %v9556_v49, 4  ;;  %v17548_v22 = vld [vmem:[#allocation3 + $0x98] sm:$0x1] }
 0x454   : > { %18878 = vst [vmem:[#allocation16_spill] sm:$0xff] %v17464_v32  ;;  %v17536_v47 = vsel %vm15299_vm1, %v12523_v7, %v9563_v29  ;;  %v9459_v46 = vld [vmem:[#allocation3 + $0x90] sm:$0xe]  ;;  %v9587_v27 = vrot.slane %v17528_v26, 5  ;;  %v8844_v30 = vshrl.u32 %v17427_v15, 16 }
 0x455   : > { %v17495_v43 = vsel %vm15299_vm1, %v9544_v1, %v9545_v41  ;;  %v9566_v1 = vrot.slane %v17476_v53, 5  ;;  %v17526_v41 = vld [vmem:[#allocation3 + $0x88] sm:$0xf]  ;;  %v17532_v58 = vsel %vm15299_vm1, %v9558_v11, %v9559_v24  ;;  %18888 = vst [vmem:[#allocation9_spill] sm:$0xff] %v17536_v47  ;;  %v9577_v24 = vrot.slane %v17503_v18, 5 }
 0x456   : > { %18882 = vst [vmem:[#allocation12_spill] sm:$0xff] %v17495_v43  ;;  %18887 = vst [vmem:[#allocation8_spill] sm:$0xff] %v17532_v58  ;;  %v9458_v11 = vld [vmem:[#allocation3 + $0x84] sm:$0xe]  ;;  %v9584_v10 = vrot.slane %v17526_v41, 5 }
 0x457   : > { %v9460_v47 = vld [vmem:[#allocation3 + $0x9c] sm:$0xe] }
 0x458   : > { %v9586_v28 = vrot.slane %v9584_v10, 4 }
 0x459   : > { %13600 = vmatmul.mubr.msk.bf16.gmra.mrb[24].mxu1 %vm7362_vm4, %v12411_v33  ;;  %v9454_v33 = vld [vmem:[#allocation3 + $0x54] sm:$0xe] }
 0x45a   : > { %13603 = vmatprep.mubr.msk.bf16.mxu1 %vm7362_vm4, %v12412_v19  ;;  %v12522_v3 = vrot.slane %v9454_v33, 9  ;;  %v9565_v33 = vrot.slane %v9563_v29, 4  ;;  %v17557_v19 = vld [vmem:[#allocation3 + $0xa0] sm:$0xf]  ;;  %v17565_v29 = vld [vmem:[#allocation3 + $0xa4] sm:$0x1] }
 0x45c   : > { %v17523_v40 = vsel %vm15299_vm1, %v12522_v3, %v9556_v49  ;;  %v17539_v49 = vld [vmem:[#allocation3 + $0x94] sm:$0xf]  ;;  %v9573_v3 = vrot.slane %v17515_v14, 5 }
 0x45d   : > { %18886 = vst [vmem:[#allocation13_spill] sm:$0xff] %v17523_v40  ;;  %v9591_v20 = vrot.slane %v17539_v49, 5  ;;  %v9594_v40 = vrot.slane %v17548_v22, 5 }
 0x45f   : > { %v9593_v58 = vrot.slane %v9591_v20, 4 }
 0x461   : > { %13604 = vmatmul.mubr.msk.bf16.gmra.mrb[28].mxu1 %vm7362_vm4, %v12413_v2  ;;  %v9552_v2 = vrot.slane %v17447_v31, 5 }
 0x462   : > { %13607 = vmatprep.mubr.msk.bf16.mxu1 %vm7362_vm4, %v18875_v55  ;;  %v9456_v55 = vld [vmem:[#allocation3 + $0x6c] sm:$0xe] }
 0x463   : > { %v17509_v21 = vsel %vm15299_vm1, %v9551_v6, %v9552_v2  ;;  %v12524_v6 = vrot.slane %v9456_v55, 9  ;;  %v9570_v2 = vrot.slane %v17485_v34, 5 }
 0x464   : > { %18884 = vst [vmem:[#allocation11_spill] sm:$0xff] %v17509_v21  ;;  %v14523_v21 = vld [vmem:[#allocation3 + $0x6c] sm:$0xff]  }
 0x465   : > { %v17554_v55 = vsel %vm15299_vm1, %v12524_v6, %v9570_v2  ;;  %v9572_v7 = vrot.slane %v9570_v2, 4  ;;  %v12526_v2 = vrot.slane %v9458_v11, 9  ;;  %v8751_v11 = vld [vmem:[#allocation3 + $0xb0] sm:$0x1] }
 0x466   : > { %18890 = vst [vmem:[#allocation19_spill] sm:$0xff] %v17554_v55 }
 0x467   : > { %v17569_v6 = vsel %vm15299_vm1, %v9572_v7, %v9573_v3  ;;  %v18894_v3 = vcombine.low %v17272_v4, %v17279_v17  ;;  %v17596_v4 = vsel %vm15299_vm1, %v12526_v2, %v9584_v10  ;;  %v17600_v17 = vsel %vm15299_vm1, %v9586_v28, %v9587_v27  ;;  %v9462_v28 = vld [vmem:[#allocation3 + $0xb4] sm:$0xe]  ;;  %v8757_v27 = vld [vmem:[#allocation3 + $0xc8] sm:$0x1] }
 0x468   : > { %18892 = vst [vmem:[#allocation21_spill] sm:$0xff] %v17569_v6  ;;  %18896 = vst [vmem:[#allocation23_spill] sm:$0xff] %v17596_v4  ;;  %v9598_v7 = vrot.slane %v17557_v19, 5  ;;  %v12528_v10 = vrot.slane %v9460_v47, 9  ;;  %v9605_v2 = vrot.slane %v17573_v36, 5  ;;  %v9622_v55 = vrot.slane %v8757_v27, 5 }
 0x469   : > { %13608 = vmatmul.mubr.msk.bf16.gmra.mrb[32].mxu1 %vm7362_vm4, %v18883_v8  ;;  %v17545_v8 = vsel %vm15299_vm1, %v9565_v33, %v9566_v1  ;;  %v9579_v33 = vrot.slane %v9577_v24, 4  ;;  %v9580_v1 = vrot.slane %v17517_v16, 5  ;;  %18897 = vst [vmem:[#allocation24_spill] sm:$0xff] %v17600_v17  ;;  %v9608_v17 = vrot.slane %v8751_v11, 5  ;;  %v14517_v27 = vld [vmem:[#allocation3 + $0x24] sm:$0xff]  }
 0x46a   : > { %13611 = vmatprep.mubr.msk.bf16.mxu1 %vm7362_vm4, %v18885_v61  ;;  %18889 = vst [vmem:[#allocation18_spill] sm:$0xff] %v17545_v8  ;;  %v12525_v61 = vrot.slane %v9457_v62, 9  ;;  %v12527_v8 = vrot.slane %v9459_v46, 9  ;;  %v17592_v46 = vld [vmem:[#allocation3 + $0xb8] sm:$0xf]  ;;  %v17621_v6 = vsel %vm15299_vm1, %v12528_v10, %v9598_v7 }
 0x46b   : > { %18900 = vst [vmem:[#allocation27_spill] sm:$0xff] %v17621_v6  ;;  %v8719_v6 = vld [vmem:[#allocation3 + $0x30] sm:$0xf] }
 0x46c   : > { %v17561_v62 = vsel %vm15299_vm1, %v12525_v61, %v9577_v24  ;;  %v17579_v24 = vsel %vm15299_vm1, %v9579_v33, %v9580_v1  ;;  %v9461_v61 = vld [vmem:[#allocation3 + $0xa8] sm:$0xe]  ;;  %v18895_v33 = vcombine.low %v17287_v39, %v17293_v5  ;;  %v8754_v1 = vld [vmem:[#allocation3 + $0xbc] sm:$0x1]  ;;  %v17607_v39 = vld [vmem:[#allocation3 + $0xc4] sm:$0xf] }
 0x46d   : > { %18891 = vst [vmem:[#allocation20_spill] sm:$0xff] %v17561_v62  ;;  %18893 = vst [vmem:[#allocation22_spill] sm:$0xff] %v17579_v24  ;;  %v9601_v24 = vrot.slane %v17565_v29, 5  ;;  %v12529_v62 = vrot.slane %v9461_v61, 9  ;;  %v9607_v5 = vrot.slane %v9605_v2, 4  ;;  %v9619_v61 = vrot.slane %v17607_v39, 5 }
 0x46f   : > { %v17637_v11 = vsel %vm15299_vm1, %v9607_v5, %v9608_v17  ;;  %v9621_v4 = vrot.slane %v9619_v61, 4  ;;  %v8716_v5 = vld [vmem:[#allocation3 + $0x24] sm:$0xf] }
 0x470   : > { %18903 = vst [vmem:[#allocation30_spill] sm:$0xff] %v17637_v11 }
 0x471   : > { %13612 = vmatmul.mubr.msk.bf16.gmra.mrb[36].mxu1 %vm7362_vm4, %v18894_v3  ;;  %v17604_v3 = vsel %vm15299_vm1, %v12527_v8, %v9591_v20  ;;  %v9600_v8 = vrot.slane %v9598_v7, 4  ;;  %v17630_v20 = vsel %vm15299_vm1, %v12529_v62, %v9605_v2  ;;  %v18904_v62 = vcombine.low %v17297_v13, %v17304_v59 }
 0x472   : > { %13615 = vmatprep.mubr.msk.bf16.mxu1 %vm7362_vm4, %v18895_v33  ;;  %18898 = vst [vmem:[#allocation25_spill] sm:$0xff] %v17604_v3  ;;  %v17613_v33 = vsel %vm15299_vm1, %v9593_v58, %v9594_v40  ;;  %v9612_v40 = vrot.slane %v17592_v46, 5  ;;  %v9463_v58 = vld [vmem:[#allocation3 + $0xc0] sm:$0xe]  ;;  %18902 = vst [vmem:[#allocation29_spill] sm:$0xff] %v17630_v20  ;;  %v9615_v3 = vrot.slane %v8754_v1, 5  ;;  %v18907_v1 = vcombine.low %v17313_v35, %v17317_v51 }
 0x473   : > { %18899 = vst [vmem:[#allocation26_spill] sm:$0xff] %v17613_v33  ;;  %v17626_v47 = vsel %vm15299_vm1, %v9600_v8, %v9601_v24  ;;  %v12530_v33 = vrot.slane %v9462_v28, 9  ;;  %v12531_v8 = vrot.slane %v9463_v58, 9  ;;  %v17665_v59 = vsel %vm15299_vm1, %v9621_v4, %v9622_v55  ;;  %v14516_v51 = vld [vmem:[#allocation3 + $0x18] sm:$0xff]   ;;  %v8710_v55 = vld [vmem:[#allocation3 + $0xc] sm:$0xf] }
 0x474   : > { %18901 = vst [vmem:[#allocation28_spill] sm:$0xff] %v17626_v47  ;;  %v9614_v10 = vrot.slane %v9612_v40, 4  ;;  %18909 = vst [vmem:[#allocation34_spill] sm:$0xff] %v17665_v59  ;;  %v18910_v35 = vcombine.low %v17324_v42, %v17328_v56  ;;  %v14524_v28 = vld [vmem:[%s18709_s2 + $0x48] sm:$0xff]   ;;  %v17680_v4 = vld [vmem:[#allocation3 + $0x10] sm:$0xf] }
 0x475   : > { %v17647_v2 = vsel %vm15299_vm1, %v12530_v33, %v9612_v40  ;;  %v17661_v13 = vsel %vm15299_vm1, %v12531_v8, %v9619_v61  ;;  %v14514_v33 = vld [vmem:[#allocation3 + $0xc] sm:$0xff]   ;;  %v17685_v42 = vld [vmem:[%s18709_s2 + $0x50] sm:$0xff]   ;;  %v8759_v56 = vshrl.u32 %v8710_v55, 16  ;;  %v8762_v40 = vshll.u32 %v8710_v55, 16  ;;  %v17690_v8 = vld [vmem:[#allocation3 + $0x1c] sm:$0xf] }
 0x476   : > { %18905 = vst [vmem:[#allocation31_spill] sm:$0xff] %v17647_v2  ;;  %v17651_v17 = vsel %vm15299_vm1, %v9614_v10, %v9615_v3  ;;  %18908 = vst [vmem:[#allocation33_spill] sm:$0xff] %v17661_v13  ;;  %v8768_v58 = vshll.u32 %v17680_v4, 16  ;;  %v8772_v61 = vshrl.u32 %v17680_v4, 16  ;;  %v8713_v10 = vld [vmem:[#allocation3 + $0x18] sm:$0xf] }
 0x477   : > { %18906 = vst [vmem:[#allocation32_spill] sm:$0xff] %v17651_v17  ;;  %v8792_v55 = vshll.u32 %v17690_v8, 16  ;;  %v8796_v3 = vshrl.u32 %v17690_v8, 16  ;;  %v17696_v24 = vld [vmem:[#allocation3 + $0x14] sm:$0x1] }
 0x478   : > { %v8778_v2 = vshll.u32 %v17696_v24, 16 }
 0x479   : > { %13616 = vmatmul.mubr.msk.bf16.gmra.mrb[40].mxu1 %vm7362_vm4, %v18904_v62  ;;  %v14519_v62 = vld [vmem:[#allocation3 + $0x3c] sm:$0xff]  }
 0x47a   : > { %13619 = vmatprep.mubr.msk.bf16.mxu1 %vm7362_vm4, %v18907_v1  ;;  %v8761_v1 = vrot.slane %v8759_v56, 4  ;;  %v8798_v56 = vrot.slane %v8796_v3, 4  ;;  %v8780_v20 = vrot.slane %v8778_v2, 5  ;;  %v8834_v2 = vshll.u32 %v8719_v6, 16 }
 0x481   : > { %13620 = vmatmul.mubr.msk.bf16.gmra.mrb[44].mxu1 %vm7362_vm4, %v18910_v35  ;;  %v8783_v35 = vshrl.u32 %v8713_v10, 16 }
 0x482   : > { %13627 = vmatprep.mubr.msk.bf16.mxu1 %vm7362_vm4, %v14514_v33  ;;  %v8764_v33 = vrot.slane %v8762_v40, 5  ;;  %v14520_v40 = vld [vmem:[#allocation3 + $0x48] sm:$0xff]  }
 0x483   : > { %v8785_v7 = vrot.slane %v8783_v35, 4 }
 0x484   : > { %v8765_v13 = vor.u32 %v8764_v33, %v8761_v1 }
 0x486   : > { %v8766_v35 = vrot.slane %v8765_v13, 4  ;;  %v14522_v13 = vld [vmem:[#allocation3 + $0x60] sm:$0xff]  }
 0x489   : > { %13628 = vmatmul.mubr.msk.bf16.vlgmr.msra.gmra.mrb[16].mxu1 %vm7362_vm4, %v14516_v51  ;;  %v8786_v51 = vshll.u32 %v8713_v10, 16  ;;  %v17700_v10 = vld [vmem:[#allocation3 + $0x20] sm:$0x1] }
 0x48a   : > { %13660 = vmatpush3.bf16.msra.mxu1 %v17394_v12  ;;  %13631 = vmatprep.mubr.msk.bf16.mxu1 %vm7362_vm4, %v14517_v27  ;;  %v14518_v12 = vld [vmem:[#allocation3 + $0x30] sm:$0xff]   ;;  %v8774_v27 = vrot.slane %v8772_v61, 4  ;;  %18911 = vst [vmem:[#allocation35_spill] sm:$0xff] %v17700_v10  ;;  %v8802_v33 = vshll.u32 %v17700_v10, 16  ;;  %v17897_v10 = vld [vmem:[#allocation3 + $0x64] sm:$0xf] }
 0x48b   : > { %13661 = vmatprep.subr.bf16.mxu1 %v14524_v28  ;;  %v8788_v59 = vrot.slane %v8786_v51, 5  ;;  %v14521_v61 = vld [vmem:[#allocation3 + $0x54] sm:$0xff]   ;;  %18930 = vst [vmem:[#allocation54_spill] sm:$0xff] %v17897_v10 }
 0x48d   : > { %v8789_v11 = vor.u32 %v8788_v59, %v8785_v7 }
 0x48e   : > { %13662 = vmatpush3.bf16.msra.mxu1 %v14524_v28  ;;  %v8770_v28 = vrot.slane %v8768_v58, 5  ;;  %v8810_v58 = vshll.u32 %v8716_v5, 16 }
 0x48f   : > { %13695 = vmatprep.subr.bf16.mxu1 %v17685_v42  ;;  %v8790_v47 = vrot.slane %v8789_v11, 4  ;;  %v8840_v11 = vshll.u32 %v17427_v15, 16  ;;  %v8868_v15 = vshrl.u32 %v17433_v60, 16 }
 0x490   : > { %v8775_v17 = vor.u32 %v8774_v27, %v8770_v28  ;;  %v8812_v27 = vrot.slane %v8810_v58, 5 }
 0x491   : > { %13632 = vmatmul.mubr.msk.bf16.gmra.mrb[20].mxu1 %vm7362_vm4, %v14518_v12  ;;  %v17698_v12 = vrot.slane %v8792_v55, 5  ;;  %v8816_v55 = vshll.u32 %v17423_v48, 16 }
 0x492   : > { %13635 = vmatprep.mubr.msk.bf16.mxu1 %vm7362_vm4, %v14519_v62  ;;  %v8807_v62 = vshrl.u32 %v8716_v5, 16  ;;  %v8776_v51 = vrot.slane %v8775_v17, 4  ;;  %v8820_v5 = vshrl.u32 %v17423_v48, 16  ;;  %v8826_v17 = vshll.u32 %v17429_v0, 16 }
 0x493   : > { %v8799_v1 = vor.u32 %v8798_v56, %v17698_v12  ;;  %v8771_v56 = vsel %vm14906_vm13, %v8766_v35, %v8770_v28  ;;  %v17714_v58 = vrot.slane %v8816_v55, 5  ;;  %v8831_v48 = vshrl.u32 %v8719_v6, 16  ;;  %v8722_v28 = vld [vmem:[#allocation3 + $0x3c] sm:$0xf] }
 0x494   : > { %v8809_v3 = vrot.slane %v8807_v62, 4  ;;  %v8781_v7 = vsel %vm14906_vm13, %v8776_v51, %v8780_v20  ;;  %v8795_v0 = vsel %vm14906_vm13, %v8790_v47, %v17698_v12  ;;  %v17727_v51 = vrot.slane %v8826_v17, 5  ;;  %v8728_v12 = vld [vmem:[#allocation3 + $0x54] sm:$0xf] }
 0x495   : > { %v8800_v59 = vrot.slane %v8799_v1, 4  ;;  %v17719_v20 = vcombine.low %v8771_v56, %v8781_v7  ;;  %v8864_v6 = vshll.u32 %v17433_v60, 16  ;;  %v8725_v1 = vld [vmem:[#allocation3 + $0x48] sm:$0xf]  ;;  %v8892_v47 = vshrl.u32 %v17437_v37, 16 }
 0x496   : > { %v8813_v62 = vor.u32 %v8812_v27, %v8809_v3  ;;  %v8888_v27 = vshll.u32 %v17437_v37, 16  ;;  %v8833_v55 = vrot.slane %v8831_v48, 4  ;;  %v8846_v7 = vrot.slane %v8844_v30, 4 }
 0x497   : > { %v8879_v17 = vshrl.u32 %v8725_v1, 16  ;;  %v17736_v56 = vrot.slane %v8864_v6, 5  ;;  %v8870_v60 = vrot.slane %v8868_v15, 4  ;;  %v8906_v43 = vshll.u32 %v8728_v12, 16 }
 0x498   : > { %v17738_v45 = vrot.slane %v8888_v27, 5  ;;  %v8894_v54 = vrot.slane %v8892_v47, 4  ;;  %v8912_v37 = vshll.u32 %v17454_v50, 16  ;;  %v8916_v48 = vshrl.u32 %v17454_v50, 16 }
 0x499   : > { %13636 = vmatmul.mubr.msk.bf16.gmra.mrb[24].mxu1 %vm7362_vm4, %v14520_v40  ;;  %v8804_v40 = vrot.slane %v8802_v33, 5  ;;  %v8814_v33 = vrot.slane %v8813_v62, 4  ;;  %v8903_v62 = vshrl.u32 %v8728_v12, 16  ;;  %v8881_v12 = vrot.slane %v8879_v17, 4 }
 0x49a   : > { %13639 = vmatprep.mubr.msk.bf16.mxu1 %vm7362_vm4, %v14521_v61  ;;  %v8822_v61 = vrot.slane %v8820_v5, 4  ;;  %v17734_v5 = vrot.slane %v8840_v11, 5  ;;  %v8871_v47 = vor.u32 %v8870_v60, %v17736_v56  ;;  %v8908_v44 = vrot.slane %v8906_v43, 5 }
 0x49b   : > { %v8805_v35 = vsel %vm14906_vm13, %v8800_v59, %v8804_v40  ;;  %v8855_v59 = vshrl.u32 %v8722_v28, 16  ;;  %v8858_v40 = vshll.u32 %v8722_v28, 16  ;;  %v8905_v50 = vrot.slane %v8903_v62, 4 }
 0x49c   : > { %v8823_v3 = vor.u32 %v8822_v61, %v17714_v58  ;;  %v14525_v61 = vld [vmem:[#allocation3 + $0x78] sm:$0xff]   ;;  %v8847_v28 = vor.u32 %v8846_v7, %v17734_v5  ;;  %v17746_v27 = vcombine.low %v8795_v0, %v8805_v35  ;;  %v8731_v7 = vld [vmem:[#allocation3 + $0x60] sm:$0xf]  ;;  %v8898_v60 = vshll.u32 %v17447_v31, 16 }
 0x49d   : > { %v8857_v6 = vrot.slane %v8855_v59, 4  ;;  %v8860_v15 = vrot.slane %v8858_v40, 5  ;;  %v8874_v40 = vshll.u32 %v17445_v9, 16  ;;  %v8930_v62 = vshll.u32 %v8731_v7, 16 }
 0x49e   : > { %v8824_v11 = vrot.slane %v8823_v3, 4  ;;  %v8819_v3 = vsel %vm14906_vm13, %v8814_v33, %v17714_v58  ;;  %v8848_v35 = vrot.slane %v8847_v28, 4  ;;  %v8872_v58 = vrot.slane %v8871_v47, 4 }
 0x49f   : > { %v8861_v43 = vor.u32 %v8860_v15, %v8857_v6  ;;  %v8909_v33 = vor.u32 %v8908_v44, %v8905_v50  ;;  %v8876_v44 = vrot.slane %v8874_v40, 5  ;;  %v8922_v6 = vshll.u32 %v17456_v38, 16  ;;  %v8734_v15 = vld [vmem:[#allocation3 + $0x6c] sm:$0xf] }
 0x4a0   : > { %v8829_v59 = vsel %vm14906_vm13, %v8824_v11, %v17727_v51  ;;  %v8940_v51 = vshrl.u32 %v17467_v63, 16  ;;  %v14528_v11 = vld [vmem:[#allocation3 + $0x9c] sm:$0xff]   ;;  %v17779_v47 = vrot.slane %v8930_v62, 5  ;;  %v14529_v40 = vld [vmem:[#allocation3 + $0xa8] sm:$0xff]   ;;  %v17850_v62 = vld [vmem:[#allocation3 + $0x44] sm:$0x1] }
 0x4a1   : > { %13640 = vmatmul.mubr.msk.bf16.gmra.mrb[28].mxu1 %vm7362_vm4, %v14522_v13  ;;  %v8882_v13 = vshll.u32 %v8725_v1, 16  ;;  %v8850_v1 = vshll.u32 %v17431_v52, 16  ;;  %v8895_v52 = vor.u32 %v8894_v54, %v17738_v45  ;;  %v8927_v54 = vshrl.u32 %v8731_v7, 16  ;;  %18919 = vst [vmem:[#allocation43_spill] sm:$0xff] %v17850_v62 }
 0x4a2   : > { %13643 = vmatprep.mubr.msk.bf16.mxu1 %vm7362_vm4, %v14523_v21  ;;  %v8836_v21 = vrot.slane %v8834_v2, 5  ;;  %v14526_v2 = vld [vmem:[#allocation3 + $0x84] sm:$0xff]   ;;  %v17787_v38 = vrot.slane %v8940_v51, 4  ;;  %v8954_v7 = vshll.u32 %v8734_v15, 16 }
 0x4a3   : > { %v8884_v32 = vrot.slane %v8882_v13, 5  ;;  %v8852_v17 = vrot.slane %v8850_v1, 5  ;;  %v8900_v1 = vrot.slane %v8898_v60, 5  ;;  %v17801_v60 = vrot.slane %v8922_v6, 5  ;;  %v17837_v6 = vld [vmem:[#allocation3 + $0x34] sm:$0xf] }
 0x4a4   : > { %v8837_v30 = vor.u32 %v8836_v21, %v8833_v55  ;;  %v17753_v55 = vrot.slane %v8912_v37, 5  ;;  %v8918_v21 = vrot.slane %v8916_v48, 4  ;;  %v8896_v37 = vrot.slane %v8895_v52, 4  ;;  %18916 = vst [vmem:[#allocation40_spill] sm:$0xff] %v17837_v6 }
 0x4a5   : > { %v8885_v13 = vor.u32 %v8884_v32, %v8881_v12  ;;  %v8853_v31 = vsel %vm14906_vm13, %v8848_v35, %v8852_v17  ;;  %v8862_v32 = vrot.slane %v8861_v43, 4  ;;  %v17775_v12 = vrot.slane %v8909_v33, 4  ;;  %v17791_v35 = vld [vmem:[#allocation3 + $0x1c] sm:$0xf]  ;;  %v14530_v33 = vld [vmem:[#allocation3 + $0xb4] sm:$0xff]  }
 0x4a6   : > { %v8838_v0 = vrot.slane %v8837_v30, 4  ;;  %v8919_v48 = vor.u32 %v8918_v21, %v17753_v55  ;;  %v17763_v30 = vcombine.low %v8819_v3, %v8829_v59  ;;  %v8901_v50 = vsel %vm14906_vm13, %v8896_v37, %v8900_v1  ;;  %18912 = vst [vmem:[#allocation36_spill] sm:$0xff] %v17791_v35  ;;  %v11039_v37 = vld [vmem:[#allocation3 + $0x18] sm:$0xe] }
 0x4a7   : > { %v8886_v28 = vrot.slane %v8885_v13, 4  ;;  %v8951_v21 = vshrl.u32 %v8734_v15, 16  ;;  %v8960_v59 = vshll.u32 %v17485_v34, 16  ;;  %v8867_v43 = vsel %vm14906_vm13, %v8862_v32, %v17736_v56  ;;  %v17840_v15 = vld [vmem:[#allocation3 + $0x38] sm:$0x1] }
 0x4a8   : > { %v8843_v9 = vsel %vm14906_vm13, %v8838_v0, %v17734_v5  ;;  %v17777_v5 = vrot.slane %v8927_v54, 4  ;;  %v17783_v3 = vrot.slane %v8919_v48, 4  ;;  %v8964_v0 = vshrl.u32 %v17485_v34, 16  ;;  %18917 = vst [vmem:[#allocation41_spill] sm:$0xff] %v17840_v15  ;;  %v17865_v56 = vld [vmem:[#allocation3 + $0x4c] sm:$0xf] }
 0x4a9   : > { %13644 = vmatmul.mubr.msk.bf16.gmra.mrb[32].mxu1 %vm7362_vm4, %v14525_v61  ;;  %v14527_v61 = vld [vmem:[#allocation3 + $0x90] sm:$0xff]   ;;  %v17793_v17 = vcombine.low %v8843_v9, %v8853_v31  ;;  %v8891_v13 = vsel %vm14906_vm13, %v8886_v28, %v17738_v45  ;;  %v17817_v45 = vld [vmem:[#allocation3 + $0x28] sm:$0xf]  ;;  %v11105_v9 = vrot.slane %v17791_v35, 5  ;;  %v11040_v31 = vld [vmem:[#allocation3 + $0x24] sm:$0xe] }
 0x4aa   : > { %13647 = vmatprep.mubr.msk.bf16.mxu1 %vm7362_vm4, %v14526_v2  ;;  %v8936_v2 = vshll.u32 %v17467_v63, 16  ;;  %v8877_v63 = vsel %vm14906_vm13, %v8872_v58, %v8876_v44  ;;  %v17803_v58 = vld [vmem:[#allocation3 + $0x78] sm:$0xf]  ;;  %v17807_v34 = vcombine.low %v8891_v13, %v8901_v50  ;;  %18914 = vst [vmem:[#allocation38_spill] sm:$0xff] %v17817_v45  ;;  %v17829_v44 = vrot.slane %v8951_v21, 4  ;;  %18922 = vst [vmem:[#allocation46_spill] sm:$0xff] %v17865_v56 }
 0x4ab   : > { %v17805_v54 = vcombine.low %v8867_v43, %v8877_v63  ;;  %v17831_v32 = vrot.slane %v8954_v7, 5  ;;  %v17833_v28 = vrot.slane %v8960_v59, 5  ;;  %v17835_v1 = vrot.slane %v8964_v0, 4  ;;  %v17842_v63 = vld [vmem:[#allocation3 + $0x40] sm:$0xf] }
 0x4ac   : > { %v17785_v52 = vrot.slane %v8936_v2, 5  ;;  %18918 = vst [vmem:[#allocation42_spill] sm:$0xff] %v17842_v63  ;;  %v12646_v50 = vrot.slane %v11039_v37, 9  ;;  %v11107_v43 = vrot.slane %v11105_v9, 4  ;;  %v11112_v21 = vrot.slane %v17817_v45, 5 }
 0x4ad   : > { %v8984_v0 = vshll.u32 %v17503_v18, 16  ;;  %v12647_v51 = vrot.slane %v11040_v31, 9  ;;  %v11042_v7 = vld [vmem:[#allocation3 + $0x3c] sm:$0xe]  ;;  %v11043_v45 = vld [vmem:[#allocation3 + $0x48] sm:$0xe] }
 0x4ae   : > { %v17854_v37 = vsel %vm15299_vm1, %v12646_v50, %v11105_v9  ;;  %v11114_v2 = vrot.slane %v11112_v21, 4  ;;  %v11119_v50 = vrot.slane %v17837_v6, 5  ;;  %v17883_v35 = vld [vmem:[#allocation3 + $0x5c] sm:$0x1]  ;;  %v12649_v6 = vrot.slane %v11042_v7, 9 }
 0x4af   : > { %18920 = vst [vmem:[#allocation44_spill] sm:$0xff] %v17854_v37  ;;  %18927 = vst [vmem:[#allocation51_spill] sm:$0xff] %v17883_v35  ;;  %v11122_v37 = vrot.slane %v17840_v15, 5  ;;  %v11046_v15 = vld [vmem:[#allocation3 + $0x6c] sm:$0xe] }
 0x4b1   : > { %13648 = vmatmul.mubr.msk.bf16.gmra.mrb[36].mxu1 %vm7362_vm4, %v14527_v61  ;;  %v17815_v61 = vld [vmem:[#allocation3 + $0x20] sm:$0x1] }
 0x4b2   : > { %13651 = vmatprep.mubr.msk.bf16.mxu1 %vm7362_vm4, %v14528_v11  ;;  %18913 = vst [vmem:[#allocation37_spill] sm:$0xff] %v17815_v61  ;;  %v17826_v11 = vld [vmem:[#allocation3 + $0x2c] sm:$0x1]  ;;  %v11108_v13 = vrot.slane %v17815_v61, 5  ;;  %v17867_v61 = vld [vmem:[#allocation3 + $0x58] sm:$0xf] }
 0x4b3   : > { %18915 = vst [vmem:[#allocation39_spill] sm:$0xff] %v17826_v11  ;;  %18923 = vst [vmem:[#allocation47_spill] sm:$0xff] %v17867_v61 }
 0x4b4   : > { %v17858_v48 = vsel %vm15299_vm1, %v11107_v43, %v11108_v13  ;;  %v17872_v43 = vld [vmem:[#allocation3 + $0x50] sm:$0x1]  ;;  %v17876_v13 = vsel %vm15299_vm1, %v12647_v51, %v11112_v21  ;;  %v17888_v51 = vrot.slane %v8984_v0, 5  ;;  %v12650_v0 = vrot.slane %v11043_v45, 9 }
 0x4b5   : > { %18921 = vst [vmem:[#allocation45_spill] sm:$0xff] %v17858_v48  ;;  %18924 = vst [vmem:[#allocation48_spill] sm:$0xff] %v17872_v43  ;;  %v11121_v48 = vrot.slane %v11119_v50, 4  ;;  %v17890_v21 = vld [vmem:[#allocation3 + $0x70] sm:$0xf]  ;;  %v11140_v45 = vrot.slane %v17867_v61, 5 }
 0x4b6   : > { %18925 = vst [vmem:[#allocation49_spill] sm:$0xff] %v17876_v13  ;;  %18928 = vst [vmem:[#allocation52_spill] sm:$0xff] %v17890_v21  ;;  %v11045_v13 = vld [vmem:[#allocation3 + $0x60] sm:$0xe] }
 0x4b7   : > { %v17901_v9 = vsel %vm15299_vm1, %v11121_v48, %v11122_v37 }
 0x4b8   : > { %18931 = vst [vmem:[#allocation55_spill] sm:$0xff] %v17901_v9  ;;  %v12652_v9 = vrot.slane %v11045_v13, 9  ;;  %v10330_v13 = vld [vmem:[#allocation3 + $0x8c] sm:$0x1] }
 0x4b9   : > { %13652 = vmatmul.mubr.msk.bf16.gmra.mrb[40].mxu1 %vm7362_vm4, %v14529_v40  ;;  %v11041_v40 = vld [vmem:[#allocation3 + $0x30] sm:$0xe] }
 0x4ba   : > { %13655 = vmatprep.mubr.msk.bf16.mxu1 %vm7362_vm4, %v14530_v33  ;;  %v11115_v33 = vrot.slane %v17826_v11, 5  ;;  %v12648_v31 = vrot.slane %v11041_v40, 9  ;;  %v11126_v11 = vrot.slane %v17842_v63, 5  ;;  %v11044_v63 = vld [vmem:[#allocation3 + $0x54] sm:$0xe] }
 0x4bb   : > { %v12651_v37 = vrot.slane %v11044_v63, 9 }
 0x4bc   : > { %v17880_v59 = vsel %vm15299_vm1, %v11114_v2, %v11115_v33  ;;  %v17894_v2 = vsel %vm15299_vm1, %v12648_v31, %v11119_v50  ;;  %v11128_v40 = vrot.slane %v11126_v11, 4  ;;  %v11129_v33 = vrot.slane %v17850_v62, 5  ;;  %v17909_v31 = vld [vmem:[#allocation3 + $0x68] sm:$0x1]  ;;  %v17911_v50 = vld [vmem:[#allocation3 + $0x74] sm:$0x1] }
 0x4bd   : > { %18926 = vst [vmem:[#allocation50_spill] sm:$0xff] %v17880_v59  ;;  %18929 = vst [vmem:[#allocation53_spill] sm:$0xff] %v17894_v2  ;;  %v17905_v7 = vsel %vm15299_vm1, %v12649_v6, %v11126_v11  ;;  %v11133_v59 = vrot.slane %v17865_v56, 5  ;;  %v11136_v11 = vrot.slane %v17872_v43, 5  ;;  %v11143_v56 = vrot.slane %v17883_v35, 5 }
 0x4be   : > { %18932 = vst [vmem:[#allocation56_spill] sm:$0xff] %v17905_v7  ;;  %18933 = vst [vmem:[#allocation57_spill] sm:$0xff] %v17909_v31  ;;  %v17917_v48 = vsel %vm15299_vm1, %v11128_v40, %v11129_v33  ;;  %v17926_v62 = vld [vmem:[#allocation3 + $0x88] sm:$0xf]  ;;  %v11142_v33 = vrot.slane %v11140_v45, 4  ;;  %v11147_v2 = vrot.slane %v17897_v10, 5  ;;  %v17941_v63 = vsel %vm15299_vm1, %v12651_v37, %v11140_v45 }
 0x4bf   : > { %18934 = vst [vmem:[#allocation58_spill] sm:$0xff] %v17911_v50  ;;  %18935 = vst [vmem:[#allocation59_spill] sm:$0xff] %v17917_v48  ;;  %v11135_v6 = vrot.slane %v11133_v59, 4  ;;  %v17930_v40 = vsel %vm15299_vm1, %v12650_v0, %v11133_v59  ;;  %v17933_v43 = vld [vmem:[#allocation3 + $0x7c] sm:$0xf]  ;;  %v11154_v48 = vrot.slane %v17890_v21, 5 }
 0x4c0   : > { %18936 = vst [vmem:[#allocation60_spill] sm:$0xff] %v17930_v40  ;;  %18937 = vst [vmem:[#allocation61_spill] sm:$0xff] %v17933_v43  ;;  %v11047_v59 = vld [vmem:[#allocation3 + $0x78] sm:$0xe]  ;;  %v17945_v0 = vld [vmem:[#allocation3 + $0x80] sm:$0x1]  ;;  %v17951_v35 = vsel %vm15299_vm1, %v11142_v33, %v11143_v56 }
 0x4c1   : > { %13656 = vmatmul.mubr.msk.bf16.gmra.mrb[44].mxu1 %vm7362_vm4, %v14531_v57  ;;  %18939 = vst [vmem:[#allocation63_spill] sm:$0xff] %v17941_v63  ;;  %v11150_v57 = vrot.slane %v17909_v31, 5  ;;  %18940 = vst [vmem:[#allocation64_spill] sm:$0xff] %v17945_v0  ;;  %v17953_v10 = vld [vmem:[#allocation3 + $0x94] sm:$0xf]  ;;  %v17959_v31 = vsel %vm15299_vm1, %v12652_v9, %v11147_v2  ;;  %v11156_v21 = vrot.slane %v11154_v48, 4 }
 0x4c2   : > { %13663 = vmatprep.mubr.msk.bf16.mxu1 %vm7362_vm4, %v17719_v20  ;;  %v17937_v20 = vsel %vm15299_vm1, %v11135_v6, %v11136_v11  ;;  %18941 = vst [vmem:[#allocation65_spill] sm:$0xff] %v17951_v35  ;;  %v11149_v11 = vrot.slane %v11147_v2, 4  ;;  %v12653_v6 = vrot.slane %v11046_v15, 9  ;;  %18942 = vst [vmem:[#allocation66_spill] sm:$0xff] %v17953_v10  ;;  %v10335_v45 = vld [vmem:[#allocation3 + $0xa0] sm:$0xf] }
 0x4c3   : > { %18938 = vst [vmem:[#allocation62_spill] sm:$0xff] %v17937_v20  ;;  %18943 = vst [vmem:[#allocation67_spill] sm:$0xff] %v17959_v31  ;;  %v11157_v61 = vrot.slane %v17911_v50, 5  ;;  %v11048_v7 = vld [vmem:[#allocation3 + $0x84] sm:$0xe]  ;;  %v14533_v56 = vld [vmem:[%s18709_s2 + $0x58] sm:$0xff]  }
 0x4c4   : > { %v17967_v15 = vsel %vm15299_vm1, %v11149_v11, %v11150_v57  ;;  %v17971_v33 = vsel %vm15299_vm1, %v12653_v6, %v11154_v48  ;;  %v12654_v37 = vrot.slane %v11047_v59, 9  ;;  %v11161_v9 = vrot.slane %v17933_v43, 5  ;;  %v11049_v2 = vld [vmem:[#allocation3 + $0x90] sm:$0xe]  ;;  %v17974_v35 = vld [vmem:[#allocation3 + $0x98] sm:$0x1] }
 0x4c5   : > { %18944 = vst [vmem:[#allocation68_spill] sm:$0xff] %v17967_v15  ;;  %18945 = vst [vmem:[#allocation69_spill] sm:$0xff] %v17971_v33  ;;  %v10336_v63 = vld [vmem:[#allocation3 + $0xa4] sm:$0x1]  ;;  %v17980_v40 = vsel %vm15299_vm1, %v11156_v21, %v11157_v61  ;;  %v11164_v57 = vrot.slane %v17945_v0, 5  ;;  %v11168_v11 = vrot.slane %v17926_v62, 5 }
 0x4c6   : > { %18946 = vst [vmem:[#allocation70_spill] sm:$0xff] %v17974_v35  ;;  %18947 = vst [vmem:[#allocation71_spill] sm:$0xff] %v17980_v40  ;;  %v11163_v59 = vrot.slane %v11161_v9, 4  ;;  %v12655_v6 = vrot.slane %v11048_v7, 9  ;;  %v11171_v50 = vrot.slane %v10330_v13, 5  ;;  %v17993_v21 = vsel %vm15299_vm1, %v12654_v37, %v11161_v9  ;;  %v17999_v7 = vld [vmem:[%s18709_s2 + $0x60] sm:$0xff]  }
 0x4c7   : > { %v11050_v43 = vld [vmem:[#allocation3 + $0x9c] sm:$0xe]  ;;  %v10341_v61 = vld [vmem:[#allocation3 + $0xb8] sm:$0xf]  ;;  %v11170_v20 = vrot.slane %v11168_v11, 4  ;;  %v12656_v15 = vrot.slane %v11049_v2, 9 }
 0x4c8   : > { %v18001_v13 = vld [vmem:[#allocation3 + $0xac] sm:$0xf]  ;;  %v11178_v37 = vrot.slane %v17974_v35, 5  ;;  %v11182_v9 = vrot.slane %v10335_v45, 5  ;;  %v10339_v2 = vld [vmem:[#allocation3 + $0xb0] sm:$0x1] }
 0x4c9   : > { %13664 = vmatmul.mubr.msk.bf16.vlgmr.msra.gmra.mrb[16].mxu1 %vm7362_vm4, %v17746_v27  ;;  %v11175_v27 = vrot.slane %v17953_v10, 5  ;;  %v18016_v40 = vsel %vm15299_vm1, %v11170_v20, %v11171_v50  ;;  %v12657_v31 = vrot.slane %v11050_v43, 9  ;;  %v11051_v0 = vld [vmem:[#allocation3 + $0xa8] sm:$0xe]  ;;  %v11052_v35 = vld [vmem:[#allocation3 + $0xb4] sm:$0xe] }
 0x4ca   : > { %13696 = vmatpush3.bf16.msra.mxu1 %v17685_v42  ;;  %13667 = vmatprep.mubr.msk.bf16.mxu1 %vm7362_vm4, %v17763_v30  ;;  %v18005_v42 = vsel %vm15299_vm1, %v11163_v59, %v11164_v57  ;;  %v18009_v30 = vsel %vm15299_vm1, %v12655_v6, %v11168_v11  ;;  %18949 = vst [vmem:[#allocation73_spill] sm:$0xff] %v18016_v40  ;;  %v8988_v57 = vshrl.u32 %v17503_v18, 16  ;;  %v11184_v59 = vrot.slane %v11182_v9, 4  ;;  %v10342_v45 = vld [vmem:[#allocation3 + $0xbc] sm:$0x1]  ;;  %v19032_v23 = vld [vmem:[#allocation56_spill] sm:$0xff] }
 0x4cb   : > { %13697 = vmatprep.subr.bf16.mxu1 %v14533_v56  ;;  %18948 = vst [vmem:[#allocation72_spill] sm:$0xff] %v18009_v30  ;;  %v11177_v33 = vrot.slane %v11175_v27, 4  ;;  %v11185_v6 = vrot.slane %v10336_v63, 5  ;;  %v18021_v10 = vld [vmem:[#allocation3 + $0xc4] sm:$0xf]  ;;  %v18025_v48 = vsel %vm15299_vm1, %v12656_v15, %v11175_v27  ;;  %v18033_v18 = vsel %vm15299_vm1, %v12657_v31, %v11182_v9 }
 0x4cc   : > { %v11189_v50 = vrot.slane %v18001_v13, 5  ;;  %v11196_v15 = vrot.slane %v10341_v61, 5  ;;  %v11053_v27 = vld [vmem:[#allocation3 + $0xc0] sm:$0xe]  ;;  %v11192_v9 = vrot.slane %v10339_v2, 5  ;;  %v12659_v11 = vrot.slane %v11052_v35, 9 }
 0x4cd   : > { %v18029_v43 = vsel %vm15299_vm1, %v11177_v33, %v11178_v37  ;;  %v18041_v63 = vsel %vm15299_vm1, %v11184_v59, %v11185_v6  ;;  %v10345_v33 = vld [vmem:[#allocation3 + $0xc8] sm:$0x1]  ;;  %v8990_v40 = vrot.slane %v8988_v57, 4  ;;  %v11199_v20 = vrot.slane %v10342_v45, 5  ;;  %v8740_v2 = vld [vmem:[#allocation3 + $0x84] sm:$0xf] }
 0x4ce   : > { %13698 = vmatpush3.bf16.msra.mxu1 %v14533_v56  ;;  %18950 = vst [vmem:[#allocation74_spill] sm:$0xff] %v18029_v43  ;;  %v12658_v56 = vrot.slane %v11051_v0, 9  ;;  %v12677_v37 = vcombine.low %v18033_v18, %v18041_v63  ;;  %v11191_v31 = vrot.slane %v11189_v50, 4  ;;  %v11198_v30 = vrot.slane %v11196_v15, 4 }
 0x4cf   : > { %13731 = vmatprep.subr.bf16.mxu1 %v17999_v7  ;;  %v11203_v43 = vrot.slane %v18021_v10, 5  ;;  %v18060_v35 = vsel %vm15299_vm1, %v12659_v11, %v11196_v15  ;;  %v11206_v6 = vrot.slane %v10345_v33, 5  ;;  %v18951_v45 = vor.u32 %v17779_v47, %v17777_v5 }
 0x4d0   : > { %v18052_v0 = vsel %vm15299_vm1, %v12658_v56, %v11189_v50  ;;  %v18056_v61 = vsel %vm15299_vm1, %v11191_v31, %v11192_v9  ;;  %v8970_v56 = vshll.u32 %v17515_v14, 16  ;;  %v18952_v11 = vshrl.u32 %v17803_v58, 16 }
 0x4d1   : > { %13668 = vmatmul.mubr.msk.bf16.gmra.mrb[20].mxu1 %vm7362_vm4, %v17793_v17  ;;  %v12660_v17 = vrot.slane %v11053_v27, 9  ;;  %v12678_v57 = vcombine.low %v18052_v0, %v18056_v61  ;;  %v11205_v59 = vrot.slane %v11203_v43, 4  ;;  %v8934_v50 = vrot.slane %v18951_v45, 4 }
 0x4d2   : > { %13671 = vmatprep.mubr.msk.bf16.mxu1 %vm7362_vm4, %v17805_v54  ;;  %v18066_v54 = vsel %vm15299_vm1, %v11198_v30, %v11199_v20  ;;  %v8977_v15 = vrot.slane %v18952_v11, 4  ;;  %v9008_v31 = vshll.u32 %v17526_v41, 16  ;;  %v9012_v9 = vshrl.u32 %v17526_v41, 16 }
 0x4d3   : > { %v12679_v27 = vcombine.low %v18060_v35, %v18066_v54  ;;  %v18080_v30 = vsel %vm15299_vm1, %v12660_v17, %v11203_v43  ;;  %v18084_v5 = vsel %vm15299_vm1, %v11205_v59, %v11206_v6  ;;  %v18953_v14 = vshll.u32 %v17803_v58, 16 }
 0x4d4   : > { %v8999_v20 = vshrl.u32 %v8740_v2, 16  ;;  %v9002_v33 = vshll.u32 %v8740_v2, 16  ;;  %v12680_v45 = vcombine.low %v18080_v30, %v18084_v5  ;;  %v18954_v11 = vor.u32 %v17787_v38, %v17785_v52 }
 0x4d5   : > { %v8980_v47 = vrot.slane %v18953_v14, 5  ;;  %v18955_v43 = vor.u32 %v17831_v32, %v17829_v44  ;;  %v18956_v59 = vor.u32 %v17835_v1, %v17833_v28  ;;  %v8991_v58 = vor.u32 %v8990_v40, %v17888_v51 }
 0x4d6   : > { %v8944_v41 = vrot.slane %v18954_v11, 4  ;;  %v18957_v2 = vsel %vm14906_vm13, %v17783_v3, %v17801_v60  ;;  %v18958_v38 = vsel %vm14906_vm13, %v17775_v12, %v17753_v55  ;;  %v18959_v44 = vshll.u32 %v17476_v53, 16 }
 0x4d7   : > { %v8958_v17 = vrot.slane %v18955_v43, 4  ;;  %v8968_v6 = vrot.slane %v18956_v59, 4  ;;  %v12488_v14 = vcombine.low %v18958_v38, %v18957_v2  ;;  %v8972_v1 = vrot.slane %v8970_v56, 5  ;;  %v8743_v59 = vld [vmem:[#allocation3 + $0x90] sm:$0xf] }
 0x4d8   : > { %v8948_v32 = vrot.slane %v18959_v44, 5  ;;  %v8994_v40 = vshll.u32 %v17517_v16, 16  ;;  %v18115_v11 = vrot.slane %v9008_v31, 5  ;;  %v9014_v43 = vrot.slane %v9012_v9, 4 }
 0x4d9   : > { %13672 = vmatmul.mubr.msk.bf16.gmra.mrb[24].mxu1 %vm7362_vm4, %v17807_v34  ;;  %v8939_v55 = vsel %vm14906_vm13, %v8934_v50, %v17785_v52  ;;  %v8981_v12 = vor.u32 %v8980_v47, %v8977_v15  ;;  %v9001_v3 = vrot.slane %v8999_v20, 4  ;;  %v9004_v53 = vrot.slane %v9002_v33, 5  ;;  %v8746_v50 = vld [vmem:[#allocation3 + $0x9c] sm:$0xf] }
 0x4da   : > { %13675 = vmatprep.mubr.msk.bf16.mxu1 %vm7362_vm4, %v12488_v14  ;;  %v8949_v60 = vsel %vm14906_vm13, %v8944_v41, %v8948_v32  ;;  %v8963_v16 = vsel %vm14906_vm13, %v8958_v17, %v17833_v28  ;;  %v8973_v34 = vsel %vm14906_vm13, %v8968_v6, %v8972_v1  ;;  %v8992_v56 = vrot.slane %v8991_v58, 4 }
 0x4db   : > { %v9023_v31 = vshrl.u32 %v8743_v59, 16  ;;  %v9026_v9 = vshll.u32 %v8743_v59, 16  ;;  %v9032_v2 = vshll.u32 %v17539_v49, 16  ;;  %v9036_v52 = vshrl.u32 %v17539_v49, 16 }
 0x4dc   : > { %v8996_v15 = vrot.slane %v8994_v40, 5  ;;  %v9015_v47 = vor.u32 %v9014_v43, %v18115_v11  ;;  %v9056_v20 = vshll.u32 %v17557_v19, 16  ;;  %v9060_v33 = vshrl.u32 %v17557_v19, 16 }
 0x4dd   : > { %v12489_v41 = vcombine.low %v8939_v55, %v8949_v60  ;;  %v12490_v28 = vcombine.low %v8963_v16, %v8973_v34  ;;  %v8982_v17 = vrot.slane %v8981_v12, 4  ;;  %v9005_v38 = vor.u32 %v9004_v53, %v9001_v3  ;;  %v8749_v16 = vld [vmem:[#allocation3 + $0xa8] sm:$0xf] }
 0x4de   : > { %v8997_v6 = vsel %vm14906_vm13, %v8992_v56, %v8996_v15  ;;  %v9018_v58 = vshll.u32 %v17528_v26, 16  ;;  %v9047_v14 = vshrl.u32 %v8746_v50, 16  ;;  %v9050_v44 = vshll.u32 %v8746_v50, 16 }
 0x4df   : > { %v9025_v49 = vrot.slane %v9023_v31, 4  ;;  %v9028_v32 = vrot.slane %v9026_v9, 5  ;;  %v9034_v1 = vrot.slane %v9032_v2, 5  ;;  %v9038_v40 = vrot.slane %v9036_v52, 4  ;;  %v8752_v2 = vld [vmem:[#allocation3 + $0xb4] sm:$0xf] }
 0x4e0   : > { %v9016_v43 = vrot.slane %v9015_v47, 4  ;;  %v18137_v59 = vrot.slane %v9056_v20, 5  ;;  %v9062_v19 = vrot.slane %v9060_v33, 4  ;;  %v8987_v55 = vsel %vm14906_vm13, %v8982_v17, %v17888_v51 }
 0x4e1   : > { %13676 = vmatmul.mubr.msk.bf16.gmra.mrb[28].mxu1 %vm7362_vm4, %v12489_v41  ;;  %v9006_v12 = vrot.slane %v9005_v38, 4  ;;  %v12491_v26 = vcombine.low %v8987_v55, %v8997_v6  ;;  %v9020_v3 = vrot.slane %v9018_v58, 5  ;;  %v9049_v53 = vrot.slane %v9047_v14, 4 }
 0x4e2   : > { %13679 = vmatprep.mubr.msk.bf16.mxu1 %vm7362_vm4, %v12490_v28  ;;  %v9052_v60 = vrot.slane %v9050_v44, 5  ;;  %v9029_v34 = vor.u32 %v9028_v32, %v9025_v49  ;;  %v9039_v56 = vor.u32 %v9038_v40, %v9034_v1  ;;  %v9080_v31 = vshll.u32 %v17573_v36, 16 }
 0x4e3   : > { %v9084_v9 = vshrl.u32 %v17573_v36, 16  ;;  %v9021_v52 = vsel %vm14906_vm13, %v9016_v43, %v9020_v3  ;;  %v9063_v50 = vor.u32 %v9062_v19, %v18137_v59  ;;  %v9104_v51 = vshll.u32 %v17592_v46, 16  ;;  %v8755_v3 = vld [vmem:[#allocation3 + $0xc0] sm:$0xf] }
 0x4e4   : > { %v9108_v15 = vshrl.u32 %v17592_v46, 16  ;;  %v9011_v47 = vsel %vm14906_vm13, %v9006_v12, %v18115_v11  ;;  %v9042_v20 = vshll.u32 %v17548_v22, 16  ;;  %v9071_v33 = vshrl.u32 %v8749_v16, 16 }
 0x4e5   : > { %v9074_v41 = vshll.u32 %v8749_v16, 16  ;;  %v9053_v28 = vor.u32 %v9052_v60, %v9049_v53  ;;  %v9066_v36 = vshll.u32 %v17565_v29, 16  ;;  %v9095_v17 = vshrl.u32 %v8752_v2, 16 }
 0x4e6   : > { %v9098_v38 = vshll.u32 %v8752_v2, 16  ;;  %v12492_v6 = vcombine.low %v9011_v47, %v9021_v52  ;;  %v9040_v58 = vrot.slane %v9039_v56, 4  ;;  %v9082_v14 = vrot.slane %v9080_v31, 5  ;;  %v14617_v2 = vld [vmem:[#allocation3 + $0xb0] sm:$0x1] }
 0x4e7   : > { %v9086_v44 = vrot.slane %v9084_v9, 4  ;;  %v9030_v46 = vrot.slane %v9029_v34, 4  ;;  %v9064_v49 = vrot.slane %v9063_v50, 4  ;;  %v9106_v32 = vrot.slane %v9104_v51, 5 }
 0x4e8   : > { %v9110_v40 = vrot.slane %v9108_v15, 4  ;;  %v9044_v22 = vrot.slane %v9042_v20, 5  ;;  %v9073_v11 = vrot.slane %v9071_v33, 4  ;;  %v9076_v43 = vrot.slane %v9074_v41, 5  ;;  %v14618_v33 = vld [vmem:[#allocation3 + $0xbc] sm:$0x1] }
 0x4e9   : > { %13680 = vmatmul.mubr.msk.bf16.gmra.mrb[32].mxu1 %vm7362_vm4, %v12491_v26  ;;  %v9054_v19 = vrot.slane %v9053_v28, 4  ;;  %v9068_v55 = vrot.slane %v9066_v36, 5  ;;  %v9097_v29 = vrot.slane %v9095_v17, 4  ;;  %v9100_v12 = vrot.slane %v9098_v38, 5 }
 0x4ea   : > { %13683 = vmatprep.mubr.msk.bf16.mxu1 %vm7362_vm4, %v12492_v6  ;;  %v9045_v53 = vsel %vm14906_vm13, %v9040_v58, %v9044_v22  ;;  %v9087_v60 = vor.u32 %v9086_v44, %v9082_v14  ;;  %v9128_v26 = vshll.u32 %v17607_v39, 16  ;;  %v9132_v16 = vshrl.u32 %v17607_v39, 16 }
 0x4eb   : > { %v9035_v34 = vsel %vm14906_vm13, %v9030_v46, %v9034_v1  ;;  %v9069_v56 = vsel %vm14906_vm13, %v9064_v49, %v9068_v55  ;;  %v9111_v31 = vor.u32 %v9110_v40, %v9106_v32  ;;  %v9077_v9 = vor.u32 %v9076_v43, %v9073_v11  ;;  %v14619_v55 = vld [vmem:[#allocation3 + $0xc8] sm:$0x1] }
 0x4ec   : > { %v9090_v52 = vshll.u32 %v14617_v2, 16  ;;  %v9119_v50 = vshrl.u32 %v8755_v3, 16  ;;  %v9122_v51 = vshll.u32 %v8755_v3, 16  ;;  %v12493_v15 = vcombine.low %v9035_v34, %v9045_v53 }
 0x4ed   : > { %v9059_v47 = vsel %vm14906_vm13, %v9054_v19, %v18137_v59  ;;  %v9101_v20 = vor.u32 %v9100_v12, %v9097_v29  ;;  %v9114_v39 = vshll.u32 %v14618_v33, 16  ;;  %v9088_v28 = vrot.slane %v9087_v60, 4 }
 0x4ee   : > { %v12494_v41 = vcombine.low %v9059_v47, %v9069_v56  ;;  %v9130_v1 = vrot.slane %v9128_v26, 5  ;;  %v9134_v36 = vrot.slane %v9132_v16, 4  ;;  %v9112_v17 = vrot.slane %v9111_v31, 4  ;;  %v18960_v47 = vld [vmem:[#allocation35_spill] sm:$0xff] }
 0x4ef   : > { %v9078_v38 = vrot.slane %v9077_v9, 4  ;;  %v9092_v6 = vrot.slane %v9090_v52, 5  ;;  %v9121_v58 = vrot.slane %v9119_v50, 4  ;;  %v9124_v44 = vrot.slane %v9122_v51, 5 }
 0x4f0   : > { %v9102_v46 = vrot.slane %v9101_v20, 4  ;;  %v9116_v49 = vrot.slane %v9114_v39, 5  ;;  %v9135_v40 = vor.u32 %v9134_v36, %v9130_v1  ;;  %v9514_v11 = vrot.slane %v17680_v4, 5  ;;  %v9448_v4 = vld [vmem:[#allocation3 + $0xc] sm:$0xe]  ;;  %v18962_v36 = vld [vmem:[#allocation15_spill] sm:$0xff] }
 0x4f1   : > { %13684 = vmatmul.mubr.msk.bf16.gmra.mrb[36].mxu1 %vm7362_vm4, %v12493_v15  ;;  %v9093_v59 = vsel %vm14906_vm13, %v9088_v28, %v9092_v6  ;;  %v9083_v43 = vsel %vm14906_vm13, %v9078_v38, %v9082_v14  ;;  %v9125_v19 = vor.u32 %v9124_v44, %v9121_v58  ;;  %v9138_v29 = vshll.u32 %v14619_v55, 16  ;;  %v14535_v28 = vld [vmem:[%s18709_s2 + $0x68] sm:$0xff]   ;;  %v14537_v38 = vld [vmem:[%s18709_s2 + $0x70] sm:$0xff]   ;;  %v18965_v58 = vld [vmem:[#allocation17_spill] sm:$0xff] }
 0x4f2   : > { %13687 = vmatprep.mubr.msk.bf16.mxu1 %vm7362_vm4, %v12494_v41  ;;  %v9117_v22 = vsel %vm14906_vm13, %v9112_v17, %v9116_v49  ;;  %v12495_v12 = vcombine.low %v9083_v43, %v9093_v59  ;;  %v9107_v3 = vsel %vm14906_vm13, %v9102_v46, %v9106_v32  ;;  %v9136_v60 = vrot.slane %v9135_v40, 4  ;;  %v18964_v6 = vld [vmem:[#allocation16_spill] sm:$0xff]  ;;  %v18967_v46 = vld [vmem:[#allocation7_spill] sm:$0xff]  ;;  %v18970_v59 = vld [vmem:[#allocation10_spill] sm:$0xff] }
 0x4f3   : > { %v12496_v53 = vcombine.low %v9107_v3, %v9117_v22  ;;  %v9516_v26 = vrot.slane %v9514_v11, 4  ;;  %v9126_v16 = vrot.slane %v9125_v19, 4  ;;  %v9140_v34 = vrot.slane %v9138_v29, 5  ;;  %v18968_v49 = vld [vmem:[#allocation12_spill] sm:$0xff]  ;;  %v18971_v40 = vld [vmem:[#allocation11_spill] sm:$0xff]  ;;  %v18976_v55 = vld [vmem:[#allocation9_spill] sm:$0xff] }
 0x4f4   : > { %v9517_v56 = vrot.slane %v17696_v24, 5  ;;  %v9521_v31 = vrot.slane %v17690_v8, 5  ;;  %v12516_v9 = vrot.slane %v9448_v4, 9  ;;  %v9449_v24 = vld [vmem:[#allocation3 + $0x18] sm:$0xe]  ;;  %v9524_v8 = vrot.slane %v18960_v47, 5 }
 0x4f5   : > { %v9141_v14 = vsel %vm14906_vm13, %v9136_v60, %v9140_v34  ;;  %v9131_v2 = vsel %vm14906_vm13, %v9126_v16, %v9130_v1  ;;  %v12517_v20 = vrot.slane %v9449_v24, 9  ;;  %v18961_v1 = vld [vmem:[#allocation14_spill] sm:$0xff]  ;;  %v18966_v44 = vcombine.low %v18964_v6, %v18965_v58  ;;  %v18974_v43 = vld [vmem:[#allocation8_spill] sm:$0xff]  ;;  %v18979_v3 = vld [vmem:[#allocation19_spill] sm:$0xff] }
 0x4f6   : > { %v9518_v32 = vsel %vm15299_vm1, %v9516_v26, %v9517_v56  ;;  %v12497_v52 = vcombine.low %v9131_v2, %v9141_v14  ;;  %v9515_v50 = vsel %vm15299_vm1, %v12516_v9, %v9514_v11  ;;  %v9523_v15 = vrot.slane %v9521_v31, 4  ;;  %v18973_v11 = vld [vmem:[#allocation13_spill] sm:$0xff]  ;;  %v18977_v29 = vld [vmem:[#allocation18_spill] sm:$0xff]  ;;  %v18982_v26 = vld [vmem:[#allocation20_spill] sm:$0xff] }
 0x4f7   : > { %v12536_v51 = vcombine.low %v9515_v50, %v9518_v32  ;;  %v9522_v39 = vsel %vm15299_vm1, %v12517_v20, %v9521_v31  ;;  %v18963_v17 = vcombine.low %v18961_v1, %v18962_v36  ;;  %v18972_v22 = vcombine.low %v18970_v59, %v18971_v40  ;;  %v18983_v16 = vld [vmem:[#allocation22_spill] sm:$0xff]  ;;  %v18985_v4 = vld [vmem:[#allocation23_spill] sm:$0xff]  ;;  %v18986_v56 = vld [vmem:[#allocation24_spill] sm:$0xff] }
 0x4f8   : > { %v9525_v33 = vsel %vm15299_vm1, %v9523_v15, %v9524_v8  ;;  %v18975_v19 = vcombine.low %v18973_v11, %v18974_v43  ;;  %v18984_v34 = vcombine.low %v18982_v26, %v18983_v16  ;;  %v18987_v14 = vcombine.low %v18985_v4, %v18986_v56  ;;  %v18988_v31 = vld [vmem:[#allocation25_spill] sm:$0xff]  ;;  %v18989_v9 = vld [vmem:[#allocation26_spill] sm:$0xff]  ;;  %v18991_v2 = vld [vmem:[#allocation27_spill] sm:$0xff] }
 0x4f9   : > { %13688 = vmatmul.mubr.msk.bf16.gmra.mrb[40].mxu1 %vm7362_vm4, %v12495_v12  ;;  %v12537_v41 = vcombine.low %v9522_v39, %v9525_v33  ;;  %v18978_v12 = vcombine.low %v18976_v55, %v18977_v29  ;;  %v18990_v32 = vcombine.low %v18988_v31, %v18989_v9  ;;  %v18995_v15 = vld [vmem:[#allocation30_spill] sm:$0xff]  ;;  %v18997_v47 = vld [vmem:[#allocation31_spill] sm:$0xff]  ;;  %v18998_v8 = vld [vmem:[#allocation32_spill] sm:$0xff] }
 0x4fa   : > { %13691 = vmatprep.mubr.msk.bf16.mxu1 %vm7362_vm4, %v12496_v53  ;;  %v18980_v53 = vld [vmem:[#allocation21_spill] sm:$0xff]  ;;  %v18999_v20 = vcombine.low %v18997_v47, %v18998_v8  ;;  %v14536_v33 = vld [vmem:[#allocation3 + $0x18] sm:$0xff]   ;;  %v18271_v6 = vld [vmem:[%s18709_s2 + $0x80] sm:$0xff]  }
 0x4fb   : > { %v18981_v60 = vcombine.low %v18979_v3, %v18980_v53  ;;  %v19000_v39 = vld [vmem:[#allocation33_spill] sm:$0xff]  ;;  %v14540_v58 = vld [vmem:[#allocation3 + $0x3c] sm:$0xff]   ;;  %v10301_v59 = vld [vmem:[#allocation3 + $0x18] sm:$0xf] }
 0x4fc   : > { %v14538_v1 = vld [vmem:[#allocation3 + $0x24] sm:$0xff]   ;;  %v10350_v55 = vshrl.u32 %v10301_v59, 16  ;;  %v10353_v29 = vshll.u32 %v10301_v59, 16  ;;  %v19004_v4 = vld [vmem:[#allocation38_spill] sm:$0xff] }
 0x4fd   : > { %v14546_v36 = vld [vmem:[%s18709_s2 + $0x78] sm:$0xff]   ;;  %v19003_v40 = vld [vmem:[#allocation36_spill] sm:$0xff]  ;;  %v10383_v56 = vshll.u32 %v19004_v4, 16 }
 0x4fe   : > { %v10363_v11 = vshrl.u32 %v19003_v40, 16  ;;  %v10304_v43 = vld [vmem:[#allocation3 + $0x24] sm:$0xf]  ;;  %v10352_v16 = vrot.slane %v10350_v55, 4 }
 0x4ff   : > { %v10377_v26 = vshll.u32 %v10304_v43, 16  ;;  %v18287_v47 = vrot.slane %v10383_v56, 5 }
 0x500   : > { %v10365_v53 = vrot.slane %v10363_v11, 4 }
 0x501   : > { %13692 = vmatmul.mubr.msk.bf16.gmra.mrb[44].mxu1 %vm7362_vm4, %v12497_v52  ;;  %v18992_v52 = vld [vmem:[#allocation28_spill] sm:$0xff]  ;;  %v10379_v9 = vrot.slane %v10377_v26, 5 }
 0x502   : > { %13699 = vmatprep.mubr.msk.bf16.mxu1 %vm7362_vm4, %v12536_v51  ;;  %v18993_v50 = vcombine.low %v18991_v2, %v18992_v52  ;;  %v18994_v51 = vld [vmem:[#allocation29_spill] sm:$0xff]  ;;  %v10307_v2 = vld [vmem:[#allocation3 + $0x30] sm:$0xf]  ;;  %v14549_v52 = vld [vmem:[#allocation3 + $0x9c] sm:$0xff]  }
 0x503   : > { %v18996_v24 = vcombine.low %v18994_v51, %v18995_v15  ;;  %v19005_v51 = vld [vmem:[#allocation37_spill] sm:$0xff]  ;;  %v10398_v8 = vshrl.u32 %v10307_v2, 16  ;;  %v14552_v26 = vld [vmem:[#allocation3 + $0xc0] sm:$0xff]  }
 0x504   : > { %v10369_v15 = vshll.u32 %v19005_v51, 16  ;;  %v18316_v51 = vld [vmem:[#allocation3 + $0xd4] sm:$0x1] }
 0x509   : > { %13700 = vmatmul.mubr.msk.bf16.vlgmr.msra.gmra.mrb[16].mxu1 %vm7362_vm4, %v12537_v41  ;;  %v19001_v41 = vld [vmem:[#allocation34_spill] sm:$0xff] }
 0x50a   : > { %13732 = vmatpush3.bf16.msra.mxu1 %v17999_v7  ;;  %13703 = vmatprep.mubr.msk.bf16.mxu1 %vm7362_vm4, %v18963_v17  ;;  %v18969_v7 = vcombine.low %v18967_v46, %v18968_v49  ;;  %v14539_v17 = vld [vmem:[#allocation3 + $0x30] sm:$0xff]   ;;  %v14543_v49 = vld [vmem:[#allocation3 + $0x60] sm:$0xff]  }
 0x50b   : > { %13733 = vmatprep.subr.bf16.mxu1 %v14535_v28  ;;  %v14542_v46 = vld [vmem:[#allocation3 + $0x54] sm:$0xff]  }
 0x50e   : > { %13734 = vmatpush3.bf16.msra.mxu1 %v14535_v28  ;;  %v19002_v28 = vcombine.low %v19000_v39, %v19001_v41  ;;  %v10401_v41 = vshll.u32 %v10307_v2, 16  ;;  %v19010_v2 = vld [vmem:[#allocation46_spill] sm:$0xff] }
 0x50f   : > { %13767 = vmatprep.subr.bf16.mxu1 %v14537_v38 }
 0x511   : > { %13704 = vmatmul.mubr.msk.bf16.gmra.mrb[20].mxu1 %vm7362_vm4, %v18966_v44  ;;  %v14541_v44 = vld [vmem:[#allocation3 + $0x48] sm:$0xff]  }
 0x512   : > { %13707 = vmatprep.mubr.msk.bf16.mxu1 %vm7362_vm4, %v18969_v7  ;;  %v14545_v7 = vld [vmem:[#allocation3 + $0x78] sm:$0xff]  }
 0x519   : > { %13708 = vmatmul.mubr.msk.bf16.gmra.mrb[24].mxu1 %vm7362_vm4, %v18972_v22  ;;  %v10359_v22 = vshll.u32 %v19003_v40, 16 }
 0x51a   : > { %13711 = vmatprep.mubr.msk.bf16.mxu1 %vm7362_vm4, %v18975_v19  ;;  %v14547_v19 = vld [vmem:[#allocation3 + $0x84] sm:$0xff]  }
 0x51b   : > { %v10361_v3 = vrot.slane %v10359_v22, 5  ;;  %v10403_v22 = vrot.slane %v10401_v41, 5  ;;  %v19011_v41 = vld [vmem:[#allocation47_spill] sm:$0xff] }
 0x521   : > { %13712 = vmatmul.mubr.msk.bf16.gmra.mrb[28].mxu1 %vm7362_vm4, %v18978_v12  ;;  %v14548_v12 = vld [vmem:[#allocation3 + $0x90] sm:$0xff]  }
 0x522   : > { %13715 = vmatprep.mubr.msk.bf16.mxu1 %vm7362_vm4, %v18981_v60  ;;  %v10374_v60 = vshrl.u32 %v10304_v43, 16 }
 0x524   : > { %v10376_v31 = vrot.slane %v10374_v60, 4 }
 0x529   : > { %13716 = vmatmul.mubr.msk.bf16.gmra.mrb[32].mxu1 %vm7362_vm4, %v18984_v34  ;;  %v10355_v34 = vrot.slane %v10353_v29, 5 }
 0x52a   : > { %13719 = vmatprep.mubr.msk.bf16.mxu1 %vm7362_vm4, %v18987_v14  ;;  %v10366_v14 = vor.u32 %v10365_v53, %v10361_v3 }
 0x531   : > { %13720 = vmatmul.mubr.msk.bf16.gmra.mrb[36].mxu1 %vm7362_vm4, %v18990_v32  ;;  %v10387_v32 = vshrl.u32 %v19004_v4, 16  ;;  %v19009_v4 = vld [vmem:[#allocation42_spill] sm:$0xff] }
 0x532   : > { %13723 = vmatprep.mubr.msk.bf16.mxu1 %vm7362_vm4, %v18993_v50  ;;  %v10356_v50 = vor.u32 %v10355_v34, %v10352_v16  ;;  %v10431_v56 = vshll.u32 %v19009_v4, 16 }
 0x533   : > { %v10389_v39 = vrot.slane %v10387_v32, 4 }
 0x535   : > { %v10390_v40 = vor.u32 %v10389_v39, %v18287_v47  ;;  %v10316_v39 = vld [vmem:[#allocation3 + $0x54] sm:$0xf] }
 0x539   : > { %13724 = vmatmul.mubr.msk.bf16.gmra.mrb[40].mxu1 %vm7362_vm4, %v18996_v24  ;;  %v14550_v24 = vld [vmem:[#allocation3 + $0xa8] sm:$0xff]  }
 0x53a   : > { %13727 = vmatprep.mubr.msk.bf16.mxu1 %vm7362_vm4, %v18999_v20  ;;  %v10367_v20 = vrot.slane %v10366_v14, 4  ;;  %v10435_v14 = vshrl.u32 %v19009_v4, 16 }
 0x541   : > { %13728 = vmatmul.mubr.msk.bf16.gmra.mrb[44].mxu1 %vm7362_vm4, %v19002_v28  ;;  %v19006_v28 = vld [vmem:[#allocation40_spill] sm:$0xff] }
 0x542   : > { %13735 = vmatprep.mubr.msk.bf16.mxu1 %vm7362_vm4, %v14536_v33  ;;  %v10380_v33 = vor.u32 %v10379_v9, %v10376_v31  ;;  %v10313_v31 = vld [vmem:[#allocation3 + $0x48] sm:$0xf]  ;;  %v10391_v9 = vrot.slane %v10390_v40, 4 }
 0x544   : > { %v18296_v59 = vrot.slane %v10380_v33, 4  ;;  %v11213_v33 = vrot.slane %v18316_v51, 5 }
 0x549   : > { %13736 = vmatmul.mubr.msk.bf16.vlgmr.msra.gmra.mrb[16].mxu1 %vm7362_vm4, %v14538_v1  ;;  %v10407_v1 = vshll.u32 %v19006_v28, 16 }
 0x54a   : > { %13768 = vmatpush3.bf16.msra.mxu1 %v14537_v38  ;;  %13739 = vmatprep.mubr.msk.bf16.mxu1 %vm7362_vm4, %v14539_v17  ;;  %v14544_v38 = vld [vmem:[#allocation3 + $0x6c] sm:$0xff]   ;;  %v10357_v17 = vrot.slane %v10356_v50, 4 }
 0x54b   : > { %13769 = vmatprep.subr.bf16.mxu1 %v14546_v36  ;;  %v18299_v11 = vrot.slane %v10407_v1, 5  ;;  %v18314_v50 = vld [vmem:[#allocation3 + $0xd0] sm:$0xf]  ;;  %v10483_v1 = vshrl.u32 %v19011_v41, 16 }
 0x54c   : > { %v10362_v55 = vsel %vm14906_vm13, %v10357_v17, %v10361_v3  ;;  %v10386_v3 = vsel %vm14906_vm13, %v18296_v59, %v18287_v47 }
 0x54e   : > { %13770 = vmatpush3.bf16.msra.mxu1 %v14546_v36  ;;  %v10411_v36 = vshrl.u32 %v19006_v28, 16  ;;  %v10479_v28 = vshll.u32 %v19011_v41, 16 }
 0x54f   : > { %13803 = vmatprep.subr.bf16.mxu1 %v18271_v6 }
 0x550   : > { %v10413_v43 = vrot.slane %v10411_v36, 4 }
 0x551   : > { %13740 = vmatmul.mubr.msk.bf16.gmra.mrb[20].mxu1 %vm7362_vm4, %v14540_v58  ;;  %v10371_v58 = vrot.slane %v10369_v15, 5 }
 0x552   : > { %13743 = vmatprep.mubr.msk.bf16.mxu1 %vm7362_vm4, %v14541_v44  ;;  %v19007_v44 = vld [vmem:[#allocation39_spill] sm:$0xff]  ;;  %v10414_v15 = vor.u32 %v10413_v43, %v18299_v11  ;;  %v10470_v43 = vshrl.u32 %v10316_v39, 16 }
 0x559   : > { %13744 = vmatmul.mubr.msk.bf16.gmra.mrb[24].mxu1 %vm7362_vm4, %v14542_v46  ;;  %v10393_v46 = vshll.u32 %v19007_v44, 16  ;;  %v10437_v44 = vrot.slane %v10435_v14, 4 }
 0x55a   : > { %13747 = vmatprep.mubr.msk.bf16.mxu1 %vm7362_vm4, %v14543_v49  ;;  %v10400_v49 = vrot.slane %v10398_v8, 4  ;;  %v11054_v8 = vld [vmem:[#allocation3 + $0xcc] sm:$0xe] }
 0x55b   : > { %v18303_v29 = vrot.slane %v10393_v46, 5  ;;  %v12661_v36 = vrot.slane %v11054_v8, 9 }
 0x55c   : > { %v10404_v32 = vor.u32 %v10403_v22, %v10400_v49  ;;  %v14553_v49 = vld [vmem:[#allocation3 + $0xcc] sm:$0xff]  }
 0x55e   : > { %v10405_v14 = vrot.slane %v10404_v32, 4  ;;  %v19013_v32 = vld [vmem:[#allocation54_spill] sm:$0xff] }
 0x561   : > { %13748 = vmatmul.mubr.msk.bf16.gmra.mrb[28].mxu1 %vm7362_vm4, %v14544_v38  ;;  %v10310_v38 = vld [vmem:[#allocation3 + $0x3c] sm:$0xf] }
 0x562   : > { %13751 = vmatprep.mubr.msk.bf16.mxu1 %vm7362_vm4, %v14545_v7  ;;  %v10372_v7 = vsel %vm14906_vm13, %v10367_v20, %v10371_v58  ;;  %v10422_v60 = vshrl.u32 %v10310_v38, 16  ;;  %v10425_v34 = vshll.u32 %v10310_v38, 16  ;;  %v11210_v20 = vrot.slane %v18314_v50, 5 }
 0x563   : > { %v12612_v16 = vcombine.low %v10362_v55, %v10372_v7  ;;  %v18325_v58 = vrot.slane %v10431_v56, 5  ;;  %v10446_v38 = vshrl.u32 %v10313_v31, 16  ;;  %v10449_v7 = vshll.u32 %v10313_v31, 16 }
 0x564   : > { %v10424_v47 = vrot.slane %v10422_v60, 4  ;;  %v10427_v17 = vrot.slane %v10425_v34, 5  ;;  %v11212_v46 = vrot.slane %v11210_v20, 4  ;;  %v18331_v40 = vsel %vm15299_vm1, %v12661_v36, %v11210_v20  ;;  %v10319_v34 = vld [vmem:[#allocation3 + $0x60] sm:$0xf] }
 0x565   : > { %v18337_v60 = vrot.slane %v10479_v28, 5  ;;  %v10396_v56 = vsel %vm14906_vm13, %v10391_v9, %v18303_v29  ;;  %v10415_v31 = vrot.slane %v10414_v15, 4  ;;  %v10451_v8 = vrot.slane %v10449_v7, 5  ;;  %v19014_v36 = vld [vmem:[#allocation48_spill] sm:$0xff] }
 0x566   : > { %v18335_v55 = vsel %vm15299_vm1, %v11212_v46, %v11213_v33  ;;  %v10428_v25 = vor.u32 %v10427_v17, %v10424_v47  ;;  %v10472_v33 = vrot.slane %v10470_v43, 4  ;;  %v10494_v41 = vshrl.u32 %v10319_v34, 16 }
 0x567   : > { %v12681_v4 = vcombine.low %v18331_v40, %v18335_v55  ;;  %v10497_v9 = vshll.u32 %v10319_v34, 16  ;;  %v10503_v15 = vshll.u32 %v19013_v32, 16  ;;  %v10507_v28 = vshrl.u32 %v19013_v32, 16  ;;  %v10322_v34 = vld [vmem:[#allocation3 + $0x6c] sm:$0xf] }
 0x568   : > { %v10410_v47 = vsel %vm14906_vm13, %v10405_v14, %v18299_v11  ;;  %v10465_v17 = vshll.u32 %v19014_v36, 16 }
 0x569   : > { %13752 = vmatmul.mubr.msk.bf16.gmra.mrb[32].mxu1 %vm7362_vm4, %v14547_v19  ;;  %v14551_v19 = vld [vmem:[#allocation3 + $0xb4] sm:$0xff]   ;;  %v10509_v11 = vrot.slane %v10507_v28, 4 }
 0x56a   : > { %13755 = vmatprep.mubr.msk.bf16.mxu1 %vm7362_vm4, %v14548_v12  ;;  %v19008_v12 = vld [vmem:[#allocation41_spill] sm:$0xff] }
 0x56b   : > { %v10417_v53 = vshll.u32 %v19008_v12, 16 }
 0x56d   : > { %v10419_v12 = vrot.slane %v10417_v53, 5  ;;  %v10438_v53 = vor.u32 %v10437_v44, %v18325_v58  ;;  %v10429_v44 = vrot.slane %v10428_v25, 4  ;;  %v19016_v25 = vld [vmem:[#allocation52_spill] sm:$0xff] }
 0x56f   : > { %v10439_v46 = vrot.slane %v10438_v53, 4  ;;  %v10531_v53 = vshrl.u32 %v19016_v25, 16 }
 0x571   : > { %13756 = vmatmul.mubr.msk.bf16.gmra.mrb[36].mxu1 %vm7362_vm4, %v14549_v52  ;;  %v10455_v52 = vshll.u32 %v19010_v2, 16 }
 0x572   : > { %13759 = vmatprep.mubr.msk.bf16.mxu1 %vm7362_vm4, %v14550_v24  ;;  %v10459_v24 = vshrl.u32 %v19010_v2, 16  ;;  %v19012_v2 = vld [vmem:[#allocation43_spill] sm:$0xff] }
 0x573   : > { %v18327_v59 = vrot.slane %v10455_v52, 5  ;;  %v10441_v52 = vshll.u32 %v19012_v2, 16  ;;  %v18359_v2 = vrot.slane %v10503_v15, 5 }
 0x574   : > { %v10461_v22 = vrot.slane %v10459_v24, 4  ;;  %v10448_v24 = vrot.slane %v10446_v38, 4  ;;  %v19015_v38 = vld [vmem:[#allocation51_spill] sm:$0xff] }
 0x575   : > { %v10489_v7 = vshll.u32 %v19015_v38, 16  ;;  %v10510_v28 = vor.u32 %v10509_v11, %v18359_v2  ;;  %v10328_v11 = vld [vmem:[#allocation3 + $0x84] sm:$0xf] }
 0x576   : > { %v10462_v20 = vor.u32 %v10461_v22, %v18327_v59  ;;  %v10452_v22 = vor.u32 %v10451_v8, %v10448_v24  ;;  %v10434_v24 = vsel %vm14906_vm13, %v10429_v44, %v18325_v58 }
 0x577   : > { %v10491_v8 = vrot.slane %v10489_v7, 5 }
 0x578   : > { %v10463_v43 = vrot.slane %v10462_v20, 4  ;;  %v10518_v20 = vshrl.u32 %v10322_v34, 16 }
 0x579   : > { %13760 = vmatmul.mubr.msk.bf16.gmra.mrb[40].mxu1 %vm7362_vm4, %v14551_v19  ;;  %v10473_v19 = vshll.u32 %v10316_v39, 16 }
 0x57a   : > { %13763 = vmatprep.mubr.msk.bf16.mxu1 %vm7362_vm4, %v14552_v26  ;;  %v10485_v26 = vrot.slane %v10483_v1, 4  ;;  %v12613_v1 = vcombine.low %v10386_v3, %v10396_v56  ;;  %v10499_v56 = vrot.slane %v10497_v9, 5  ;;  %v10520_v44 = vrot.slane %v10518_v20, 4 }
 0x57b   : > { %v10475_v39 = vrot.slane %v10473_v19, 5 }
 0x57c   : > { %v10486_v29 = vor.u32 %v10485_v26, %v18337_v60  ;;  %v10496_v26 = vrot.slane %v10494_v41, 4 }
 0x57d   : > { %v10476_v19 = vor.u32 %v10475_v39, %v10472_v33  ;;  %v10521_v33 = vshll.u32 %v10322_v34, 16  ;;  %v10325_v39 = vld [vmem:[#allocation3 + $0x78] sm:$0xf] }
 0x57e   : > { %v10487_v3 = vrot.slane %v10486_v29, 4  ;;  %v10453_v29 = vrot.slane %v10452_v22, 4  ;;  %v10500_v58 = vor.u32 %v10499_v56, %v10496_v26  ;;  %v10542_v36 = vshrl.u32 %v10325_v39, 16 }
 0x57f   : > { %v10477_v32 = vrot.slane %v10476_v19, 4 }
 0x580   : > { %v10492_v15 = vsel %vm14906_vm13, %v10487_v3, %v10491_v8  ;;  %v10501_v3 = vrot.slane %v10500_v58, 4 }
 0x581   : > { %13764 = vmatmul.mubr.msk.bf16.gmra.mrb[44].mxu1 %vm7362_vm4, %v14553_v49  ;;  %v10443_v49 = vrot.slane %v10441_v52, 5  ;;  %v10527_v52 = vshll.u32 %v19016_v25, 16  ;;  %v10482_v19 = vsel %vm14906_vm13, %v10477_v32, %v18337_v60  ;;  %v10544_v25 = vrot.slane %v10542_v36, 4  ;;  %v19020_v32 = vld [vmem:[#allocation66_spill] sm:$0xff] }
 0x582   : > { %13771 = vmatprep.mubr.msk.bf16.mxu1 %vm7362_vm4, %v12612_v16  ;;  %v10420_v16 = vsel %vm14906_vm13, %v10415_v31, %v10419_v12  ;;  %v14555_v12 = vld [vmem:[%s18709_s2 + $0x88] sm:$0xff]   ;;  %v10467_v31 = vrot.slane %v10465_v17, 5  ;;  %v10545_v17 = vshll.u32 %v10325_v39, 16  ;;  %v12617_v34 = vcombine.low %v10482_v19, %v10492_v15 }
 0x583   : > { %v12614_v14 = vcombine.low %v10410_v47, %v10420_v16  ;;  %v10444_v41 = vsel %vm14906_vm13, %v10439_v46, %v10443_v49  ;;  %v10533_v16 = vrot.slane %v10531_v53, 4  ;;  %v10523_v46 = vrot.slane %v10521_v33, 5  ;;  %v19018_v49 = vld [vmem:[#allocation61_spill] sm:$0xff]  ;;  %v10331_v53 = vld [vmem:[#allocation3 + $0x90] sm:$0xf] }
 0x584   : > { %v10468_v9 = vsel %vm14906_vm13, %v10463_v43, %v10467_v31  ;;  %v10551_v38 = vshll.u32 %v19018_v49, 16  ;;  %v10555_v7 = vshrl.u32 %v19018_v49, 16  ;;  %v12615_v22 = vcombine.low %v10434_v24, %v10444_v41 }
 0x585   : > { %v10458_v43 = vsel %vm14906_vm13, %v10453_v29, %v18327_v59  ;;  %v10524_v24 = vor.u32 %v10523_v46, %v10520_v44  ;;  %v19019_v59 = vld [vmem:[#allocation58_spill] sm:$0xff]  ;;  %v10569_v33 = vshll.u32 %v10328_v11, 16  ;;  %v10575_v39 = vshll.u32 %v17926_v62, 16 }
 0x586   : > { %v12616_v26 = vcombine.low %v10458_v43, %v10468_v9  ;;  %v10537_v8 = vshll.u32 %v19019_v59, 16  ;;  %v18393_v20 = vrot.slane %v10551_v38, 5  ;;  %v10557_v60 = vrot.slane %v10555_v7, 4 }
 0x587   : > { %v10579_v41 = vshrl.u32 %v17926_v62, 16  ;;  %v10590_v29 = vshrl.u32 %v10331_v53, 16  ;;  %v10593_v9 = vshll.u32 %v10331_v53, 16  ;;  %v10599_v15 = vshll.u32 %v19020_v32, 16  ;;  %v19021_v62 = vld [vmem:[#allocation64_spill] sm:$0xff] }
 0x588   : > { %v10603_v58 = vshrl.u32 %v19020_v32, 16  ;;  %v10525_v36 = vrot.slane %v10524_v24, 4  ;;  %v10558_v44 = vor.u32 %v10557_v60, %v18393_v20  ;;  %v10561_v46 = vshll.u32 %v19021_v62, 16  ;;  %v10337_v32 = vld [vmem:[#allocation3 + $0xa8] sm:$0xf] }
 0x589   : > { %13772 = vmatmul.mubr.msk.bf16.vlgmr.msra.gmra.mrb[16].mxu1 %vm7362_vm4, %v12613_v1  ;;  %v19017_v1 = vld [vmem:[#allocation57_spill] sm:$0xff]  ;;  %v10571_v38 = vrot.slane %v10569_v33, 5  ;;  %v18407_v7 = vrot.slane %v10575_v39, 5  ;;  %v10592_v43 = vrot.slane %v10590_v29, 4  ;;  %v10595_v19 = vrot.slane %v10593_v9, 5 }
 0x58a   : > { %13804 = vmatpush3.bf16.msra.mxu1 %v18271_v6  ;;  %13775 = vmatprep.mubr.msk.bf16.mxu1 %vm7362_vm4, %v12614_v14  ;;  %v10513_v47 = vshll.u32 %v19017_v1, 16  ;;  %v18380_v6 = vrot.slane %v10527_v52, 5  ;;  %v10511_v14 = vrot.slane %v10510_v28, 4  ;;  %v10547_v52 = vrot.slane %v10545_v17, 5  ;;  %v14620_v39 = vld [vmem:[#allocation3 + $0x8c] sm:$0x1] }
 0x58b   : > { %13805 = vmatprep.subr.bf16.mxu1 %v14555_v12  ;;  %v10506_v28 = vsel %vm14906_vm13, %v10501_v3, %v18359_v2  ;;  %v10539_v17 = vrot.slane %v10537_v8, 5  ;;  %v10605_v2 = vrot.slane %v10603_v58, 4  ;;  %v10334_v3 = vld [vmem:[#allocation3 + $0x9c] sm:$0xf]  ;;  %v10563_v60 = vrot.slane %v10561_v46, 5  ;;  %v19022_v58 = vld [vmem:[#allocation70_spill] sm:$0xff] }
 0x58c   : > { %v10515_v56 = vrot.slane %v10513_v47, 5  ;;  %v10534_v31 = vor.u32 %v10533_v16, %v18380_v6  ;;  %v10548_v16 = vor.u32 %v10547_v52, %v10544_v25  ;;  %v10559_v25 = vrot.slane %v10558_v44, 4 }
 0x58d   : > { %v10614_v24 = vshrl.u32 %v10334_v3, 16  ;;  %v10617_v59 = vshll.u32 %v10334_v3, 16  ;;  %v10638_v46 = vshrl.u32 %v10337_v32, 16 }
 0x58e   : > { %13806 = vmatpush3.bf16.msra.mxu1 %v14555_v12  ;;  %v10566_v12 = vshrl.u32 %v10328_v11, 16  ;;  %v10516_v1 = vsel %vm14906_vm13, %v10511_v14, %v10515_v56  ;;  %v10535_v47 = vrot.slane %v10534_v31, 4  ;;  %v10549_v14 = vrot.slane %v10548_v16, 4 }
 0x58f   : > { %v12618_v56 = vcombine.low %v10506_v28, %v10516_v1  ;;  %v10530_v31 = vsel %vm14906_vm13, %v10525_v36, %v18380_v6  ;;  %v14621_v6 = vld [vmem:[#allocation3 + $0xa0] sm:$0xf]  ;;  %v10609_v28 = vshll.u32 %v19022_v58, 16  ;;  %v10647_v1 = vshll.u32 %v18001_v13, 16 }
 0x590   : > { %v10568_v49 = vrot.slane %v10566_v12, 4  ;;  %v10540_v11 = vsel %vm14906_vm13, %v10535_v47, %v10539_v17  ;;  %v10596_v12 = vor.u32 %v10595_v19, %v10592_v43  ;;  %v10623_v29 = vshll.u32 %v14621_v6, 16 }
 0x591   : > { %13776 = vmatmul.mubr.msk.bf16.gmra.mrb[20].mxu1 %vm7362_vm4, %v12615_v22  ;;  %v10581_v22 = vrot.slane %v10579_v41, 4  ;;  %v12619_v8 = vcombine.low %v10530_v31, %v10540_v11  ;;  %v10585_v41 = vshll.u32 %v14620_v39, 16  ;;  %v10627_v9 = vshrl.u32 %v14621_v6, 16  ;;  %v10343_v39 = vld [vmem:[#allocation3 + $0xc0] sm:$0xf] }
 0x592   : > { %13779 = vmatprep.mubr.msk.bf16.mxu1 %vm7362_vm4, %v12616_v26  ;;  %v18409_v26 = vrot.slane %v10599_v15, 5  ;;  %v10572_v52 = vor.u32 %v10571_v38, %v10568_v49  ;;  %v10564_v15 = vsel %vm14906_vm13, %v10559_v25, %v10563_v60  ;;  %v10651_v47 = vshrl.u32 %v18001_v13, 16  ;;  %v10340_v13 = vld [vmem:[#allocation3 + $0xb4] sm:$0xf]  ;;  %v14622_v25 = vld [vmem:[#allocation3 + $0xa4] sm:$0x1] }
 0x593   : > { %v10582_v53 = vor.u32 %v10581_v22, %v18407_v7  ;;  %v10616_v17 = vrot.slane %v10614_v24, 4  ;;  %v10619_v44 = vrot.slane %v10617_v59, 5  ;;  %v10641_v49 = vshll.u32 %v10337_v32, 16 }
 0x594   : > { %v10606_v33 = vor.u32 %v10605_v2, %v18409_v26  ;;  %v10573_v16 = vrot.slane %v10572_v52, 4  ;;  %v10587_v22 = vrot.slane %v10585_v41, 5  ;;  %v18428_v43 = vrot.slane %v10623_v29, 5 }
 0x595   : > { %v10583_v36 = vrot.slane %v10582_v53, 4  ;;  %v10629_v19 = vrot.slane %v10627_v9, 4  ;;  %v10611_v2 = vrot.slane %v10609_v28, 5  ;;  %v18431_v3 = vrot.slane %v10647_v1, 5  ;;  %v14624_v1 = vld [vmem:[#allocation3 + $0xb0] sm:$0x1] }
 0x596   : > { %v10607_v62 = vrot.slane %v10606_v33, 4  ;;  %v10578_v11 = vsel %vm14906_vm13, %v10573_v16, %v18407_v7  ;;  %v10620_v31 = vor.u32 %v10619_v44, %v10616_v17  ;;  %v10633_v52 = vshll.u32 %v14622_v25, 16  ;;  %v14623_v33 = vld [vmem:[#allocation3 + $0xb8] sm:$0xf]  ;;  %v10346_v17 = vld [vmem:[#allocation3 + $0xcc] sm:$0xf] }
 0x597   : > { %v10640_v59 = vrot.slane %v10638_v46, 4  ;;  %v10630_v60 = vor.u32 %v10629_v19, %v18428_v43  ;;  %v10671_v7 = vshll.u32 %v14623_v33, 16  ;;  %v10665_v6 = vshll.u32 %v10340_v13, 16 }
 0x598   : > { %v10612_v24 = vsel %vm14906_vm13, %v10607_v62, %v10611_v2  ;;  %v10695_v29 = vshll.u32 %v18021_v10, 16  ;;  %v10699_v9 = vshrl.u32 %v18021_v10, 16  ;;  %v10635_v58 = vrot.slane %v10633_v52, 5 }
 0x599   : > { %13780 = vmatmul.mubr.msk.bf16.gmra.mrb[24].mxu1 %vm7362_vm4, %v12617_v34  ;;  %v10554_v34 = vsel %vm14906_vm13, %v10549_v14, %v18393_v20  ;;  %v10597_v20 = vrot.slane %v10596_v12, 4  ;;  %v10588_v14 = vsel %vm14906_vm13, %v10583_v36, %v10587_v22  ;;  %v10662_v12 = vshrl.u32 %v10340_v13, 16 }
 0x59a   : > { %13783 = vmatprep.mubr.msk.bf16.mxu1 %vm7362_vm4, %v12618_v56  ;;  %v12620_v38 = vcombine.low %v10554_v34, %v10564_v15  ;;  %v10653_v56 = vrot.slane %v10651_v47, 4  ;;  %v10675_v34 = vshrl.u32 %v14623_v33, 16  ;;  %v10621_v15 = vrot.slane %v10620_v31, 4 }
 0x59b   : > { %v10602_v53 = vsel %vm14906_vm13, %v10597_v20, %v18409_v26  ;;  %v12621_v26 = vcombine.low %v10578_v11, %v10588_v14  ;;  %v10657_v47 = vshll.u32 %v14624_v1, 16  ;;  %v10686_v16 = vshrl.u32 %v10343_v39, 16 }
 0x59c   : > { %v10654_v41 = vor.u32 %v10653_v56, %v18431_v3  ;;  %v12622_v32 = vcombine.low %v10602_v53, %v10612_v24  ;;  %v10689_v36 = vshll.u32 %v10343_v39, 16  ;;  %v10631_v44 = vrot.slane %v10630_v60, 4  ;;  %v14625_v60 = vld [vmem:[#allocation3 + $0xbc] sm:$0x1] }
 0x59d   : > { %v10664_v20 = vrot.slane %v10662_v12, 4  ;;  %v10673_v62 = vrot.slane %v10671_v7, 5  ;;  %v10677_v46 = vrot.slane %v10675_v34, 4  ;;  %v10697_v22 = vrot.slane %v10695_v29, 5  ;;  %v14626_v29 = vld [vmem:[#allocation3 + $0xc8] sm:$0x1] }
 0x59e   : > { %v10701_v10 = vrot.slane %v10699_v9, 4  ;;  %v10710_v19 = vshrl.u32 %v10346_v17, 16  ;;  %v10713_v2 = vshll.u32 %v10346_v17, 16  ;;  %v10719_v56 = vshll.u32 %v18314_v50, 16 }
 0x59f   : > { %v10723_v13 = vshrl.u32 %v18314_v50, 16  ;;  %v10659_v14 = vrot.slane %v10657_v47, 5  ;;  %v10688_v31 = vrot.slane %v10686_v16, 4  ;;  %v10691_v25 = vrot.slane %v10689_v36, 5 }
 0x5a0   : > { %v10626_v52 = vsel %vm14906_vm13, %v10621_v15, %v18428_v43  ;;  %v10636_v53 = vsel %vm14906_vm13, %v10631_v44, %v10635_v58  ;;  %v10678_v24 = vor.u32 %v10677_v46, %v10673_v62  ;;  %v10681_v12 = vshll.u32 %v14625_v60, 16  ;;  %v19035_v60 = vld [vmem:[#allocation60_spill] sm:$0xff] }
 0x5a1   : > { %13784 = vmatmul.mubr.msk.bf16.gmra.mrb[28].mxu1 %vm7362_vm4, %v12619_v8  ;;  %v10643_v8 = vrot.slane %v10641_v49, 5  ;;  %v10655_v49 = vrot.slane %v10654_v41, 4  ;;  %v10702_v33 = vor.u32 %v10701_v10, %v10697_v22  ;;  %v10712_v50 = vrot.slane %v10710_v19, 4 }
 0x5a2   : > { %13787 = vmatprep.mubr.msk.bf16.mxu1 %vm7362_vm4, %v12620_v38  ;;  %v10667_v38 = vrot.slane %v10665_v6, 5  ;;  %v10715_v7 = vrot.slane %v10713_v2, 5  ;;  %v10721_v34 = vrot.slane %v10719_v56, 5  ;;  %v10725_v39 = vrot.slane %v10723_v13, 4 }
 0x5a3   : > { %v10644_v28 = vor.u32 %v10643_v8, %v10640_v59  ;;  %v10660_v59 = vsel %vm14906_vm13, %v10655_v49, %v10659_v14  ;;  %v12623_v41 = vcombine.low %v10626_v52, %v10636_v53  ;;  %v10692_v6 = vor.u32 %v10691_v25, %v10688_v31  ;;  %v19027_v31 = vld [vmem:[#allocation50_spill] sm:$0xff]  ;;  %v19029_v52 = vld [vmem:[#allocation53_spill] sm:$0xff]  ;;  %v19030_v53 = vld [vmem:[#allocation55_spill] sm:$0xff] }
 0x5a4   : > { %v10668_v8 = vor.u32 %v10667_v38, %v10664_v20  ;;  %v10705_v9 = vshll.u32 %v14626_v29, 16  ;;  %v10683_v15 = vrot.slane %v10681_v12, 5  ;;  %v10703_v58 = vrot.slane %v10702_v33, 4  ;;  %v19036_v12 = vld [vmem:[#allocation62_spill] sm:$0xff]  ;;  %v19045_v29 = vld [vmem:[#allocation71_spill] sm:$0xff] }
 0x5a5   : > { %v10645_v11 = vrot.slane %v10644_v28, 4  ;;  %v10716_v1 = vor.u32 %v10715_v7, %v10712_v50  ;;  %v10726_v47 = vor.u32 %v10725_v39, %v10721_v34  ;;  %v10729_v16 = vshll.u32 %v18316_v51, 16  ;;  %v19038_v50 = vld [vmem:[#allocation63_spill] sm:$0xff]  ;;  %v19039_v7 = vld [vmem:[#allocation65_spill] sm:$0xff] }
 0x5a6   : > { %v10669_v28 = vrot.slane %v10668_v8, 4  ;;  %v10693_v36 = vrot.slane %v10692_v6, 4  ;;  %v10707_v17 = vrot.slane %v10705_v9, 5  ;;  %v19037_v33 = vcombine.low %v19035_v60, %v19036_v12  ;;  %v19041_v39 = vld [vmem:[#allocation67_spill] sm:$0xff]  ;;  %v19044_v6 = vld [vmem:[#allocation69_spill] sm:$0xff] }
 0x5a7   : > { %v10650_v43 = vsel %vm14906_vm13, %v10645_v11, %v18431_v3  ;;  %v10717_v46 = vrot.slane %v10716_v1, 4  ;;  %v10727_v49 = vrot.slane %v10726_v47, 4  ;;  %v10731_v38 = vrot.slane %v10729_v16, 5  ;;  %v19024_v11 = vld [vmem:[#allocation45_spill] sm:$0xff] }
 0x5a8   : > { %v10708_v44 = vsel %vm14906_vm13, %v10703_v58, %v10707_v17  ;;  %v10674_v20 = vsel %vm14906_vm13, %v10669_v28, %v10673_v62  ;;  %v10698_v19 = vsel %vm14906_vm13, %v10693_v36, %v10697_v22  ;;  %v19023_v62 = vld [vmem:[#allocation44_spill] sm:$0xff]  ;;  %v19026_v22 = vld [vmem:[#allocation49_spill] sm:$0xff]  ;;  %v19046_v9 = vcombine.low %v19044_v6, %v19045_v29  ;;  %v19051_v28 = vld [vmem:[#allocation74_spill] sm:$0xff] }
 0x5a9   : > { %13788 = vmatmul.mubr.msk.bf16.gmra.mrb[32].mxu1 %vm7362_vm4, %v12621_v26  ;;  %v12624_v26 = vcombine.low %v10650_v43, %v10660_v59  ;;  %v12626_v2 = vcombine.low %v10698_v19, %v10708_v44  ;;  %v10722_v51 = vsel %vm14906_vm13, %v10717_v46, %v10721_v34  ;;  %v10732_v56 = vsel %vm14906_vm13, %v10727_v49, %v10731_v38  ;;  %v19033_v59 = vld [vmem:[#allocation59_spill] sm:$0xff] }
 0x5aa   : > { %13791 = vmatprep.mubr.msk.bf16.mxu1 %vm7362_vm4, %v12622_v32  ;;  %v10679_v32 = vrot.slane %v10678_v24, 4  ;;  %v12627_v13 = vcombine.low %v10722_v51, %v10732_v56  ;;  %v19025_v14 = vcombine.low %v19023_v62, %v19024_v11  ;;  %v19028_v25 = vcombine.low %v19026_v22, %v19027_v31 }
 0x5ab   : > { %v19031_v24 = vcombine.low %v19029_v52, %v19030_v53  ;;  %v19034_v8 = vcombine.low %v19032_v23, %v19033_v59  ;;  %v19040_v34 = vcombine.low %v19038_v50, %v19039_v7  ;;  %v19052_v1 = vcombine.low %v18025_v48, %v19051_v28  ;;  %v18548_v48 = vld [vmem:[%s18711_s4] ss:$0 sm:$0xff] }
 0x5ac   : > { %v10684_v3 = vsel %vm14906_vm13, %v10679_v32, %v10683_v15  ;;  %v19048_v32 = vld [vmem:[#allocation72_spill] sm:$0xff]  ;;  %v19049_v15 = vld [vmem:[#allocation73_spill] sm:$0xff] }
 0x5ad   : > { %v12625_v10 = vcombine.low %v10674_v20, %v10684_v3  ;;  %v19050_v58 = vcombine.low %v19048_v32, %v19049_v15 }
 0x5b1   : > { %13792 = vmatmul.mubr.msk.bf16.gmra.mrb[36].mxu1 %vm7362_vm4, %v12623_v41  ;;  %v19042_v41 = vld [vmem:[#allocation68_spill] sm:$0xff] }
 0x5b2   : > { %13795 = vmatprep.mubr.msk.bf16.mxu1 %vm7362_vm4, %v12624_v26  ;;  %v19043_v43 = vcombine.low %v19041_v39, %v19042_v41  ;;  %v19047_v26 = vcombine.low %v17993_v21, %v18005_v42 }
 0x5b9   : > { %13796 = vmatmul.mubr.msk.bf16.gmra.mrb[40].mxu1 %vm7362_vm4, %v12625_v10 }
 0x5ba   : > { %13799 = vmatprep.mubr.msk.bf16.mxu1 %vm7362_vm4, %v12626_v2 }
 0x5c1   : > { %13800 = vmatmul.mubr.msk.bf16.gmra.mrb[44].mxu1 %vm7362_vm4, %v12627_v13 }
 0x5c2   : > { %13807 = vmatprep.mubr.msk.bf16.mxu1 %vm7362_vm4, %v19025_v14 }
 0x5c9   : > { %13808 = vmatmul.mubr.msk.bf16.vlgmr.msra.gmra.mrb[16].mxu1 %vm7362_vm4, %v19028_v25 }
 0x5ca   : > { %13811 = vmatprep.mubr.msk.bf16.mxu1 %vm7362_vm4, %v19031_v24 }
 0x5d1   : > { %13812 = vmatmul.mubr.msk.bf16.gmra.mrb[20].mxu1 %vm7362_vm4, %v19034_v8 }
 0x5d2   : > { %13815 = vmatprep.mubr.msk.bf16.mxu1 %vm7362_vm4, %v19037_v33 }
 0x5d9   : > { %13816 = vmatmul.mubr.msk.bf16.gmra.mrb[24].mxu1 %vm7362_vm4, %v19040_v34 }
 0x5da   : > { %13819 = vmatprep.mubr.msk.bf16.mxu1 %vm7362_vm4, %v19043_v43 }
 0x5e1   : > { %13820 = vmatmul.mubr.msk.bf16.gmra.mrb[28].mxu1 %vm7362_vm4, %v19046_v9 }
 0x5e2   : > { %13823 = vmatprep.mubr.msk.bf16.mxu1 %vm7362_vm4, %v19047_v26 }
 0x5e9   : > { %13824 = vmatmul.mubr.msk.bf16.gmra.mrb[32].mxu1 %vm7362_vm4, %v19050_v58 }
 0x5ea   : > { %13827 = vmatprep.mubr.msk.bf16.mxu1 %vm7362_vm4, %v19052_v1 }
 0x5f1   : > { %13828 = vmatmul.mubr.msk.bf16.gmra.mrb[36].mxu1 %vm7362_vm4, %v12677_v37 }
 0x5f2   : > { %13831 = vmatprep.mubr.msk.bf16.mxu1 %vm7362_vm4, %v12678_v57 }
 0x5f9   : > { %13832 = vmatmul.mubr.msk.bf16.gmra.mrb[40].mxu1 %vm7362_vm4, %v12679_v27 }
 0x5fa   : > { %13835 = vmatprep.mubr.msk.bf16.mxu1 %vm7362_vm4, %v12680_v45 }
 0x601   : > { %13836 = vmatmul.mubr.msk.bf16.gmra.mrb[44].mxu1 %vm7362_vm4, %v12681_v4 }
 0x69c   : > { %v13809_v21 = vpop.f32.mrb[16].mxu1 }
 0x69d   : > { %v11530_v42 = vadd.f32 %v13809_v21, %v18548_v48  ;;  %v11362_v18 = vpop.f32.mrb[17].mxu1 }
 0x69e   : > { %v11528_v63 = vadd.f32 %v18548_v48, %v11362_v18  ;;  %v13810_v37 = vpop.f32.mrb[18].mxu1 }
 0x69f   : > { %v11562_v0 = vmax.f32 %v11530_v42, 0.0  ;;  %v11531_v61 = vadd.f32 %v13810_v37, %v18548_v48  ;;  %v11365_v35 = vpop.f32.mrb[19].mxu1 }
 0x6a0   : > { %v11560_v57 = vmax.f32 %v11528_v63, 0.0  ;;  %v11529_v54 = vadd.f32 %v18548_v48, %v11365_v35 }
 0x6a1   : > { %v12809_v27 = vpack.c.bf16 %v11562_v0, %v11562_v0  ;;  %v11563_v30 = vmax.f32 %v11531_v61, 0.0 }
 0x6a2   : > { %v12807_v5 = vpack.c.bf16 %v11560_v57, %v11560_v57  ;;  %v11561_v45 = vmax.f32 %v11529_v54, 0.0 }
 0x6a3   : > { %11722 = vst.msk [vmem:[%s18556_s16 + $0x8] sm:$0xf] %vm6720_vm2, %v12809_v27  ;;  %v12810_v40 = vpack.c.bf16 %v11563_v30, %v11563_v30 }
 0x6a4   : > { %11720 = vst.msk [vmem:[%s18556_s16] sm:$0xf] %vm6720_vm2, %v12807_v5  ;;  %v12808_v55 = vpack.c.bf16 %v11561_v45, %v11561_v45  ;;  %v13813_v4 = vpop.f32.mrb[20].mxu1 }
 0x6a5   : > { %11723 = vst.msk [vmem:[%s18556_s16 + $0xc] sm:$0xf] %vm6720_vm2, %v12810_v40  ;;  %v11534_v47 = vadd.f32 %v13813_v4, %v18548_v48  ;;  %v11378_v16 = vpop.f32.mrb[21].mxu1 }
 0x6a6   : > { %11721 = vst.msk [vmem:[%s18556_s16 + $0x4] sm:$0xf] %vm6720_vm2, %v12808_v55  ;;  %v11532_v36 = vadd.f32 %v18548_v48, %v11378_v16  ;;  %v13814_v17 = vpop.f32.mrb[22].mxu1 }
 0x6a7   : > { %v11566_v3 = vmax.f32 %v11534_v47, 0.0  ;;  %v11535_v44 = vadd.f32 %v13814_v17, %v18548_v48  ;;  %v11381_v20 = vpop.f32.mrb[23].mxu1 }
 0x6a8   : > { %v11564_v46 = vmax.f32 %v11532_v36, 0.0  ;;  %v11533_v49 = vadd.f32 %v18548_v48, %v11381_v20 }
 0x6a9   : > { %v12813_v38 = vpack.c.bf16 %v11566_v3, %v11566_v3  ;;  %v11567_v10 = vmax.f32 %v11535_v44, 0.0 }
 0x6aa   : > { %v12811_v19 = vpack.c.bf16 %v11564_v46, %v11564_v46  ;;  %v11565_v2 = vmax.f32 %v11533_v49, 0.0 }
 0x6ab   : > { %11726 = vst.msk [vmem:[%s18556_s16 + $0x18] sm:$0xf] %vm6720_vm2, %v12813_v38  ;;  %v12814_v51 = vpack.c.bf16 %v11567_v10, %v11567_v10 }
 0x6ac   : > { %11724 = vst.msk [vmem:[%s18556_s16 + $0x10] sm:$0xf] %vm6720_vm2, %v12811_v19  ;;  %v12812_v56 = vpack.c.bf16 %v11565_v2, %v11565_v2  ;;  %v13817_v13 = vpop.f32.mrb[24].mxu1 }
 0x6ad   : > { %11727 = vst.msk [vmem:[%s18556_s16 + $0x1c] sm:$0xf] %vm6720_vm2, %v12814_v51  ;;  %v11538_v62 = vadd.f32 %v13817_v13, %v18548_v48  ;;  %v11394_v11 = vpop.f32.mrb[25].mxu1 }
 0x6ae   : > { %11725 = vst.msk [vmem:[%s18556_s16 + $0x14] sm:$0xf] %vm6720_vm2, %v12812_v56  ;;  %v11536_v14 = vadd.f32 %v18548_v48, %v11394_v11  ;;  %v13818_v22 = vpop.f32.mrb[26].mxu1 }
 0x6af   : > { %v11570_v31 = vmax.f32 %v11538_v62, 0.0  ;;  %v11539_v25 = vadd.f32 %v13818_v22, %v18548_v48  ;;  %v11397_v52 = vpop.f32.mrb[27].mxu1 }
 0x6b0   : > { %v11568_v53 = vmax.f32 %v11536_v14, 0.0  ;;  %v11537_v24 = vadd.f32 %v18548_v48, %v11397_v52 }
 0x6b1   : > { %v12817_v23 = vpack.c.bf16 %v11570_v31, %v11570_v31  ;;  %v11571_v59 = vmax.f32 %v11539_v25, 0.0 }
 0x6b2   : > { %v12815_v8 = vpack.c.bf16 %v11568_v53, %v11568_v53  ;;  %v11569_v60 = vmax.f32 %v11537_v24, 0.0 }
 0x6b3   : > { %11730 = vst.msk [vmem:[%s18556_s16 + $0x28] sm:$0xf] %vm6720_vm2, %v12817_v23  ;;  %v12818_v12 = vpack.c.bf16 %v11571_v59, %v11571_v59 }
 0x6b4   : > { %11728 = vst.msk [vmem:[%s18556_s16 + $0x20] sm:$0xf] %vm6720_vm2, %v12815_v8  ;;  %v12816_v33 = vpack.c.bf16 %v11569_v60, %v11569_v60  ;;  %v13821_v50 = vpop.f32.mrb[28].mxu1 }
 0x6b5   : > { %11731 = vst.msk [vmem:[%s18556_s16 + $0x2c] sm:$0xf] %vm6720_vm2, %v12818_v12  ;;  %v11542_v7 = vadd.f32 %v13821_v50, %v18548_v48  ;;  %v11410_v34 = vpop.f32.mrb[29].mxu1 }
 0x6b6   : > { %11729 = vst.msk [vmem:[%s18556_s16 + $0x24] sm:$0xf] %vm6720_vm2, %v12816_v33  ;;  %v11540_v39 = vadd.f32 %v18548_v48, %v11410_v34  ;;  %v13822_v41 = vpop.f32.mrb[30].mxu1 }
 0x6b7   : > { %v11574_v43 = vmax.f32 %v11542_v7, 0.0  ;;  %v11543_v6 = vadd.f32 %v13822_v41, %v18548_v48  ;;  %v11413_v29 = vpop.f32.mrb[31].mxu1 }
 0x6b8   : > { %v11572_v9 = vmax.f32 %v11540_v39, 0.0  ;;  %v11541_v26 = vadd.f32 %v18548_v48, %v11413_v29 }
 0x6b9   : > { %v12821_v32 = vpack.c.bf16 %v11574_v43, %v11574_v43  ;;  %v11575_v15 = vmax.f32 %v11543_v6, 0.0 }
 0x6ba   : > { %v12819_v58 = vpack.c.bf16 %v11572_v9, %v11572_v9  ;;  %v11573_v28 = vmax.f32 %v11541_v26, 0.0 }
 0x6bb   : > { %11734 = vst.msk [vmem:[%s18556_s16 + $0x38] sm:$0xf] %vm6720_vm2, %v12821_v32  ;;  %v12822_v1 = vpack.c.bf16 %v11575_v15, %v11575_v15 }
 0x6bc   : > { %11732 = vst.msk [vmem:[%s18556_s16 + $0x30] sm:$0xf] %vm6720_vm2, %v12819_v58  ;;  %v12820_v21 = vpack.c.bf16 %v11573_v28, %v11573_v28  ;;  %v13825_v42 = vpop.f32.mrb[32].mxu1 }
 0x6bd   : > { %11735 = vst.msk [vmem:[%s18556_s16 + $0x3c] sm:$0xf] %vm6720_vm2, %v12822_v1  ;;  %v11546_v18 = vadd.f32 %v13825_v42, %v18548_v48  ;;  %v11426_v63 = vpop.f32.mrb[33].mxu1 }
 0x6be   : > { %11733 = vst.msk [vmem:[%s18556_s16 + $0x34] sm:$0xf] %vm6720_vm2, %v12820_v21  ;;  %v11544_v37 = vadd.f32 %v18548_v48, %v11426_v63  ;;  %v13826_v0 = vpop.f32.mrb[34].mxu1 }
 0x6bf   : > { %v11578_v61 = vmax.f32 %v11546_v18, 0.0  ;;  %v11547_v35 = vadd.f32 %v13826_v0, %v18548_v48  ;;  %v11429_v57 = vpop.f32.mrb[35].mxu1 }
 0x6c0   : > { %v11576_v54 = vmax.f32 %v11544_v37, 0.0  ;;  %v11545_v27 = vadd.f32 %v18548_v48, %v11429_v57 }
 0x6c1   : > { %v12825_v30 = vpack.c.bf16 %v11578_v61, %v11578_v61  ;;  %v11579_v5 = vmax.f32 %v11547_v35, 0.0 }
 0x6c2   : > { %v12823_v45 = vpack.c.bf16 %v11576_v54, %v11576_v54  ;;  %v11577_v40 = vmax.f32 %v11545_v27, 0.0 }
 0x6c3   : > { %11738 = vst.msk [vmem:[%s18556_s16 + $0x48] sm:$0xf] %vm6720_vm2, %v12825_v30  ;;  %v12826_v55 = vpack.c.bf16 %v11579_v5, %v11579_v5 }
 0x6c4   : > { %11736 = vst.msk [vmem:[%s18556_s16 + $0x40] sm:$0xf] %vm6720_vm2, %v12823_v45  ;;  %v12824_v4 = vpack.c.bf16 %v11577_v40, %v11577_v40  ;;  %v13829_v47 = vpop.f32.mrb[36].mxu1 }
 0x6c5   : > { %11739 = vst.msk [vmem:[%s18556_s16 + $0x4c] sm:$0xf] %vm6720_vm2, %v12826_v55  ;;  %v11550_v16 = vadd.f32 %v13829_v47, %v18548_v48  ;;  %v11442_v36 = vpop.f32.mrb[37].mxu1 }
 0x6c6   : > { %11737 = vst.msk [vmem:[%s18556_s16 + $0x44] sm:$0xf] %vm6720_vm2, %v12824_v4  ;;  %v11548_v17 = vadd.f32 %v18548_v48, %v11442_v36  ;;  %v13830_v3 = vpop.f32.mrb[38].mxu1 }
 0x6c7   : > { %v11582_v44 = vmax.f32 %v11550_v16, 0.0  ;;  %v11551_v20 = vadd.f32 %v13830_v3, %v18548_v48  ;;  %v11445_v46 = vpop.f32.mrb[39].mxu1 }
 0x6c8   : > { %v11580_v49 = vmax.f32 %v11548_v17, 0.0  ;;  %v11549_v38 = vadd.f32 %v18548_v48, %v11445_v46 }
 0x6c9   : > { %v12829_v10 = vpack.c.bf16 %v11582_v44, %v11582_v44  ;;  %v11583_v19 = vmax.f32 %v11551_v20, 0.0 }
 0x6ca   : > { %v12827_v2 = vpack.c.bf16 %v11580_v49, %v11580_v49  ;;  %v11581_v51 = vmax.f32 %v11549_v38, 0.0 }
 0x6cb   : > { %11742 = vst.msk [vmem:[%s18556_s16 + $0x58] sm:$0xf] %vm6720_vm2, %v12829_v10  ;;  %v12830_v56 = vpack.c.bf16 %v11583_v19, %v11583_v19 }
 0x6cc   : > { %11740 = vst.msk [vmem:[%s18556_s16 + $0x50] sm:$0xf] %vm6720_vm2, %v12827_v2  ;;  %v12828_v13 = vpack.c.bf16 %v11581_v51, %v11581_v51  ;;  %v13833_v62 = vpop.f32.mrb[40].mxu1 }
 0x6cd   : > { %11743 = vst.msk [vmem:[%s18556_s16 + $0x5c] sm:$0xf] %vm6720_vm2, %v12830_v56  ;;  %v11554_v11 = vadd.f32 %v13833_v62, %v18548_v48  ;;  %v11458_v14 = vpop.f32.mrb[41].mxu1 }
 0x6ce   : > { %11741 = vst.msk [vmem:[%s18556_s16 + $0x54] sm:$0xf] %vm6720_vm2, %v12828_v13  ;;  %v11552_v22 = vadd.f32 %v18548_v48, %v11458_v14  ;;  %v13834_v31 = vpop.f32.mrb[42].mxu1 }
 0x6cf   : > { %v11586_v25 = vmax.f32 %v11554_v11, 0.0  ;;  %v11555_v52 = vadd.f32 %v13834_v31, %v18548_v48  ;;  %v11461_v53 = vpop.f32.mrb[43].mxu1 }
 0x6d0   : > { %v11584_v24 = vmax.f32 %v11552_v22, 0.0  ;;  %v11553_v23 = vadd.f32 %v18548_v48, %v11461_v53 }
 0x6d1   : > { %v12833_v59 = vpack.c.bf16 %v11586_v25, %v11586_v25  ;;  %v11587_v8 = vmax.f32 %v11555_v52, 0.0 }
 0x6d2   : > { %v12831_v60 = vpack.c.bf16 %v11584_v24, %v11584_v24  ;;  %v11585_v12 = vmax.f32 %v11553_v23, 0.0 }
 0x6d3   : > { %11746 = vst.msk [vmem:[%s18556_s16 + $0x68] sm:$0xf] %vm6720_vm2, %v12833_v59  ;;  %v12834_v33 = vpack.c.bf16 %v11587_v8, %v11587_v8 }
 0x6d4   : > { %11744 = vst.msk [vmem:[%s18556_s16 + $0x60] sm:$0xf] %vm6720_vm2, %v12831_v60  ;;  %v12832_v50 = vpack.c.bf16 %v11585_v12, %v11585_v12  ;;  %v13837_v7 = vpop.f32.mrb[44].mxu1 }
 0x6d5   : > { %11747 = vst.msk [vmem:[%s18556_s16 + $0x6c] sm:$0xf] %vm6720_vm2, %v12834_v33  ;;  %v11558_v34 = vadd.f32 %v13837_v7, %v18548_v48  ;;  %v11474_v39 = vpop.f32.mrb[45].mxu1 }
 0x6d6   : > { %11745 = vst.msk [vmem:[%s18556_s16 + $0x64] sm:$0xf] %vm6720_vm2, %v12832_v50  ;;  %v11556_v41 = vadd.f32 %v18548_v48, %v11474_v39  ;;  %v13838_v43 = vpop.f32.mrb[46].mxu1 }
 0x6d7   : > { %v11590_v6 = vmax.f32 %v11558_v34, 0.0  ;;  %v11559_v29 = vadd.f32 %v13838_v43, %v18548_v48  ;;  %v11477_v9 = vpop.f32.mrb[47].mxu1 }
 0x6d8   : > { %v11588_v26 = vmax.f32 %v11556_v41, 0.0  ;;  %v11557_v32 = vadd.f32 %v18548_v48, %v11477_v9 }
 0x6d9   : > { %v12837_v15 = vpack.c.bf16 %v11590_v6, %v11590_v6  ;;  %v11591_v58 = vmax.f32 %v11559_v29, 0.0 }
 0x6da   : > { %v12835_v28 = vpack.c.bf16 %v11588_v26, %v11588_v26  ;;  %v11589_v1 = vmax.f32 %v11557_v32, 0.0 }
 0x6db   : > { %11750 = vst.msk [vmem:[%s18556_s16 + $0x78] sm:$0xf] %vm6720_vm2, %v12837_v15  ;;  %v12838_v21 = vpack.c.bf16 %v11591_v58, %v11591_v58 }
 0x6dc   : > { %11748 = vst.msk [vmem:[%s18556_s16 + $0x70] sm:$0xf] %vm6720_vm2, %v12835_v28  ;;  %v12836_v48 = vpack.c.bf16 %v11589_v1, %v11589_v1 }
 0x6dd   : > { %11751 = vst.msk [vmem:[%s18556_s16 + $0x7c] sm:$0xf] %vm6720_vm2, %v12838_v21 }
 0x6de   : > { %11749 = vst.msk [vmem:[%s18556_s16 + $0x74] sm:$0xf] %vm6720_vm2, %v12836_v48 }
 0x6df   : > { %14640 = shalt.err (!%p14637_p5)
}
 0x6e0   : > { %s14641_s11 = scalar_lea.hbm %s18649_s29, 2048  ;;  %s14645_s14 = scalar_lea.hbm %s18712_s5, 4096 }
 0x6e1   : > { %p14642_p6 = scmp.ne.s32.totalorder %s18649_s29, %s14641_s11  ;;  %p14646_p10 = scmp.lt.u32.totalorder %s18649_s29, %s18712_s5 }
 0x6e2   : > { %p14647_p11 = scmp.lt.u32.totalorder %s14645_s14, %s14641_s11  ;;  %p14649_p13 = scmp.lt.u32.totalorder %s14641_s11, %s18649_s29 }
 0x6e3   : > { %p14643_p7 = pnand %p14642_p6, %p14781_p4 }
 0x6e4   : > { %p14648_p12 = por %p14647_p11, %p14646_p10 }
 0x6e5   : > { %p14644_p9 = pneg %p14643_p7 }
 0x6e6   : > { %p14650_p0 = por %p14649_p13, %p14648_p12 }
 0x6e8   : > { %p14651_p1 = pnand %p14650_p0, %p14644_p9 }
 0x6ea   : > { %14654 = shalt.err (!%p14651_p1)
}
 0x6eb   : > { %s14709_s17 = smov 64   ;;  %s14710_s25 = smov 4  }
 0x6ec   : > { %14395 = dma.vmem_to_hbm [thread:$0]  (%p14781_p4), %s18651_s24, 2048, %s18649_s29, %s18661_s21, %s14709_s17, %s14709_s17, %s14710_s25  }
 0x6ed PF: > { %p14401_p2 = scmp.ge.s32.totalorder %s14705_s23, 2  ;;  %s11784_s27 = sand.u32 1, %s14685_s18  }
 0x6ee   : > { %s11785_s7 = scalar_lea.sflag [#allocation5], %s11784_s27 }
 0x6ef   : > { %p14398_p3 = pnand %p14401_p2, %p14788_p8 }
 0x6f1   : > { %14680 = dma.done.wait (!%p14398_p3), %s11785_s7, 2048  }
 0x6f2   : > { %14682 = vsyncadd (!%p14398_p3), %s11785_s7, 4294965248  ;;  %s18_s23 = sadd.s32 1, %s14705_s23   ;;  %s19053_s18 = smov %s14689_s19 }
 0x6f3   : > { %p15_p5 = scmp.ge.s32.totalorder %s18_s23, 4   ;;  %s19054_s19 = smov %s14693_s20 }
 0x6f4   : > { %s19055_s20 = smov %s14794_s6  ;;  %s19056_s21 = smov %s14701_s22 }
 0x6f5   : > { %s19057_s22 = smov %s19059_s26  ;;  %17 = sbr.rel (!%p15_p5) target bundleno = 4 (0x4), region = 101 }
 0x6fc   :  { %11790 = vsyncpa [#allocation5], 1 }
 0x6fd   :  { %11792 = vsyncpa [#allocation5 + $0x1], 1 }

</bundles_post_ra>
